<compile_context>
chip_gen: v6e
topology: v6e:2x2x1
jax: 0.10.0
libtpu: 0.0.40
codegen_flags: <defaults>
</compile_context>

<pallas_src>
import functools

import jax
import jax.numpy as jnp
from jax.experimental import pallas as pl
from jax.experimental.pallas import tpu as pltpu


def _proj_kernel(h_ref, wext_ref, bext_ref, wh_ref, src_ref, dst_ref, *,
                 n_head, f_out):
    """Fused projection for all heads on one row tile: z = h @ Wext + bext."""
    hf = n_head * f_out
    z = jnp.dot(h_ref[...], wext_ref[...],
                preferred_element_type=jnp.float32) + bext_ref[...]
    wh_ref[...] = z[:, :hf].astype(wh_ref.dtype)             # (tq, H*F_out)
    src_ref[...] = z[:, hf:hf + n_head]                       # (tq, H)
    dst_ref[...] = z[:, hf + n_head:hf + 2 * n_head]          # (tq, H)


def _attn_kernel(mask_ref, wh_ref, src_ref, dstT_ref, o_ref, *,
                 n_head, f_out, alpha, last):
    """One row tile of query nodes, all heads: masked softmax + aggregation."""
    neg_big = jnp.float32(-9.0e15)
    # int8 mask -> f32 once per row tile, reused by every head.
    mask_ok = mask_ref[...].astype(jnp.float32) > 0            # (tq, N)

    outs = []
    for h in range(n_head):                                    # static unroll
        src_h = src_ref[:, h:h + 1]                            # (tq, 1) f32
        dst_h = dstT_ref[h:h + 1, :]                           # (1, N)  f32
        e = src_h + dst_h                                      # (tq, N)
        e = jnp.where(e >= 0, e, alpha * e)                    # leaky_relu
        e = jnp.where(mask_ok, e, neg_big)                     # adjacency mask
        m = jnp.max(e, axis=-1, keepdims=True)
        p = jnp.exp(e - m)
        inv = pl.reciprocal(jnp.sum(p, axis=-1, keepdims=True), approx=True)
        # TODO(synk): F.dropout on attention weights skipped (eval-mode only).
        att = (p * inv).astype(jnp.bfloat16)                   # (tq, N)
        wh_h = wh_ref[:, h * f_out:(h + 1) * f_out]            # (N, F_out) bf16
        agg = jnp.dot(att, wh_h, preferred_element_type=jnp.float32)
        outs.append(agg)                                       # (tq, F_out) f32

    if last:
        acc = outs[0]
        for agg in outs[1:]:
            acc = acc + agg
        o_ref[...] = acc * jnp.float32(1.0 / n_head)           # head mean
    else:
        cat = jnp.concatenate(outs, axis=-1)                   # (tq, H*F_out)
        # ELU; clamp the exp argument so the dead branch never produces inf.
        o_ref[...] = jnp.where(cat > 0, cat,
                               jnp.exp(jnp.minimum(cat, 0.0)) - 1.0)


def gat_layer(h, mask, W, b, a_src, a_dst, a_bias, *, alpha=0.2, last=False,
              row_block=None):
    """GATLayer forward (eval mode: attention dropout is a no-op).

    Args:
      h:      (N, F_in) node features.
      mask:   (N, N) adjacency mask; entry > 0 means the edge is kept.
      W:      (H, F_in, F_out)  per-head Linear weight (pre-transposed).
      b:      (H, F_out)        per-head Linear bias.
      a_src:  (H, F_out)        A.weight[:, :F_out]   (applied to Wh_i).
      a_dst:  (H, F_out)        A.weight[:, F_out:]   (applied to Wh_j).
      a_bias: (H,)              A.bias.
    """
    N, f_in = h.shape
    n_head, _, f_out = W.shape
    hf = n_head * f_out

    if row_block is None:
        row_block = min(256, N)          # re-derive smaller for v7x (64 MiB VMEM)
    tq = row_block if (N % row_block == 0) else N
    n_rt = N // tq

    # --- fold attention projections into one extended weight matrix (algebra,
    #     done once per call; no per-head tiny-DMA parameters in the kernels).
    w_all = jnp.transpose(W, (1, 0, 2)).reshape(f_in, hf)          # (F_in, H*F_out)
    b_all = b.reshape(1, hf)
    w_src = jnp.einsum('hif,hf->ih', W, a_src)                      # (F_in, H)
    w_dst = jnp.einsum('hif,hf->ih', W, a_dst)                      # (F_in, H)
    b_src = (jnp.einsum('hf,hf->h', b, a_src) + a_bias)[None, :]    # (1, H)
    b_dst = jnp.einsum('hf,hf->h', b, a_dst)[None, :]               # (1, H)
    wext = jnp.concatenate([w_all, w_src, w_dst], axis=1)           # (F_in, C)
    bext = jnp.concatenate([b_all, b_src, b_dst], axis=1)           # (1, C)
    c = hf + 2 * n_head

    # --- pass 1: fused, lane-dense projection over row tiles -----------------
    wh, src, dst = pl.pallas_call(
        functools.partial(_proj_kernel, n_head=n_head, f_out=f_out),
        grid=(n_rt,),
        in_specs=[
            pl.BlockSpec((tq, f_in), lambda i: (i, 0)),     # h row tile
            pl.BlockSpec((f_in, c), lambda i: (0, 0)),      # Wext (resident)
            pl.BlockSpec((1, c), lambda i: (0, 0)),         # bext (resident)
        ],
        out_specs=(
            pl.BlockSpec((tq, hf), lambda i: (i, 0)),       # Wh (bf16)
            pl.BlockSpec((tq, n_head), lambda i: (i, 0)),   # src logits
            pl.BlockSpec((tq, n_head), lambda i: (i, 0)),   # dst logits
        ),
        out_shape=(
            jax.ShapeDtypeStruct((N, hf), jnp.bfloat16),
            jax.ShapeDtypeStruct((N, n_head), jnp.float32),
            jax.ShapeDtypeStruct((N, n_head), jnp.float32),
        ),
        compiler_params=pltpu.CompilerParams(
            dimension_semantics=("parallel",)),
    )(h.astype(jnp.float32), wext, bext)

    dst_t = dst.T                             # (H, N): tiny; lane-major per head
    mask_i8 = (mask > 0).astype(jnp.int8)     # 4x less HBM/VMEM than f32 mask

    # --- pass 2: row-tiled masked softmax + aggregation ----------------------
    out_cols = f_out if last else hf
    out = pl.pallas_call(
        functools.partial(_attn_kernel, n_head=n_head, f_out=f_out,
                          alpha=float(alpha), last=last),
        grid=(n_rt,),
        in_specs=[
            pl.BlockSpec((tq, N), lambda i: (i, 0)),        # mask row tile
            pl.BlockSpec((N, hf), lambda i: (0, 0)),        # Wh (resident)
            pl.BlockSpec((tq, n_head), lambda i: (i, 0)),   # src logits tile
            pl.BlockSpec((n_head, N), lambda i: (0, 0)),    # dst logits (resident)
        ],
        out_specs=pl.BlockSpec((tq, out_cols), lambda i: (i, 0)),
        out_shape=jax.ShapeDtypeStruct((N, out_cols), jnp.float32),
        compiler_params=pltpu.CompilerParams(
            dimension_semantics=("parallel",)),
    )(mask_i8, wh, src, dst_t)
    return out


if __name__ == "__main__":
    N, f_in, f_out, n_head = 256, 32, 16, 8
    alpha = 0.2

    key = jax.random.PRNGKey(0)
    keys = jax.random.split(key, 7)

    h = jax.random.normal(keys[0], (N, f_in), dtype=jnp.float32)
    mask = (jax.random.uniform(keys[1], (N, N)) > 0.7).astype(jnp.float32)
    mask = jnp.maximum(mask, jnp.eye(N, dtype=jnp.float32))  # self loops

    # deterministic parameter init (xavier_uniform, gain=1.414, as in __init__)
    gain = 1.414
    w_bound = gain * (6.0 / (f_in + f_out)) ** 0.5
    W = jax.random.uniform(keys[2], (n_head, f_in, f_out),
                           minval=-w_bound, maxval=w_bound, dtype=jnp.float32)
    b_bound = 1.0 / (f_in ** 0.5)
    b = jax.random.uniform(keys[3], (n_head, f_out),
                           minval=-b_bound, maxval=b_bound, dtype=jnp.float32)
    a_bound = gain * (6.0 / (2 * f_out + 1)) ** 0.5
    a_src = jax.random.uniform(keys[4], (n_head, f_out),
                               minval=-a_bound, maxval=a_bound,
                               dtype=jnp.float32)
    a_dst = jax.random.uniform(keys[5], (n_head, f_out),
                               minval=-a_bound, maxval=a_bound,
                               dtype=jnp.float32)
    ab_bound = 1.0 / ((2 * f_out) ** 0.5)
    a_bias = jax.random.uniform(keys[6], (n_head,),
                                minval=-ab_bound, maxval=ab_bound,
                                dtype=jnp.float32)

    # pure-JAX reference (same semantics as the PyTorch forward, eval mode)
    def ref(h, mask, last):
        outs = []
        for i in range(n_head):
            Wh = h @ W[i] + b[i]
            e = (Wh @ a_src[i])[:, None] + (Wh @ a_dst[i])[None, :] + a_bias[i]
            e = jnp.where(e >= 0, e, alpha * e)
            a = jnp.where(mask > 0, e, -9.0e15)
            a = jax.nn.softmax(a, axis=1)
            aWh = a @ Wh
            outs.append(aWh if last else jax.nn.elu(aWh))
        if last:
            return jnp.mean(jnp.stack(outs, axis=2), axis=2)
        return jnp.concatenate(outs, axis=1)

    for last in (False, True):
        fn = jax.jit(functools.partial(gat_layer, alpha=alpha, last=last,
                                       row_block=128))
        out = jax.block_until_ready(fn(h, mask, W, b, a_src, a_dst, a_bias))
        expected = ref(h, mask, last)
        assert out.shape == expected.shape, (out.shape, expected.shape)
        err = float(jnp.max(jnp.abs(out - expected)))
        # tolerance accounts for bf16 MXU inputs + approx-reciprocal softmax
        assert err < 5e-2, err

    print("KERNEL_OK")
</pallas_src>

<mosaic_0001>
module attributes {stable_mosaic.version = 11 : i64} {
  func.func @_proj_kernel(%arg0: i32, %arg1: memref<128x32xf32, #tpu.memory_space<vmem>>, %arg2: memref<32x144xf32, #tpu.memory_space<vmem>>, %arg3: memref<1x144xf32, #tpu.memory_space<vmem>>, %arg4: memref<128x128xbf16, #tpu.memory_space<vmem>>, %arg5: memref<128x8xf32, #tpu.memory_space<vmem>>, %arg6: memref<128x8xf32, #tpu.memory_space<vmem>>) attributes {dimension_semantics = [#tpu.dimension_semantics<parallel>], iteration_bounds = array<i64: 2>, scalar_prefetch = 0 : i64, scratch_operands = 0 : i64, tpu.core_type = #tpu.core_type<tc>, window_params = [{transform_indices = @transform_0, window_bounds = array<i64: 128, 32>}, {pipeline_mode = #tpu.pipeline_mode<synchronous>, transform_indices = @transform_1, window_bounds = array<i64: 32, 144>}, {pipeline_mode = #tpu.pipeline_mode<synchronous>, transform_indices = @transform_2, window_bounds = array<i64: 1, 144>}, {transform_indices = @transform_3, window_bounds = array<i64: 128, 128>}, {transform_indices = @transform_4, window_bounds = array<i64: 128, 8>}, {transform_indices = @transform_5, window_bounds = array<i64: 128, 8>}]} {
    %c0 = arith.constant 0 : index
    %c0_0 = arith.constant 0 : index
    %0 = vector.load %arg1[%c0, %c0_0] : memref<128x32xf32, #tpu.memory_space<vmem>>, vector<128x32xf32>
    %c0_1 = arith.constant 0 : index
    %c0_2 = arith.constant 0 : index
    %1 = vector.load %arg2[%c0_1, %c0_2] : memref<32x144xf32, #tpu.memory_space<vmem>>, vector<32x144xf32>
    %cst = arith.constant dense<0.000000e+00> : vector<128x144xf32>
    %2 = tpu.matmul %0, %1, %cst {dimension_numbers = #tpu.dot_dimension_numbers<[1], [0], [0], [1], [0, 0, 1, 1], [], []>} : vector<128x32xf32>, vector<32x144xf32>, vector<128x144xf32> -> vector<128x144xf32>
    %c0_3 = arith.constant 0 : index
    %c0_4 = arith.constant 0 : index
    %3 = vector.load %arg3[%c0_3, %c0_4] : memref<1x144xf32, #tpu.memory_space<vmem>>, vector<1x144xf32>
    %4 = vector.broadcast %3 : vector<1x144xf32> to vector<128x144xf32>
    %5 = arith.addf %2, %4 : vector<128x144xf32>
    %6 = vector.extract_strided_slice %5 {offsets = [0, 0], sizes = [128, 128], strides = [1, 1]} : vector<128x144xf32> to vector<128x128xf32>
    %7 = arith.truncf %6 : vector<128x128xf32> to vector<128x128xbf16>
    %c0_5 = arith.constant 0 : index
    %c0_6 = arith.constant 0 : index
    %8 = vector.load %arg4[%c0_5, %c0_6] : memref<128x128xbf16, #tpu.memory_space<vmem>>, vector<128x128xbf16>
    tpu.vector_store %arg4[%c0_5, %c0_6], %7 {strides = array<i32>} : memref<128x128xbf16, #tpu.memory_space<vmem>>, vector<128x128xbf16>,
    %9 = vector.extract_strided_slice %5 {offsets = [0, 128], sizes = [128, 8], strides = [1, 1]} : vector<128x144xf32> to vector<128x8xf32>
    %c0_7 = arith.constant 0 : index
    %c0_8 = arith.constant 0 : index
    %10 = vector.load %arg5[%c0_7, %c0_8] : memref<128x8xf32, #tpu.memory_space<vmem>>, vector<128x8xf32>
    tpu.vector_store %arg5[%c0_7, %c0_8], %9 {strides = array<i32>} : memref<128x8xf32, #tpu.memory_space<vmem>>, vector<128x8xf32>,
    %11 = vector.extract_strided_slice %5 {offsets = [0, 136], sizes = [128, 8], strides = [1, 1]} : vector<128x144xf32> to vector<128x8xf32>
    %c0_9 = arith.constant 0 : index
    %c0_10 = arith.constant 0 : index
    %12 = vector.load %arg6[%c0_9, %c0_10] : memref<128x8xf32, #tpu.memory_space<vmem>>, vector<128x8xf32>
    tpu.vector_store %arg6[%c0_9, %c0_10], %11 {strides = array<i32>} : memref<128x8xf32, #tpu.memory_space<vmem>>, vector<128x8xf32>,
    return
  }
  func.func @transform_0(%arg0: i32) -> (i32, i32) {
    %c0_i32 = arith.constant 0 : i32
    %c0_i32_0 = arith.constant 0 : i32
    return %arg0, %c0_i32 : i32, i32
  }
  func.func @transform_1(%arg0: i32) -> (i32, i32) {
    %c0_i32 = arith.constant 0 : i32
    %c0_i32_0 = arith.constant 0 : i32
    %c0_i32_1 = arith.constant 0 : i32
    return %c0_i32, %c0_i32_0 : i32, i32
  }
  func.func @transform_2(%arg0: i32) -> (i32, i32) {
    %c0_i32 = arith.constant 0 : i32
    %c0_i32_0 = arith.constant 0 : i32
    %c0_i32_1 = arith.constant 0 : i32
    return %c0_i32, %c0_i32_0 : i32, i32
  }
  func.func @transform_3(%arg0: i32) -> (i32, i32) {
    %c0_i32 = arith.constant 0 : i32
    %c0_i32_0 = arith.constant 0 : i32
    return %arg0, %c0_i32 : i32, i32
  }
  func.func @transform_4(%arg0: i32) -> (i32, i32) {
    %c0_i32 = arith.constant 0 : i32
    %c0_i32_0 = arith.constant 0 : i32
    return %arg0, %c0_i32 : i32, i32
  }
  func.func @transform_5(%arg0: i32) -> (i32, i32) {
    %c0_i32 = arith.constant 0 : i32
    %c0_i32_0 = arith.constant 0 : i32
    return %arg0, %c0_i32 : i32, i32
  }
}

module attributes {stable_mosaic.version = 11 : i64} {
  func.func @_attn_kernel(%arg0: i32, %arg1: memref<128x256xi8, #tpu.memory_space<vmem>>, %arg2: memref<256x128xbf16, #tpu.memory_space<vmem>>, %arg3: memref<128x8xf32, #tpu.memory_space<vmem>>, %arg4: memref<8x256xf32, #tpu.memory_space<vmem>>, %arg5: memref<128x128xf32, #tpu.memory_space<vmem>>) attributes {dimension_semantics = [#tpu.dimension_semantics<parallel>], iteration_bounds = array<i64: 2>, scalar_prefetch = 0 : i64, scratch_operands = 0 : i64, tpu.core_type = #tpu.core_type<tc>, window_params = [{transform_indices = @transform_0, window_bounds = array<i64: 128, 256>}, {pipeline_mode = #tpu.pipeline_mode<synchronous>, transform_indices = @transform_1, window_bounds = array<i64: 256, 128>}, {transform_indices = @transform_2, window_bounds = array<i64: 128, 8>}, {pipeline_mode = #tpu.pipeline_mode<synchronous>, transform_indices = @transform_3, window_bounds = array<i64: 8, 256>}, {transform_indices = @transform_4, window_bounds = array<i64: 128, 128>}]} {
    %c0 = arith.constant 0 : index
    %c0_0 = arith.constant 0 : index
    %0 = vector.load %arg1[%c0, %c0_0] : memref<128x256xi8, #tpu.memory_space<vmem>>, vector<128x256xi8>
    %1 = arith.sitofp %0 : vector<128x256xi8> to vector<128x256xf32>
    %cst = arith.constant 0.000000e+00 : f32
    %2 = vector.broadcast %cst : f32 to vector<128x256xf32>
    %3 = arith.cmpf ogt, %1, %2 : vector<128x256xf32>
    %c0_1 = arith.constant 0 : index
    %c0_2 = arith.constant 0 : index
    %4 = vector.load %arg3[%c0_1, %c0_2] : memref<128x8xf32, #tpu.memory_space<vmem>>, vector<128x1xf32>
    %c0_3 = arith.constant 0 : index
    %c0_4 = arith.constant 0 : index
    %5 = vector.load %arg4[%c0_3, %c0_4] : memref<8x256xf32, #tpu.memory_space<vmem>>, vector<1x256xf32>
    %6 = vector.broadcast %4 : vector<128x1xf32> to vector<128x256xf32>
    %7 = vector.broadcast %5 : vector<1x256xf32> to vector<128x256xf32>
    %8 = arith.addf %6, %7 : vector<128x256xf32>
    %cst_5 = arith.constant 0.000000e+00 : f32
    %9 = vector.broadcast %cst_5 : f32 to vector<128x256xf32>
    %10 = arith.cmpf oge, %8, %9 : vector<128x256xf32>
    %cst_6 = arith.constant 2.000000e-01 : f32
    %11 = vector.broadcast %cst_6 : f32 to vector<128x256xf32>
    %12 = arith.mulf %11, %8 : vector<128x256xf32>
    %13 = arith.select %10, %8, %12 : vector<128x256xi1>, vector<128x256xf32>
    %cst_7 = arith.constant -9.000000e+15 : f32
    %14 = vector.broadcast %cst_7 : f32 to vector<128x256xf32>
    %15 = arith.select %3, %13, %14 : vector<128x256xi1>, vector<128x256xf32>
    %cst_8 = arith.constant dense<0xFF800000> : vector<128xf32>
    %16 = vector.multi_reduction <maximumf>, %15, %cst_8 [1] : vector<128x256xf32> to vector<128xf32>
    %17 = vector.shape_cast %16 : vector<128xf32> to vector<128x1xf32>
    %18 = vector.broadcast %17 : vector<128x1xf32> to vector<128x256xf32>
    %19 = arith.subf %15, %18 : vector<128x256xf32>
    %20 = math.exp %19 : vector<128x256xf32>
    %cst_9 = arith.constant dense<0.000000e+00> : vector<128xf32>
    %21 = vector.multi_reduction <add>, %20, %cst_9 [1] : vector<128x256xf32> to vector<128xf32>
    %22 = vector.shape_cast %21 : vector<128xf32> to vector<128x1xf32>
    %23 = tpu.reciprocal %22 {approx = true} : vector<128x1xf32> -> vector<128x1xf32>
    %24 = vector.broadcast %23 : vector<128x1xf32> to vector<128x256xf32>
    %25 = arith.mulf %20, %24 : vector<128x256xf32>
    %26 = arith.truncf %25 : vector<128x256xf32> to vector<128x256xbf16>
    %c0_10 = arith.constant 0 : index
    %c0_11 = arith.constant 0 : index
    %27 = vector.load %arg2[%c0_10, %c0_11] : memref<256x128xbf16, #tpu.memory_space<vmem>>, vector<256x16xbf16>
    %cst_12 = arith.constant dense<0.000000e+00> : vector<128x16xf32>
    %28 = tpu.matmul %26, %27, %cst_12 {dimension_numbers = #tpu.dot_dimension_numbers<[1], [0], [0], [1], [0, 0, 1, 1], [], []>} : vector<128x256xbf16>, vector<256x16xbf16>, vector<128x16xf32> -> vector<128x16xf32>
    %c0_13 = arith.constant 0 : index
    %c1 = arith.constant 1 : index
    %29 = vector.load %arg3[%c0_13, %c1] : memref<128x8xf32, #tpu.memory_space<vmem>>, vector<128x1xf32>
    %c1_14 = arith.constant 1 : index
    %c0_15 = arith.constant 0 : index
    %30 = vector.load %arg4[%c1_14, %c0_15] : memref<8x256xf32, #tpu.memory_space<vmem>>, vector<1x256xf32>
    %31 = vector.broadcast %29 : vector<128x1xf32> to vector<128x256xf32>
    %32 = vector.broadcast %30 : vector<1x256xf32> to vector<128x256xf32>
    %33 = arith.addf %31, %32 : vector<128x256xf32>
    %cst_16 = arith.constant 0.000000e+00 : f32
    %34 = vector.broadcast %cst_16 : f32 to vector<128x256xf32>
    %35 = arith.cmpf oge, %33, %34 : vector<128x256xf32>
    %cst_17 = arith.constant 2.000000e-01 : f32
    %36 = vector.broadcast %cst_17 : f32 to vector<128x256xf32>
    %37 = arith.mulf %36, %33 : vector<128x256xf32>
    %38 = arith.select %35, %33, %37 : vector<128x256xi1>, vector<128x256xf32>
    %cst_18 = arith.constant -9.000000e+15 : f32
    %39 = vector.broadcast %cst_18 : f32 to vector<128x256xf32>
    %40 = arith.select %3, %38, %39 : vector<128x256xi1>, vector<128x256xf32>
    %cst_19 = arith.constant dense<0xFF800000> : vector<128xf32>
    %41 = vector.multi_reduction <maximumf>, %40, %cst_19 [1] : vector<128x256xf32> to vector<128xf32>
    %42 = vector.shape_cast %41 : vector<128xf32> to vector<128x1xf32>
    %43 = vector.broadcast %42 : vector<128x1xf32> to vector<128x256xf32>
    %44 = arith.subf %40, %43 : vector<128x256xf32>
    %45 = math.exp %44 : vector<128x256xf32>
    %cst_20 = arith.constant dense<0.000000e+00> : vector<128xf32>
    %46 = vector.multi_reduction <add>, %45, %cst_20 [1] : vector<128x256xf32> to vector<128xf32>
    %47 = vector.shape_cast %46 : vector<128xf32> to vector<128x1xf32>
    %48 = tpu.reciprocal %47 {approx = true} : vector<128x1xf32> -> vector<128x1xf32>
    %49 = vector.broadcast %48 : vector<128x1xf32> to vector<128x256xf32>
    %50 = arith.mulf %45, %49 : vector<128x256xf32>
    %51 = arith.truncf %50 : vector<128x256xf32> to vector<128x256xbf16>
    %c0_21 = arith.constant 0 : index
    %c16 = arith.constant 16 : index
    %52 = vector.load %arg2[%c0_21, %c16] : memref<256x128xbf16, #tpu.memory_space<vmem>>, vector<256x16xbf16>
    %cst_22 = arith.constant dense<0.000000e+00> : vector<128x16xf32>
    %53 = tpu.matmul %51, %52, %cst_22 {dimension_numbers = #tpu.dot_dimension_numbers<[1], [0], [0], [1], [0, 0, 1, 1], [], []>} : vector<128x256xbf16>, vector<256x16xbf16>, vector<128x16xf32> -> vector<128x16xf32>
    %c0_23 = arith.constant 0 : index
    %c2 = arith.constant 2 : index
    %54 = vector.load %arg3[%c0_23, %c2] : memref<128x8xf32, #tpu.memory_space<vmem>>, vector<128x1xf32>
    %c2_24 = arith.constant 2 : index
    %c0_25 = arith.constant 0 : index
    %55 = vector.load %arg4[%c2_24, %c0_25] : memref<8x256xf32, #tpu.memory_space<vmem>>, vector<1x256xf32>
    %56 = vector.broadcast %54 : vector<128x1xf32> to vector<128x256xf32>
    %57 = vector.broadcast %55 : vector<1x256xf32> to vector<128x256xf32>
    %58 = arith.addf %56, %57 : vector<128x256xf32>
    %cst_26 = arith.constant 0.000000e+00 : f32
    %59 = vector.broadcast %cst_26 : f32 to vector<128x256xf32>
    %60 = arith.cmpf oge, %58, %59 : vector<128x256xf32>
    %cst_27 = arith.constant 2.000000e-01 : f32
    %61 = vector.broadcast %cst_27 : f32 to vector<128x256xf32>
    %62 = arith.mulf %61, %58 : vector<128x256xf32>
    %63 = arith.select %60, %58, %62 : vector<128x256xi1>, vector<128x256xf32>
    %cst_28 = arith.constant -9.000000e+15 : f32
    %64 = vector.broadcast %cst_28 : f32 to vector<128x256xf32>
    %65 = arith.select %3, %63, %64 : vector<128x256xi1>, vector<128x256xf32>
    %cst_29 = arith.constant dense<0xFF800000> : vector<128xf32>
    %66 = vector.multi_reduction <maximumf>, %65, %cst_29 [1] : vector<128x256xf32> to vector<128xf32>
    %67 = vector.shape_cast %66 : vector<128xf32> to vector<128x1xf32>
    %68 = vector.broadcast %67 : vector<128x1xf32> to vector<128x256xf32>
    %69 = arith.subf %65, %68 : vector<128x256xf32>
    %70 = math.exp %69 : vector<128x256xf32>
    %cst_30 = arith.constant dense<0.000000e+00> : vector<128xf32>
    %71 = vector.multi_reduction <add>, %70, %cst_30 [1] : vector<128x256xf32> to vector<128xf32>
    %72 = vector.shape_cast %71 : vector<128xf32> to vector<128x1xf32>
    %73 = tpu.reciprocal %72 {approx = true} : vector<128x1xf32> -> vector<128x1xf32>
    %74 = vector.broadcast %73 : vector<128x1xf32> to vector<128x256xf32>
    %75 = arith.mulf %70, %74 : vector<128x256xf32>
    %76 = arith.truncf %75 : vector<128x256xf32> to vector<128x256xbf16>
    %c0_31 = arith.constant 0 : index
    %c32 = arith.constant 32 : index
    %77 = vector.load %arg2[%c0_31, %c32] : memref<256x128xbf16, #tpu.memory_space<vmem>>, vector<256x16xbf16>
    %cst_32 = arith.constant dense<0.000000e+00> : vector<128x16xf32>
    %78 = tpu.matmul %76, %77, %cst_32 {dimension_numbers = #tpu.dot_dimension_numbers<[1], [0], [0], [1], [0, 0, 1, 1], [], []>} : vector<128x256xbf16>, vector<256x16xbf16>, vector<128x16xf32> -> vector<128x16xf32>
    %c0_33 = arith.constant 0 : index
    %c3 = arith.constant 3 : index
    %79 = vector.load %arg3[%c0_33, %c3] : memref<128x8xf32, #tpu.memory_space<vmem>>, vector<128x1xf32>
    %c3_34 = arith.constant 3 : index
    %c0_35 = arith.constant 0 : index
    %80 = vector.load %arg4[%c3_34, %c0_35] : memref<8x256xf32, #tpu.memory_space<vmem>>, vector<1x256xf32>
    %81 = vector.broadcast %79 : vector<128x1xf32> to vector<128x256xf32>
    %82 = vector.broadcast %80 : vector<1x256xf32> to vector<128x256xf32>
    %83 = arith.addf %81, %82 : vector<128x256xf32>
    %cst_36 = arith.constant 0.000000e+00 : f32
    %84 = vector.broadcast %cst_36 : f32 to vector<128x256xf32>
    %85 = arith.cmpf oge, %83, %84 : vector<128x256xf32>
    %cst_37 = arith.constant 2.000000e-01 : f32
    %86 = vector.broadcast %cst_37 : f32 to vector<128x256xf32>
    %87 = arith.mulf %86, %83 : vector<128x256xf32>
    %88 = arith.select %85, %83, %87 : vector<128x256xi1>, vector<128x256xf32>
    %cst_38 = arith.constant -9.000000e+15 : f32
    %89 = vector.broadcast %cst_38 : f32 to vector<128x256xf32>
    %90 = arith.select %3, %88, %89 : vector<128x256xi1>, vector<128x256xf32>
    %cst_39 = arith.constant dense<0xFF800000> : vector<128xf32>
    %91 = vector.multi_reduction <maximumf>, %90, %cst_39 [1] : vector<128x256xf32> to vector<128xf32>
    %92 = vector.shape_cast %91 : vector<128xf32> to vector<128x1xf32>
    %93 = vector.broadcast %92 : vector<128x1xf32> to vector<128x256xf32>
    %94 = arith.subf %90, %93 : vector<128x256xf32>
    %95 = math.exp %94 : vector<128x256xf32>
    %cst_40 = arith.constant dense<0.000000e+00> : vector<128xf32>
    %96 = vector.multi_reduction <add>, %95, %cst_40 [1] : vector<128x256xf32> to vector<128xf32>
    %97 = vector.shape_cast %96 : vector<128xf32> to vector<128x1xf32>
    %98 = tpu.reciprocal %97 {approx = true} : vector<128x1xf32> -> vector<128x1xf32>
    %99 = vector.broadcast %98 : vector<128x1xf32> to vector<128x256xf32>
    %100 = arith.mulf %95, %99 : vector<128x256xf32>
    %101 = arith.truncf %100 : vector<128x256xf32> to vector<128x256xbf16>
    %c0_41 = arith.constant 0 : index
    %c48 = arith.constant 48 : index
    %102 = vector.load %arg2[%c0_41, %c48] : memref<256x128xbf16, #tpu.memory_space<vmem>>, vector<256x16xbf16>
    %cst_42 = arith.constant dense<0.000000e+00> : vector<128x16xf32>
    %103 = tpu.matmul %101, %102, %cst_42 {dimension_numbers = #tpu.dot_dimension_numbers<[1], [0], [0], [1], [0, 0, 1, 1], [], []>} : vector<128x256xbf16>, vector<256x16xbf16>, vector<128x16xf32> -> vector<128x16xf32>
    %c0_43 = arith.constant 0 : index
    %c4 = arith.constant 4 : index
    %104 = vector.load %arg3[%c0_43, %c4] : memref<128x8xf32, #tpu.memory_space<vmem>>, vector<128x1xf32>
    %c4_44 = arith.constant 4 : index
    %c0_45 = arith.constant 0 : index
    %105 = vector.load %arg4[%c4_44, %c0_45] : memref<8x256xf32, #tpu.memory_space<vmem>>, vector<1x256xf32>
    %106 = vector.broadcast %104 : vector<128x1xf32> to vector<128x256xf32>
    %107 = vector.broadcast %105 : vector<1x256xf32> to vector<128x256xf32>
    %108 = arith.addf %106, %107 : vector<128x256xf32>
    %cst_46 = arith.constant 0.000000e+00 : f32
    %109 = vector.broadcast %cst_46 : f32 to vector<128x256xf32>
    %110 = arith.cmpf oge, %108, %109 : vector<128x256xf32>
    %cst_47 = arith.constant 2.000000e-01 : f32
    %111 = vector.broadcast %cst_47 : f32 to vector<128x256xf32>
    %112 = arith.mulf %111, %108 : vector<128x256xf32>
    %113 = arith.select %110, %108, %112 : vector<128x256xi1>, vector<128x256xf32>
    %cst_48 = arith.constant -9.000000e+15 : f32
    %114 = vector.broadcast %cst_48 : f32 to vector<128x256xf32>
    %115 = arith.select %3, %113, %114 : vector<128x256xi1>, vector<128x256xf32>
    %cst_49 = arith.constant dense<0xFF800000> : vector<128xf32>
    %116 = vector.multi_reduction <maximumf>, %115, %cst_49 [1] : vector<128x256xf32> to vector<128xf32>
    %117 = vector.shape_cast %116 : vector<128xf32> to vector<128x1xf32>
    %118 = vector.broadcast %117 : vector<128x1xf32> to vector<128x256xf32>
    %119 = arith.subf %115, %118 : vector<128x256xf32>
    %120 = math.exp %119 : vector<128x256xf32>
    %cst_50 = arith.constant dense<0.000000e+00> : vector<128xf32>
    %121 = vector.multi_reduction <add>, %120, %cst_50 [1] : vector<128x256xf32> to vector<128xf32>
    %122 = vector.shape_cast %121 : vector<128xf32> to vector<128x1xf32>
    %123 = tpu.reciprocal %122 {approx = true} : vector<128x1xf32> -> vector<128x1xf32>
    %124 = vector.broadcast %123 : vector<128x1xf32> to vector<128x256xf32>
    %125 = arith.mulf %120, %124 : vector<128x256xf32>
    %126 = arith.truncf %125 : vector<128x256xf32> to vector<128x256xbf16>
    %c0_51 = arith.constant 0 : index
    %c64 = arith.constant 64 : index
    %127 = vector.load %arg2[%c0_51, %c64] : memref<256x128xbf16, #tpu.memory_space<vmem>>, vector<256x16xbf16>
    %cst_52 = arith.constant dense<0.000000e+00> : vector<128x16xf32>
    %128 = tpu.matmul %126, %127, %cst_52 {dimension_numbers = #tpu.dot_dimension_numbers<[1], [0], [0], [1], [0, 0, 1, 1], [], []>} : vector<128x256xbf16>, vector<256x16xbf16>, vector<128x16xf32> -> vector<128x16xf32>
    %c0_53 = arith.constant 0 : index
    %c5 = arith.constant 5 : index
    %129 = vector.load %arg3[%c0_53, %c5] : memref<128x8xf32, #tpu.memory_space<vmem>>, vector<128x1xf32>
    %c5_54 = arith.constant 5 : index
    %c0_55 = arith.constant 0 : index
    %130 = vector.load %arg4[%c5_54, %c0_55] : memref<8x256xf32, #tpu.memory_space<vmem>>, vector<1x256xf32>
    %131 = vector.broadcast %129 : vector<128x1xf32> to vector<128x256xf32>
    %132 = vector.broadcast %130 : vector<1x256xf32> to vector<128x256xf32>
    %133 = arith.addf %131, %132 : vector<128x256xf32>
    %cst_56 = arith.constant 0.000000e+00 : f32
    %134 = vector.broadcast %cst_56 : f32 to vector<128x256xf32>
    %135 = arith.cmpf oge, %133, %134 : vector<128x256xf32>
    %cst_57 = arith.constant 2.000000e-01 : f32
    %136 = vector.broadcast %cst_57 : f32 to vector<128x256xf32>
    %137 = arith.mulf %136, %133 : vector<128x256xf32>
    %138 = arith.select %135, %133, %137 : vector<128x256xi1>, vector<128x256xf32>
    %cst_58 = arith.constant -9.000000e+15 : f32
    %139 = vector.broadcast %cst_58 : f32 to vector<128x256xf32>
    %140 = arith.select %3, %138, %139 : vector<128x256xi1>, vector<128x256xf32>
    %cst_59 = arith.constant dense<0xFF800000> : vector<128xf32>
    %141 = vector.multi_reduction <maximumf>, %140, %cst_59 [1] : vector<128x256xf32> to vector<128xf32>
    %142 = vector.shape_cast %141 : vector<128xf32> to vector<128x1xf32>
    %143 = vector.broadcast %142 : vector<128x1xf32> to vector<128x256xf32>
    %144 = arith.subf %140, %143 : vector<128x256xf32>
    %145 = math.exp %144 : vector<128x256xf32>
    %cst_60 = arith.constant dense<0.000000e+00> : vector<128xf32>
    %146 = vector.multi_reduction <add>, %145, %cst_60 [1] : vector<128x256xf32> to vector<128xf32>
    %147 = vector.shape_cast %146 : vector<128xf32> to vector<128x1xf32>
    %148 = tpu.reciprocal %147 {approx = true} : vector<128x1xf32> -> vector<128x1xf32>
    %149 = vector.broadcast %148 : vector<128x1xf32> to vector<128x256xf32>
    %150 = arith.mulf %145, %149 : vector<128x256xf32>
    %151 = arith.truncf %150 : vector<128x256xf32> to vector<128x256xbf16>
    %c0_61 = arith.constant 0 : index
    %c80 = arith.constant 80 : index
    %152 = vector.load %arg2[%c0_61, %c80] : memref<256x128xbf16, #tpu.memory_space<vmem>>, vector<256x16xbf16>
    %cst_62 = arith.constant dense<0.000000e+00> : vector<128x16xf32>
    %153 = tpu.matmul %151, %152, %cst_62 {dimension_numbers = #tpu.dot_dimension_numbers<[1], [0], [0], [1], [0, 0, 1, 1], [], []>} : vector<128x256xbf16>, vector<256x16xbf16>, vector<128x16xf32> -> vector<128x16xf32>
    %c0_63 = arith.constant 0 : index
    %c6 = arith.constant 6 : index
    %154 = vector.load %arg3[%c0_63, %c6] : memref<128x8xf32, #tpu.memory_space<vmem>>, vector<128x1xf32>
    %c6_64 = arith.constant 6 : index
    %c0_65 = arith.constant 0 : index
    %155 = vector.load %arg4[%c6_64, %c0_65] : memref<8x256xf32, #tpu.memory_space<vmem>>, vector<1x256xf32>
    %156 = vector.broadcast %154 : vector<128x1xf32> to vector<128x256xf32>
    %157 = vector.broadcast %155 : vector<1x256xf32> to vector<128x256xf32>
    %158 = arith.addf %156, %157 : vector<128x256xf32>
    %cst_66 = arith.constant 0.000000e+00 : f32
    %159 = vector.broadcast %cst_66 : f32 to vector<128x256xf32>
    %160 = arith.cmpf oge, %158, %159 : vector<128x256xf32>
    %cst_67 = arith.constant 2.000000e-01 : f32
    %161 = vector.broadcast %cst_67 : f32 to vector<128x256xf32>
    %162 = arith.mulf %161, %158 : vector<128x256xf32>
    %163 = arith.select %160, %158, %162 : vector<128x256xi1>, vector<128x256xf32>
    %cst_68 = arith.constant -9.000000e+15 : f32
    %164 = vector.broadcast %cst_68 : f32 to vector<128x256xf32>
    %165 = arith.select %3, %163, %164 : vector<128x256xi1>, vector<128x256xf32>
    %cst_69 = arith.constant dense<0xFF800000> : vector<128xf32>
    %166 = vector.multi_reduction <maximumf>, %165, %cst_69 [1] : vector<128x256xf32> to vector<128xf32>
    %167 = vector.shape_cast %166 : vector<128xf32> to vector<128x1xf32>
    %168 = vector.broadcast %167 : vector<128x1xf32> to vector<128x256xf32>
    %169 = arith.subf %165, %168 : vector<128x256xf32>
    %170 = math.exp %169 : vector<128x256xf32>
    %cst_70 = arith.constant dense<0.000000e+00> : vector<128xf32>
    %171 = vector.multi_reduction <add>, %170, %cst_70 [1] : vector<128x256xf32> to vector<128xf32>
    %172 = vector.shape_cast %171 : vector<128xf32> to vector<128x1xf32>
    %173 = tpu.reciprocal %172 {approx = true} : vector<128x1xf32> -> vector<128x1xf32>
    %174 = vector.broadcast %173 : vector<128x1xf32> to vector<128x256xf32>
    %175 = arith.mulf %170, %174 : vector<128x256xf32>
    %176 = arith.truncf %175 : vector<128x256xf32> to vector<128x256xbf16>
    %c0_71 = arith.constant 0 : index
    %c96 = arith.constant 96 : index
    %177 = vector.load %arg2[%c0_71, %c96] : memref<256x128xbf16, #tpu.memory_space<vmem>>, vector<256x16xbf16>
    %cst_72 = arith.constant dense<0.000000e+00> : vector<128x16xf32>
    %178 = tpu.matmul %176, %177, %cst_72 {dimension_numbers = #tpu.dot_dimension_numbers<[1], [0], [0], [1], [0, 0, 1, 1], [], []>} : vector<128x256xbf16>, vector<256x16xbf16>, vector<128x16xf32> -> vector<128x16xf32>
    %c0_73 = arith.constant 0 : index
    %c7 = arith.constant 7 : index
    %179 = vector.load %arg3[%c0_73, %c7] : memref<128x8xf32, #tpu.memory_space<vmem>>, vector<128x1xf32>
    %c7_74 = arith.constant 7 : index
    %c0_75 = arith.constant 0 : index
    %180 = vector.load %arg4[%c7_74, %c0_75] : memref<8x256xf32, #tpu.memory_space<vmem>>, vector<1x256xf32>
    %181 = vector.broadcast %179 : vector<128x1xf32> to vector<128x256xf32>
    %182 = vector.broadcast %180 : vector<1x256xf32> to vector<128x256xf32>
    %183 = arith.addf %181, %182 : vector<128x256xf32>
    %cst_76 = arith.constant 0.000000e+00 : f32
    %184 = vector.broadcast %cst_76 : f32 to vector<128x256xf32>
    %185 = arith.cmpf oge, %183, %184 : vector<128x256xf32>
    %cst_77 = arith.constant 2.000000e-01 : f32
    %186 = vector.broadcast %cst_77 : f32 to vector<128x256xf32>
    %187 = arith.mulf %186, %183 : vector<128x256xf32>
    %188 = arith.select %185, %183, %187 : vector<128x256xi1>, vector<128x256xf32>
    %cst_78 = arith.constant -9.000000e+15 : f32
    %189 = vector.broadcast %cst_78 : f32 to vector<128x256xf32>
    %190 = arith.select %3, %188, %189 : vector<128x256xi1>, vector<128x256xf32>
    %cst_79 = arith.constant dense<0xFF800000> : vector<128xf32>
    %191 = vector.multi_reduction <maximumf>, %190, %cst_79 [1] : vector<128x256xf32> to vector<128xf32>
    %192 = vector.shape_cast %191 : vector<128xf32> to vector<128x1xf32>
    %193 = vector.broadcast %192 : vector<128x1xf32> to vector<128x256xf32>
    %194 = arith.subf %190, %193 : vector<128x256xf32>
    %195 = math.exp %194 : vector<128x256xf32>
    %cst_80 = arith.constant dense<0.000000e+00> : vector<128xf32>
    %196 = vector.multi_reduction <add>, %195, %cst_80 [1] : vector<128x256xf32> to vector<128xf32>
    %197 = vector.shape_cast %196 : vector<128xf32> to vector<128x1xf32>
    %198 = tpu.reciprocal %197 {approx = true} : vector<128x1xf32> -> vector<128x1xf32>
    %199 = vector.broadcast %198 : vector<128x1xf32> to vector<128x256xf32>
    %200 = arith.mulf %195, %199 : vector<128x256xf32>
    %201 = arith.truncf %200 : vector<128x256xf32> to vector<128x256xbf16>
    %c0_81 = arith.constant 0 : index
    %c112 = arith.constant 112 : index
    %202 = vector.load %arg2[%c0_81, %c112] : memref<256x128xbf16, #tpu.memory_space<vmem>>, vector<256x16xbf16>
    %cst_82 = arith.constant dense<0.000000e+00> : vector<128x16xf32>
    %203 = tpu.matmul %201, %202, %cst_82 {dimension_numbers = #tpu.dot_dimension_numbers<[1], [0], [0], [1], [0, 0, 1, 1], [], []>} : vector<128x256xbf16>, vector<256x16xbf16>, vector<128x16xf32> -> vector<128x16xf32>
    %204 = tpu.concatenate %28, %53, %78, %103, %128, %153, %178, %203 in 1 : vector<128x16xf32>, vector<128x16xf32>, vector<128x16xf32>, vector<128x16xf32>, vector<128x16xf32>, vector<128x16xf32>, vector<128x16xf32>, vector<128x16xf32> -> vector<128x128xf32>
    %cst_83 = arith.constant 0.000000e+00 : f32
    %205 = vector.broadcast %cst_83 : f32 to vector<128x128xf32>
    %206 = arith.cmpf ogt, %204, %205 : vector<128x128xf32>
    %cst_84 = arith.constant 0.000000e+00 : f32
    %207 = vector.broadcast %cst_84 : f32 to vector<128x128xf32>
    %208 = arith.minimumf %204, %207 : vector<128x128xf32>
    %209 = math.exp %208 : vector<128x128xf32>
    %cst_85 = arith.constant 1.000000e+00 : f32
    %210 = vector.broadcast %cst_85 : f32 to vector<128x128xf32>
    %211 = arith.subf %209, %210 : vector<128x128xf32>
    %212 = arith.select %206, %204, %211 : vector<128x128xi1>, vector<128x128xf32>
    %c0_86 = arith.constant 0 : index
    %c0_87 = arith.constant 0 : index
    %213 = vector.load %arg5[%c0_86, %c0_87] : memref<128x128xf32, #tpu.memory_space<vmem>>, vector<128x128xf32>
    tpu.vector_store %arg5[%c0_86, %c0_87], %212 {strides = array<i32>} : memref<128x128xf32, #tpu.memory_space<vmem>>, vector<128x128xf32>,
    return
  }
  func.func @transform_0(%arg0: i32) -> (i32, i32) {
    %c0_i32 = arith.constant 0 : i32
    %c0_i32_0 = arith.constant 0 : i32
    return %arg0, %c0_i32 : i32, i32
  }
  func.func @transform_1(%arg0: i32) -> (i32, i32) {
    %c0_i32 = arith.constant 0 : i32
    %c0_i32_0 = arith.constant 0 : i32
    %c0_i32_1 = arith.constant 0 : i32
    return %c0_i32, %c0_i32_0 : i32, i32
  }
  func.func @transform_2(%arg0: i32) -> (i32, i32) {
    %c0_i32 = arith.constant 0 : i32
    %c0_i32_0 = arith.constant 0 : i32
    return %arg0, %c0_i32 : i32, i32
  }
  func.func @transform_3(%arg0: i32) -> (i32, i32) {
    %c0_i32 = arith.constant 0 : i32
    %c0_i32_0 = arith.constant 0 : i32
    %c0_i32_1 = arith.constant 0 : i32
    return %c0_i32, %c0_i32_0 : i32, i32
  }
  func.func @transform_4(%arg0: i32) -> (i32, i32) {
    %c0_i32 = arith.constant 0 : i32
    %c0_i32_0 = arith.constant 0 : i32
    return %arg0, %c0_i32 : i32, i32
  }
}

</mosaic_0001>

<bundles_post_ra>
// kernel: gat_layer.2
= control target key start
LH: loop header
LB: loop body
LE: loop exit
PB: predicated region body
PF: predicated region fallthrough
CT: control target
= control target key end

     0   :  { %s970_s18 = smov 0   ;;  %s1193_s0 = inlined_call_operand.vmem [shape: f32[256,32], index: 0, kind: input, shape index: {}]   ;;  %s1194_s1 = inlined_call_operand.vmem [shape: f32[32,144], index: 1, kind: input, shape index: {}]   ;;  %s1195_s2 = inlined_call_operand.vmem [shape: f32[1,144], index: 2, kind: input, shape index: {}]   ;;  %s1196_s3 = inlined_call_operand.vmem [shape: bf16[256,128], index: 3, kind: output, shape index: {0}]   ;;  %s1197_s4 = inlined_call_operand.vmem [shape: f32[256,8], index: 4, kind: output, shape index: {1}]   ;;  %s1198_s5 = inlined_call_operand.vmem [shape: f32[256,8], index: 5, kind: output, shape index: {2}]  }
   0x1 LB: > { %s802_s19 = sadd.s32 4294967295, %s936_s18   ;;  %p806_p0 = scmp.ge.s32.totalorder %s936_s18, 1  ;;  %s936_s18 = sphi %s970_s18, %s16_s18  }
   0x2   : > { %p193_p1 = scmp.lt.s32.totalorder %s936_s18, 3 }
   0x4   : > { %p194_p2 = pnand %p806_p0, %p193_p1 }
   0x5   : > { %s807_s26 = sshll.u32 (!%p194_p2), %s802_s19, 4  ;;  %s939_s23 = smov (!%p194_p2), 120  }
   0x6   : > { %197 = sbr.rel (%p194_p2) target bundleno = 366 (0x16e), region = 32  ;;  %p232_p3 = scmp.lt.s32.totalorder (!%p194_p2), %s807_s26, 31 }
   0xb   : > { %v278_v0 = vld [vmem:[%s1194_s1 + $0x38] sm:$0xff]  ;;  %v277_v1 = vld [vmem:[%s1194_s1 + $0x30] sm:$0xff]  ;;  %v276_v2 = vld [vmem:[%s1194_s1 + $0x28] sm:$0xff]  ;;  %s1200_s26 = smov (!%p232_p3, %s807_s26), 31  ;;  %vm291_vm0 = vcmask 261120   ;;  %v938_v10 = vmov 0.0   ;;  %v281_v25 = vlaneseq }
   0xc   : > { %364 = vmatprep.subr.mxu0 %v278_v0  ;;  %912 = vmatprep.subr.mxu1 %v278_v0  ;;  %v275_v3 = vld [vmem:[%s1194_s1 + $0x20] sm:$0xff]  ;;  %v274_v4 = vld [vmem:[%s1194_s1 + $0x18] sm:$0xff]  ;;  %v273_v5 = vld [vmem:[%s1194_s1 + $0x10] sm:$0xff]  ;;  %s1005_s12 = sshll.u32 %s1200_s26, 3  ;;  %vm581_vm1 = vcmask 64512   ;;  %s810_s22 = sshll.u32 %s1200_s26, 2 }
   0xd   : > { %365 = vmatpush1.msra.mxu0 %v277_v1  ;;  %916 = vmatpush1.msra.mxu1 %v277_v1  ;;  %v272_v6 = vld [vmem:[%s1194_s1 + $0x8] sm:$0xff]  ;;  %v271_v7 = vld [vmem:[%s1194_s1] sm:$0xff]  ;;  %s1011_s15 = scalar_lea.vmem %s1193_s0, %s1005_s12  ;;  %v282_v26 = vshrl.u32 %v281_v25, 7  ;;  %s1056_s21 = scalar_lea.vmem %s1197_s4, %s1005_s12 }
   0xe   : > { %366 = vmatprep.subr.mxu0 %v276_v2  ;;  %913 = vmatprep.subr.mxu1 %v276_v2  ;;  %v255_v8 = vld [vmem:[%s1011_s15] sm:$0xff]  ;;  %v256_v11 = vld [vmem:[%s1011_s15 + $0x8] sm:$0xff]  ;;  %v257_v13 = vld [vmem:[%s1011_s15 + $0x10] sm:$0xff]  ;;  %s1073_s26 = scalar_lea.vmem %s1196_s3, %s810_s22  ;;  %s1156_s29 = scalar_lea.vmem %s1198_s5, %s1005_s12 }
   0xf   : > { %367 = vmatpush1.msra.mxu0 %v275_v3  ;;  %917 = vmatpush1.msra.mxu1 %v275_v3  ;;  %v263_v9 = vld [vmem:[%s1011_s15 + $0x40] sm:$0xff]  ;;  %v264_v12 = vld [vmem:[%s1011_s15 + $0x48] sm:$0xff]  ;;  %v265_v14 = vld [vmem:[%s1011_s15 + $0x50] sm:$0xff]  ;;  %v287_v27 = vsub.s32 1, %v282_v26  ;;  %v283_v28 = vsub.s32 0, %v282_v26 }
  0x10   : > { %368 = vmatprep.subr.mxu0 %v274_v4  ;;  %914 = vmatprep.subr.mxu1 %v274_v4  ;;  %v258_v15 = vld [vmem:[%s1011_s15 + $0x18] sm:$0xff]  ;;  %v259_v17 = vld [vmem:[%s1011_s15 + $0x20] sm:$0xff]  ;;  %v260_v19 = vld [vmem:[%s1011_s15 + $0x28] sm:$0xff] }
  0x11   : > { %369 = vmatpush1.msra.mxu0 %v273_v5  ;;  %918 = vmatpush1.msra.mxu1 %v273_v5  ;;  %v266_v16 = vld [vmem:[%s1011_s15 + $0x58] sm:$0xff]  ;;  %v267_v18 = vld [vmem:[%s1011_s15 + $0x60] sm:$0xff]  ;;  %v268_v20 = vld [vmem:[%s1011_s15 + $0x68] sm:$0xff] }
  0x12   : > { %370 = vmatprep.subr.mxu0 %v272_v6  ;;  %915 = vmatprep.subr.mxu1 %v272_v6  ;;  %v261_v21 = vld [vmem:[%s1011_s15 + $0x30] sm:$0xff]  ;;  %v262_v23 = vld [vmem:[%s1011_s15 + $0x38] sm:$0xff]  ;;  %v279_v29 = vld [vmem:[%s1195_s2] sm:$0x3] }
  0x13   : > { %371 = vmatpush1.msra.mxu0 %v271_v7  ;;  %919 = vmatpush1.msra.mxu1 %v271_v7  ;;  %v269_v22 = vld [vmem:[%s1011_s15 + $0x70] sm:$0xff]  ;;  %v270_v24 = vld [vmem:[%s1011_s15 + $0x78] sm:$0xff]  ;;  %v1048_v30 = vrot.slane %v279_v29, %v287_v27  ;;  %v1050_v33 = vrot.slane %v279_v29, %v283_v28 }
  0x14   : > { %404 = vmatprep.mubr.f32.mxu0 %v938_v10  ;;  %452 = vmatprep.mubr.f32.mxu1 %v938_v10 }
  0x15   : > { %815 = vmatmul.mubr.msk.f32.vlgmr.msra.gmra.mxu0 %vm291_vm0, %v255_v8  ;;  %823 = vmatmul.mubr.msk.f32.vlgmr.msra.gmra.mxu1 %vm291_vm0, %v263_v9 }
  0x16   : > { %410 = vmatprep.mubr.f32.mxu0 %v938_v10  ;;  %458 = vmatprep.mubr.f32.mxu1 %v938_v10 }
  0x19   : > { %816 = vmatmul.mubr.msk.f32.gmra.mxu0 %vm291_vm0, %v256_v11  ;;  %824 = vmatmul.mubr.msk.f32.gmra.mxu1 %vm291_vm0, %v264_v12 }
  0x1a   : > { %416 = vmatprep.mubr.f32.mxu0 %v938_v10  ;;  %464 = vmatprep.mubr.f32.mxu1 %v938_v10 }
  0x1d   : > { %817 = vmatmul.mubr.msk.f32.gmra.mxu0 %vm291_vm0, %v257_v13  ;;  %825 = vmatmul.mubr.msk.f32.gmra.mxu1 %vm291_vm0, %v265_v14 }
  0x1e   : > { %422 = vmatprep.mubr.f32.mxu0 %v938_v10  ;;  %470 = vmatprep.mubr.f32.mxu1 %v938_v10 }
  0x21   : > { %818 = vmatmul.mubr.msk.f32.gmra.mxu0 %vm291_vm0, %v258_v15  ;;  %826 = vmatmul.mubr.msk.f32.gmra.mxu1 %vm291_vm0, %v266_v16 }
  0x22   : > { %428 = vmatprep.mubr.f32.mxu0 %v938_v10  ;;  %476 = vmatprep.mubr.f32.mxu1 %v938_v10 }
  0x25   : > { %819 = vmatmul.mubr.msk.f32.gmra.mxu0 %vm291_vm0, %v259_v17  ;;  %827 = vmatmul.mubr.msk.f32.gmra.mxu1 %vm291_vm0, %v267_v18 }
  0x26   : > { %434 = vmatprep.mubr.f32.mxu0 %v938_v10  ;;  %482 = vmatprep.mubr.f32.mxu1 %v938_v10 }
  0x29   : > { %820 = vmatmul.mubr.msk.f32.gmra.mxu0 %vm291_vm0, %v260_v19  ;;  %828 = vmatmul.mubr.msk.f32.gmra.mxu1 %vm291_vm0, %v268_v20 }
  0x2a   : > { %440 = vmatprep.mubr.f32.mxu0 %v938_v10  ;;  %488 = vmatprep.mubr.f32.mxu1 %v938_v10 }
  0x2d   : > { %821 = vmatmul.mubr.msk.f32.gmra.mxu0 %vm291_vm0, %v261_v21  ;;  %829 = vmatmul.mubr.msk.f32.gmra.mxu1 %vm291_vm0, %v269_v22 }
  0x2e   : > { %446 = vmatprep.mubr.f32.mxu0 %v938_v10  ;;  %494 = vmatprep.mubr.f32.mxu1 %v938_v10 }
  0x31   : > { %822 = vmatmul.mubr.msk.f32.gmra.mxu0 %vm291_vm0, %v262_v23  ;;  %830 = vmatmul.mubr.msk.f32.gmra.mxu1 %vm291_vm0, %v270_v24 }
  0xd5   : > { %v406_v31 = vpop.f32.mrf.mxu0  ;;  %v454_v32 = vpop.f32.mrf.mxu1 }
  0xd6   : > { %v407_v40 = vadd.f32 %v406_v31, %v1050_v33  ;;  %v455_v41 = vadd.f32 %v454_v32, %v1050_v33 }
  0xd7   : > { %v408_v34 = vpop.f32.mrf.mxu0  ;;  %v456_v35 = vpop.f32.mrf.mxu1 }
  0xd8   : > { %v409_v36 = vadd.f32 %v408_v34, %v1048_v30  ;;  %v457_v37 = vadd.f32 %v456_v35, %v1048_v30 }
  0xd9   : > { %v412_v38 = vpop.f32.mrf.mxu0  ;;  %v460_v39 = vpop.f32.mrf.mxu1 }
  0xda   : > { %582 = vst.msk [vmem:[%s1056_s21] sm:$0xff] %vm581_vm1, %v409_v36  ;;  %590 = vst.msk [vmem:[%s1056_s21 + $0x40] sm:$0xff] %vm581_vm1, %v457_v37  ;;  %v413_v42 = vadd.f32 %v412_v38, %v1050_v33  ;;  %v461_v43 = vadd.f32 %v460_v39, %v1050_v33  ;;  %614 = vrot.lane.b32.xlu0 %v409_v36, %s939_s23 }
  0xdb   : > { %v414_v44 = vpop.f32.mrf.mxu0  ;;  %v462_v45 = vpop.f32.mrf.mxu1 }
  0xdc   : > { %v868_v46 = vpack.c.bf16 %v413_v42, %v407_v40  ;;  %v888_v47 = vpack.c.bf16 %v461_v43, %v455_v41  ;;  %v415_v48 = vadd.f32 %v414_v44, %v1048_v30  ;;  %v463_v49 = vadd.f32 %v462_v45, %v1048_v30 }
  0xdd   : > { %v418_v50 = vpop.f32.mrf.mxu0  ;;  %v466_v51 = vpop.f32.mrf.mxu1 }
  0xde   : > { %869 = vst [vmem:[%s1073_s26] sm:$0xff] %v868_v46   ;;  %908 = vst [vmem:[%s1073_s26 + $0x20] sm:$0xff] %v888_v47   ;;  %632 = vrot.lane.b32.xlu1 %v463_v49, %s939_s23  ;;  %630 = vrot.lane.b32.xlu0 %v457_v37, %s939_s23  ;;  %v467_v54 = vadd.f32 %v466_v51, %v1050_v33  ;;  %v419_v59 = vadd.f32 %v418_v50, %v1050_v33 }
  0xdf   : > { %583 = vst.msk [vmem:[%s1056_s21 + $0x8] sm:$0xff] %vm581_vm1, %v415_v48  ;;  %591 = vst.msk [vmem:[%s1056_s21 + $0x48] sm:$0xff] %vm581_vm1, %v463_v49  ;;  %v420_v52 = vpop.f32.mrf.mxu0  ;;  %v468_v53 = vpop.f32.mrf.mxu1 }
  0xe0   : > { %v421_v55 = vadd.f32 %v420_v52, %v1048_v30  ;;  %v469_v56 = vadd.f32 %v468_v53, %v1048_v30 }
  0xe1   : > { %v424_v57 = vpop.f32.mrf.mxu0  ;;  %v472_v58 = vpop.f32.mrf.mxu1 }
  0xe2   : > { %584 = vst.msk [vmem:[%s1056_s21 + $0x10] sm:$0xff] %vm581_vm1, %v421_v55  ;;  %592 = vst.msk [vmem:[%s1056_s21 + $0x50] sm:$0xff] %vm581_vm1, %v469_v56  ;;  %v425_v60 = vadd.f32 %v424_v57, %v1050_v33  ;;  %v473_v61 = vadd.f32 %v472_v58, %v1050_v33  ;;  %618 = vrot.lane.b32.xlu1 %v421_v55, %s939_s23  ;;  %616 = vrot.lane.b32.xlu0 %v415_v48, %s939_s23 }
  0xe3   : > { %v426_v62 = vpop.f32.mrf.mxu0  ;;  %v474_v63 = vpop.f32.mrf.mxu1 }
  0xe4   : > { %v873_v0 = vpack.c.bf16 %v425_v60, %v419_v59  ;;  %v893_v1 = vpack.c.bf16 %v473_v61, %v467_v54  ;;  %v427_v2 = vadd.f32 %v426_v62, %v1048_v30  ;;  %v475_v3 = vadd.f32 %v474_v63, %v1048_v30 }
  0xe5   : > { %v430_v4 = vpop.f32.mrf.mxu0  ;;  %v478_v5 = vpop.f32.mrf.mxu1 }
  0xe6   : > { %905 = vst [vmem:[%s1073_s26 + $0x8] sm:$0xff] %v873_v0   ;;  %909 = vst [vmem:[%s1073_s26 + $0x28] sm:$0xff] %v893_v1   ;;  %620 = vrot.lane.b32.xlu1 %v427_v2, %s939_s23  ;;  %634 = vrot.lane.b32.xlu0 %v469_v56, %s939_s23  ;;  %v479_v8 = vadd.f32 %v478_v5, %v1050_v33  ;;  %v431_v13 = vadd.f32 %v430_v4, %v1050_v33 }
  0xe7   : > { %585 = vst.msk [vmem:[%s1056_s21 + $0x18] sm:$0xff] %vm581_vm1, %v427_v2  ;;  %593 = vst.msk [vmem:[%s1056_s21 + $0x58] sm:$0xff] %vm581_vm1, %v475_v3  ;;  %v432_v6 = vpop.f32.mrf.mxu0  ;;  %v480_v7 = vpop.f32.mrf.mxu1 }
  0xe8   : > { %v433_v9 = vadd.f32 %v432_v6, %v1048_v30  ;;  %v481_v10 = vadd.f32 %v480_v7, %v1048_v30 }
  0xe9   : > { %v436_v11 = vpop.f32.mrf.mxu0  ;;  %v484_v12 = vpop.f32.mrf.mxu1 }
  0xea   : > { %586 = vst.msk [vmem:[%s1056_s21 + $0x20] sm:$0xff] %vm581_vm1, %v433_v9  ;;  %594 = vst.msk [vmem:[%s1056_s21 + $0x60] sm:$0xff] %vm581_vm1, %v481_v10  ;;  %v437_v14 = vadd.f32 %v436_v11, %v1050_v33  ;;  %v485_v15 = vadd.f32 %v484_v12, %v1050_v33  ;;  %636 = vrot.lane.b32.xlu1 %v475_v3, %s939_s23  ;;  %622 = vrot.lane.b32.xlu0 %v433_v9, %s939_s23 }
  0xeb   : > { %v438_v16 = vpop.f32.mrf.mxu0  ;;  %v486_v17 = vpop.f32.mrf.mxu1 }
  0xec   : > { %v878_v18 = vpack.c.bf16 %v437_v14, %v431_v13  ;;  %v898_v19 = vpack.c.bf16 %v485_v15, %v479_v8  ;;  %v439_v20 = vadd.f32 %v438_v16, %v1048_v30  ;;  %v487_v21 = vadd.f32 %v486_v17, %v1048_v30 }
  0xed   : > { %v442_v22 = vpop.f32.mrf.mxu0  ;;  %v490_v23 = vpop.f32.mrf.mxu1 }
  0xee   : > { %906 = vst [vmem:[%s1073_s26 + $0x10] sm:$0xff] %v878_v18   ;;  %910 = vst [vmem:[%s1073_s26 + $0x30] sm:$0xff] %v898_v19   ;;  %624 = vrot.lane.b32.xlu1 %v439_v20, %s939_s23  ;;  %638 = vrot.lane.b32.xlu0 %v481_v10, %s939_s23  ;;  %v491_v26 = vadd.f32 %v490_v23, %v1050_v33  ;;  %v443_v32 = vadd.f32 %v442_v22, %v1050_v33 }
  0xef   : > { %587 = vst.msk [vmem:[%s1056_s21 + $0x28] sm:$0xff] %vm581_vm1, %v439_v20  ;;  %595 = vst.msk [vmem:[%s1056_s21 + $0x68] sm:$0xff] %vm581_vm1, %v487_v21  ;;  %v444_v24 = vpop.f32.mrf.mxu0  ;;  %v492_v25 = vpop.f32.mrf.mxu1 }
  0xf0   : > { %v445_v27 = vadd.f32 %v444_v24, %v1048_v30  ;;  %v493_v28 = vadd.f32 %v492_v25, %v1048_v30 }
  0xf1   : > { %v448_v29 = vpop.f32.mrf.mxu0  ;;  %v496_v31 = vpop.f32.mrf.mxu1 }
  0xf2   : > { %588 = vst.msk [vmem:[%s1056_s21 + $0x30] sm:$0xff] %vm581_vm1, %v445_v27  ;;  %596 = vst.msk [vmem:[%s1056_s21 + $0x70] sm:$0xff] %vm581_vm1, %v493_v28  ;;  %v449_v34 = vadd.f32 %v448_v29, %v1050_v33  ;;  %v497_v35 = vadd.f32 %v496_v31, %v1050_v33  ;;  %640 = vrot.lane.b32.xlu1 %v487_v21, %s939_s23  ;;  %626 = vrot.lane.b32.xlu0 %v445_v27, %s939_s23 }
  0xf3   : > { %v450_v36 = vpop.f32.mrf.mxu0  ;;  %v498_v37 = vpop.f32.mrf.mxu1 }
  0xf4   : > { %v883_v38 = vpack.c.bf16 %v449_v34, %v443_v32  ;;  %v903_v39 = vpack.c.bf16 %v497_v35, %v491_v26  ;;  %v451_v40 = vadd.f32 %v450_v36, %v1048_v30  ;;  %v499_v41 = vadd.f32 %v498_v37, %v1048_v30 }
  0xf6   : > { %907 = vst [vmem:[%s1073_s26 + $0x18] sm:$0xff] %v883_v38   ;;  %911 = vst [vmem:[%s1073_s26 + $0x38] sm:$0xff] %v903_v39   ;;  %628 = vrot.lane.b32.xlu1 %v451_v40, %s939_s23  ;;  %642 = vrot.lane.b32.xlu0 %v493_v28, %s939_s23 }
  0xf7   : > { %589 = vst.msk [vmem:[%s1056_s21 + $0x38] sm:$0xff] %vm581_vm1, %v451_v40  ;;  %597 = vst.msk [vmem:[%s1056_s21 + $0x78] sm:$0xff] %vm581_vm1, %v499_v41 }
  0xfa   : > { %644 = vrot.lane.b32.xlu1 %v499_v41, %s939_s23 }
 0x14c   : > { %v615_v30 = vpop.permute.xlu0 %614 }
 0x14d   : > { %662 = vst.msk [vmem:[%s1156_s29] sm:$0xff] %vm581_vm1, %v615_v30 }
 0x150   : > { %v633_v33 = vpop.permute.xlu1 %632  ;;  %v631_v42 = vpop.permute.xlu0 %630 }
 0x151   : > { %671 = vst.msk [vmem:[%s1156_s29 + $0x48] sm:$0xff] %vm581_vm1, %v633_v33  ;;  %670 = vst.msk [vmem:[%s1156_s29 + $0x40] sm:$0xff] %vm581_vm1, %v631_v42 }
 0x154   : > { %v619_v43 = vpop.permute.xlu1 %618  ;;  %v617_v44 = vpop.permute.xlu0 %616 }
 0x155   : > { %664 = vst.msk [vmem:[%s1156_s29 + $0x10] sm:$0xff] %vm581_vm1, %v619_v43  ;;  %663 = vst.msk [vmem:[%s1156_s29 + $0x8] sm:$0xff] %vm581_vm1, %v617_v44 }
 0x158   : > { %v621_v45 = vpop.permute.xlu1 %620  ;;  %v635_v46 = vpop.permute.xlu0 %634 }
 0x159   : > { %665 = vst.msk [vmem:[%s1156_s29 + $0x18] sm:$0xff] %vm581_vm1, %v621_v45  ;;  %672 = vst.msk [vmem:[%s1156_s29 + $0x50] sm:$0xff] %vm581_vm1, %v635_v46 }
 0x15c   : > { %v637_v47 = vpop.permute.xlu1 %636  ;;  %v623_v48 = vpop.permute.xlu0 %622 }
 0x15d   : > { %673 = vst.msk [vmem:[%s1156_s29 + $0x58] sm:$0xff] %vm581_vm1, %v637_v47  ;;  %666 = vst.msk [vmem:[%s1156_s29 + $0x20] sm:$0xff] %vm581_vm1, %v623_v48 }
 0x160   : > { %v625_v49 = vpop.permute.xlu1 %624  ;;  %v639_v50 = vpop.permute.xlu0 %638 }
 0x161   : > { %667 = vst.msk [vmem:[%s1156_s29 + $0x28] sm:$0xff] %vm581_vm1, %v625_v49  ;;  %674 = vst.msk [vmem:[%s1156_s29 + $0x60] sm:$0xff] %vm581_vm1, %v639_v50 }
 0x164   : > { %v641_v51 = vpop.permute.xlu1 %640  ;;  %v627_v52 = vpop.permute.xlu0 %626 }
 0x165   : > { %675 = vst.msk [vmem:[%s1156_s29 + $0x68] sm:$0xff] %vm581_vm1, %v641_v51  ;;  %668 = vst.msk [vmem:[%s1156_s29 + $0x30] sm:$0xff] %vm581_vm1, %v627_v52 }
 0x168   : > { %v629_v53 = vpop.permute.xlu1 %628  ;;  %v643_v54 = vpop.permute.xlu0 %642 }
 0x169   : > { %669 = vst.msk [vmem:[%s1156_s29 + $0x38] sm:$0xff] %vm581_vm1, %v629_v53  ;;  %676 = vst.msk [vmem:[%s1156_s29 + $0x70] sm:$0xff] %vm581_vm1, %v643_v54 }
 0x16c   : > { %v645_v55 = vpop.permute.xlu1 %644 }
 0x16d   : > { %677 = vst.msk [vmem:[%s1156_s29 + $0x78] sm:$0xff] %vm581_vm1, %v645_v55 }
 0x16e PF: > { %s16_s18 = sadd.s32 1, %s936_s18  }
 0x16f   : > { %p13_p4 = scmp.ge.s32.totalorder %s16_s18, 4  }
 0x171   :  { %15 = sbr.rel (!%p13_p4) target bundleno = 1 (0x1), region = 86 }

// kernel: gat_layer.3
= control target key start
LH: loop header
LB: loop body
LE: loop exit
PB: predicated region body
PF: predicated region fallthrough
CT: control target
= control target key end

     0   :  { %9 = vsyncpa [#allocation3], 0  ;;  %s14418_s0 = inlined_call_operand.vmem [shape: s8[256,256], index: 0, kind: input, shape index: {}]   ;;  %s14419_s1 = inlined_call_operand.vmem [shape: bf16[256,128], index: 1, kind: input, shape index: {}]   ;;  %s14420_s2 = inlined_call_operand.vmem [shape: f32[256,8], index: 2, kind: input, shape index: {}]   ;;  %s14421_s3 = inlined_call_operand.vmem [shape: f32[8,256], index: 3, kind: input, shape index: {}]   ;;  %s14422_s4 = inlined_call_operand.hbm [shape: f32[256,128], index: 4, kind: output, shape index: {}]  }
   0x1   :  { %11 = vsyncpa [#allocation3 + $0x1], 0  ;;  %s8046_s15 = smov 0   ;;  %s8048_s16 = smov 0  }
   0x2   :  { %s8050_s17 = smov 0   ;;  %s8052_s18 = smov 0  }
   0x3 LB: > { %s8067_s19 = sadd.s32 4294967295, %s8001_s18   ;;  %s6311_s20 = sadd.s32 4294967294, %s8001_s18   ;;  %s8001_s18 = sphi %s8052_s18, %s15950_s18   ;;  %s7997_s17 = sphi %s8050_s17, %s15949_s17   ;;  %s7993_s16 = sphi %s8048_s16, %s15948_s16   ;;  %s7989_s15 = sphi %s8046_s15, %s15947_s15  }
   0x4   : > { %s8071_s21 = sadd.s32 1, %s8001_s18   ;;  %s118_s22 = sadd.s32 1, %s7997_s17 }
   0x5   : > { %s115_s23 = ssub.s32 %s8001_s18, %s8071_s21  ;;  %p128_p0 = scmp.ne.s32.totalorder %s7997_s17, %s7993_s16 }
   0x6   : > { %p116_p1 = scmp.eq.s32.totalorder %s115_s23, 0  ;;  %p129_p2 = scmp.eq.s32.totalorder %s8067_s19, 1 }
   0x7   : > { %p134_p3 = scmp.ne.s32.totalorder %s7993_s16, %s7989_s15  ;;  %p135_p4 = scmp.eq.s32.totalorder %s6311_s20, 1 }
   0x8   : > { %s8082_s24 = scalar_select %p116_p1, %s7997_s17, %s118_s22  }
   0x9   : > { %p8084_p5 = por %p129_p2, %p128_p0  ;;  %p8088_p6 = por %p135_p4, %p134_p3 }
   0xa   : > { %p6314_p7 = scmp.ge.s32.totalorder %s8001_s18, 1  ;;  %p178_p8 = scmp.lt.s32.totalorder %s8001_s18, 3 }
   0xc   : > { %p179_p9 = pnand %p6314_p7, %p178_p8 }
   0xe   : > { %182 = sbr.rel (%p179_p9) target bundleno = 3450 (0xd7a), region = 36 }
  0x13   : > { %s6319_s27 = sshll.u32 %s8067_s19, 4  ;;  %v8003_v0 = vmov 0   ;;  %v8004_v17 = vmov 1   ;;  %s6316_s6 = sshll.u32 %s8067_s19, 2  ;;  %v427_v18 = vlaneseq }
  0x14   : > { %6936 = vset.pattern.permute.xlu1 %v8003_v0  ;;  %6935 = vset.pattern.permute.xlu0 %v8003_v0  ;;  %p218_p10 = scmp.lt.s32.totalorder %s6319_s27, 31  ;;  %p211_p11 = scmp.lt.s32.totalorder %s6316_s6, 7  ;;  %v345_v28 = vld [vmem:[%s14421_s3] ss:$8 sm:$0x3] }
  0x15   : > { %v428_v19 = vshrl.u32 %v427_v18, 7  ;;  %s8010_s13 = smov 80   ;;  %s8012_s8 = smov 64  }
  0x16   : > { %s15952_s27 = smov (!%p218_p10, %s6319_s27), 31  ;;  %s15954_s6 = smov (!%p211_p11, %s6316_s6), 7 }
  0x17   : > { %s6320_s28 = sshll.u32 %s15952_s27, 3  ;;  %s6365_s7 = sshll.u32 %s15954_s6, 4  ;;  %v8141_v24 = vsub.s32 0, %v428_v19  ;;  %v8143_v25 = vsub.s32 1, %v428_v19 }
  0x18   : > { %s8098_s5 = scalar_lea.vmem %s14420_s2, %s6320_s28  ;;  %s8135_s10 = scalar_lea.vmem %s14418_s0, %s6365_s7 }
  0x19   : > { %v331_v1 = vld [vmem:[%s8098_s5 + $0x10] sm:$0xff]  ;;  %v329_v2 = vld [vmem:[%s8098_s5] sm:$0xff]  ;;  %v332_v3 = vld [vmem:[%s8098_s5 + $0x18] sm:$0xff]  ;;  %14781 = vst [vmem:[#allocation5_spill] sm:$0xff] %v8141_v24  ;;  %v8149_v37 = vrot.slane %v345_v28, %v8141_v24  ;;  %v8152_v38 = vrot.slane %v345_v28, %v8143_v25  ;;  %s8005_s28 = smov 112   ;;  %s8008_s6 = smov 96  }
  0x1a   : > { %358 = vperm.xlu1 %6936, %v331_v1   ;;  %348 = vperm.xlu0 %6935, %v329_v2   ;;  %v330_v4 = vld [vmem:[%s8098_s5 + $0x8] sm:$0xff]  ;;  %v333_v6 = vld [vmem:[%s8098_s5 + $0x20] sm:$0xff]  ;;  %v336_v7 = vld [vmem:[%s8098_s5 + $0x38] sm:$0xff]  ;;  %14782 = vst [vmem:[#allocation6_spill] sm:$0xff] %v8143_v25  ;;  %s8014_s30 = smov 48   ;;  %s8017_s11 = smov 16  }
  0x1b   : > { %v334_v5 = vld [vmem:[%s8098_s5 + $0x28] sm:$0xff]  ;;  %v335_v8 = vld [vmem:[%s8098_s5 + $0x30] sm:$0xff]  ;;  %v337_v10 = vld [vmem:[%s8098_s5 + $0x40] sm:$0xff]  ;;  %s8018_s20 = smov [#allocation2]  }
  0x1c   : > { %v338_v9 = vld [vmem:[%s8098_s5 + $0x48] sm:$0xff]  ;;  %v8111_v11 = vld [vmem:[%s8098_s5 + $0x58] sm:$0xff]  ;;  %v339_v12 = vld [vmem:[%s8098_s5 + $0x50] sm:$0xff]  ;;  %s7945_s22 = sshll.u32 %s8018_s20, 4  ;;  %s7946_s22 = int_to_ptr.vmem [resolvable:$false] %s7945_s22 }
  0x1d   : > { %v8116_v13 = vld [vmem:[%s8098_s5 + $0x68] sm:$0xff]  ;;  %v8119_v14 = vld [vmem:[%s8098_s5 + $0x60] sm:$0xff]  ;;  %v8124_v15 = vld [vmem:[%s8098_s5 + $0x78] sm:$0xff] }
  0x1e   : > { %363 = vperm.xlu1 %6936, %v332_v3   ;;  %353 = vperm.xlu0 %6935, %v330_v4   ;;  %v8127_v16 = vld [vmem:[%s8098_s5 + $0x70] sm:$0xff]  ;;  %v225_v20 = vld [vmem:[%s8135_s10] sm:$0xff]  ;;  %v226_v21 = vld [vmem:[%s8135_s10 + $0x8] sm:$0xff] }
  0x1f   : > { %v227_v22 = vld [vmem:[%s8135_s10 + $0x10] sm:$0xff]  ;;  %v228_v23 = vld [vmem:[%s8135_s10 + $0x18] sm:$0xff]  ;;  %v233_v26 = vunpack.c.0.s8 %v225_v20  ;;  %v234_v27 = vunpack.c.0.s8 %v226_v21  ;;  %v235_v29 = vunpack.c.1.s8 %v225_v20  ;;  %v236_v30 = vunpack.c.1.s8 %v226_v21  ;;  %v229_v45 = vld [vmem:[%s8135_s10 + $0x20] sm:$0xff] }
  0x20   : > { %v237_v31 = vunpack.c.2.s8 %v225_v20  ;;  %v238_v32 = vunpack.c.2.s8 %v226_v21  ;;  %v241_v33 = vunpack.c.0.s8 %v227_v22  ;;  %v242_v34 = vunpack.c.0.s8 %v228_v23  ;;  %v230_v46 = vld [vmem:[%s8135_s10 + $0x28] sm:$0xff]  ;;  %v8177_v59 = vld [vmem:[%s8135_s10 + $0x30] sm:$0xff]  ;;  %v8180_v60 = vld [vmem:[%s8135_s10 + $0x38] sm:$0xff]  ;;  %s8016_s10 = smov 32  }
  0x21   : > { %v239_v35 = vunpack.c.3.s8 %v225_v20  ;;  %v240_v36 = vunpack.c.3.s8 %v226_v21  ;;  %v8154_v39 = vcvt.s32.f32 %v233_v26  ;;  %v8156_v40 = vcvt.s32.f32 %v234_v27 }
  0x22   : > { %373 = vperm.xlu1 %6936, %v334_v5   ;;  %368 = vperm.xlu0 %6935, %v333_v6   ;;  %v8158_v41 = vcvt.s32.f32 %v235_v29  ;;  %v8160_v42 = vcvt.s32.f32 %v236_v30  ;;  %v243_v43 = vunpack.c.1.s8 %v227_v22  ;;  %v244_v44 = vunpack.c.1.s8 %v228_v23 }
  0x23   : > { %14783 = vst [vmem:[#allocation7_spill] sm:$0xff] %v8154_v39  ;;  %14784 = vst [vmem:[#allocation8_spill] sm:$0xff] %v8156_v40  ;;  %v8164_v47 = vcvt.s32.f32 %v237_v31  ;;  %v8166_v48 = vcvt.s32.f32 %v238_v32  ;;  %v8168_v49 = vcvt.s32.f32 %v241_v33  ;;  %v8170_v50 = vcvt.s32.f32 %v242_v34 }
  0x24   : > { %14785 = vst [vmem:[#allocation9_spill] sm:$0xff] %v8158_v41  ;;  %14786 = vst [vmem:[#allocation10_spill] sm:$0xff] %v8160_v42  ;;  %v8172_v51 = vcvt.s32.f32 %v239_v35  ;;  %v8174_v52 = vcvt.s32.f32 %v240_v36  ;;  %v245_v53 = vunpack.c.2.s8 %v227_v22  ;;  %v246_v54 = vunpack.c.2.s8 %v228_v23 }
  0x25   : > { %14787 = vst [vmem:[#allocation11_spill] sm:$0xff] %v8164_v47  ;;  %14788 = vst [vmem:[#allocation12_spill] sm:$0xff] %v8166_v48  ;;  %v249_v55 = vunpack.c.0.s8 %v229_v45  ;;  %v250_v56 = vunpack.c.0.s8 %v230_v46  ;;  %v247_v57 = vunpack.c.3.s8 %v227_v22  ;;  %v248_v58 = vunpack.c.3.s8 %v228_v23 }
  0x26   : > { %383 = vperm.xlu1 %6936, %v336_v7   ;;  %378 = vperm.xlu0 %6935, %v335_v8   ;;  %14789 = vst [vmem:[#allocation13_spill] sm:$0xff] %v8168_v49  ;;  %14790 = vst [vmem:[#allocation14_spill] sm:$0xff] %v8170_v50  ;;  %v8182_v61 = vcvt.s32.f32 %v243_v43  ;;  %v8184_v62 = vcvt.s32.f32 %v244_v44  ;;  %v251_v63 = vunpack.c.1.s8 %v229_v45  ;;  %v252_v0 = vunpack.c.1.s8 %v230_v46 }
  0x27   : > { %14791 = vst [vmem:[#allocation15_spill] sm:$0xff] %v8172_v51  ;;  %14792 = vst [vmem:[#allocation16_spill] sm:$0xff] %v8174_v52  ;;  %vm14433_vm0 = vcmp.gt.f32.partialorder %v8154_v39, 0.0  ;;  %vm14432_vm1 = vcmp.gt.f32.partialorder %v8156_v40, 0.0  ;;  %vm14424_vm2 = vcmp.gt.f32.partialorder %v8164_v47, 0.0  ;;  %v259_v20 = vunpack.c.1.s8 %v8177_v59 }
  0x28   : > { %14793 = vst [vmem:[#allocation17_spill] sm:$0xff] %v8182_v61  ;;  %14794 = vst [vmem:[#allocation18_spill] sm:$0xff] %v8184_v62  ;;  %v8203_v18 = vcvt.s32.f32 %v251_v63  ;;  %v8205_v19 = vcvt.s32.f32 %v252_v0  ;;  %v260_v21 = vunpack.c.1.s8 %v8180_v60  ;;  %vm14423_vm3 = vcmp.gt.f32.partialorder %v8166_v48, 0.0 }
  0x29   : > { %vm14456_vm4 = vcmp.gt.f32.partialorder %v8158_v41, 0.0  ;;  %vm14453_vm5 = vcmp.gt.f32.partialorder %v8160_v42, 0.0  ;;  %v261_v32 = vunpack.c.2.s8 %v8177_v59  ;;  %v262_v33 = vunpack.c.2.s8 %v8180_v60 }
  0x2a   : > { %393 = vperm.xlu1 %6936, %v338_v9   ;;  %388 = vperm.xlu0 %6935, %v337_v10   ;;  %14801 = vst [vmem:[#allocation25_spill] sm:$0xff] %v8203_v18  ;;  %14802 = vst [vmem:[#allocation26_spill] sm:$0xff] %v8205_v19  ;;  %v8230_v44 = vcvt.s32.f32 %v259_v20  ;;  %vm14430_vm10 = vcmp.gt.f32.partialorder %v8168_v49, 0.0  ;;  %vm14429_vm11 = vcmp.gt.f32.partialorder %v8170_v50, 0.0  ;;  %vm14445_vm14 = vcmp.gt.f32.partialorder %v8172_v51, 0.0 }
  0x2b   : > { %vm14440_vm15 = vcmp.gt.f32.partialorder %v8174_v52, 0.0 }
  0x2c   : > { %14809 = vst [vmem:[#allocation33_spill] sm:$0xff] %v8230_v44 }
  0x2e   : > { %403 = vperm.xlu1 %6936, %v8111_v11   ;;  %398 = vperm.xlu0 %6935, %v339_v12  }
  0x32   : > { %413 = vperm.xlu1 %6936, %v8116_v13   ;;  %408 = vperm.xlu0 %6935, %v8119_v14  }
  0x36   : > { %423 = vperm.xlu1 %6936, %v8124_v15   ;;  %418 = vperm.xlu0 %6935, %v8127_v16  }
  0x3a   : > { %6937 = vset.pattern.permute.xlu1 %v8004_v17  ;;  %6938 = vset.pattern.permute.xlu0 %v8004_v17  ;;  %v8201_v17 = vcvt.s32.f32 %v248_v58 }
  0x3b   : > { %1081 = vperm.xlu1 %6937, %v329_v2   ;;  %1085 = vperm.xlu0 %6938, %v330_v4   ;;  %v254_v2 = vunpack.c.2.s8 %v230_v46  ;;  %v256_v4 = vunpack.c.3.s8 %v230_v46  ;;  %v263_v46 = vunpack.c.3.s8 %v8177_v59 }
  0x3c   : > { %14800 = vst [vmem:[#allocation24_spill] sm:$0xff] %v8201_v17 }
  0x3d   : > { %v8212_v23 = vcvt.s32.f32 %v254_v2  ;;  %v8216_v27 = vcvt.s32.f32 %v256_v4  ;;  %v8242_v2 = vcvt.s32.f32 %v262_v33 }
  0x3f   : > { %1089 = vperm.xlu1 %6937, %v331_v1   ;;  %1121 = vperm.xlu0 %6938, %v339_v12   ;;  %v253_v1 = vunpack.c.2.s8 %v229_v45  ;;  %v8199_v12 = vcvt.s32.f32 %v247_v57  ;;  %14804 = vst [vmem:[#allocation28_spill] sm:$0xff] %v8212_v23  ;;  %14806 = vst [vmem:[#allocation30_spill] sm:$0xff] %v8216_v27 }
  0x40   : > { %14812 = vst [vmem:[#allocation36_spill] sm:$0xff] %v8242_v2 }
  0x41   : > { %14799 = vst [vmem:[#allocation23_spill] sm:$0xff] %v8199_v12  ;;  %v8210_v22 = vcvt.s32.f32 %v253_v1  ;;  %v8240_v1 = vcvt.s32.f32 %v261_v32 }
  0x43   : > { %1093 = vperm.xlu1 %6937, %v332_v3   ;;  %v255_v3 = vunpack.c.3.s8 %v229_v45  ;;  %14803 = vst [vmem:[#allocation27_spill] sm:$0xff] %v8210_v22  ;;  %v8232_v45 = vcvt.s32.f32 %v260_v21  ;;  %14811 = vst [vmem:[#allocation35_spill] sm:$0xff] %v8240_v1 }
  0x45   : > { %v8214_v26 = vcvt.s32.f32 %v255_v3  ;;  %14810 = vst [vmem:[#allocation34_spill] sm:$0xff] %v8232_v45 }
  0x47   : > { %1097 = vperm.xlu1 %6937, %v333_v6   ;;  %v8190_v6 = vcvt.s32.f32 %v246_v54  ;;  %14805 = vst [vmem:[#allocation29_spill] sm:$0xff] %v8214_v26 }
  0x49   : > { %14796 = vst [vmem:[#allocation20_spill] sm:$0xff] %v8190_v6 }
  0x4b   : > { %1101 = vperm.xlu1 %6937, %v334_v5   ;;  %v8188_v5 = vcvt.s32.f32 %v245_v53 }
  0x4d   : > { %14795 = vst [vmem:[#allocation19_spill] sm:$0xff] %v8188_v5 }
  0x4f   : > { %1105 = vperm.xlu1 %6937, %v335_v8   ;;  %v258_v8 = vunpack.c.0.s8 %v8180_v60 }
  0x51   : > { %v8222_v31 = vcvt.s32.f32 %v258_v8 }
  0x53   : > { %1109 = vperm.xlu1 %6937, %v336_v7   ;;  %v257_v7 = vunpack.c.0.s8 %v8177_v59  ;;  %14808 = vst [vmem:[#allocation32_spill] sm:$0xff] %v8222_v31 }
  0x55   : > { %v8220_v30 = vcvt.s32.f32 %v257_v7 }
  0x57   : > { %1113 = vperm.xlu1 %6937, %v337_v10   ;;  %v8197_v10 = vcvt.s32.f32 %v250_v56  ;;  %14807 = vst [vmem:[#allocation31_spill] sm:$0xff] %v8220_v30 }
  0x59   : > { %14798 = vst [vmem:[#allocation22_spill] sm:$0xff] %v8197_v10 }
  0x5b   : > { %1117 = vperm.xlu1 %6937, %v338_v9   ;;  %v8195_v9 = vcvt.s32.f32 %v249_v55 }
  0x5d   : > { %14797 = vst [vmem:[#allocation21_spill] sm:$0xff] %v8195_v9 }
  0x95   : > { %v359_v28 = vpop.permute.xlu1 %358  ;;  %v349_v29 = vpop.permute.xlu0 %348 }
  0x96   : > { %v441_v34 = vadd.f32 %v8149_v37, %v359_v28  ;;  %v442_v35 = vadd.f32 %v8152_v38, %v359_v28  ;;  %v437_v36 = vadd.f32 %v8149_v37, %v349_v29  ;;  %v438_v43 = vadd.f32 %v8152_v38, %v349_v29 }
  0x98   : > { %vm469_vm6 = vcmp.ge.f32.partialorder %v437_v36, 0.0  ;;  %vm470_vm7 = vcmp.ge.f32.partialorder %v438_v43, 0.0  ;;  %v501_v54 = vmul.f32 0.2, %v437_v36  ;;  %v502_v55 = vmul.f32 0.2, %v438_v43 }
  0x99   : > { %v364_v56 = vpop.permute.xlu1 %363  ;;  %v354_v57 = vpop.permute.xlu0 %353  ;;  %vm473_vm8 = vcmp.ge.f32.partialorder %v441_v34, 0.0  ;;  %vm474_vm9 = vcmp.ge.f32.partialorder %v442_v35, 0.0  ;;  %v505_v58 = vmul.f32 0.2, %v441_v34  ;;  %v506_v63 = vmul.f32 0.2, %v442_v35 }
  0x9a   : > { %v439_v0 = vadd.f32 %v8149_v37, %v354_v57  ;;  %v440_v59 = vadd.f32 %v8152_v38, %v354_v57  ;;  %v533_v3 = vsel %vm469_vm6, %v437_v36, %v501_v54  ;;  %v534_v4 = vsel %vm470_vm7, %v438_v43, %v502_v55 }
  0x9b   : > { %v537_v7 = vsel %vm473_vm8, %v441_v34, %v505_v58  ;;  %v538_v8 = vsel %vm474_vm9, %v442_v35, %v506_v63  ;;  %v8248_v20 = vsel %vm14433_vm0, %v533_v3, -9e+15  ;;  %v8252_v21 = vsel %vm14432_vm1, %v534_v4, -9e+15 }
  0x9c   : > { %14813 = vst [vmem:[#allocation37_spill] sm:$0xff] %v8248_v20  ;;  %14814 = vst [vmem:[#allocation38_spill] sm:$0xff] %v8252_v21  ;;  %vm471_vm12 = vcmp.ge.f32.partialorder %v439_v0, 0.0  ;;  %vm472_vm13 = vcmp.ge.f32.partialorder %v440_v59, 0.0  ;;  %v597_v32 = vmax.f32 %v8248_v20, %v8252_v21  ;;  %v503_v33 = vmul.f32 0.2, %v439_v0 }
  0x9d   : > { %v374_v28 = vpop.permute.xlu1 %373  ;;  %v369_v29 = vpop.permute.xlu0 %368  ;;  %v504_v34 = vmul.f32 0.2, %v440_v59  ;;  %v8259_v35 = vsel %vm14424_vm2, %v537_v7, -9e+15  ;;  %v443_v36 = vadd.f32 %v8149_v37, %v364_v56  ;;  %v8265_v55 = vcvt.s32.f32 %v263_v46 }
  0x9e   : > { %14815 = vst [vmem:[#allocation39_spill] sm:$0xff] %v8259_v35  ;;  %v445_v43 = vadd.f32 %v8149_v37, %v369_v29  ;;  %v446_v54 = vadd.f32 %v8152_v38, %v369_v29  ;;  %v444_v57 = vadd.f32 %v8152_v38, %v364_v56  ;;  %598 = vmax.xlane.f32.xlu0 %v597_v32  ;;  %v8272_v3 = vsel %vm14423_vm3, %v538_v8, -9e+15 }
  0x9f   : > { %14816 = vst [vmem:[#allocation40_spill] sm:$0xff] %v8265_v55  ;;  %v535_v58 = vsel %vm471_vm12, %v439_v0, %v503_v33  ;;  %v536_v63 = vsel %vm472_vm13, %v440_v59, %v504_v34  ;;  %14817 = vst [vmem:[#allocation41_spill] sm:$0xff] %v8272_v3  ;;  %v603_v46 = vmax.f32 %v8259_v35, %v8272_v3  ;;  %vm14450_vm7 = vcmp.gt.f32.partialorder %v8188_v5, 0.0 }
  0xa0   : > { %v8276_v4 = vsel %vm14456_vm4, %v535_v58, -9e+15  ;;  %v8280_v7 = vsel %vm14453_vm5, %v536_v63, -9e+15  ;;  %vm477_vm6 = vcmp.ge.f32.partialorder %v445_v43, 0.0  ;;  %vm14446_vm8 = vcmp.gt.f32.partialorder %v8190_v6, 0.0 }
  0xa1   : > { %14818 = vst [vmem:[#allocation42_spill] sm:$0xff] %v8276_v4  ;;  %14819 = vst [vmem:[#allocation43_spill] sm:$0xff] %v8280_v7  ;;  %v384_v56 = vpop.permute.xlu1 %383  ;;  %v379_v0 = vpop.permute.xlu0 %378  ;;  %v600_v59 = vmax.f32 %v8276_v4, %v8280_v7  ;;  %vm478_vm9 = vcmp.ge.f32.partialorder %v446_v54, 0.0  ;;  %v509_v8 = vmul.f32 0.2, %v445_v43  ;;  %vm14441_vm12 = vcmp.gt.f32.partialorder %v8182_v61, 0.0 }
  0xa2   : > { %v510_v29 = vmul.f32 0.2, %v446_v54  ;;  %vm14444_vm13 = vcmp.gt.f32.partialorder %v8184_v62, 0.0  ;;  %v447_v32 = vadd.f32 %v8149_v37, %v374_v28  ;;  %v449_v33 = vadd.f32 %v8149_v37, %v379_v0  ;;  %604 = vmax.xlane.f32.xlu0 %v603_v46 }
  0xa3   : > { %v450_v34 = vadd.f32 %v8152_v38, %v379_v0  ;;  %vm475_vm3 = vcmp.ge.f32.partialorder %v443_v36, 0.0  ;;  %601 = vmax.xlane.f32.xlu1 %v600_v59  ;;  %v541_v58 = vsel %vm477_vm6, %v445_v43, %v509_v8  ;;  %vm476_vm2 = vcmp.ge.f32.partialorder %v444_v57, 0.0 }
  0xa4   : > { %v542_v63 = vsel %vm478_vm9, %v446_v54, %v510_v29  ;;  %v507_v53 = vmul.f32 0.2, %v443_v36  ;;  %v448_v3 = vadd.f32 %v8152_v38, %v374_v28  ;;  %v8297_v35 = vsel %vm14430_vm10, %v541_v58, -9e+15 }
  0xa5   : > { %14820 = vst [vmem:[#allocation44_spill] sm:$0xff] %v8297_v35  ;;  %v8301_v21 = vsel %vm14429_vm11, %v542_v63, -9e+15  ;;  %v508_v20 = vmul.f32 0.2, %v444_v57  ;;  %v8304_v0 = vadd.f32 %v8149_v37, %v384_v56  ;;  %v394_v46 = vpop.permute.xlu1 %393  ;;  %v389_v59 = vpop.permute.xlu0 %388  ;;  %vm14449_vm6 = vcmp.gt.f32.partialorder %v8195_v9, 0.0 }
  0xa6   : > { %14821 = vst [vmem:[#allocation45_spill] sm:$0xff] %v8301_v21  ;;  %v609_v43 = vmax.f32 %v8297_v35, %v8301_v21  ;;  %v539_v54 = vsel %vm475_vm3, %v443_v36, %v507_v53  ;;  %vm14448_vm9 = vcmp.gt.f32.partialorder %v8197_v10, 0.0  ;;  %v14822_v28 = vunpack.c.3.s8 %v8180_v60 }
  0xa7   : > { %v453_v29 = vadd.f32 %v8149_v37, %v389_v59  ;;  %v454_v58 = vadd.f32 %v8152_v38, %v389_v59  ;;  %vm481_vm11 = vcmp.ge.f32.partialorder %v449_v33, 0.0  ;;  %vm482_vm10 = vcmp.ge.f32.partialorder %v450_v34, 0.0 }
  0xa8   : > { %v8312_v8 = vcvt.s32.f32 %v14822_v28  ;;  %610 = vmax.xlane.f32.xlu1 %v609_v43  ;;  %v540_v63 = vsel %vm476_vm2, %v444_v57, %v508_v20  ;;  %v8319_v53 = vsel %vm14445_vm14, %v539_v54, -9e+15  ;;  %v513_v36 = vmul.f32 0.2, %v449_v33 }
  0xa9   : > { %14824 = vst [vmem:[#allocation47_spill] sm:$0xff] %v8319_v53  ;;  %v514_v21 = vmul.f32 0.2, %v450_v34  ;;  %v8323_v60 = vsel %vm14440_vm15, %v540_v63, -9e+15  ;;  %vm479_vm3 = vcmp.ge.f32.partialorder %v447_v32, 0.0  ;;  %v404_v43 = vpop.permute.xlu1 %403  ;;  %v399_v20 = vpop.permute.xlu0 %398  ;;  %v452_v7 = vadd.f32 %v8152_v38, %v384_v56 }
  0xaa   : > { %14823 = vst [vmem:[#allocation46_spill] sm:$0xff] %v8312_v8  ;;  %14825 = vst [vmem:[#allocation48_spill] sm:$0xff] %v8323_v60  ;;  %vm480_vm1 = vcmp.ge.f32.partialorder %v448_v3, 0.0  ;;  %v511_v28 = vmul.f32 0.2, %v447_v32  ;;  %vm14455_vm0 = vcmp.gt.f32.partialorder %v8199_v12, 0.0  ;;  %v606_v59 = vmax.f32 %v8319_v53, %v8323_v60 }
  0xab   : > { %v545_v57 = vsel %vm481_vm11, %v449_v33, %v513_v36  ;;  %v546_v35 = vsel %vm482_vm10, %v450_v34, %v514_v21  ;;  %v512_v54 = vmul.f32 0.2, %v448_v3  ;;  %vm14454_vm2 = vcmp.gt.f32.partialorder %v8201_v17, 0.0 }
  0xac   : > { %v8331_v63 = vadd.f32 %v8149_v37, %v394_v46  ;;  %v8334_v4 = vadd.f32 %v8152_v38, %v394_v46  ;;  %v8337_v52 = vadd.f32 %v8149_v37, %v404_v43  ;;  %607 = vmax.xlane.f32.xlu0 %v606_v59  ;;  %v8341_v60 = vsel %vm14450_vm7, %v545_v57, -9e+15 }
  0xad   : > { %14826 = vst [vmem:[#allocation49_spill] sm:$0xff] %v8341_v60  ;;  %v8345_v21 = vsel %vm14446_vm8, %v546_v35, -9e+15  ;;  %v543_v56 = vsel %vm479_vm3, %v447_v32, %v511_v28  ;;  %v544_v33 = vsel %vm480_vm1, %v448_v3, %v512_v54  ;;  %vm14593_vm10 = vcmp.gt.f32.partialorder %v8210_v22, 0.0  ;;  %v414_v3 = vpop.permute.xlu1 %413  ;;  %v409_v32 = vpop.permute.xlu0 %408 }
  0xae   : > { %14827 = vst [vmem:[#allocation50_spill] sm:$0xff] %v8345_v21  ;;  %v615_v34 = vmax.f32 %v8341_v60, %v8345_v21  ;;  %v8354_v46 = vsel %vm14441_vm12, %v543_v56, -9e+15  ;;  %v8358_v36 = vsel %vm14444_vm13, %v544_v33, -9e+15  ;;  %vm485_vm11 = vcmp.ge.f32.partialorder %v453_v29, 0.0 }
  0xaf   : > { %14828 = vst [vmem:[#allocation51_spill] sm:$0xff] %v8354_v46  ;;  %14829 = vst [vmem:[#allocation52_spill] sm:$0xff] %v8358_v36  ;;  %vm14459_vm15 = vcmp.gt.f32.partialorder %v8212_v23, 0.0  ;;  %v612_v35 = vmax.f32 %v8354_v46, %v8358_v36  ;;  %vm486_vm1 = vcmp.ge.f32.partialorder %v454_v58, 0.0  ;;  %v517_v28 = vmul.f32 0.2, %v453_v29 }
  0xb0   : > { %v518_v59 = vmul.f32 0.2, %v454_v58  ;;  %vm315_vm3 = vcmp.gt.f32.partialorder %v8203_v18, 0.0  ;;  %vm316_vm12 = vcmp.gt.f32.partialorder %v8205_v19, 0.0  ;;  %v8366_v57 = vadd.f32 %v8152_v38, %v404_v43  ;;  %616 = vmax.xlane.f32.xlu1 %v615_v34 }
  0xb1   : > { %v457_v54 = vadd.f32 %v8149_v37, %v399_v20  ;;  %v458_v56 = vadd.f32 %v8152_v38, %v399_v20  ;;  %v8371_v33 = vadd.f32 %v8149_v37, %v414_v3  ;;  %613 = vmax.xlane.f32.xlu0 %v612_v35  ;;  %v549_v21 = vsel %vm485_vm11, %v453_v29, %v517_v28  ;;  %v419_v28 = vpop.permute.xlu0 %418 }
  0xb2   : > { %v550_v60 = vsel %vm486_vm1, %v454_v58, %v518_v59  ;;  %vm483_vm13 = vcmp.ge.f32.partialorder %v8304_v0, 0.0  ;;  %vm484_vm14 = vcmp.ge.f32.partialorder %v452_v7, 0.0  ;;  %vm14462_vm8 = vcmp.gt.f32.partialorder %v8220_v30, 0.0 }
  0xb3   : > { %v8377_v43 = vadd.f32 %v8152_v38, %v414_v3  ;;  %v8381_v36 = vsel %vm14449_vm6, %v549_v21, -9e+15  ;;  %v8385_v20 = vsel %vm14448_vm9, %v550_v60, -9e+15  ;;  %v515_v34 = vmul.f32 0.2, %v8304_v0 }
  0xb4   : > { %14830 = vst [vmem:[#allocation53_spill] sm:$0xff] %v8381_v36  ;;  %14831 = vst [vmem:[#allocation54_spill] sm:$0xff] %v8385_v20  ;;  %vm14461_vm11 = vcmp.gt.f32.partialorder %v8222_v31, 0.0  ;;  %v461_v29 = vadd.f32 %v8149_v37, %v409_v32  ;;  %v462_v58 = vadd.f32 %v8152_v38, %v409_v32  ;;  %v621_v35 = vmax.f32 %v8381_v36, %v8385_v20 }
  0xb5   : > { %v516_v3 = vmul.f32 0.2, %v452_v7  ;;  %v547_v21 = vsel %vm483_vm13, %v8304_v0, %v515_v34  ;;  %v8395_v59 = vadd.f32 %v8149_v37, %v419_v28  ;;  %vm489_vm1 = vcmp.ge.f32.partialorder %v457_v54, 0.0 }
  0xb6   : > { %vm490_vm9 = vcmp.ge.f32.partialorder %v458_v56, 0.0  ;;  %vm14591_vm6 = vcmp.gt.f32.partialorder %v8214_v26, 0.0  ;;  %vm14463_vm7 = vcmp.gt.f32.partialorder %v8216_v27, 0.0  ;;  %622 = vmax.xlane.f32.xlu1 %v621_v35  ;;  %v8402_v32 = vsel %vm14455_vm0, %v547_v21, -9e+15 }
  0xb7   : > { %v548_v60 = vsel %vm484_vm14, %v452_v7, %v516_v3  ;;  %14832 = vst [vmem:[#allocation55_spill] sm:$0xff] %v8402_v32  ;;  %v466_v20 = vadd.f32 %v8152_v38, %v419_v28  ;;  %v521_v36 = vmul.f32 0.2, %v457_v54  ;;  %v522_v34 = vmul.f32 0.2, %v458_v56 }
  0xb8   : > { %v8407_v0 = vsel %vm14454_vm2, %v548_v60, -9e+15  ;;  %vm487_vm13 = vcmp.ge.f32.partialorder %v8331_v63, 0.0  ;;  %vm488_vm5 = vcmp.ge.f32.partialorder %v8334_v4, 0.0  ;;  %v519_v3 = vmul.f32 0.2, %v8331_v63 }
  0xb9   : > { %14833 = vst [vmem:[#allocation56_spill] sm:$0xff] %v8407_v0  ;;  %v618_v35 = vmax.f32 %v8402_v32, %v8407_v0  ;;  %v553_v7 = vsel %vm489_vm1, %v457_v54, %v521_v36  ;;  %v520_v21 = vmul.f32 0.2, %v8334_v4  ;;  %vm14488_vm14 = vcmp.gt.f32.partialorder %v8240_v1, 0.0 }
  0xba   : > { %v554_v28 = vsel %vm490_vm9, %v458_v56, %v522_v34  ;;  %v8419_v60 = vsel %vm14593_vm10, %v553_v7, -9e+15  ;;  %vm493_vm2 = vcmp.ge.f32.partialorder %v461_v29, 0.0  ;;  %vm494_vm0 = vcmp.ge.f32.partialorder %v462_v58, 0.0  ;;  %v424_v56 = vpop.permute.xlu1 %423 }
  0xbb   : > { %14834 = vst [vmem:[#allocation57_spill] sm:$0xff] %v8419_v60  ;;  %vm14487_vm4 = vcmp.gt.f32.partialorder %v8242_v2, 0.0  ;;  %619 = vmax.xlane.f32.xlu0 %v618_v35  ;;  %v8424_v36 = vsel %vm14459_vm15, %v554_v28, -9e+15  ;;  %v551_v54 = vsel %vm487_vm13, %v8331_v63, %v519_v3  ;;  %v552_v0 = vsel %vm488_vm5, %v8334_v4, %v520_v21 }
  0xbc   : > { %14835 = vst [vmem:[#allocation58_spill] sm:$0xff] %v8424_v36  ;;  %v525_v32 = vmul.f32 0.2, %v461_v29  ;;  %vm14588_vm9 = vcmp.gt.f32.partialorder %v8230_v44, 0.0  ;;  %vm14583_vm1 = vcmp.gt.f32.partialorder %v8232_v45, 0.0  ;;  %v627_v34 = vmax.f32 %v8419_v60, %v8424_v36 }
  0xbd   : > { %v8434_v35 = vsel %vm315_vm3, %v551_v54, -9e+15  ;;  %v8438_v7 = vsel %vm316_vm12, %v552_v0, -9e+15  ;;  %v526_v63 = vmul.f32 0.2, %v462_v58  ;;  %v467_v36 = vadd.f32 %v8149_v37, %v424_v56 }
  0xbe   : > { %14836 = vst [vmem:[#allocation59_spill] sm:$0xff] %v8434_v35  ;;  %14837 = vst [vmem:[#allocation60_spill] sm:$0xff] %v8438_v7  ;;  %v624_v4 = vmax.f32 %v8434_v35, %v8438_v7  ;;  %v557_v3 = vsel %vm493_vm2, %v461_v29, %v525_v32  ;;  %vm491_vm5 = vcmp.ge.f32.partialorder %v8337_v52, 0.0  ;;  %vm492_vm13 = vcmp.ge.f32.partialorder %v8366_v57, 0.0  ;;  %628 = vmax.xlane.f32.xlu1 %v627_v34 }
  0xbf   : > { %vm14582_vm15 = vcmp.gt.f32.partialorder %v8265_v55, 0.0  ;;  %v558_v21 = vsel %vm494_vm0, %v462_v58, %v526_v63  ;;  %v8449_v28 = vsel %vm14462_vm8, %v557_v3, -9e+15  ;;  %v523_v0 = vmul.f32 0.2, %v8337_v52  ;;  %v14883_v55 = vld [vmem:[#allocation51_spill] sm:$0xff] }
  0xc0   : > { %14838 = vst [vmem:[#allocation61_spill] sm:$0xff] %v8449_v28  ;;  %v524_v54 = vmul.f32 0.2, %v8366_v57  ;;  %v468_v29 = vadd.f32 %v8152_v38, %v424_v56  ;;  %625 = vmax.xlane.f32.xlu0 %v624_v4  ;;  %v8457_v32 = vsel %vm14461_vm11, %v558_v21, -9e+15  ;;  %vm497_vm2 = vcmp.ge.f32.partialorder %v8395_v59, 0.0 }
  0xc1   : > { %14839 = vst [vmem:[#allocation62_spill] sm:$0xff] %v8457_v32  ;;  %v633_v58 = vmax.f32 %v8449_v28, %v8457_v32  ;;  %v555_v34 = vsel %vm491_vm5, %v8337_v52, %v523_v0  ;;  %vm498_vm0 = vcmp.ge.f32.partialorder %v466_v20, 0.0  ;;  %v529_v56 = vmul.f32 0.2, %v8395_v59 }
  0xc2   : > { %v556_v63 = vsel %vm492_vm13, %v8366_v57, %v524_v54  ;;  %v8466_v37 = vsel %vm14591_vm6, %v555_v34, -9e+15  ;;  %v530_v3 = vmul.f32 0.2, %v466_v20  ;;  %vm495_vm5 = vcmp.ge.f32.partialorder %v8371_v33, 0.0 }
  0xc3   : > { %14840 = vst [vmem:[#allocation63_spill] sm:$0xff] %v8466_v37  ;;  %v8470_v38 = vsel %vm14463_vm7, %v556_v63, -9e+15  ;;  %634 = vmax.xlane.f32.xlu1 %v633_v58  ;;  %vm496_vm13 = vcmp.ge.f32.partialorder %v8377_v43, 0.0  ;;  %v561_v52 = vsel %vm497_vm2, %v8395_v59, %v529_v56  ;;  %v527_v57 = vmul.f32 0.2, %v8371_v33 }
  0xc4   : > { %14841 = vst [vmem:[#allocation64_spill] sm:$0xff] %v8470_v38  ;;  %v630_v4 = vmax.f32 %v8466_v37, %v8470_v38  ;;  %v528_v21 = vmul.f32 0.2, %v8377_v43  ;;  %vm14581_vm11 = vcmp.gt.f32.partialorder %v8312_v8, 0.0  ;;  %v562_v0 = vsel %vm498_vm0, %v466_v20, %v530_v3 }
  0xc5   : > { %v8483_v54 = vsel %vm14488_vm14, %v561_v52, -9e+15  ;;  %vm499_vm8 = vcmp.ge.f32.partialorder %v467_v36, 0.0  ;;  %vm500_vm7 = vcmp.ge.f32.partialorder %v468_v29, 0.0  ;;  %v8487_v58 = vsel %vm14487_vm4, %v562_v0, -9e+15 }
  0xc6   : > { %631 = vmax.xlane.f32.xlu0 %v630_v4  ;;  %14842 = vst [vmem:[#allocation65_spill] sm:$0xff] %v8483_v54  ;;  %14843 = vst [vmem:[#allocation66_spill] sm:$0xff] %v8487_v58  ;;  %v559_v59 = vsel %vm495_vm5, %v8371_v33, %v527_v57  ;;  %v560_v34 = vsel %vm496_vm13, %v8377_v43, %v528_v21  ;;  %v531_v63 = vmul.f32 0.2, %v467_v36  ;;  %v532_v3 = vmul.f32 0.2, %v468_v29 }
  0xc7   : > { %v639_v56 = vmax.f32 %v8483_v54, %v8487_v58  ;;  %v8495_v20 = vsel %vm14588_vm9, %v559_v59, -9e+15  ;;  %v8499_v4 = vsel %vm14583_vm1, %v560_v34, -9e+15  ;;  %v1082_v59 = vpop.permute.xlu1 %1081 }
  0xc8   : > { %14844 = vst [vmem:[#allocation67_spill] sm:$0xff] %v8495_v20  ;;  %14845 = vst [vmem:[#allocation68_spill] sm:$0xff] %v8499_v4  ;;  %v636_v52 = vmax.f32 %v8495_v20, %v8499_v4  ;;  %v563_v0 = vsel %vm499_vm8, %v467_v36, %v531_v63  ;;  %v564_v33 = vsel %vm500_vm7, %v468_v29, %v532_v3  ;;  %v6337_v63 = vld [vmem:[%s14421_s3 + $0x1] ss:$8 sm:$0x3] }
  0xc9   : > { %640 = vmax.xlane.f32.xlu1 %v639_v56  ;;  %v8505_v43 = vsel %vm14582_vm15, %v563_v0, -9e+15  ;;  %v8509_v57 = vsel %vm14581_vm11, %v564_v33, -9e+15  ;;  %v8522_v3 = vrot.slane %v6337_v63, %v8141_v24 }
  0xca   : > { %14846 = vst [vmem:[#allocation69_spill] sm:$0xff] %v8505_v43  ;;  %637 = vmax.xlane.f32.xlu0 %v636_v52  ;;  %14847 = vst [vmem:[#allocation70_spill] sm:$0xff] %v8509_v57  ;;  %v642_v21 = vmax.f32 %v8505_v43, %v8509_v57 }
  0xcb   : > { %v1090_v34 = vpop.permute.xlu1 %1089  ;;  %v1155_v52 = vadd.f32 %v8522_v3, %v1082_v59 }
  0xcc   : > { %v1159_v24 = vadd.f32 %v8522_v3, %v1090_v34 }
  0xcd   : > { %vm1187_vm8 = vcmp.ge.f32.partialorder %v1155_v52, 0.0  ;;  %v1219_v32 = vmul.f32 0.2, %v1155_v52 }
  0xce   : > { %643 = vmax.xlane.f32.xlu0 %v642_v21  ;;  %v1223_v46 = vmul.f32 0.2, %v1159_v24  ;;  %vm1191_vm4 = vcmp.ge.f32.partialorder %v1159_v24, 0.0 }
  0xcf   : > { %v1094_v36 = vpop.permute.xlu1 %1093  ;;  %v1251_v38 = vsel %vm1187_vm8, %v1155_v52, %v1219_v32  ;;  %vm14849_vm8 = vcmp.gt.f32.partialorder %v8160_v42, 0.0 }
  0xd3   : > { %v1098_v29 = vpop.permute.xlu1 %1097 }
  0xd4   : > { %v1163_v33 = vadd.f32 %v8522_v3, %v1098_v29 }
  0xd6   : > { %vm1195_vm5 = vcmp.ge.f32.partialorder %v1163_v33, 0.0 }
  0xd7   : > { %v1102_v56 = vpop.permute.xlu1 %1101 }
  0xda   : > { %1125 = vperm.xlu1 %6937, %v8111_v11   ;;  %v8525_v11 = vrot.slane %v6337_v63, %v8143_v25 }
  0xdb   : > { %v1106_v0 = vpop.permute.xlu1 %1105 }
  0xdc   : > { %v1164_v21 = vadd.f32 %v8525_v11, %v1098_v29  ;;  %v1160_v63 = vadd.f32 %v8525_v11, %v1090_v34  ;;  %v1161_v29 = vadd.f32 %v8522_v3, %v1094_v36  ;;  %v1162_v57 = vadd.f32 %v8525_v11, %v1094_v36 }
  0xdd   : > { %v1167_v4 = vadd.f32 %v8522_v3, %v1106_v0  ;;  %v1168_v2 = vadd.f32 %v8525_v11, %v1106_v0  ;;  %v1165_v36 = vadd.f32 %v8522_v3, %v1102_v56  ;;  %v1166_v32 = vadd.f32 %v8525_v11, %v1102_v56 }
  0xde   : > { %1133 = vperm.xlu1 %6937, %v8116_v13   ;;  %v1086_v13 = vpop.permute.xlu0 %1085  ;;  %v1228_v60 = vmul.f32 0.2, %v1164_v21  ;;  %vm1196_vm13 = vcmp.ge.f32.partialorder %v1164_v21, 0.0  ;;  %v1224_v53 = vmul.f32 0.2, %v1160_v63  ;;  %vm1192_vm14 = vcmp.ge.f32.partialorder %v1160_v63, 0.0 }
  0xe0   : > { %v1260_v35 = vsel %vm1196_vm13, %v1164_v21, %v1228_v60  ;;  %vm14853_vm13 = vcmp.gt.f32.partialorder %v8170_v50, 0.0 }
  0xe2   : > { %1141 = vperm.xlu1 %6937, %v8124_v15   ;;  %v1157_v15 = vadd.f32 %v8522_v3, %v1086_v13  ;;  %v1122_v25 = vpop.permute.xlu0 %1121 }
  0xe3   : > { %v8538_v43 = vadd.f32 %v8522_v3, %v1122_v25  ;;  %v8545_v1 = vadd.f32 %v8525_v11, %v1122_v25 }
  0xe4   : > { %1129 = vperm.xlu0 %6938, %v8119_v14   ;;  %v1156_v14 = vadd.f32 %v8525_v11, %v1082_v59  ;;  %vm1189_vm7 = vcmp.ge.f32.partialorder %v1157_v15, 0.0  ;;  %v1221_v58 = vmul.f32 0.2, %v1157_v15  ;;  %v1227_v59 = vmul.f32 0.2, %v1163_v33 }
  0xe6   : > { %v1220_v28 = vmul.f32 0.2, %v1156_v14  ;;  %vm1188_vm0 = vcmp.ge.f32.partialorder %v1156_v14, 0.0  ;;  %v1253_v34 = vsel %vm1189_vm7, %v1157_v15, %v1221_v58  ;;  %v1259_v7 = vsel %vm1195_vm5, %v1163_v33, %v1227_v59 }
  0xe7   : > { %vm14848_vm7 = vcmp.gt.f32.partialorder %v8158_v41, 0.0  ;;  %vm14852_vm5 = vcmp.gt.f32.partialorder %v8168_v49, 0.0  ;;  %v8571_v15 = vsel %vm14853_vm13, %v1260_v35, -9e+15  ;;  %v1225_v33 = vmul.f32 0.2, %v1161_v29 }
  0xe8   : > { %1137 = vperm.xlu0 %6938, %v8127_v16   ;;  %v1158_v16 = vadd.f32 %v8525_v11, %v1086_v13  ;;  %v1110_v13 = vpop.permute.xlu1 %1109  ;;  %v1252_v37 = vsel %vm1188_vm0, %v1156_v14, %v1220_v28  ;;  %v8550_v58 = vsel %vm14848_vm7, %v1253_v34, -9e+15  ;;  %vm14851_vm0 = vcmp.gt.f32.partialorder %v8156_v40, 0.0 }
  0xe9   : > { %v8567_v52 = vsel %vm14852_vm5, %v1259_v7, -9e+15  ;;  %v1256_v14 = vsel %vm1192_vm14, %v1160_v63, %v1224_v53  ;;  %vm1199_vm7 = vcmp.ge.f32.partialorder %v1167_v4, 0.0  ;;  %v1226_v7 = vmul.f32 0.2, %v1162_v57 }
  0xea   : > { %v1222_v54 = vmul.f32 0.2, %v1158_v16  ;;  %vm1190_vm2 = vcmp.ge.f32.partialorder %v1158_v16, 0.0  ;;  %v1169_v21 = vadd.f32 %v8522_v3, %v1110_v13  ;;  %v1170_v35 = vadd.f32 %v8525_v11, %v1110_v13 }
  0xeb   : > { %v1327_v53 = vmax.f32 %v8567_v52, %v8571_v15  ;;  %vm14854_vm14 = vcmp.gt.f32.partialorder %v8164_v47, 0.0 }
  0xec   : > { %v1254_v20 = vsel %vm1190_vm2, %v1158_v16, %v1222_v54  ;;  %vm14850_vm2 = vcmp.gt.f32.partialorder %v8154_v39, 0.0  ;;  %v1114_v25 = vpop.permute.xlu1 %1113  ;;  %v8563_v54 = vsel %vm14851_vm0, %v1252_v37, -9e+15  ;;  %v1232_v16 = vmul.f32 0.2, %v1168_v2 }
  0xed   : > { %v8554_v28 = vsel %vm14849_vm8, %v1254_v20, -9e+15  ;;  %v8558_v60 = vsel %vm14850_vm2, %v1251_v38, -9e+15  ;;  %v1255_v20 = vsel %vm1191_vm4, %v1159_v24, %v1223_v46  ;;  %v1231_v38 = vmul.f32 0.2, %v1167_v4 }
  0xee   : > { %v1171_v0 = vadd.f32 %v8522_v3, %v1114_v25  ;;  %v1172_v56 = vadd.f32 %v8525_v11, %v1114_v25  ;;  %v1318_v37 = vmax.f32 %v8550_v58, %v8554_v28  ;;  %vm1200_vm8 = vcmp.ge.f32.partialorder %v1168_v2, 0.0 }
  0xef   : > { %vm1193_vm2 = vcmp.ge.f32.partialorder %v1161_v29, 0.0  ;;  %v1315_v24 = vmax.f32 %v8558_v60, %v8563_v54  ;;  %vm1194_vm4 = vcmp.ge.f32.partialorder %v1162_v57, 0.0  ;;  %v8585_v46 = vsel %vm14854_vm14, %v1255_v20, -9e+15 }
  0xf0   : > { %vm14855_vm0 = vcmp.gt.f32.partialorder %v8166_v48, 0.0  ;;  %v1263_v59 = vsel %vm1199_vm7, %v1167_v4, %v1231_v38  ;;  %v1118_v34 = vpop.permute.xlu1 %1117  ;;  %v1264_v25 = vsel %vm1200_vm8, %v1168_v2, %v1232_v16  ;;  %v1257_v13 = vsel %vm1193_vm2, %v1161_v29, %v1225_v33  ;;  %v14859_v16 = vld [vmem:[#allocation16_spill] sm:$0xff] }
  0xf1   : > { %v8589_v63 = vsel %vm14855_vm0, %v1256_v14, -9e+15  ;;  %v1235_v50 = vmul.f32 0.2, %v1171_v0  ;;  %v1236_v49 = vmul.f32 0.2, %v1172_v56  ;;  %v1258_v40 = vsel %vm1194_vm4, %v1162_v57, %v1226_v7 }
  0xf2   : > { %vm1203_vm5 = vcmp.ge.f32.partialorder %v1171_v0, 0.0  ;;  %vm1204_vm13 = vcmp.ge.f32.partialorder %v1172_v56, 0.0  ;;  %v1229_v39 = vmul.f32 0.2, %v1165_v36  ;;  %v1321_v20 = vmax.f32 %v8585_v46, %v8589_v63 }
  0xf3   : > { %vm14856_vm14 = vcmp.gt.f32.partialorder %v8188_v5, 0.0  ;;  %vm1197_vm0 = vcmp.ge.f32.partialorder %v1165_v36, 0.0  ;;  %v1230_v4 = vmul.f32 0.2, %v1166_v32  ;;  %v1173_v2 = vadd.f32 %v8522_v3, %v1118_v34 }
  0xf4   : > { %v8596_v14 = vsel %vm14856_vm14, %v1263_v59, -9e+15  ;;  %vm14857_vm7 = vcmp.gt.f32.partialorder %v8190_v6, 0.0  ;;  %vm14858_vm8 = vcmp.gt.f32.partialorder %v8172_v51, 0.0  ;;  %vm1198_vm2 = vcmp.ge.f32.partialorder %v1166_v32, 0.0 }
  0xf5   : > { %v8601_v29 = vsel %vm14857_vm7, %v1264_v25, -9e+15  ;;  %v8605_v57 = vsel %vm14858_vm8, %v1257_v13, -9e+15  ;;  %v1174_v38 = vadd.f32 %v8525_v11, %v1118_v34  ;;  %vm14860_vm4 = vcmp.gt.f32.partialorder %v14859_v16, 0.0 }
  0xf6   : > { %v8610_v33 = vsel %vm14860_vm4, %v1258_v40, -9e+15  ;;  %v1268_v7 = vsel %vm1204_vm13, %v1172_v56, %v1236_v49  ;;  %vm1207_vm14 = vcmp.ge.f32.partialorder %v8538_v43, 0.0  ;;  %v1239_v59 = vmul.f32 0.2, %v8538_v43 }
  0xf7   : > { %v1240_v25 = vmul.f32 0.2, %v8545_v1  ;;  %v1262_v13 = vsel %vm1198_vm2, %v1166_v32, %v1230_v4  ;;  %vm1208_vm7 = vcmp.ge.f32.partialorder %v8545_v1, 0.0  ;;  %v1233_v6 = vmul.f32 0.2, %v1169_v21 }
  0xf8   : > { %v1234_v34 = vmul.f32 0.2, %v1170_v35  ;;  %v1333_v40 = vmax.f32 %v8596_v14, %v8601_v29  ;;  %vm1201_vm8 = vcmp.ge.f32.partialorder %v1169_v21, 0.0  ;;  %vm14861_vm13 = vcmp.gt.f32.partialorder %v8195_v9, 0.0 }
  0xf9   : > { %vm14863_vm2 = vcmp.gt.f32.partialorder %v8182_v61, 0.0  ;;  %vm14864_vm4 = vcmp.gt.f32.partialorder %v8184_v62, 0.0  ;;  %v1272_v56 = vsel %vm1208_vm7, %v8545_v1, %v1240_v25  ;;  %v1237_v4 = vmul.f32 0.2, %v1173_v2 }
  0xfa   : > { %v8634_v32 = vsel %vm14864_vm4, %v1262_v13, -9e+15  ;;  %vm14866_vm7 = vcmp.gt.f32.partialorder %v8199_v12, 0.0  ;;  %vm14868_vm4 = vcmp.gt.f32.partialorder %v8216_v27, 0.0 }
 0x106   : > { %1319 = vmax.xlane.f32.xlu1 %v1318_v37  ;;  %v1267_v37 = vsel %vm1203_vm5, %v1171_v0, %v1235_v50  ;;  %vm1202_vm5 = vcmp.ge.f32.partialorder %v1170_v35, 0.0  ;;  %v1271_v0 = vsel %vm1207_vm14, %v8538_v43, %v1239_v59  ;;  %vm14865_vm14 = vcmp.gt.f32.partialorder %v8212_v23, 0.0 }
 0x107   : > { %1316 = vmax.xlane.f32.xlu0 %v1315_v24  ;;  %v1261_v24 = vsel %vm1197_vm0, %v1165_v36, %v1229_v39  ;;  %v1324_v39 = vmax.f32 %v8605_v57, %v8610_v33  ;;  %v8622_v49 = vsel %vm14861_vm13, %v1267_v37, -9e+15  ;;  %vm14862_vm0 = vcmp.gt.f32.partialorder %v8197_v10, 0.0 }
 0x108   : > { %v8626_v50 = vsel %vm14862_vm0, %v1268_v7, -9e+15  ;;  %v8630_v36 = vsel %vm14863_vm2, %v1261_v24, -9e+15  ;;  %v1238_v37 = vmul.f32 0.2, %v1174_v38 }
 0x109   : > { %v1339_v7 = vmax.f32 %v8622_v49, %v8626_v50  ;;  %vm1205_vm13 = vcmp.ge.f32.partialorder %v1173_v2, 0.0  ;;  %vm1206_vm0 = vcmp.ge.f32.partialorder %v1174_v38, 0.0  ;;  %v1330_v24 = vmax.f32 %v8630_v36, %v8634_v32 }
 0x10a   : > { %1328 = vmax.xlane.f32.xlu1 %v1327_v53  ;;  %v1265_v53 = vsel %vm1201_vm8, %v1169_v21, %v1233_v6  ;;  %v8646_v13 = vsel %vm14593_vm10, %v1271_v0, -9e+15  ;;  %v8650_v1 = vsel %vm14865_vm14, %v1272_v56, -9e+15  ;;  %vm14867_vm8 = vcmp.gt.f32.partialorder %v8201_v17, 0.0 }
 0x10b   : > { %1322 = vmax.xlane.f32.xlu0 %v1321_v20  ;;  %v1266_v20 = vsel %vm1202_vm5, %v1170_v35, %v1234_v34  ;;  %v8654_v6 = vsel %vm14866_vm7, %v1265_v53, -9e+15  ;;  %v1269_v21 = vsel %vm1205_vm13, %v1173_v2, %v1237_v4  ;;  %v1270_v35 = vsel %vm1206_vm0, %v1174_v38, %v1238_v37 }
 0x10c   : > { %v8658_v43 = vsel %vm14867_vm8, %v1266_v20, -9e+15  ;;  %v1345_v59 = vmax.f32 %v8646_v13, %v8650_v1  ;;  %v8666_v34 = vsel %vm315_vm3, %v1269_v21, -9e+15 }
 0x10d   : > { %v1336_v25 = vmax.f32 %v8654_v6, %v8658_v43 }
 0x10e   : > { %1334 = vmax.xlane.f32.xlu1 %v1333_v40  ;;  %v8670_v40 = vsel %vm316_vm12, %v1270_v35, -9e+15 }
 0x10f   : > { %1325 = vmax.xlane.f32.xlu0 %v1324_v39  ;;  %v1342_v2 = vmax.f32 %v8666_v34, %v8670_v40 }
 0x112   : > { %1340 = vmax.xlane.f32.xlu1 %v1339_v7 }
 0x113   : > { %1331 = vmax.xlane.f32.xlu0 %v1330_v24 }
 0x116   : > { %1346 = vmax.xlane.f32.xlu1 %v1345_v59 }
 0x117   : > { %1337 = vmax.xlane.f32.xlu0 %v1336_v25 }
 0x11b   : > { %1343 = vmax.xlane.f32.xlu0 %v1342_v2 }
 0x127   : > { %v8674_v38 = vpop.xlane.xlu0 %598 }
 0x12b   : > { %v8678_v0 = vpop.xlane.xlu0 %604 }
 0x12c   : > { %v8676_v39 = vpop.xlane.xlu1 %601 }
 0x131   : > { %v8680_v56 = vpop.xlane.xlu1 %610 }
 0x135   : > { %v8682_v53 = vpop.xlane.xlu0 %607 }
 0x139   : > { %v8684_v20 = vpop.xlane.xlu1 %616 }
 0x13a   : > { %v8686_v4 = vpop.xlane.xlu0 %613 }
 0x13f   : > { %v8688_v37 = vpop.xlane.xlu1 %622 }
 0x144   : > { %v8690_v7 = vpop.xlane.xlu0 %619 }
 0x147   : > { %v8692_v24 = vpop.xlane.xlu1 %628 }
 0x149   : > { %v8694_v21 = vpop.xlane.xlu0 %625 }
 0x14c   : > { %v8696_v35 = vpop.xlane.xlu1 %634 }
 0x14f   : > { %v8698_v59 = vpop.xlane.xlu0 %631 }
 0x152   : > { %v8700_v25 = vpop.xlane.xlu1 %640 }
 0x153   : > { %v8702_v2 = vpop.xlane.xlu0 %637 }
 0x156   : > { %v1126_v23 = vpop.permute.xlu1 %1125 }
 0x157   : > { %v1177_v22 = vadd.f32 %v8522_v3, %v1126_v23  ;;  %v1178_v19 = vadd.f32 %v8525_v11, %v1126_v23  ;;  %v8706_v17 = vpop.xlane.xlu0 %643 }
 0x159   : > { %vm1209_vm5 = vcmp.ge.f32.partialorder %v1177_v22, 0.0  ;;  %vm1210_vm2 = vcmp.ge.f32.partialorder %v1178_v19, 0.0  ;;  %v1241_v18 = vmul.f32 0.2, %v1177_v22  ;;  %v1242_v9 = vmul.f32 0.2, %v1178_v19 }
 0x15a   : > { %v1134_v10 = vpop.permute.xlu1 %1133 }
 0x15b   : > { %v1181_v12 = vadd.f32 %v8522_v3, %v1134_v10  ;;  %v1182_v5 = vadd.f32 %v8525_v11, %v1134_v10  ;;  %v1273_v62 = vsel %vm1209_vm5, %v1177_v22, %v1241_v18  ;;  %v1274_v61 = vsel %vm1210_vm2, %v1178_v19, %v1242_v9 }
 0x15c   : > { %v8712_v16 = vsel %vm14591_vm6, %v1273_v62, -9e+15  ;;  %v8716_v23 = vsel %vm14868_vm4, %v1274_v61, -9e+15  ;;  %vm14872_vm2 = vcmp.gt.f32.partialorder %v8220_v30, 0.0  ;;  %vm14873_vm4 = vcmp.gt.f32.partialorder %v8222_v31, 0.0 }
 0x15d   : > { %14869 = vst [vmem:[#allocation71_spill] sm:$0xff] %v8716_v23  ;;  %vm1213_vm13 = vcmp.ge.f32.partialorder %v1181_v12, 0.0  ;;  %vm1214_vm0 = vcmp.ge.f32.partialorder %v1182_v5, 0.0  ;;  %v1348_v48 = vmax.f32 %v8712_v16, %v8716_v23  ;;  %v1245_v47 = vmul.f32 0.2, %v1181_v12 }
 0x15e   : > { %v1142_v51 = vpop.permute.xlu1 %1141  ;;  %v1246_v42 = vmul.f32 0.2, %v1182_v5 }
 0x15f   : > { %v1185_v10 = vadd.f32 %v8522_v3, %v1142_v51  ;;  %v1186_v9 = vadd.f32 %v8525_v11, %v1142_v51  ;;  %v1130_v18 = vpop.permute.xlu0 %1129  ;;  %1349 = vmax.xlane.f32.xlu0 %v1348_v48  ;;  %v1277_v61 = vsel %vm1213_vm13, %v1181_v12, %v1245_v47 }
 0x160   : > { %v1179_v62 = vadd.f32 %v8522_v3, %v1130_v18  ;;  %v1180_v19 = vadd.f32 %v8525_v11, %v1130_v18  ;;  %v1278_v22 = vsel %vm1214_vm0, %v1182_v5, %v1246_v42  ;;  %v8726_v27 = vsel %vm14588_vm9, %v1277_v61, -9e+15 }
 0x161   : > { %14870 = vst [vmem:[#allocation72_spill] sm:$0xff] %v8726_v27  ;;  %v8730_v26 = vsel %vm14583_vm1, %v1278_v22, -9e+15  ;;  %vm1217_vm14 = vcmp.ge.f32.partialorder %v1185_v10, 0.0  ;;  %vm1218_vm7 = vcmp.ge.f32.partialorder %v1186_v9, 0.0 }
 0x162   : > { %14871 = vst [vmem:[#allocation73_spill] sm:$0xff] %v8730_v26  ;;  %v1354_v51 = vmax.f32 %v8726_v27, %v8730_v26  ;;  %v1249_v41 = vmul.f32 0.2, %v1185_v10  ;;  %v1250_v23 = vmul.f32 0.2, %v1186_v9  ;;  %vm1211_vm8 = vcmp.ge.f32.partialorder %v1179_v62, 0.0 }
 0x163   : > { %v1138_v18 = vpop.permute.xlu0 %1137  ;;  %vm1212_vm5 = vcmp.ge.f32.partialorder %v1180_v19, 0.0  ;;  %v1243_v47 = vmul.f32 0.2, %v1179_v62  ;;  %v1244_v42 = vmul.f32 0.2, %v1180_v19 }
 0x164   : > { %v1183_v48 = vadd.f32 %v8522_v3, %v1138_v18  ;;  %v1184_v5 = vadd.f32 %v8525_v11, %v1138_v18  ;;  %1355 = vmax.xlane.f32.xlu0 %v1354_v51  ;;  %v1281_v12 = vsel %vm1217_vm14, %v1185_v10, %v1249_v41  ;;  %v1282_v61 = vsel %vm1218_vm7, %v1186_v9, %v1250_v23 }
 0x165   : > { %v8738_v22 = vsel %vm14582_vm15, %v1281_v12, -9e+15  ;;  %v8742_v45 = vsel %vm14581_vm11, %v1282_v61, -9e+15  ;;  %v1275_v44 = vsel %vm1211_vm8, %v1179_v62, %v1243_v47  ;;  %v1276_v26 = vsel %vm1212_vm5, %v1180_v19, %v1244_v42  ;;  %v14874_v19 = vld [vmem:[#allocation35_spill] sm:$0xff]  ;;  %v8769_v47 = vld [vmem:[%s14419_s1] sm:$0xff]  }
 0x166   : > { %v1360_v27 = vmax.f32 %v8738_v22, %v8742_v45  ;;  %v8748_v3 = vsel %vm14872_vm2, %v1275_v44, -9e+15  ;;  %v8752_v41 = vsel %vm14873_vm4, %v1276_v26, -9e+15  ;;  %vm1215_vm13 = vcmp.ge.f32.partialorder %v1183_v48, 0.0  ;;  %v14876_v44 = vld [vmem:[#allocation36_spill] sm:$0xff] }
 0x167   : > { %v1351_v11 = vmax.f32 %v8748_v3, %v8752_v41  ;;  %vm1216_vm0 = vcmp.ge.f32.partialorder %v1184_v5, 0.0  ;;  %v1247_v23 = vmul.f32 0.2, %v1183_v48  ;;  %v1248_v10 = vmul.f32 0.2, %v1184_v5  ;;  %v8783_v42 = vld [vmem:[%s14419_s1 + $0x10] sm:$0xff]  }
 0x168   : > { %1361 = vmax.xlane.f32.xlu0 %v1360_v27  ;;  %vm14875_vm14 = vcmp.gt.f32.partialorder %v14874_v19, 0.0  ;;  %vm14877_vm7 = vcmp.gt.f32.partialorder %v14876_v44, 0.0  ;;  %v8774_v27 = vld [vmem:[%s14419_s1 + $0x8] sm:$0xff]   ;;  %v8792_v12 = vld [vmem:[%s14419_s1 + $0x18] sm:$0xff]   ;;  %v14880_v61 = vld [vmem:[#allocation43_spill] sm:$0xff]  ;;  %v655_v44 = vsub.f32 %v14883_v55, %v8686_v4 }
 0x169   : > { %1352 = vmax.xlane.f32.xlu1 %v1351_v11  ;;  %v1279_v9 = vsel %vm1215_vm13, %v1183_v48, %v1247_v23  ;;  %v1280_v62 = vsel %vm1216_vm0, %v1184_v5, %v1248_v10  ;;  %v14879_v48 = vld [vmem:[#allocation42_spill] sm:$0xff]  ;;  %v648_v11 = vsub.f32 %v14880_v61, %v8676_v39  ;;  %v14881_v10 = vld [vmem:[#allocation47_spill] sm:$0xff]  ;;  %v14885_v61 = vld [vmem:[#allocation37_spill] sm:$0xff] }
 0x16a   : > { %v8758_v51 = vsel %vm14875_vm14, %v1279_v9, -9e+15  ;;  %v8762_v18 = vsel %vm14877_vm7, %v1280_v62, -9e+15  ;;  %v647_v5 = vsub.f32 %v14879_v48, %v8676_v39  ;;  %v651_v9 = vsub.f32 %v14881_v10, %v8682_v53  ;;  %v14884_v39 = vld [vmem:[#allocation52_spill] sm:$0xff]  ;;  %v14888_v55 = vld [vmem:[#allocation38_spill] sm:$0xff] }
 0x16b   : > { %14878 = vst [vmem:[#allocation74_spill] sm:$0xff] %v8762_v18  ;;  %v1357_v26 = vmax.f32 %v8758_v51, %v8762_v18  ;;  %v683_v62 = vmul.f32 1.442695, %v648_v11  ;;  %v645_v10 = vsub.f32 %v14885_v61, %v8674_v38  ;;  %v697_v31 = vmul.f32 1.442695, %v655_v44  ;;  %v14886_v11 = vld [vmem:[#allocation55_spill] sm:$0xff] }
 0x16c   : > { %v681_v23 = vmul.f32 1.442695, %v647_v5  ;;  %v689_v8 = vmul.f32 1.442695, %v651_v9  ;;  %v656_v5 = vsub.f32 %v14884_v39, %v8686_v4  ;;  %v659_v30 = vsub.f32 %v14886_v11, %v8690_v7  ;;  %v14890_v44 = vld [vmem:[#allocation59_spill] sm:$0xff] }
 0x16d   : > { %1358 = vmax.xlane.f32.xlu1 %v1357_v26  ;;  %v14882_v26 = vld [vmem:[#allocation48_spill] sm:$0xff]  ;;  %v663_v61 = vsub.f32 %v14890_v44, %v8694_v21 }
 0x16e   : > { %v652_v48 = vsub.f32 %v14882_v26, %v8682_v53  ;;  %6981 = vpow2.f32 %v681_v23  ;;  %v699_v53 = vmul.f32 1.442695, %v656_v5  ;;  %v14887_v23 = vld [vmem:[#allocation56_spill] sm:$0xff]  ;;  %v677_v26 = vmul.f32 1.442695, %v645_v10 }
 0x16f   : > { %6983 = vpow2.f32 %v683_v62  ;;  %v660_v9 = vsub.f32 %v14887_v23, %v8690_v7  ;;  %v646_v62 = vsub.f32 %v14888_v55, %v8674_v38  ;;  %v14891_v5 = vld [vmem:[#allocation60_spill] sm:$0xff]  ;;  %v14892_v23 = vld [vmem:[#allocation41_spill] sm:$0xff] }
 0x170   : > { %v691_v19 = vmul.f32 1.442695, %v652_v48  ;;  %6985 = vpow2.f32 %v689_v8  ;;  %v14889_v48 = vld [vmem:[#allocation39_spill] sm:$0xff]  ;;  %v705_v8 = vmul.f32 1.442695, %v659_v30  ;;  %v664_v11 = vsub.f32 %v14891_v5, %v8694_v21  ;;  %v14893_v55 = vld [vmem:[#allocation44_spill] sm:$0xff] }
 0x171   : > { %v649_v4 = vsub.f32 %v14889_v48, %v8678_v0  ;;  %v679_v7 = vmul.f32 1.442695, %v646_v62  ;;  %v650_v38 = vsub.f32 %v14892_v23, %v8678_v0  ;;  %v653_v48 = vsub.f32 %v14893_v55, %v8680_v56  ;;  %v14894_v30 = vld [vmem:[#allocation63_spill] sm:$0xff]  ;;  %v14896_v21 = vld [vmem:[#allocation64_spill] sm:$0xff] }
 0x172   : > { %6987 = vpow2.f32 %v691_v19  ;;  %v707_v19 = vmul.f32 1.442695, %v660_v9  ;;  %v667_v18 = vsub.f32 %v14894_v30, %v8698_v59  ;;  %v668_v9 = vsub.f32 %v14896_v21, %v8698_v59  ;;  %v14898_v5 = vld [vmem:[#allocation67_spill] sm:$0xff]  ;;  %v14901_v30 = vld [vmem:[#allocation49_spill] sm:$0xff] }
 0x173   : > { %6989 = vpow2.f32 %v697_v31  ;;  %v685_v10 = vmul.f32 1.442695, %v649_v4  ;;  %v713_v31 = vmul.f32 1.442695, %v663_v61  ;;  %v14897_v4 = vld [vmem:[#allocation45_spill] sm:$0xff]  ;;  %v671_v23 = vsub.f32 %v14898_v5, %v8702_v2 }
 0x174   : > { %6991 = vpow2.f32 %v699_v53  ;;  %v715_v53 = vmul.f32 1.442695, %v664_v11  ;;  %v693_v61 = vmul.f32 1.442695, %v653_v48  ;;  %v14899_v11 = vld [vmem:[#allocation68_spill] sm:$0xff]  ;;  %v657_v21 = vsub.f32 %v14901_v30, %v8684_v20  ;;  %v14902_v48 = vld [vmem:[#allocation50_spill] sm:$0xff] }
 0x175   : > { %6993 = vpow2.f32 %v677_v26  ;;  %v687_v26 = vmul.f32 1.442695, %v650_v38  ;;  %v672_v55 = vsub.f32 %v14899_v11, %v8702_v2  ;;  %v14903_v2 = vld [vmem:[#allocation53_spill] sm:$0xff] }
 0x176   : > { %6995 = vpow2.f32 %v705_v8  ;;  %v654_v8 = vsub.f32 %v14897_v4, %v8680_v56  ;;  %v729_v4 = vmul.f32 1.442695, %v671_v23 }
 0x177   : > { %6997 = vpow2.f32 %v707_v19  ;;  %v721_v19 = vmul.f32 1.442695, %v667_v18  ;;  %v658_v18 = vsub.f32 %v14902_v48, %v8684_v20 }
 0x178   : > { %6999 = vpow2.f32 %v679_v7  ;;  %v723_v7 = vmul.f32 1.442695, %v668_v9  ;;  %v14904_v9 = vld [vmem:[#allocation69_spill] sm:$0xff] }
 0x179   : > { %7001 = vpow2.f32 %v685_v10  ;;  %v695_v10 = vmul.f32 1.442695, %v654_v8  ;;  %v675_v11 = vsub.f32 %v14904_v9, %v8706_v17  ;;  %v14905_v8 = vld [vmem:[#allocation70_spill] sm:$0xff]  ;;  %v14907_v9 = vld [vmem:[#allocation57_spill] sm:$0xff] }
 0x17a   : > { %7003 = vpow2.f32 %v713_v31  ;;  %v661_v31 = vsub.f32 %v14903_v2, %v8688_v37  ;;  %v676_v20 = vsub.f32 %v14905_v8, %v8706_v17 }
 0x17b   : > { %v8828_v44 = vpop.eup %6981  ;;  %7005 = vpow2.f32 %v715_v53  ;;  %v731_v53 = vmul.f32 1.442695, %v672_v55  ;;  %v737_v17 = vmul.f32 1.442695, %v675_v11 }
 0x17c   : > { %14895 = vst [vmem:[#allocation42_spill] sm:$0xff] %v8828_v44  ;;  %v8834_v0 = vpop.eup %6983  ;;  %7007 = vpow2.f32 %v687_v26  ;;  %v701_v26 = vmul.f32 1.442695, %v657_v21  ;;  %v709_v2 = vmul.f32 1.442695, %v661_v31 }
 0x17d   : > { %v8842_v59 = vpop.eup %6985  ;;  %v744_v56 = vadd.f32 %v8834_v0, %v8828_v44  ;;  %7009 = vpow2.f32 %v693_v61  ;;  %v665_v44 = vsub.f32 %v14907_v9, %v8692_v24 }
 0x17e   : > { %1571 = vrot.lane.b32.xlu1 %v8769_v47, %s8005_s28  ;;  %1573 = vrot.lane.b32.xlu0 %v8774_v27, %s8005_s28  ;;  %14900 = vst [vmem:[#allocation43_spill] sm:$0xff] %v8842_v59  ;;  %7011 = vpow2.f32 %v721_v19  ;;  %v14906_v19 = vld [vmem:[#allocation54_spill] sm:$0xff] }
 0x17f   : > { %v8848_v38 = vpop.eup %6987  ;;  %7013 = vpow2.f32 %v723_v7  ;;  %v662_v55 = vsub.f32 %v14906_v19, %v8688_v37 }
 0x180   : > { %v8858_v30 = vpop.eup %6989  ;;  %v750_v48 = vadd.f32 %v8848_v38, %v8842_v59  ;;  %7015 = vpow2.f32 %v695_v10  ;;  %v739_v10 = vmul.f32 1.442695, %v676_v20 }
 0x181   : > { %v8864_v23 = vpop.eup %6991  ;;  %7017 = vpow2.f32 %v729_v4  ;;  %v711_v4 = vmul.f32 1.442695, %v662_v55 }
 0x182   : > { %1575 = vrot.lane.b32.xlu1 %v8783_v42, %s8005_s28  ;;  %v8870_v21 = vpop.eup %6993  ;;  %7019 = vpow2.f32 %v731_v53  ;;  %v756_v37 = vadd.f32 %v8864_v23, %v8858_v30  ;;  %v14909_v53 = vld [vmem:[#allocation58_spill] sm:$0xff] }
 0x183   : > { %v8873_v8 = vpop.eup %6995  ;;  %7021 = vpow2.f32 %v701_v26  ;;  %v666_v11 = vsub.f32 %v14909_v53, %v8692_v24  ;;  %v14910_v26 = vld [vmem:[#allocation61_spill] sm:$0xff] }
 0x184   : > { %14908 = vst [vmem:[#allocation47_spill] sm:$0xff] %v8873_v8  ;;  %v8880_v31 = vpop.eup %6997  ;;  %v669_v20 = vsub.f32 %v14910_v26, %v8696_v35 }
 0x186   : > { %1577 = vrot.lane.b32.xlu1 %v8792_v12, %s8005_s28 }
 0x18f   : > { %v1320_v61 = vpop.xlane.xlu1 %1319 }
 0x190   : > { %v8816_v39 = vpop.xlane.xlu0 %1316  ;;  %v1365_v7 = vsub.f32 %v8550_v58, %v1320_v61  ;;  %v717_v58 = vmul.f32 1.442695, %v665_v44  ;;  %v762_v44 = vadd.f32 %v8880_v31, %v8873_v8 }
 0x194   : > { %v8832_v62 = vpop.xlane.xlu0 %1322 }
 0x198   : > { %v8854_v5 = vpop.xlane.xlu0 %1325 }
 0x199   : > { %v1369_v19 = vsub.f32 %v8605_v57, %v8854_v5  ;;  %v1370_v24 = vsub.f32 %v8610_v33, %v8854_v5  ;;  %v14913_v57 = vld [vmem:[#allocation62_spill] sm:$0xff]  ;;  %v8912_v33 = vld [vmem:[%s14419_s1 + $0x38] sm:$0xff]  }
 0x19c   : > { %v8876_v59 = vpop.xlane.xlu0 %1331 }
 0x19d   : > { %745 = vadd.xlane.f32.xlu0 %v744_v56  ;;  %v703_v56 = vmul.f32 1.442695, %v658_v18  ;;  %v1366_v18 = vsub.f32 %v8554_v28, %v1320_v61  ;;  %v1399_v61 = vmul.f32 1.442695, %v1365_v7  ;;  %v670_v7 = vsub.f32 %v14913_v57, %v8696_v35 }
 0x19e   : > { %v1373_v26 = vsub.f32 %v8630_v36, %v8876_v59  ;;  %v1374_v57 = vsub.f32 %v8634_v32, %v8876_v59  ;;  %v8946_v32 = vld [vmem:[%s14419_s1 + $0x30] sm:$0xff]  }
 0x19f   : > { %7023 = vpow2.f32 %v703_v56  ;;  %v1401_v55 = vmul.f32 1.442695, %v1366_v18  ;;  %v725_v18 = vmul.f32 1.442695, %v669_v20  ;;  %v1409_v20 = vmul.f32 1.442695, %v1370_v24 }
 0x1a0   : > { %7025 = vpow2.f32 %v709_v2  ;;  %v8901_v2 = vld [vmem:[%s14419_s1 + $0x78] sm:$0xff]   ;;  %v727_v36 = vmul.f32 1.442695, %v670_v7  ;;  %v8960_v7 = vpop.xlane.xlu1 %1328 }
 0x1a1   : > { %751 = vadd.xlane.f32.xlu0 %v750_v48  ;;  %v8884_v48 = vpop.eup %6999  ;;  %7027 = vpow2.f32 %v737_v17  ;;  %v719_v17 = vmul.f32 1.442695, %v666_v11  ;;  %6367 = vmatprep.subr.bf16.mxu0 %v8901_v2  ;;  %v1407_v11 = vmul.f32 1.442695, %v1369_v19 }
 0x1a2   : > { %v8888_v28 = vpop.eup %7001  ;;  %7029 = vpow2.f32 %v739_v10  ;;  %v741_v10 = vadd.f32 %v8884_v48, %v8870_v21  ;;  %6368 = vmatpush3.bf16.msra.mxu0 %v8912_v33 }
 0x1a3   : > { %v8892_v56 = vpop.eup %7003  ;;  %7031 = vpow2.f32 %v711_v4  ;;  %v8918_v4 = vpop.xlane.xlu0 %1337 }
 0x1a4   : > { %14911 = vst [vmem:[#allocation48_spill] sm:$0xff] %v8892_v56  ;;  %v8903_v9 = vpop.eup %7005  ;;  %7033 = vpow2.f32 %v717_v58 }
 0x1a5   : > { %757 = vadd.xlane.f32.xlu0 %v756_v37  ;;  %14912 = vst [vmem:[#allocation51_spill] sm:$0xff] %v8903_v9  ;;  %v8914_v5 = vpop.eup %7007  ;;  %v14914_v37 = vld [vmem:[#allocation65_spill] sm:$0xff]  ;;  %7035 = vpow2.f32 %v1399_v61  ;;  %v8935_v61 = vld [vmem:[%s14419_s1 + $0x70] sm:$0xff]  }
 0x1a6   : > { %v673_v53 = vsub.f32 %v14914_v37, %v8700_v25  ;;  %v8921_v35 = vpop.eup %7009  ;;  %7037 = vpow2.f32 %v1401_v55  ;;  %v747_v55 = vadd.f32 %v8914_v5, %v8888_v28  ;;  %6369 = vmatprep.subr.bf16.mxu0 %v8935_v61 }
 0x1a7   : > { %v8926_v58 = vpop.eup %7011  ;;  %7039 = vpow2.f32 %v719_v17  ;;  %6370 = vmatpush3.bf16.msra.mxu0 %v8946_v32 }
 0x1a8   : > { %14915 = vst [vmem:[#allocation52_spill] sm:$0xff] %v8926_v58  ;;  %v8937_v19 = vpop.eup %7013  ;;  %7041 = vpow2.f32 %v725_v18  ;;  %v733_v24 = vmul.f32 1.442695, %v673_v53  ;;  %v1377_v18 = vsub.f32 %v8654_v6, %v8918_v4  ;;  %v1417_v53 = vmul.f32 1.442695, %v1374_v57 }
 0x1a9   : > { %763 = vadd.xlane.f32.xlu0 %v762_v44  ;;  %v768_v44 = vadd.f32 %v8903_v9, %v8892_v56  ;;  %v8948_v59 = vpop.eup %7015  ;;  %v1363_v56 = vsub.f32 %v8558_v60, %v8816_v39  ;;  %7043 = vpow2.f32 %v1407_v11  ;;  %v1344_v9 = vpop.xlane.xlu0 %1343  ;;  %v774_v8 = vadd.f32 %v8937_v19, %v8926_v58 }
 0x1aa   : > { %742 = vadd.xlane.f32.xlu1 %v741_v10  ;;  %v14916_v10 = vld [vmem:[#allocation66_spill] sm:$0xff]  ;;  %v8958_v17 = vpop.eup %7017  ;;  %7045 = vpow2.f32 %v1409_v20  ;;  %v753_v20 = vadd.f32 %v8948_v59, %v8921_v35 }
 0x1ab   : > { %v674_v37 = vsub.f32 %v14916_v10, %v8700_v25  ;;  %v8956_v25 = vld [vmem:[%s14419_s1 + $0x68] sm:$0xff]   ;;  %14917 = vst [vmem:[#allocation37_spill] sm:$0xff] %v8958_v17  ;;  %v1415_v10 = vmul.f32 1.442695, %v1373_v26  ;;  %v8965_v60 = vpop.eup %7019  ;;  %7047 = vpow2.f32 %v727_v36  ;;  %v1364_v26 = vsub.f32 %v8563_v54, %v8816_v39  ;;  %v8990_v54 = vld [vmem:[%s14419_s1 + $0x60] sm:$0xff]  }
 0x1ac   : > { %6371 = vmatprep.subr.bf16.mxu0 %v8956_v25  ;;  %v8972_v11 = vpop.eup %7021  ;;  %7049 = vpow2.f32 %v733_v24  ;;  %v1395_v57 = vmul.f32 1.442695, %v1363_v56  ;;  %v1423_v36 = vmul.f32 1.442695, %v1377_v18  ;;  %v780_v24 = vadd.f32 %v8965_v60, %v8958_v17  ;;  %v1335_v18 = vpop.xlane.xlu1 %1334 }
 0x1ad   : > { %769 = vadd.xlane.f32.xlu0 %v768_v44  ;;  %v1378_v44 = vsub.f32 %v8658_v43, %v8918_v4  ;;  %v735_v6 = vmul.f32 1.442695, %v674_v37  ;;  %v8981_v43 = vld [vmem:[%s14419_s1 + $0x28] sm:$0xff]   ;;  %v8983_v4 = vpop.eup %7023  ;;  %7051 = vpow2.f32 %v1415_v10  ;;  %v1381_v37 = vsub.f32 %v8666_v34, %v1344_v9 }
 0x1ae   : > { %748 = vadd.xlane.f32.xlu1 %v747_v55  ;;  %v1367_v55 = vsub.f32 %v8585_v46, %v8832_v62  ;;  %v8992_v39 = vpop.eup %7025  ;;  %6372 = vmatpush3.bf16.msra.mxu0 %v8981_v43  ;;  %7053 = vpow2.f32 %v1417_v53  ;;  %v1397_v10 = vmul.f32 1.442695, %v1364_v26  ;;  %v1368_v34 = vsub.f32 %v8589_v63, %v8832_v62  ;;  %v9011_v53 = vld [vmem:[%s14419_s1 + $0x20] sm:$0xff]   ;;  %v9018_v63 = vld [vmem:[%s14419_s1 + $0x58] sm:$0xff]  }
 0x1af   : > { %v8998_v56 = vpop.eup %7027  ;;  %v1425_v46 = vmul.f32 1.442695, %v1378_v44  ;;  %6373 = vmatprep.subr.bf16.mxu0 %v8990_v54  ;;  %7055 = vpow2.f32 %v735_v6  ;;  %v8006_v44 = vmov 2   ;;  %v1431_v6 = vmul.f32 1.442695, %v1381_v37 }
 0x1b0   : > { %14918 = vst [vmem:[#allocation55_spill] sm:$0xff] %v8998_v56  ;;  %v9002_v58 = vpop.eup %7029  ;;  %6940 = vset.pattern.permute.xlu1 %v8006_v44  ;;  %6939 = vset.pattern.permute.xlu0 %v8006_v44  ;;  %7057 = vpow2.f32 %v1395_v57  ;;  %v1371_v44 = vsub.f32 %v8567_v52, %v8960_v7  ;;  %v1405_v37 = vmul.f32 1.442695, %v1368_v34  ;;  %v9041_v52 = vld [vmem:[%s14419_s1 + $0x50] sm:$0xff]  }
 0x1b1   : > { %775 = vadd.xlane.f32.xlu0 %v774_v8  ;;  %v1382_v8 = vsub.f32 %v8670_v40, %v1344_v9  ;;  %14919 = vst [vmem:[#allocation56_spill] sm:$0xff] %v9002_v58  ;;  %v9013_v40 = vpop.eup %7031  ;;  %v1403_v9 = vmul.f32 1.442695, %v1367_v55  ;;  %7059 = vpow2.f32 %v1423_v36  ;;  %v786_v55 = vadd.f32 %v9002_v58, %v8998_v56 }
 0x1b2   : > { %754 = vadd.xlane.f32.xlu1 %v753_v20  ;;  %v759_v20 = vadd.f32 %v8983_v4, %v8972_v11  ;;  %v9020_v62 = vpop.eup %7033  ;;  %6374 = vmatpush3.bf16.msra.mxu0 %v9011_v53  ;;  %7061 = vpow2.f32 %v1425_v46  ;;  %v1372_v36 = vsub.f32 %v8571_v15, %v8960_v7  ;;  %v1411_v7 = vmul.f32 1.442695, %v1371_v44 }
 0x1b3   : > { %v9023_v26 = vpop.eup %7035  ;;  %v1433_v57 = vmul.f32 1.442695, %v1382_v8  ;;  %6375 = vmatprep.subr.bf16.mxu0 %v9018_v63  ;;  %7063 = vpow2.f32 %v1397_v10  ;;  %v1341_v8 = vpop.xlane.xlu1 %1340  ;;  %v1375_v10 = vsub.f32 %v8596_v14, %v1335_v18  ;;  %v9062_v14 = vld [vmem:[%s14419_s1 + $0x48] sm:$0xff]  }
 0x1b4   : > { %7065 = vpow2.f32 %v1403_v9  ;;  %v1380_v56 = vsub.f32 %v8626_v50, %v1341_v8 }
 0x1b5   : > { %781 = vadd.xlane.f32.xlu0 %v780_v24  ;;  %v9030_v24 = vpop.eup %7037  ;;  %7067 = vpow2.f32 %v1431_v6  ;;  %v1376_v6 = vsub.f32 %v8601_v29, %v1335_v18  ;;  %v1419_v29 = vmul.f32 1.442695, %v1375_v10  ;;  %v1379_v18 = vsub.f32 %v8622_v49, %v1341_v8  ;;  %v9083_v49 = vld [vmem:[%s14419_s1 + $0x40] sm:$0xff]  }
 0x1b6   : > { %760 = vadd.xlane.f32.xlu1 %v759_v20  ;;  %v765_v20 = vadd.f32 %v9013_v40, %v8992_v39  ;;  %v9036_v17 = vpop.eup %7039  ;;  %6376 = vmatpush3.bf16.msra.mxu0 %v8792_v12  ;;  %7069 = vpow2.f32 %v1433_v57  ;;  %v1462_v34 = vadd.f32 %v9030_v24, %v9023_v26 }
 0x1b7   : > { %v9043_v46 = vpop.eup %7041  ;;  %6377 = vmatprep.subr.bf16.mxu0 %v9041_v52  ;;  %7071 = vpow2.f32 %v1405_v37  ;;  %v771_v12 = vadd.f32 %v9036_v17, %v9020_v62  ;;  %v1427_v50 = vmul.f32 1.442695, %v1379_v18 }
 0x1b8   : > { %v9046_v15 = vpop.eup %7043  ;;  %7073 = vpow2.f32 %v1411_v7 }
 0x1b9   : > { %787 = vadd.xlane.f32.xlu0 %v786_v55  ;;  %14920 = vst [vmem:[#allocation38_spill] sm:$0xff] %v9046_v15  ;;  %v9052_v9 = vpop.eup %7045  ;;  %v1413_v55 = vmul.f32 1.442695, %v1372_v36 }
 0x1ba   : > { %766 = vadd.xlane.f32.xlu1 %v765_v20  ;;  %v9057_v20 = vpop.eup %7047  ;;  %6378 = vmatpush3.bf16.msra.mxu0 %v8783_v42  ;;  %v1468_v36 = vadd.f32 %v9052_v9, %v9046_v15 }
 0x1bb   : > { %v9064_v44 = vpop.eup %7049  ;;  %6379 = vmatprep.subr.bf16.mxu0 %v9062_v14  ;;  %7075 = vpow2.f32 %v1413_v55  ;;  %v777_v42 = vadd.f32 %v9057_v20, %v9043_v46 }
 0x1bc   : > { %v9067_v57 = vpop.eup %7051  ;;  %7077 = vpow2.f32 %v1419_v29 }
 0x1bd   : > { %1463 = vadd.xlane.f32.xlu0 %v1462_v34  ;;  %14921 = vst [vmem:[#allocation39_spill] sm:$0xff] %v9067_v57  ;;  %v9073_v37 = vpop.eup %7053  ;;  %v1421_v34 = vmul.f32 1.442695, %v1376_v6 }
 0x1be   : > { %772 = vadd.xlane.f32.xlu1 %v771_v12  ;;  %14922 = vst [vmem:[#allocation59_spill] sm:$0xff] %v9073_v37  ;;  %v1347_v12 = vpop.xlane.xlu1 %1346  ;;  %v9078_v58 = vpop.eup %7055  ;;  %6380 = vmatpush3.bf16.msra.mxu0 %v8774_v27  ;;  %v1474_v55 = vadd.f32 %v9073_v37, %v9067_v57 }
 0x1bf   : > { %v9085_v7 = vpop.eup %7057  ;;  %v1383_v8 = vsub.f32 %v8646_v13, %v1347_v12  ;;  %6381 = vmatprep.subr.bf16.mxu0 %v9083_v49  ;;  %7079 = vpow2.f32 %v1421_v34  ;;  %v1384_v15 = vsub.f32 %v8650_v1, %v1347_v12  ;;  %v783_v27 = vadd.f32 %v9078_v58, %v9064_v44 }
 0x1c0   : > { %v9088_v10 = vpop.eup %7059  ;;  %7081 = vpow2.f32 %v1427_v50 }
 0x1c1   : > { %1469 = vadd.xlane.f32.xlu0 %v1468_v36  ;;  %14923 = vst [vmem:[#allocation60_spill] sm:$0xff] %v9088_v10  ;;  %v9094_v6 = vpop.eup %7061  ;;  %v1429_v36 = vmul.f32 1.442695, %v1380_v56  ;;  %v1435_v18 = vmul.f32 1.442695, %v1383_v8 }
 0x1c2   : > { %778 = vadd.xlane.f32.xlu1 %v777_v42  ;;  %14924 = vst [vmem:[#allocation41_spill] sm:$0xff] %v9094_v6  ;;  %v9099_v42 = vpop.eup %7063  ;;  %6382 = vmatpush3.bf16.msra.mxu0 %v8769_v47  ;;  %v1480_v56 = vadd.f32 %v9094_v6, %v9088_v10  ;;  %v1437_v1 = vmul.f32 1.442695, %v1384_v15  ;;  %v14936_v6 = vld [vmem:[#allocation72_spill] sm:$0xff] }
 0x1c3   : > { %v9101_v29 = vpop.eup %7065  ;;  %7083 = vpow2.f32 %v1429_v36  ;;  %v1459_v12 = vadd.f32 %v9099_v42, %v9085_v7 }
 0x1c4   : > { %14925 = vst [vmem:[#allocation44_spill] sm:$0xff] %v9101_v29  ;;  %v9104_v13 = vpop.eup %7067  ;;  %7085 = vpow2.f32 %v1435_v18 }
 0x1c5   : > { %1475 = vadd.xlane.f32.xlu0 %v1474_v55  ;;  %14926 = vst [vmem:[#allocation63_spill] sm:$0xff] %v9104_v13  ;;  %v9108_v34 = vpop.eup %7069  ;;  %7087 = vpow2.f32 %v1437_v1 }
 0x1c6   : > { %784 = vadd.xlane.f32.xlu1 %v783_v27  ;;  %14927 = vst [vmem:[#allocation64_spill] sm:$0xff] %v9108_v34  ;;  %v9112_v55 = vpop.eup %7071  ;;  %v1486_v47 = vadd.f32 %v9108_v34, %v9104_v13 }
 0x1c7   : > { %v9116_v50 = vpop.eup %7073  ;;  %v1465_v8 = vadd.f32 %v9112_v55, %v9101_v29  ;;  %v14937_v29 = vld [vmem:[#allocation73_spill] sm:$0xff] }
 0x1c8   : > { %14928 = vst [vmem:[#allocation45_spill] sm:$0xff] %v9116_v50  ;;  %v9120_v27 = vpop.eup %7075 }
 0x1c9   : > { %1481 = vadd.xlane.f32.xlu0 %v1480_v56  ;;  %14929 = vst [vmem:[#allocation67_spill] sm:$0xff] %v9120_v27  ;;  %v9122_v15 = vpop.eup %7077  ;;  %v1471_v36 = vadd.f32 %v9120_v27, %v9116_v50  ;;  %v14935_v50 = vld [vmem:[#allocation71_spill] sm:$0xff] }
 0x1ca   : > { %1460 = vadd.xlane.f32.xlu1 %v1459_v12  ;;  %14930 = vst [vmem:[#allocation68_spill] sm:$0xff] %v9122_v15 }
 0x1cc   : > { %v9126_v56 = vpop.eup %7079 }
 0x1cd   : > { %1487 = vadd.xlane.f32.xlu0 %v1486_v47  ;;  %14931 = vst [vmem:[#allocation49_spill] sm:$0xff] %v9126_v56  ;;  %v9128_v18 = vpop.eup %7081  ;;  %v1477_v1 = vadd.f32 %v9126_v56, %v9122_v15 }
 0x1ce   : > { %1466 = vadd.xlane.f32.xlu1 %v1465_v8  ;;  %14932 = vst [vmem:[#allocation50_spill] sm:$0xff] %v9128_v18 }
 0x1d0   : > { %v9132_v12 = vpop.eup %7083 }
 0x1d1   : > { %14933 = vst [vmem:[#allocation53_spill] sm:$0xff] %v9132_v12  ;;  %v9134_v13 = vpop.eup %7085  ;;  %v1483_v47 = vadd.f32 %v9132_v12, %v9128_v18 }
 0x1d2   : > { %1472 = vadd.xlane.f32.xlu1 %v1471_v36  ;;  %14934 = vst [vmem:[#allocation69_spill] sm:$0xff] %v9134_v13  ;;  %v9138_v8 = vpop.eup %7087 }
 0x1d3   : > { %v1489_v34 = vadd.f32 %v9138_v8, %v9134_v13 }
 0x1d6   : > { %1478 = vadd.xlane.f32.xlu1 %v1477_v1 }
 0x1da   : > { %1484 = vadd.xlane.f32.xlu1 %v1483_v47 }
 0x1de   : > { %1490 = vadd.xlane.f32.xlu1 %v1489_v34 }
 0x1e8   : > { %v1350_v36 = vpop.xlane.xlu0 %1349 }
 0x1e9   : > { %v1385_v10 = vsub.f32 %v8712_v16, %v1350_v36  ;;  %v1386_v15 = vsub.f32 %v14935_v50, %v1350_v36 }
 0x1eb   : > { %v1439_v56 = vmul.f32 1.442695, %v1385_v10  ;;  %v1441_v27 = vmul.f32 1.442695, %v1386_v15 }
 0x1ed   : > { %v1356_v1 = vpop.xlane.xlu0 %1355  ;;  %7089 = vpow2.f32 %v1439_v56 }
 0x1ee   : > { %v1389_v57 = vsub.f32 %v14936_v6, %v1356_v1  ;;  %v1390_v18 = vsub.f32 %v14937_v29, %v1356_v1  ;;  %7091 = vpow2.f32 %v1441_v27  ;;  %v14938_v27 = vld [vmem:[#allocation74_spill] sm:$0xff] }
 0x1f0   : > { %v1447_v12 = vmul.f32 1.442695, %v1389_v57  ;;  %v1449_v47 = vmul.f32 1.442695, %v1390_v18 }
 0x1f1   : > { %v1362_v37 = vpop.xlane.xlu0 %1361 }
 0x1f2   : > { %7093 = vpow2.f32 %v1447_v12  ;;  %v1353_v13 = vpop.xlane.xlu1 %1352  ;;  %v1393_v34 = vsub.f32 %v8738_v22, %v1362_v37  ;;  %v1394_v16 = vsub.f32 %v8742_v45, %v1362_v37 }
 0x1f3   : > { %7095 = vpow2.f32 %v1449_v47  ;;  %v1387_v10 = vsub.f32 %v8748_v3, %v1353_v13  ;;  %v1388_v50 = vsub.f32 %v8752_v41, %v1353_v13 }
 0x1f4   : > { %v1455_v15 = vmul.f32 1.442695, %v1393_v34  ;;  %v1457_v36 = vmul.f32 1.442695, %v1394_v16 }
 0x1f5   : > { %v1443_v56 = vmul.f32 1.442695, %v1387_v10  ;;  %v1445_v6 = vmul.f32 1.442695, %v1388_v50 }
 0x1f6   : > { %7097 = vpow2.f32 %v1455_v15  ;;  %v1359_v29 = vpop.xlane.xlu1 %1358 }
 0x1f7   : > { %7099 = vpow2.f32 %v1443_v56  ;;  %v1391_v57 = vsub.f32 %v8758_v51, %v1359_v29  ;;  %v1392_v18 = vsub.f32 %v14938_v27, %v1359_v29  ;;  %v7783_v27 = vld [vmem:[%s8098_s5 + $0x10] sm:$0xff] }
 0x1f8   : > { %7101 = vpow2.f32 %v1445_v6 }
 0x1f9   : > { %7103 = vpow2.f32 %v1457_v36  ;;  %v1451_v22 = vmul.f32 1.442695, %v1391_v57  ;;  %v1453_v45 = vmul.f32 1.442695, %v1392_v18  ;;  %v9188_v36 = vpop.permute.xlu0 %1573 }
 0x1fa   : > { %v9152_v37 = vpop.eup %7089  ;;  %v9190_v29 = vpop.permute.xlu1 %1571 }
 0x1fb   : > { %7105 = vpow2.f32 %v1451_v22  ;;  %v9154_v3 = vpop.eup %7091  ;;  %v7785_v22 = vld [vmem:[%s8098_s5 + $0x20] sm:$0xff] }
 0x1fc   : > { %7107 = vpow2.f32 %v1453_v45  ;;  %v1492_v41 = vadd.f32 %v9154_v3, %v9152_v37 }
 0x1fe   : > { %1493 = vadd.xlane.f32.xlu0 %v1492_v41  ;;  %v7786_v41 = vld [vmem:[%s8098_s5 + $0x28] sm:$0xff] }
 0x1ff   : > { %v9158_v13 = vpop.eup %7093 }
 0x200   : > { %14939 = vst [vmem:[#allocation70_spill] sm:$0xff] %v9158_v13  ;;  %v9160_v12 = vpop.eup %7095 }
 0x201   : > { %v1498_v51 = vadd.f32 %v9160_v12, %v9158_v13 }
 0x203   : > { %v9164_v1 = vpop.eup %7097  ;;  %1499 = vadd.xlane.f32.xlu0 %v1498_v51 }
 0x204   : > { %14940 = vst [vmem:[#allocation54_spill] sm:$0xff] %v9164_v1  ;;  %v9166_v47 = vpop.eup %7099 }
 0x205   : > { %14941 = vst [vmem:[#allocation57_spill] sm:$0xff] %v9166_v47  ;;  %v9168_v34 = vpop.eup %7101 }
 0x206   : > { %v9170_v16 = vpop.eup %7103  ;;  %v1495_v10 = vadd.f32 %v9168_v34, %v9166_v47  ;;  %v14980_v47 = vld [vmem:[#allocation15_spill] sm:$0xff] }
 0x207   : > { %14942 = vst [vmem:[#allocation58_spill] sm:$0xff] %v9170_v16  ;;  %v1504_v50 = vadd.f32 %v9170_v16, %v9164_v1  ;;  %vm14981_vm9 = vcmp.gt.f32.partialorder %v14980_v47, 0.0 }
 0x208   : > { %v9176_v15 = vpop.eup %7105  ;;  %1496 = vadd.xlane.f32.xlu1 %v1495_v10 }
 0x209   : > { %14943 = vst [vmem:[#allocation61_spill] sm:$0xff] %v9176_v15  ;;  %v9178_v56 = vpop.eup %7107  ;;  %1505 = vadd.xlane.f32.xlu0 %v1504_v50  ;;  %v7787_v50 = vld [vmem:[%s8098_s5 + $0x30] sm:$0xff] }
 0x20a   : > { %14944 = vst [vmem:[#allocation62_spill] sm:$0xff] %v9178_v56  ;;  %v1501_v6 = vadd.f32 %v9178_v56, %v9176_v15 }
 0x20c   : > { %1502 = vadd.xlane.f32.xlu1 %v1501_v6 }
 0x21d   : > { %1581 = vrot.lane.b32.xlu1 %v8981_v43, %s8005_s28  ;;  %v9198_v43 = vpop.permute.xlu1 %1575 }
 0x21f   : > { %1579 = vrot.lane.b32.xlu0 %v9011_v53, %s8005_s28 }
 0x221   : > { %1585 = vrot.lane.b32.xlu1 %v8912_v33, %s8005_s28  ;;  %v9206_v53 = vpop.permute.xlu1 %1577 }
 0x223   : > { %1583 = vrot.lane.b32.xlu0 %v8946_v32, %s8005_s28 }
 0x225   : > { %1589 = vrot.lane.b32.xlu1 %v9062_v14, %s8005_s28  ;;  %v7781_v14 = vld [vmem:[%s8098_s5 + $0x8] sm:$0xff] }
 0x226   : > { %v746_v57 = vpop.xlane.xlu0 %745 }
 0x227   : > { %1587 = vrot.lane.b32.xlu0 %v9083_v49, %s8005_s28  ;;  %7109 = vrcp.f32 %v746_v57  ;;  %v7782_v49 = vld [vmem:[%s8098_s5] sm:$0xff] }
 0x229   : > { %1593 = vrot.lane.b32.xlu1 %v9018_v63, %s8005_s28 }
 0x22a   : > { %v752_v33 = vpop.xlane.xlu0 %751 }
 0x22b   : > { %1591 = vrot.lane.b32.xlu0 %v9041_v52, %s8005_s28 }
 0x22d   : > { %1597 = vrot.lane.b32.xlu1 %v8956_v25, %s8005_s28 }
 0x22e   : > { %v758_v32 = vpop.xlane.xlu0 %757 }
 0x22f   : > { %1595 = vrot.lane.b32.xlu0 %v8990_v54, %s8005_s28 }
 0x231   : > { %1601 = vrot.lane.b32.xlu1 %v8901_v2, %s8005_s28  ;;  %v7784_v2 = vld [vmem:[%s8098_s5 + $0x18] sm:$0xff] }
 0x232   : > { %v764_v63 = vpop.xlane.xlu0 %763 }
 0x233   : > { %1599 = vrot.lane.b32.xlu0 %v8935_v61, %s8005_s28  ;;  %v743_v52 = vpop.xlane.xlu1 %742 }
 0x234   : > { %7111 = vrcp.f32 %v743_v52  ;;  %v7110_v45 = vpop.eup %7109  ;;  %v14945_v52 = vld [vmem:[#allocation42_spill] sm:$0xff] }
 0x235   : > { %1723 = vperm.xlu1 %6940, %v7781_v14   ;;  %7113 = vrcp.f32 %v752_v33  ;;  %v808_v6 = vmul.f32 %v7110_v45, %v8834_v0  ;;  %v807_v14 = vmul.f32 %v7110_v45, %v14945_v52  ;;  %v7789_v0 = vld [vmem:[%s8098_s5 + $0x40] sm:$0xff]  ;;  %v14946_v52 = vld [vmem:[#allocation43_spill] sm:$0xff] }
 0x236   : > { %v770_v25 = vpop.xlane.xlu0 %769 }
 0x237   : > { %1719 = vperm.xlu0 %6939, %v7782_v49   ;;  %v749_v54 = vpop.xlane.xlu1 %748 }
 0x238   : > { %7115 = vrcp.f32 %v749_v54  ;;  %v7788_v54 = vld [vmem:[%s8098_s5 + $0x38] sm:$0xff] }
 0x239   : > { %1727 = vperm.xlu1 %6940, %v7783_v27   ;;  %7117 = vrcp.f32 %v758_v32 }
 0x23a   : > { %v9218_v61 = vpop.xlane.xlu0 %775 }
 0x23b   : > { %1731 = vperm.xlu0 %6939, %v7784_v2   ;;  %v755_v18 = vpop.xlane.xlu1 %754 }
 0x23c   : > { %7119 = vrcp.f32 %v755_v18 }
 0x23d   : > { %1735 = vperm.xlu1 %6940, %v7785_v22  }
 0x23e   : > { %v9224_v57 = vpop.xlane.xlu0 %781 }
 0x23f   : > { %1739 = vperm.xlu0 %6939, %v7786_v41   ;;  %v761_v51 = vpop.xlane.xlu1 %760 }
 0x240   : > { %7121 = vrcp.f32 %v761_v51 }
 0x241   : > { %v7112_v10 = vpop.eup %7111  ;;  %1743 = vperm.xlu1 %6940, %v7787_v50   ;;  %7123 = vrcp.f32 %v764_v63 }
 0x242   : > { %v806_v33 = vmul.f32 %v7112_v10, %v8884_v48  ;;  %v805_v32 = vmul.f32 %v7112_v10, %v8870_v21  ;;  %v7114_v49 = vpop.eup %7113  ;;  %v7790_v21 = vld [vmem:[%s8098_s5 + $0x48] sm:$0xff]  ;;  %v9234_v10 = vpop.xlane.xlu0 %787 }
 0x243   : > { %1747 = vperm.xlu0 %6939, %v7788_v54   ;;  %v767_v27 = vpop.xlane.xlu1 %766  ;;  %v812_v48 = vmul.f32 %v7114_v49, %v8848_v38  ;;  %v7792_v38 = vld [vmem:[%s8098_s5 + $0x58] sm:$0xff] }
 0x244   : > { %v838_v2 = vpack.c.bf16 %v808_v6, %v806_v33  ;;  %v837_v18 = vpack.c.bf16 %v807_v14, %v805_v32  ;;  %v7791_v6 = vld [vmem:[%s8098_s5 + $0x50] sm:$0xff]  ;;  %7125 = vrcp.f32 %v767_v27  ;;  %v811_v14 = vmul.f32 %v7114_v49, %v14946_v52  ;;  %v7794_v27 = vld [vmem:[%s8098_s5 + $0x68] sm:$0xff]  ;;  %v7796_v49 = vld [vmem:[%s8098_s5 + $0x78] sm:$0xff] }
 0x245   : > { %v7116_v22 = vpop.eup %7115  ;;  %1751 = vperm.xlu1 %6940, %v7789_v0   ;;  %7127 = vrcp.f32 %v770_v25 }
 0x246   : > { %1013 = vmatprep.mubr.bf16.mxu0 %v838_v2  ;;  %v810_v41 = vmul.f32 %v7116_v22, %v8914_v5  ;;  %v7118_v51 = vpop.eup %7117  ;;  %v809_v33 = vmul.f32 %v7116_v22, %v8888_v28  ;;  %v7793_v2 = vld [vmem:[%s8098_s5 + $0x60] sm:$0xff]  ;;  %v1464_v0 = vpop.xlane.xlu0 %1463 }
 0x247   : > { %1755 = vperm.xlu0 %6939, %v7790_v21   ;;  %v773_v45 = vpop.xlane.xlu1 %772  ;;  %1014 = vmatmul.mubr.bf16.vlgmr.msra.gmra.mxu0 %v837_v18  ;;  %v816_v54 = vmul.f32 %v7118_v51, %v8864_v23  ;;  %7129 = vrcp.f32 %v1464_v0 }
 0x248   : > { %v840_v63 = vpack.c.bf16 %v812_v48, %v810_v41  ;;  %v839_v18 = vpack.c.bf16 %v811_v14, %v809_v33  ;;  %v7795_v48 = vld [vmem:[%s8098_s5 + $0x70] sm:$0xff]  ;;  %7131 = vrcp.f32 %v773_v45 }
 0x249   : > { %v7120_v50 = vpop.eup %7119  ;;  %1759 = vperm.xlu1 %6940, %v7791_v6   ;;  %7133 = vrcp.f32 %v9218_v61  ;;  %v14947_v61 = vld [vmem:[#allocation47_spill] sm:$0xff] }
 0x24a   : > { %1021 = vmatprep.mubr.bf16.mxu0 %v840_v63  ;;  %v814_v5 = vmul.f32 %v7120_v50, %v8948_v59  ;;  %v813_v25 = vmul.f32 %v7120_v50, %v8921_v35  ;;  %v815_v63 = vmul.f32 %v7118_v51, %v8858_v30  ;;  %v14948_v50 = vld [vmem:[#allocation51_spill] sm:$0xff] }
 0x24b   : > { %1763 = vperm.xlu0 %6939, %v7792_v38   ;;  %v779_v32 = vpop.xlane.xlu1 %778 }
 0x24c   : > { %v842_v28 = vpack.c.bf16 %v816_v54, %v814_v5  ;;  %v841_v33 = vpack.c.bf16 %v815_v63, %v813_v25  ;;  %v14950_v25 = vld [vmem:[#allocation52_spill] sm:$0xff] }
 0x24d   : > { %1767 = vperm.xlu1 %6940, %v7793_v2   ;;  %v7122_v22 = vpop.eup %7121 }
 0x24e   : > { %v7124_v59 = vpop.eup %7123  ;;  %v818_v23 = vmul.f32 %v7122_v22, %v8983_v4  ;;  %v817_v35 = vmul.f32 %v7122_v22, %v8972_v11  ;;  %v14949_v22 = vld [vmem:[#allocation48_spill] sm:$0xff] }
 0x24f   : > { %1771 = vperm.xlu0 %6939, %v7794_v27   ;;  %v785_v41 = vpop.xlane.xlu1 %784  ;;  %1022 = vmatmul.mubr.bf16.gmra.mxu0 %v839_v18  ;;  %v820_v6 = vmul.f32 %v7124_v59, %v8880_v31  ;;  %v819_v45 = vmul.f32 %v7124_v59, %v14947_v61 }
 0x250   : > { %1029 = vmatprep.mubr.bf16.mxu0 %v842_v28 }
 0x251   : > { %1775 = vperm.xlu1 %6940, %v7795_v48   ;;  %v844_v5 = vpack.c.bf16 %v820_v6, %v818_v23  ;;  %v7126_v38 = vpop.eup %7125  ;;  %v843_v51 = vpack.c.bf16 %v819_v45, %v817_v35 }
 0x252   : > { %v7128_v52 = vpop.eup %7127  ;;  %v822_v4 = vmul.f32 %v7126_v38, %v9013_v40 }
 0x253   : > { %1779 = vperm.xlu0 %6939, %v7796_v49   ;;  %v1461_v21 = vpop.xlane.xlu1 %1460  ;;  %v824_v30 = vmul.f32 %v7128_v52, %v14948_v50  ;;  %v823_v27 = vmul.f32 %v7128_v52, %v14949_v22 }
 0x254   : > { %7135 = vrcp.f32 %v1461_v21  ;;  %v7130_v14 = vpop.eup %7129 }
 0x255   : > { %7137 = vrcp.f32 %v779_v32  ;;  %v846_v31 = vpack.c.bf16 %v824_v30, %v822_v4  ;;  %v7132_v54 = vpop.eup %7131  ;;  %v1526_v11 = vmul.f32 %v7130_v14, %v9030_v24  ;;  %v821_v32 = vmul.f32 %v7126_v38, %v8992_v39  ;;  %v14951_v38 = vld [vmem:[#allocation37_spill] sm:$0xff]  ;;  %v14953_v30 = vld [vmem:[#allocation55_spill] sm:$0xff] }
 0x256   : > { %7139 = vrcp.f32 %v9224_v57  ;;  %v7134_v2 = vpop.eup %7133  ;;  %v826_v0 = vmul.f32 %v7132_v54, %v9036_v17  ;;  %v9264_v28 = vmul.f32 %v7130_v14, %v9023_v26  ;;  %v825_v26 = vmul.f32 %v7132_v54, %v9020_v62  ;;  %v14952_v62 = vld [vmem:[#allocation56_spill] sm:$0xff] }
 0x257   : > { %1030 = vmatmul.mubr.bf16.gmra.mxu0 %v841_v33  ;;  %7141 = vrcp.f32 %v785_v41  ;;  %v828_v41 = vmul.f32 %v7134_v2, %v8937_v19  ;;  %v845_v24 = vpack.c.bf16 %v823_v27, %v821_v32  ;;  %v827_v23 = vmul.f32 %v7134_v2, %v14950_v25  ;;  %v1470_v33 = vpop.xlane.xlu0 %1469  ;;  %v6338_v25 = vld [vmem:[%s14421_s3 + $0x2] ss:$8 sm:$0x3] }
 0x258   : > { %1037 = vmatprep.mubr.bf16.mxu0 %v844_v5  ;;  %7143 = vrcp.f32 %v9234_v10 }
 0x259   : > { %v847_v49 = vpack.c.bf16 %v827_v23, %v825_v26 }
 0x25f   : > { %1038 = vmatmul.mubr.bf16.gmra.mxu0 %v843_v51 }
 0x260   : > { %1045 = vmatprep.mubr.bf16.mxu0 %v846_v31 }
 0x261   : > { %v7136_v18 = vpop.eup %7135 }
 0x262   : > { %v1524_v40 = vmul.f32 %v7136_v18, %v9099_v42  ;;  %v9261_v57 = vmul.f32 %v7136_v18, %v9085_v7  ;;  %v848_v42 = vpack.c.bf16 %v828_v41, %v826_v0  ;;  %v7138_v17 = vpop.eup %7137 }
 0x263   : > { %v7140_v7 = vpop.eup %7139  ;;  %v830_v48 = vmul.f32 %v7138_v17, %v9057_v20  ;;  %v829_v6 = vmul.f32 %v7138_v17, %v9043_v46  ;;  %v1467_v20 = vpop.xlane.xlu1 %1466 }
 0x264   : > { %v1556_v59 = vpack.c.bf16 %v1526_v11, %v1524_v40  ;;  %v832_v10 = vmul.f32 %v7140_v7, %v8965_v60  ;;  %v7142_v19 = vpop.eup %7141  ;;  %v831_v52 = vmul.f32 %v7140_v7, %v14951_v38  ;;  %v1476_v60 = vpop.xlane.xlu0 %1475  ;;  %7145 = vrcp.f32 %v1467_v20  ;;  %v14956_v20 = vld [vmem:[#allocation38_spill] sm:$0xff] }
 0x265   : > { %v7144_v63 = vpop.eup %7143  ;;  %v834_v5 = vmul.f32 %v7142_v19, %v9078_v58  ;;  %v833_v45 = vmul.f32 %v7142_v19, %v9064_v44  ;;  %7147 = vrcp.f32 %v1470_v33  ;;  %v14955_v33 = vld [vmem:[#allocation6_spill] sm:$0xff] }
 0x266   : > { %1651 = vmatprep.mubr.bf16.mxu1 %v1556_v59  ;;  %v850_v21 = vpack.c.bf16 %v832_v10, %v830_v48  ;;  %v836_v35 = vmul.f32 %v7144_v63, %v14952_v62  ;;  %v849_v4 = vpack.c.bf16 %v831_v52, %v829_v6  ;;  %v835_v51 = vmul.f32 %v7144_v63, %v14953_v30  ;;  %v14954_v63 = vld [vmem:[#allocation5_spill] sm:$0xff]  ;;  %v14959_v30 = vld [vmem:[#allocation39_spill] sm:$0xff] }
 0x267   : > { %1046 = vmatmul.mubr.bf16.gmra.mxu0 %v845_v24  ;;  %v1473_v50 = vpop.xlane.xlu1 %1472  ;;  %7149 = vrcp.f32 %v1476_v60  ;;  %v9309_v6 = vrot.slane %v6338_v25, %v14954_v63 }
 0x268   : > { %1053 = vmatprep.mubr.bf16.mxu0 %v848_v42  ;;  %v852_v61 = vpack.c.bf16 %v836_v35, %v834_v5  ;;  %v851_v14 = vpack.c.bf16 %v835_v51, %v833_v45  ;;  %v1482_v46 = vpop.xlane.xlu0 %1481  ;;  %v9312_v5 = vrot.slane %v6338_v25, %v14955_v33 }
 0x269   : > { %7151 = vrcp.f32 %v1482_v46 }
 0x26a   : > { %7153 = vrcp.f32 %v1473_v50 }
 0x26b   : > { %v1479_v31 = vpop.xlane.xlu1 %1478 }
 0x26c   : > { %v1488_v58 = vpop.xlane.xlu0 %1487  ;;  %7155 = vrcp.f32 %v1479_v31 }
 0x26d   : > { %7157 = vrcp.f32 %v1488_v58 }
 0x26f   : > { %1054 = vmatmul.mubr.bf16.gmra.mxu0 %v847_v49  ;;  %v1485_v54 = vpop.xlane.xlu1 %1484 }
 0x270   : > { %1061 = vmatprep.mubr.bf16.mxu0 %v850_v21  ;;  %7159 = vrcp.f32 %v1485_v54 }
 0x271   : > { %v7146_v48 = vpop.eup %7145 }
 0x272   : > { %v7148_v23 = vpop.eup %7147  ;;  %v9315_v38 = vmul.f32 %v7146_v48, %v9112_v55  ;;  %v14958_v55 = vld [vmem:[#allocation44_spill] sm:$0xff] }
 0x273   : > { %v1491_v11 = vpop.xlane.xlu1 %1490  ;;  %v9320_v35 = vmul.f32 %v7148_v23, %v9052_v9  ;;  %v9329_v50 = vmul.f32 %v7146_v48, %v14958_v55 }
 0x274   : > { %v7150_v10 = vpop.eup %7149  ;;  %7161 = vrcp.f32 %v1491_v11  ;;  %v14961_v11 = vld [vmem:[#allocation67_spill] sm:$0xff] }
 0x275   : > { %v9332_v51 = vmul.f32 %v7150_v10, %v14959_v30 }
 0x276   : > { %v9306_v19 = vpop.eup %7151 }
 0x277   : > { %1062 = vmatmul.mubr.bf16.gmra.mxu0 %v849_v4  ;;  %v7154_v52 = vpop.eup %7153  ;;  %v9323_v4 = vmul.f32 %v7148_v23, %v14956_v20  ;;  %v14962_v23 = vld [vmem:[#allocation45_spill] sm:$0xff] }
 0x278   : > { %1069 = vmatprep.mubr.bf16.mxu0 %v852_v61  ;;  %v14957_v61 = vld [vmem:[#allocation59_spill] sm:$0xff] }
 0x279   : > { %v9317_v62 = vpop.eup %7155  ;;  %v9326_v60 = vmul.f32 %v7150_v10, %v14957_v61  ;;  %v9348_v10 = vmul.f32 %v7154_v52, %v14962_v23 }
 0x27f   : > { %1070 = vmatmul.mubr.bf16.gmra.mxu0 %v851_v14  ;;  %v14960_v14 = vld [vmem:[#allocation41_spill] sm:$0xff] }
 0x280   : > { %v9336_v46 = vmul.f32 %v9306_v19, %v14960_v14  ;;  %v14967_v14 = vld [vmem:[#allocation10_spill] sm:$0xff] }
 0x281   : > { %vm14968_vm13 = vcmp.gt.f32.partialorder %v14967_v14, 0.0  ;;  %v9395_v14 = vpop.eup %7157 }
 0x287   : > { %v9281_v2 = vpop.xlane.xlu0 %1493 }
 0x288   : > { %7163 = vrcp.f32 %v9281_v2 }
 0x28c   : > { %v9283_v18 = vpop.xlane.xlu0 %1499 }
 0x291   : > { %v9285_v32 = vpop.xlane.xlu1 %1496 }
 0x292   : > { %v9287_v40 = vpop.xlane.xlu0 %1505  ;;  %7165 = vrcp.f32 %v9285_v32 }
 0x293   : > { %7167 = vrcp.f32 %v9283_v18 }
 0x295   : > { %v9289_v0 = vpop.xlane.xlu1 %1502 }
 0x296   : > { %v9291_v44 = vpop.permute.xlu0 %1579  ;;  %7169 = vrcp.f32 %v9289_v0 }
 0x297   : > { %7171 = vrcp.f32 %v9287_v40 }
 0x299   : > { %v9293_v22 = vpop.permute.xlu1 %1581 }
 0x29a   : > { %v1584_v27 = vpop.permute.xlu0 %1583 }
 0x29d   : > { %v1586_v59 = vpop.permute.xlu1 %1585 }
 0x29e   : > { %v9295_v41 = vpop.permute.xlu0 %1587 }
 0x2a1   : > { %v9297_v24 = vpop.permute.xlu1 %1589 }
 0x2a2   : > { %v9299_v42 = vpop.permute.xlu0 %1591 }
 0x2a5   : > { %v9301_v17 = vpop.permute.xlu1 %1593 }
 0x2a6   : > { %v1596_v7 = vpop.permute.xlu0 %1595 }
 0x2a9   : > { %v1598_v26 = vpop.permute.xlu1 %1597 }
 0x2aa   : > { %v1600_v21 = vpop.permute.xlu0 %1599 }
 0x2ad   : > { %v1602_v49 = vpop.permute.xlu1 %1601 }
 0x2ae   : > { %6431 = vmatprep.subr.bf16.mxu1 %v1602_v49  ;;  %v14963_v49 = vld [vmem:[#allocation49_spill] sm:$0xff] }
 0x2af   : > { %6432 = vmatpush3.bf16.msra.mxu1 %v1586_v59  ;;  %v9343_v59 = vmul.f32 %v7154_v52, %v14961_v11 }
 0x2b0   : > { %6433 = vmatprep.subr.bf16.mxu1 %v1600_v21  ;;  %v9352_v21 = vmul.f32 %v9317_v62, %v14963_v49 }
 0x2b1   : > { %v1724_v45 = vpop.permute.xlu1 %1723 }
 0x2b2   : > { %v1795_v9 = vadd.f32 %v9309_v6, %v1724_v45  ;;  %v1796_v31 = vadd.f32 %v9312_v5, %v1724_v45  ;;  %v1720_v58 = vpop.permute.xlu0 %1719 }
 0x2b3   : > { %v1793_v48 = vadd.f32 %v9309_v6, %v1720_v58  ;;  %v1794_v25 = vadd.f32 %v9312_v5, %v1720_v58  ;;  %6434 = vmatpush3.bf16.msra.mxu1 %v1584_v27 }
 0x2b4   : > { %vm1827_vm8 = vcmp.ge.f32.partialorder %v1795_v9, 0.0  ;;  %vm1828_vm5 = vcmp.ge.f32.partialorder %v1796_v31, 0.0  ;;  %v1859_v20 = vmul.f32 0.2, %v1795_v9  ;;  %v1860_v61 = vmul.f32 0.2, %v1796_v31  ;;  %6435 = vmatprep.subr.bf16.mxu1 %v1598_v26 }
 0x2b5   : > { %vm1825_vm2 = vcmp.ge.f32.partialorder %v1793_v48, 0.0  ;;  %v1857_v45 = vmul.f32 0.2, %v1793_v48  ;;  %v1858_v55 = vmul.f32 0.2, %v1794_v25  ;;  %v1728_v30 = vpop.permute.xlu1 %1727  ;;  %v14964_v26 = vld [vmem:[#allocation9_spill] sm:$0xff] }
 0x2b6   : > { %v1797_v27 = vadd.f32 %v9309_v6, %v1728_v30  ;;  %v1798_v52 = vadd.f32 %v9312_v5, %v1728_v30  ;;  %v1732_v58 = vpop.permute.xlu0 %1731  ;;  %v1891_v11 = vsel %vm1827_vm8, %v1795_v9, %v1859_v20  ;;  %v1892_v23 = vsel %vm1828_vm5, %v1796_v31, %v1860_v61 }
 0x2b7   : > { %v9359_v49 = vadd.f32 %v9309_v6, %v1732_v58  ;;  %v9362_v54 = vadd.f32 %v9312_v5, %v1732_v58  ;;  %6436 = vmatpush3.bf16.msra.mxu1 %v9293_v22  ;;  %vm14965_vm4 = vcmp.gt.f32.partialorder %v14964_v26, 0.0  ;;  %v9371_v33 = vsel %vm14968_vm13, %v1892_v23, -9e+15 }
 0x2b8   : > { %v9367_v39 = vsel %vm14965_vm4, %v1891_v11, -9e+15  ;;  %14969 = vst [vmem:[#allocation66_spill] sm:$0xff] %v9371_v33  ;;  %vm1826_vm0 = vcmp.ge.f32.partialorder %v1794_v25, 0.0  ;;  %6437 = vmatprep.subr.bf16.mxu1 %v1596_v7  ;;  %vm1829_vm14 = vcmp.ge.f32.partialorder %v1797_v27, 0.0  ;;  %vm1830_vm7 = vcmp.ge.f32.partialorder %v1798_v52, 0.0 }
 0x2b9   : > { %14966 = vst [vmem:[#allocation65_spill] sm:$0xff] %v9367_v39  ;;  %v1861_v22 = vmul.f32 0.2, %v1797_v27  ;;  %v1862_v61 = vmul.f32 0.2, %v1798_v52  ;;  %v1736_v30 = vpop.permute.xlu1 %1735  ;;  %v1956_v23 = vmax.f32 %v9367_v39, %v9371_v33  ;;  %v1889_v31 = vsel %vm1825_vm2, %v1793_v48, %v1857_v45  ;;  %v14970_v48 = vld [vmem:[#allocation7_spill] sm:$0xff]  ;;  %v9407_v33 = vpop.eup %7159 }
 0x2ba   : > { %v9380_v58 = vadd.f32 %v9309_v6, %v1736_v30  ;;  %v9383_v11 = vadd.f32 %v9312_v5, %v1736_v30  ;;  %v1740_v7 = vpop.permute.xlu0 %1739  ;;  %vm1831_vm8 = vcmp.ge.f32.partialorder %v9359_v49, 0.0  ;;  %vm1832_vm5 = vcmp.ge.f32.partialorder %v9362_v54, 0.0 }
 0x2bb   : > { %v9391_v20 = vadd.f32 %v9309_v6, %v1740_v7  ;;  %v1890_v9 = vsel %vm1826_vm0, %v1794_v25, %v1858_v55  ;;  %6438 = vmatpush3.bf16.msra.mxu1 %v9291_v44  ;;  %v1863_v30 = vmul.f32 0.2, %v9359_v49  ;;  %v1864_v26 = vmul.f32 0.2, %v9362_v54  ;;  %1957 = vmax.xlane.f32.xlu0 %v1956_v23  ;;  %v14973_v23 = vld [vmem:[#allocation8_spill] sm:$0xff] }
 0x2bc   : > { %v9400_v63 = vadd.f32 %v9312_v5, %v1740_v7  ;;  %vm14971_vm2 = vcmp.gt.f32.partialorder %v14970_v48, 0.0  ;;  %6439 = vmatprep.subr.bf16.mxu1 %v9301_v17  ;;  %vm1833_vm4 = vcmp.ge.f32.partialorder %v9380_v58, 0.0  ;;  %vm1834_vm13 = vcmp.ge.f32.partialorder %v9383_v11, 0.0  ;;  %v9413_v7 = vpop.eup %7161 }
 0x2bd   : > { %v9404_v45 = vsel %vm14971_vm2, %v1889_v31, -9e+15  ;;  %v1865_v44 = vmul.f32 0.2, %v9380_v58  ;;  %v1866_v25 = vmul.f32 0.2, %v9383_v11  ;;  %v1744_v55 = vpop.permute.xlu1 %1743  ;;  %v1893_v16 = vsel %vm1829_vm14, %v1797_v27, %v1861_v22 }
 0x2be   : > { %14972 = vst [vmem:[#allocation71_spill] sm:$0xff] %v9404_v45  ;;  %vm1835_vm0 = vcmp.ge.f32.partialorder %v9391_v20, 0.0  ;;  %vm14974_vm2 = vcmp.gt.f32.partialorder %v14973_v23, 0.0  ;;  %v9421_v17 = vadd.f32 %v9309_v6, %v1744_v55  ;;  %v9424_v48 = vadd.f32 %v9312_v5, %v1744_v55  ;;  %v1748_v39 = vpop.permute.xlu0 %1747  ;;  %v14976_v22 = vld [vmem:[#allocation11_spill] sm:$0xff] }
 0x2bf   : > { %v9418_v31 = vsel %vm14974_vm2, %v1890_v9, -9e+15  ;;  %v9429_v15 = vadd.f32 %v9309_v6, %v1748_v39  ;;  %v1894_v13 = vsel %vm1830_vm7, %v1798_v52, %v1862_v61  ;;  %6440 = vmatpush3.bf16.msra.mxu1 %v9206_v53  ;;  %vm1836_vm2 = vcmp.ge.f32.partialorder %v9400_v63, 0.0  ;;  %v14978_v61 = vld [vmem:[#allocation12_spill] sm:$0xff] }
 0x2c0   : > { %14975 = vst [vmem:[#allocation72_spill] sm:$0xff] %v9418_v31  ;;  %v1953_v1 = vmax.f32 %v9404_v45, %v9418_v31  ;;  %v1867_v9 = vmul.f32 0.2, %v9391_v20  ;;  %v1868_v55 = vmul.f32 0.2, %v9400_v63  ;;  %v9438_v23 = vadd.f32 %v9312_v5, %v1748_v39  ;;  %6441 = vmatprep.subr.bf16.mxu1 %v9299_v42 }
 0x2c1   : > { %vm1837_vm11 = vcmp.ge.f32.partialorder %v9421_v17, 0.0  ;;  %vm1838_vm14 = vcmp.ge.f32.partialorder %v9424_v48, 0.0  ;;  %v9444_v27 = vmul.f32 0.2, %v9421_v17  ;;  %v9447_v53 = vmul.f32 0.2, %v9424_v48  ;;  %v1752_v52 = vpop.permute.xlu1 %1751 }
 0x2c2   : > { %1954 = vmax.xlane.f32.xlu1 %v1953_v1  ;;  %vm1839_vm7 = vcmp.ge.f32.partialorder %v9429_v15, 0.0  ;;  %vm14977_vm15 = vcmp.gt.f32.partialorder %v14976_v22, 0.0  ;;  %vm14979_vm1 = vcmp.gt.f32.partialorder %v14978_v61, 0.0  ;;  %v1895_v42 = vsel %vm1831_vm8, %v9359_v49, %v1863_v30  ;;  %v1756_v45 = vpop.permute.xlu0 %1755  ;;  %v14983_v22 = vld [vmem:[#allocation16_spill] sm:$0xff] }
 0x2c3   : > { %v9452_v39 = vsel %vm14977_vm15, %v1893_v16, -9e+15  ;;  %v9456_v1 = vsel %vm14979_vm1, %v1894_v13, -9e+15  ;;  %v1896_v31 = vsel %vm1832_vm5, %v9362_v54, %v1864_v26  ;;  %v9468_v16 = vsel %vm14981_vm9, %v1895_v42, -9e+15  ;;  %6442 = vmatpush3.bf16.msra.mxu1 %v9198_v43 }
 0x2c4   : > { %v1959_v56 = vmax.f32 %v9452_v39, %v9456_v1  ;;  %14982 = vst [vmem:[#allocation73_spill] sm:$0xff] %v9468_v16  ;;  %vm14984_vm15 = vcmp.gt.f32.partialorder %v14983_v22, 0.0  ;;  %v9475_v61 = vadd.f32 %v9309_v6, %v1752_v52  ;;  %vm1840_vm1 = vcmp.ge.f32.partialorder %v9438_v23, 0.0  ;;  %6443 = vmatprep.subr.bf16.mxu1 %v9297_v24 }
 0x2c5   : > { %v9472_v13 = vsel %vm14984_vm15, %v1896_v31, -9e+15  ;;  %v9482_v49 = vadd.f32 %v9312_v5, %v1752_v52  ;;  %v9485_v26 = vadd.f32 %v9309_v6, %v1756_v45  ;;  %v1871_v30 = vmul.f32 0.2, %v9429_v15  ;;  %v1760_v52 = vpop.permute.xlu1 %1759 }
 0x2c6   : > { %14985 = vst [vmem:[#allocation74_spill] sm:$0xff] %v9472_v13  ;;  %v1962_v54 = vmax.f32 %v9468_v16, %v9472_v13  ;;  %v1872_v31 = vmul.f32 0.2, %v9438_v23  ;;  %1960 = vmax.xlane.f32.xlu0 %v1959_v56  ;;  %v1897_v43 = vsel %vm1833_vm4, %v9380_v58, %v1865_v44  ;;  %v1898_v42 = vsel %vm1834_vm13, %v9383_v11, %v1866_v25  ;;  %v1764_v56 = vpop.permute.xlu0 %1763  ;;  %v14986_v58 = vld [vmem:[#allocation13_spill] sm:$0xff]  ;;  %v14988_v25 = vld [vmem:[#allocation14_spill] sm:$0xff] }
 0x2c7   : > { %vm1841_vm9 = vcmp.ge.f32.partialorder %v9475_v61, 0.0  ;;  %vm1842_vm8 = vcmp.ge.f32.partialorder %v9482_v49, 0.0  ;;  %v1873_v24 = vmul.f32 0.2, %v9475_v61  ;;  %v9500_v22 = vadd.f32 %v9312_v5, %v1756_v45  ;;  %6444 = vmatpush3.bf16.msra.mxu1 %v9188_v36  ;;  %v14990_v13 = vld [vmem:[#allocation17_spill] sm:$0xff] }
 0x2c8   : > { %1963 = vmax.xlane.f32.xlu1 %v1962_v54  ;;  %v1874_v47 = vmul.f32 0.2, %v9482_v49  ;;  %vm1843_vm5 = vcmp.ge.f32.partialorder %v9485_v26, 0.0  ;;  %vm14987_vm4 = vcmp.gt.f32.partialorder %v14986_v58, 0.0  ;;  %v1899_v11 = vsel %vm1835_vm0, %v9391_v20, %v1867_v9  ;;  %6445 = vmatprep.subr.bf16.mxu1 %v9295_v41  ;;  %v14993_v20 = vld [vmem:[#allocation18_spill] sm:$0xff] }
 0x2c9   : > { %v9506_v44 = vsel %vm14987_vm4, %v1897_v43, -9e+15  ;;  %vm14989_vm13 = vcmp.gt.f32.partialorder %v14988_v25, 0.0  ;;  %v1900_v45 = vsel %vm1836_vm2, %v9400_v63, %v1868_v55  ;;  %vm14991_vm15 = vcmp.gt.f32.partialorder %v14990_v13, 0.0  ;;  %v1768_v13 = vpop.permute.xlu1 %1767 }
 0x2ca   : > { %v9514_v54 = vsel %vm14989_vm13, %v1898_v42, -9e+15  ;;  %v9521_v16 = vsel %vm14991_vm15, %v1899_v11, -9e+15  ;;  %v9524_v43 = vadd.f32 %v9309_v6, %v1760_v52  ;;  %vm14994_vm0 = vcmp.gt.f32.partialorder %v14993_v20, 0.0  ;;  %v1772_v25 = vpop.permute.xlu0 %1771 }
 0x2cb   : > { %14992 = vst [vmem:[#allocation42_spill] sm:$0xff] %v9521_v16  ;;  %v1965_v36 = vmax.f32 %v9506_v44, %v9514_v54  ;;  %v9531_v9 = vsel %vm14994_vm0, %v1900_v45, -9e+15  ;;  %v9534_v42 = vadd.f32 %v9312_v5, %v1760_v52  ;;  %v9537_v63 = vadd.f32 %v9309_v6, %v1764_v56  ;;  %6446 = vmatpush3.bf16.msra.mxu1 %v9190_v29 }
 0x2cc   : > { %14995 = vst [vmem:[#allocation43_spill] sm:$0xff] %v9531_v9  ;;  %vm1844_vm2 = vcmp.ge.f32.partialorder %v9500_v22, 0.0  ;;  %v1875_v55 = vmul.f32 0.2, %v9485_v26  ;;  %v1968_v41 = vmax.f32 %v9521_v16, %v9531_v9  ;;  %v9544_v11 = vadd.f32 %v9312_v5, %v1764_v56  ;;  %v14998_v9 = vld [vmem:[#allocation20_spill] sm:$0xff] }
 0x2cd   : > { %v1876_v45 = vmul.f32 0.2, %v9500_v22  ;;  %1966 = vmax.xlane.f32.xlu0 %v1965_v36  ;;  %v9549_v52 = vmul.f32 0.2, %v9524_v43  ;;  %v9552_v20 = vmul.f32 0.2, %v9534_v42  ;;  %v1901_v36 = vsel %vm1837_vm11, %v9421_v17, %v9444_v27 }
 0x2ce   : > { %1969 = vmax.xlane.f32.xlu1 %v1968_v41  ;;  %vm1845_vm4 = vcmp.ge.f32.partialorder %v9524_v43, 0.0  ;;  %vm1846_vm13 = vcmp.ge.f32.partialorder %v9534_v42, 0.0  ;;  %v9558_v56 = vmul.f32 0.2, %v9537_v63  ;;  %v9561_v2 = vmul.f32 0.2, %v9544_v11 }
 0x2cf   : > { %v1902_v29 = vsel %vm1838_vm14, %v9424_v48, %v9447_v53  ;;  %vm1847_vm15 = vcmp.ge.f32.partialorder %v9537_v63, 0.0  ;;  %vm1848_vm0 = vcmp.ge.f32.partialorder %v9544_v11, 0.0  ;;  %v14996_v41 = vld [vmem:[#allocation19_spill] sm:$0xff]  ;;  %vm14999_vm10 = vcmp.gt.f32.partialorder %v14998_v9, 0.0 }
 0x2d0   : > { %vm14997_vm6 = vcmp.gt.f32.partialorder %v14996_v41, 0.0  ;;  %v9579_v16 = vsel %vm14999_vm10, %v1902_v29, -9e+15  ;;  %v1903_v17 = vsel %vm1839_vm7, %v9429_v15, %v1871_v30  ;;  %v1904_v48 = vsel %vm1840_vm1, %v9438_v23, %v1872_v31  ;;  %v15000_v53 = vld [vmem:[#allocation23_spill] sm:$0xff] }
 0x2d1   : > { %v9575_v58 = vsel %vm14997_vm6, %v1901_v36, -9e+15  ;;  %vm15001_vm11 = vcmp.gt.f32.partialorder %v15000_v53, 0.0  ;;  %v15002_v36 = vld [vmem:[#allocation24_spill] sm:$0xff]  ;;  %v1817_v29 = vadd.f32 %v9309_v6, %v1768_v13  ;;  %v15005_v15 = vpack.c.bf16 %v9264_v28, %v9261_v57 }
 0x2d2   : > { %v1971_v27 = vmax.f32 %v9575_v58, %v9579_v16  ;;  %v9591_v41 = vsel %vm15001_vm11, %v1903_v17, -9e+15  ;;  %vm15003_vm6 = vcmp.gt.f32.partialorder %v15002_v36, 0.0  ;;  %v1818_v30 = vadd.f32 %v9312_v5, %v1768_v13  ;;  %v1776_v13 = vpop.permute.xlu1 %1775 }
 0x2d3   : > { %v9595_v9 = vsel %vm15003_vm6, %v1904_v48, -9e+15  ;;  %1652 = vmatmul.mubr.bf16.vlgmr.msra.gmra.mxu1 %v15005_v15  ;;  %v1819_v31 = vadd.f32 %v9309_v6, %v1772_v25  ;;  %v1820_v17 = vadd.f32 %v9312_v5, %v1772_v25  ;;  %v15006_v36 = vpack.c.bf16 %v9320_v35, %v9315_v38  ;;  %v1780_v25 = vpop.permute.xlu0 %1779 }
 0x2d4   : > { %15004 = vst [vmem:[#allocation47_spill] sm:$0xff] %v9595_v9  ;;  %v1974_v23 = vmax.f32 %v9591_v41, %v9595_v9  ;;  %1972 = vmax.xlane.f32.xlu0 %v1971_v27  ;;  %vm1849_vm10 = vcmp.ge.f32.partialorder %v1817_v29, 0.0  ;;  %v1881_v48 = vmul.f32 0.2, %v1817_v29  ;;  %v1905_v57 = vsel %vm1841_vm9, %v9475_v61, %v1873_v24  ;;  %v15007_v27 = vld [vmem:[#allocation21_spill] sm:$0xff]  ;;  %v15009_v24 = vld [vmem:[#allocation22_spill] sm:$0xff] }
 0x2d5   : > { %1659 = vmatprep.mubr.bf16.mxu1 %v15006_v36  ;;  %v1906_v28 = vsel %vm1842_vm8, %v9482_v49, %v1874_v47  ;;  %vm1850_vm14 = vcmp.ge.f32.partialorder %v1818_v30, 0.0  ;;  %v1882_v15 = vmul.f32 0.2, %v1818_v30  ;;  %vm1851_vm7 = vcmp.ge.f32.partialorder %v1819_v31, 0.0 }
 0x2d6   : > { %1975 = vmax.xlane.f32.xlu1 %v1974_v23  ;;  %vm1852_vm1 = vcmp.ge.f32.partialorder %v1820_v17, 0.0  ;;  %v1883_v38 = vmul.f32 0.2, %v1819_v31  ;;  %v1884_v35 = vmul.f32 0.2, %v1820_v17  ;;  %vm15008_vm11 = vcmp.gt.f32.partialorder %v15007_v27, 0.0 }
 0x2d7   : > { %v9617_v36 = vsel %vm15008_vm11, %v1905_v57, -9e+15  ;;  %v1907_v61 = vsel %vm1843_vm5, %v9485_v26, %v1875_v55  ;;  %vm15010_vm9 = vcmp.gt.f32.partialorder %v15009_v24, 0.0  ;;  %v1908_v49 = vsel %vm1844_vm2, %v9500_v22, %v1876_v45 }
 0x2d8   : > { %v9624_v47 = vsel %vm15010_vm9, %v1906_v28, -9e+15  ;;  %v9631_v53 = vsel %vm315_vm3, %v1907_v61, -9e+15  ;;  %v1821_v27 = vadd.f32 %v9309_v6, %v1776_v13  ;;  %v9638_v26 = vsel %vm316_vm12, %v1908_v49, -9e+15 }
 0x2d9   : > { %v1977_v57 = vmax.f32 %v9617_v36, %v9624_v47  ;;  %v1822_v55 = vadd.f32 %v9312_v5, %v1776_v13  ;;  %v1823_v28 = vadd.f32 %v9309_v6, %v1780_v25  ;;  %v1980_v22 = vmax.f32 %v9631_v53, %v9638_v26 }
 0x2da   : > { %vm1853_vm8 = vcmp.ge.f32.partialorder %v1821_v27, 0.0  ;;  %v1885_v45 = vmul.f32 0.2, %v1821_v27  ;;  %v1824_v61 = vadd.f32 %v9312_v5, %v1780_v25  ;;  %v15013_v49 = vpack.c.bf16 %v9323_v4, %v9329_v50  ;;  %v15015_v4 = vld [vmem:[#allocation27_spill] sm:$0xff] }
 0x2db   : > { %1978 = vmax.xlane.f32.xlu0 %v1977_v57  ;;  %vm1854_vm5 = vcmp.ge.f32.partialorder %v1822_v55, 0.0  ;;  %v1886_v23 = vmul.f32 0.2, %v1822_v55  ;;  %vm1855_vm2 = vcmp.ge.f32.partialorder %v1823_v28, 0.0  ;;  %v1887_v24 = vmul.f32 0.2, %v1823_v28  ;;  %1981 = vmax.xlane.f32.xlu1 %v1980_v22  ;;  %v7164_v57 = vpop.eup %7163 }
 0x2dc   : > { %1660 = vmatmul.mubr.bf16.gmra.mxu1 %v15013_v49  ;;  %vm1856_vm6 = vcmp.ge.f32.partialorder %v1824_v61, 0.0  ;;  %v1888_v13 = vmul.f32 0.2, %v1824_v61  ;;  %v1909_v6 = vsel %vm1845_vm4, %v9524_v43, %v9549_v52  ;;  %v1910_v5 = vsel %vm1846_vm13, %v9534_v42, %v9552_v20  ;;  %v15017_v22 = vld [vmem:[#allocation28_spill] sm:$0xff]  ;;  %v15019_v20 = vld [vmem:[#allocation29_spill] sm:$0xff]  ;;  %v15021_v52 = vld [vmem:[#allocation30_spill] sm:$0xff] }
 0x2dd   : > { %v15014_v25 = vpack.c.bf16 %v9326_v60, %v9343_v59  ;;  %vm15016_vm11 = vcmp.gt.f32.partialorder %v15015_v4, 0.0  ;;  %vm15018_vm9 = vcmp.gt.f32.partialorder %v15017_v22, 0.0  ;;  %v1911_v43 = vsel %vm1847_vm15, %v9537_v63, %v9558_v56 }
 0x2de   : > { %v9661_v50 = vsel %vm15016_vm11, %v1909_v6, -9e+15  ;;  %v9665_v49 = vsel %vm15018_vm9, %v1910_v5, -9e+15  ;;  %v1912_v60 = vsel %vm1848_vm0, %v9544_v11, %v9561_v2  ;;  %vm15020_vm4 = vcmp.gt.f32.partialorder %v15019_v20, 0.0 }
 0x2df   : > { %1667 = vmatprep.mubr.bf16.mxu1 %v15014_v25  ;;  %v1983_v59 = vmax.f32 %v9661_v50, %v9665_v49  ;;  %v9679_v42 = vsel %vm15020_vm4, %v1911_v43, -9e+15  ;;  %vm15022_vm13 = vcmp.gt.f32.partialorder %v15021_v52, 0.0  ;;  %v1913_v5 = vsel %vm1849_vm10, %v1817_v29, %v1881_v48  ;;  %v15023_v25 = vld [vmem:[#allocation31_spill] sm:$0xff]  ;;  %v15025_v43 = vld [vmem:[#allocation32_spill] sm:$0xff]  ;;  %v15027_v52 = vld [vmem:[#allocation33_spill] sm:$0xff] }
 0x2e0   : > { %v9683_v6 = vsel %vm15022_vm13, %v1912_v60, -9e+15  ;;  %v1914_v56 = vsel %vm1850_vm14, %v1818_v30, %v1882_v15  ;;  %vm15024_vm15 = vcmp.gt.f32.partialorder %v15023_v25, 0.0  ;;  %v1915_v2 = vsel %vm1851_vm7, %v1819_v31, %v1883_v38  ;;  %v15029_v15 = vld [vmem:[#allocation34_spill] sm:$0xff] }
 0x2e1   : > { %v1986_v63 = vmax.f32 %v9679_v42, %v9683_v6  ;;  %v9691_v11 = vsel %vm15024_vm15, %v1913_v5, -9e+15  ;;  %1984 = vmax.xlane.f32.xlu0 %v1983_v59  ;;  %vm15026_vm0 = vcmp.gt.f32.partialorder %v15025_v43, 0.0  ;;  %v1916_v60 = vsel %vm1852_vm1, %v1820_v17, %v1884_v35  ;;  %v15031_v59 = vld [vmem:[#allocation35_spill] sm:$0xff]  ;;  %v15033_v35 = vld [vmem:[#allocation36_spill] sm:$0xff] }
 0x2e2   : > { %v9696_v20 = vsel %vm15026_vm0, %v1914_v56, -9e+15  ;;  %vm15028_vm10 = vcmp.gt.f32.partialorder %v15027_v52, 0.0  ;;  %v1917_v48 = vsel %vm1853_vm8, %v1821_v27, %v1885_v45  ;;  %vm15030_vm14 = vcmp.gt.f32.partialorder %v15029_v15, 0.0  ;;  %v15035_v56 = vld [vmem:[#allocation40_spill] sm:$0xff] }
 0x2e3   : > { %v9701_v29 = vsel %vm15028_vm10, %v1915_v2, -9e+15  ;;  %1987 = vmax.xlane.f32.xlu1 %v1986_v63  ;;  %v1989_v30 = vmax.f32 %v9691_v11, %v9696_v20  ;;  %v9708_v31 = vsel %vm15030_vm14, %v1916_v60, -9e+15  ;;  %v1918_v38 = vsel %vm1854_vm5, %v1822_v55, %v1886_v23  ;;  %v15037_v23 = vld [vmem:[#allocation46_spill] sm:$0xff] }
 0x2e4   : > { %vm15032_vm7 = vcmp.gt.f32.partialorder %v15031_v59, 0.0  ;;  %v1992_v17 = vmax.f32 %v9701_v29, %v9708_v31  ;;  %vm15034_vm1 = vcmp.gt.f32.partialorder %v15033_v35, 0.0  ;;  %v1919_v45 = vsel %vm1855_vm2, %v1823_v28, %v1887_v24 }
 0x2e5   : > { %v9713_v5 = vsel %vm15032_vm7, %v1917_v48, -9e+15  ;;  %v9719_v27 = vsel %vm15034_vm1, %v1918_v38, -9e+15  ;;  %v1920_v63 = vsel %vm1856_vm6, %v1824_v61, %v1888_v13  ;;  %vm15036_vm8 = vcmp.gt.f32.partialorder %v15035_v56, 0.0  ;;  %1990 = vmax.xlane.f32.xlu0 %v1989_v30  ;;  %v15041_v61 = vld [vmem:[#allocation68_spill] sm:$0xff] }
 0x2e6   : > { %v9725_v2 = vsel %vm15036_vm8, %v1919_v45, -9e+15  ;;  %vm15038_vm5 = vcmp.gt.f32.partialorder %v15037_v23, 0.0  ;;  %v15039_v60 = vpack.c.bf16 %v9332_v51, %v9348_v10  ;;  %v1995_v48 = vmax.f32 %v9713_v5, %v9719_v27  ;;  %v15042_v38 = vld [vmem:[#allocation53_spill] sm:$0xff]  ;;  %v15043_v10 = vld [vmem:[#allocation60_spill] sm:$0xff] }
 0x2e7   : > { %v9729_v55 = vsel %vm15038_vm5, %v1920_v63, -9e+15  ;;  %v15040_v24 = vpack.c.bf16 %v9336_v46, %v9352_v21  ;;  %1993 = vmax.xlane.f32.xlu1 %v1992_v17  ;;  %v1535_v13 = vmul.f32 %v9317_v62, %v15041_v61  ;;  %v1540_v51 = vmul.f32 %v9407_v33, %v15042_v38  ;;  %v15044_v46 = vld [vmem:[#allocation64_spill] sm:$0xff]  ;;  %v15045_v62 = vld [vmem:[#allocation50_spill] sm:$0xff] }
 0x2e8   : > { %1668 = vmatmul.mubr.bf16.gmra.mxu1 %v15039_v60  ;;  %v1998_v28 = vmax.f32 %v9725_v2, %v9729_v55  ;;  %v1537_v30 = vmul.f32 %v9306_v19, %v15043_v10  ;;  %v1542_v21 = vmul.f32 %v9395_v14, %v15044_v46  ;;  %v1539_v32 = vmul.f32 %v9407_v33, %v15045_v62  ;;  %v15046_v60 = vld [vmem:[#allocation63_spill] sm:$0xff]  ;;  %v15048_v10 = vld [vmem:[#allocation57_spill] sm:$0xff]  ;;  %v15049_v46 = vld [vmem:[#allocation62_spill] sm:$0xff] }
 0x2e9   : > { %1675 = vmatprep.mubr.bf16.mxu1 %v15040_v24  ;;  %1996 = vmax.xlane.f32.xlu0 %v1995_v48  ;;  %v1546_v63 = vmul.f32 %v7164_v57, %v9154_v3  ;;  %v1541_v19 = vmul.f32 %v9395_v14, %v15046_v60  ;;  %v1544_v18 = vmul.f32 %v9413_v7, %v9138_v8 }
 0x2ea   : > { %v1561_v17 = vpack.c.bf16 %v1537_v30, %v1535_v13  ;;  %v1564_v45 = vpack.c.bf16 %v1542_v21, %v1540_v51  ;;  %v1545_v33 = vmul.f32 %v7164_v57, %v9152_v37  ;;  %v15047_v13 = vld [vmem:[#allocation69_spill] sm:$0xff]  ;;  %v15051_v37 = vld [vmem:[#allocation58_spill] sm:$0xff] }
 0x2eb   : > { %1999 = vmax.xlane.f32.xlu1 %v1998_v28  ;;  %v1563_v48 = vpack.c.bf16 %v1541_v19, %v1539_v32  ;;  %v1566_v24 = vpack.c.bf16 %v1546_v63, %v1544_v18  ;;  %v7166_v28 = vpop.eup %7165  ;;  %v1543_v3 = vmul.f32 %v9413_v7, %v15047_v13  ;;  %v15052_v7 = vld [vmem:[#allocation61_spill] sm:$0xff]  ;;  %v15053_v32 = vld [vmem:[#allocation54_spill] sm:$0xff] }
 0x2ec   : > { %v7168_v61 = vpop.eup %7167  ;;  %v1548_v0 = vmul.f32 %v7166_v28, %v9168_v34  ;;  %v1547_v30 = vmul.f32 %v7166_v28, %v15048_v10 }
 0x2ed   : > { %v1550_v14 = vmul.f32 %v7168_v61, %v9160_v12  ;;  %v1565_v38 = vpack.c.bf16 %v1545_v33, %v1543_v3  ;;  %v7170_v51 = vpop.eup %7169 }
 0x2ee   : > { %v7172_v8 = vpop.eup %7171  ;;  %v1552_v21 = vmul.f32 %v7170_v51, %v15049_v46  ;;  %v1551_v12 = vmul.f32 %v7170_v51, %v15052_v7 }
 0x2ef   : > { %v1568_v40 = vpack.c.bf16 %v1550_v14, %v1548_v0  ;;  %v1554_v57 = vmul.f32 %v7172_v8, %v15051_v37  ;;  %v1553_v63 = vmul.f32 %v7172_v8, %v15053_v32 }
 0x2f0   : > { %1676 = vmatmul.mubr.bf16.gmra.mxu1 %v1561_v17  ;;  %v15050_v17 = vld [vmem:[#allocation70_spill] sm:$0xff] }
 0x2f1   : > { %1683 = vmatprep.mubr.bf16.mxu1 %v1564_v45  ;;  %v1549_v45 = vmul.f32 %v7168_v61, %v15050_v17  ;;  %v1570_v62 = vpack.c.bf16 %v1554_v57, %v1552_v21  ;;  %v1569_v60 = vpack.c.bf16 %v1553_v63, %v1551_v12 }
 0x2f3   : > { %v1567_v34 = vpack.c.bf16 %v1549_v45, %v1547_v30 }
 0x2f8   : > { %1684 = vmatmul.mubr.bf16.gmra.mxu1 %v1563_v48 }
 0x2f9   : > { %1691 = vmatprep.mubr.bf16.mxu1 %v1566_v24 }
 0x300   : > { %1692 = vmatmul.mubr.bf16.gmra.mxu1 %v1565_v38 }
 0x301   : > { %1699 = vmatprep.mubr.bf16.mxu1 %v1568_v40 }
 0x307   : > { %v6383_v19 = vpop.f32.mrf.mxu0 }
 0x308   : > { %1700 = vmatmul.mubr.bf16.gmra.mxu1 %v1567_v34 }
 0x309   : > { %1707 = vmatprep.mubr.bf16.mxu1 %v1570_v62  ;;  %v6384_v18 = vpop.f32.mrf.mxu0 }
 0x30a   : > { %v9771_v48 = vadd.f32 %v6384_v18, %v6383_v19  ;;  %v8007_v19 = vmov 3  }
 0x30b   : > { %v9773_v24 = vpop.f32.mrf.mxu0  ;;  %6941 = vset.pattern.permute.xlu1 %v8007_v19  ;;  %6942 = vset.pattern.permute.xlu0 %v8007_v19 }
 0x30c   : > { %15054 = vst [vmem:[#allocation51_spill] sm:$0xff] %v9771_v48  ;;  %15055 = vst [vmem:[#allocation48_spill] sm:$0xff] %v9773_v24 }
 0x30d   : > { %v9775_v28 = vpop.f32.mrf.mxu0 }
 0x30e   : > { %15056 = vst [vmem:[#allocation52_spill] sm:$0xff] %v9775_v28 }
 0x30f   : > { %v6389_v61 = vpop.f32.mrf.mxu0 }
 0x310   : > { %1708 = vmatmul.mubr.bf16.gmra.mxu1 %v1569_v60 }
 0x311   : > { %v6390_v33 = vpop.f32.mrf.mxu0 }
 0x312   : > { %v9777_v0 = vadd.f32 %v6390_v33, %v6389_v61 }
 0x313   : > { %v9779_v13 = vpop.f32.mrf.mxu0 }
 0x314   : > { %15057 = vst [vmem:[#allocation37_spill] sm:$0xff] %v9777_v0  ;;  %15058 = vst [vmem:[#allocation56_spill] sm:$0xff] %v9779_v13  ;;  %v7824_v13 = vld [vmem:[%s8098_s5 + $0x58] sm:$0xff] }
 0x315   : > { %v9781_v3 = vpop.f32.mrf.mxu0 }
 0x316   : > { %15059 = vst [vmem:[#allocation55_spill] sm:$0xff] %v9781_v3  ;;  %v7820_v3 = vld [vmem:[%s8098_s5 + $0x38] sm:$0xff] }
 0x317   : > { %v6395_v14 = vpop.f32.mrf.mxu0 }
 0x319   : > { %v6396_v38 = vpop.f32.mrf.mxu0 }
 0x31a   : > { %v9783_v40 = vadd.f32 %v6396_v38, %v6395_v14 }
 0x31b   : > { %v9785_v51 = vpop.f32.mrf.mxu0 }
 0x31c   : > { %15060 = vst [vmem:[#allocation38_spill] sm:$0xff] %v9783_v40  ;;  %15061 = vst [vmem:[#allocation59_spill] sm:$0xff] %v9785_v51  ;;  %v15075_v40 = vld [vmem:[#allocation71_spill] sm:$0xff] }
 0x31d   : > { %v9787_v8 = vpop.f32.mrf.mxu0  ;;  %v7819_v51 = vld [vmem:[%s8098_s5 + $0x30] sm:$0xff] }
 0x31e   : > { %15062 = vst [vmem:[#allocation44_spill] sm:$0xff] %v9787_v8  ;;  %v7816_v8 = vld [vmem:[%s8098_s5 + $0x18] sm:$0xff] }
 0x31f   : > { %v6401_v10 = vpop.f32.mrf.mxu0 }
 0x321   : > { %v6402_v30 = vpop.f32.mrf.mxu0 }
 0x322   : > { %v9789_v46 = vadd.f32 %v6402_v30, %v6401_v10 }
 0x323   : > { %v9791_v21 = vpop.f32.mrf.mxu0 }
 0x324   : > { %15063 = vst [vmem:[#allocation39_spill] sm:$0xff] %v9789_v46  ;;  %15064 = vst [vmem:[#allocation41_spill] sm:$0xff] %v9791_v21 }
 0x325   : > { %v9793_v17 = vpop.f32.mrf.mxu0 }
 0x326   : > { %15065 = vst [vmem:[#allocation67_spill] sm:$0xff] %v9793_v17 }
 0x327   : > { %v6407_v45 = vpop.f32.mrf.mxu0 }
 0x329   : > { %v6408_v37 = vpop.f32.mrf.mxu0 }
 0x32a   : > { %v9795_v57 = vadd.f32 %v6408_v37, %v6407_v45 }
 0x32b   : > { %v6410_v34 = vpop.f32.mrf.mxu0 }
 0x32c   : > { %15066 = vst [vmem:[#allocation45_spill] sm:$0xff] %v9795_v57  ;;  %v15074_v57 = vld [vmem:[#allocation66_spill] sm:$0xff] }
 0x32d   : > { %v6411_v62 = vpop.f32.mrf.mxu0 }
 0x32e   : > { %v9797_v7 = vadd.f32 %v6411_v62, %v6410_v34 }
 0x32f   : > { %v6413_v12 = vpop.f32.mrf.mxu0 }
 0x330   : > { %15067 = vst [vmem:[#allocation49_spill] sm:$0xff] %v9797_v7 }
 0x331   : > { %v6414_v32 = vpop.f32.mrf.mxu0 }
 0x332   : > { %v9799_v63 = vadd.f32 %v6414_v32, %v6413_v12  ;;  %v15073_v32 = vld [vmem:[#allocation65_spill] sm:$0xff] }
 0x333   : > { %v6416_v60 = vpop.f32.mrf.mxu0 }
 0x334   : > { %15068 = vst [vmem:[#allocation68_spill] sm:$0xff] %v9799_v63 }
 0x335   : > { %v6417_v18 = vpop.f32.mrf.mxu0 }
 0x336   : > { %v9801_v61 = vadd.f32 %v6417_v18, %v6416_v60 }
 0x337   : > { %v6419_v33 = vpop.f32.mrf.mxu0 }
 0x338   : > { %15069 = vst [vmem:[#allocation53_spill] sm:$0xff] %v9801_v61 }
 0x339   : > { %v6420_v14 = vpop.f32.mrf.mxu0 }
 0x33a   : > { %v9803_v38 = vadd.f32 %v6420_v14, %v6419_v33  ;;  %v15076_v14 = vld [vmem:[#allocation72_spill] sm:$0xff] }
 0x33b   : > { %v6422_v10 = vpop.f32.mrf.mxu0 }
 0x33c   : > { %15070 = vst [vmem:[#allocation60_spill] sm:$0xff] %v9803_v38 }
 0x33d   : > { %v6423_v30 = vpop.f32.mrf.mxu0 }
 0x33e   : > { %v9805_v45 = vadd.f32 %v6423_v30, %v6422_v10 }
 0x33f   : > { %v6425_v37 = vpop.f32.mrf.mxu0 }
 0x340   : > { %15071 = vst [vmem:[#allocation64_spill] sm:$0xff] %v9805_v45 }
 0x341   : > { %v6426_v34 = vpop.f32.mrf.mxu0 }
 0x342   : > { %v9807_v62 = vadd.f32 %v6426_v34, %v6425_v37 }
 0x344   : > { %15072 = vst [vmem:[#allocation50_spill] sm:$0xff] %v9807_v62  ;;  %v1958_v12 = vpop.xlane.xlu0 %1957 }
 0x345   : > { %v2003_v63 = vsub.f32 %v15073_v32, %v1958_v12  ;;  %v2004_v19 = vsub.f32 %v15074_v57, %v1958_v12  ;;  %v15077_v57 = vld [vmem:[#allocation73_spill] sm:$0xff]  ;;  %v15078_v12 = vld [vmem:[#allocation74_spill] sm:$0xff] }
 0x347   : > { %v2037_v46 = vmul.f32 1.442695, %v2003_v63  ;;  %v2039_v60 = vmul.f32 1.442695, %v2004_v19 }
 0x349   : > { %7173 = vpow2.f32 %v2037_v46 }
 0x34a   : > { %7175 = vpow2.f32 %v2039_v60 }
 0x34b   : > { %v1955_v18 = vpop.xlane.xlu1 %1954 }
 0x34c   : > { %v2001_v33 = vsub.f32 %v15075_v40, %v1955_v18  ;;  %v2002_v38 = vsub.f32 %v15076_v14, %v1955_v18 }
 0x34e   : > { %v2033_v10 = vmul.f32 1.442695, %v2001_v33  ;;  %v2035_v30 = vmul.f32 1.442695, %v2002_v38  ;;  %v15080_v33 = vld [vmem:[#allocation43_spill] sm:$0xff] }
 0x34f   : > { %v1961_v0 = vpop.xlane.xlu0 %1960 }
 0x350   : > { %7177 = vpow2.f32 %v2033_v10  ;;  %v2005_v34 = vsub.f32 %v9452_v39, %v1961_v0  ;;  %v2006_v32 = vsub.f32 %v9456_v1, %v1961_v0  ;;  %v15079_v1 = vld [vmem:[#allocation42_spill] sm:$0xff] }
 0x351   : > { %v1964_v37 = vpop.xlane.xlu1 %1963  ;;  %7179 = vpow2.f32 %v2035_v30 }
 0x352   : > { %v2007_v63 = vsub.f32 %v15077_v57, %v1964_v37  ;;  %v2008_v19 = vsub.f32 %v15078_v12, %v1964_v37  ;;  %v2041_v46 = vmul.f32 1.442695, %v2005_v34  ;;  %v2043_v62 = vmul.f32 1.442695, %v2006_v32 }
 0x354   : > { %v2045_v48 = vmul.f32 1.442695, %v2007_v63  ;;  %v2047_v40 = vmul.f32 1.442695, %v2008_v19  ;;  %7181 = vpow2.f32 %v2041_v46  ;;  %v15081_v19 = vld [vmem:[#allocation47_spill] sm:$0xff] }
 0x356   : > { %7183 = vpow2.f32 %v2045_v48  ;;  %v1967_v60 = vpop.xlane.xlu0 %1966  ;;  %v9821_v10 = vpop.eup %7173 }
 0x357   : > { %7185 = vpow2.f32 %v2047_v40  ;;  %v1970_v38 = vpop.xlane.xlu1 %1969  ;;  %v2009_v18 = vsub.f32 %v9506_v44, %v1967_v60  ;;  %v2010_v39 = vsub.f32 %v9514_v54, %v1967_v60  ;;  %v9823_v37 = vpop.eup %7175 }
 0x358   : > { %7187 = vpow2.f32 %v2043_v62  ;;  %v2011_v0 = vsub.f32 %v15079_v1, %v1970_v38  ;;  %v2012_v14 = vsub.f32 %v15080_v33, %v1970_v38  ;;  %v2100_v44 = vadd.f32 %v9823_v37, %v9821_v10 }
 0x359   : > { %v2049_v30 = vmul.f32 1.442695, %v2009_v18  ;;  %v2051_v48 = vmul.f32 1.442695, %v2010_v39 }
 0x35a   : > { %v2053_v34 = vmul.f32 1.442695, %v2011_v0  ;;  %v2055_v32 = vmul.f32 1.442695, %v2012_v14  ;;  %2101 = vadd.xlane.f32.xlu1 %v2100_v44 }
 0x35b   : > { %7189 = vpow2.f32 %v2049_v30 }
 0x35c   : > { %7191 = vpow2.f32 %v2053_v34 }
 0x35d   : > { %v1973_v57 = vpop.xlane.xlu0 %1972  ;;  %7193 = vpow2.f32 %v2055_v32  ;;  %v9831_v40 = vpop.eup %7177 }
 0x35e   : > { %v2013_v62 = vsub.f32 %v9575_v58, %v1973_v57  ;;  %v2014_v63 = vsub.f32 %v9579_v16, %v1973_v57  ;;  %7195 = vpow2.f32 %v2051_v48  ;;  %v9833_v38 = vpop.eup %7179 }
 0x35f   : > { %v1976_v54 = vpop.xlane.xlu1 %1975  ;;  %v2097_v58 = vadd.f32 %v9833_v38, %v9831_v40 }
 0x360   : > { %v2015_v12 = vsub.f32 %v9591_v41, %v1976_v54  ;;  %v2016_v46 = vsub.f32 %v15081_v19, %v1976_v54  ;;  %v2057_v60 = vmul.f32 1.442695, %v2013_v62  ;;  %v2059_v1 = vmul.f32 1.442695, %v2014_v63 }
 0x361   : > { %v9837_v0 = vpop.eup %7181  ;;  %2098 = vadd.xlane.f32.xlu0 %v2097_v58 }
 0x362   : > { %v2061_v18 = vmul.f32 1.442695, %v2015_v12  ;;  %v2063_v39 = vmul.f32 1.442695, %v2016_v46  ;;  %7197 = vpow2.f32 %v2057_v60 }
 0x363   : > { %v9841_v30 = vpop.eup %7183 }
 0x364   : > { %7199 = vpow2.f32 %v2061_v18  ;;  %v1979_v16 = vpop.xlane.xlu0 %1978  ;;  %v1982_v41 = vpop.xlane.xlu1 %1981 }
 0x365   : > { %7201 = vpow2.f32 %v2063_v39  ;;  %v2017_v33 = vsub.f32 %v9617_v36, %v1979_v16  ;;  %v2018_v14 = vsub.f32 %v9624_v47, %v1979_v16  ;;  %v2019_v34 = vsub.f32 %v9631_v53, %v1982_v41  ;;  %v9845_v48 = vpop.eup %7185 }
 0x366   : > { %7203 = vpow2.f32 %v2059_v1  ;;  %v2020_v32 = vsub.f32 %v9638_v26, %v1982_v41  ;;  %v9847_v44 = vpop.eup %7187  ;;  %v2106_v36 = vadd.f32 %v9845_v48, %v9841_v30 }
 0x367   : > { %v2065_v57 = vmul.f32 1.442695, %v2017_v33  ;;  %v2069_v54 = vmul.f32 1.442695, %v2019_v34  ;;  %v2067_v63 = vmul.f32 1.442695, %v2018_v14  ;;  %v2103_v12 = vadd.f32 %v9847_v44, %v9837_v0 }
 0x368   : > { %v2071_v62 = vmul.f32 1.442695, %v2020_v32  ;;  %2107 = vadd.xlane.f32.xlu1 %v2106_v36  ;;  %v9855_v46 = vpop.eup %7189 }
 0x369   : > { %7205 = vpow2.f32 %v2065_v57  ;;  %2104 = vadd.xlane.f32.xlu0 %v2103_v12  ;;  %v9859_v39 = vpop.eup %7191 }
 0x36a   : > { %v1985_v47 = vpop.xlane.xlu0 %1984  ;;  %7207 = vpow2.f32 %v2069_v54  ;;  %v9861_v58 = vpop.eup %7193 }
 0x36b   : > { %v2021_v26 = vsub.f32 %v9661_v50, %v1985_v47  ;;  %v2022_v19 = vsub.f32 %v9665_v49, %v1985_v47  ;;  %7209 = vpow2.f32 %v2071_v62  ;;  %v9863_v49 = vpop.eup %7195 }
 0x36c   : > { %v1988_v53 = vpop.xlane.xlu1 %1987  ;;  %7211 = vpow2.f32 %v2067_v63  ;;  %v2109_v54 = vadd.f32 %v9863_v49, %v9855_v46 }
 0x36d   : > { %v2023_v60 = vsub.f32 %v9679_v42, %v1988_v53  ;;  %v2024_v18 = vsub.f32 %v9683_v6, %v1988_v53  ;;  %v2073_v1 = vmul.f32 1.442695, %v2021_v26  ;;  %v2075_v50 = vmul.f32 1.442695, %v2022_v19 }
 0x36e   : > { %v1991_v33 = vpop.xlane.xlu0 %1990  ;;  %v2112_v6 = vadd.f32 %v9861_v58, %v9859_v39  ;;  %2110 = vadd.xlane.f32.xlu0 %v2109_v54 }
 0x36f   : > { %v2077_v16 = vmul.f32 1.442695, %v2023_v60  ;;  %v2079_v41 = vmul.f32 1.442695, %v2024_v18  ;;  %7213 = vpow2.f32 %v2073_v1  ;;  %v2025_v34 = vsub.f32 %v9691_v11, %v1991_v33  ;;  %v9873_v62 = vpop.eup %7197 }
 0x370   : > { %v1994_v14 = vpop.xlane.xlu1 %1993  ;;  %v2026_v42 = vsub.f32 %v9696_v20, %v1991_v33  ;;  %2113 = vadd.xlane.f32.xlu1 %v2112_v6 }
 0x371   : > { %7215 = vpow2.f32 %v2077_v16  ;;  %v2027_v32 = vsub.f32 %v9701_v29, %v1994_v14  ;;  %v2028_v57 = vsub.f32 %v9708_v31, %v1994_v14  ;;  %v2081_v63 = vmul.f32 1.442695, %v2025_v34  ;;  %v9875_v36 = vpop.eup %7199 }
 0x372   : > { %7217 = vpow2.f32 %v2079_v41  ;;  %v2083_v47 = vmul.f32 1.442695, %v2026_v42  ;;  %v1997_v12 = vpop.xlane.xlu0 %1996  ;;  %v9877_v53 = vpop.eup %7201 }
 0x373   : > { %7219 = vpow2.f32 %v2075_v50  ;;  %v2085_v20 = vmul.f32 1.442695, %v2027_v32  ;;  %v2087_v11 = vmul.f32 1.442695, %v2028_v57  ;;  %v2029_v31 = vsub.f32 %v9713_v5, %v1997_v12  ;;  %v9881_v19 = vpop.eup %7203 }
 0x374   : > { %7221 = vpow2.f32 %v2081_v63  ;;  %v2000_v29 = vpop.xlane.xlu1 %1999  ;;  %v2030_v26 = vsub.f32 %v9719_v27, %v1997_v12  ;;  %v2118_v1 = vadd.f32 %v9877_v53, %v9875_v36  ;;  %v2115_v41 = vadd.f32 %v9881_v19, %v9873_v62 }
 0x375   : > { %7223 = vpow2.f32 %v2085_v20  ;;  %v2031_v60 = vsub.f32 %v9725_v2, %v2000_v29  ;;  %v2032_v18 = vsub.f32 %v9729_v55, %v2000_v29  ;;  %v2089_v16 = vmul.f32 1.442695, %v2029_v31 }
 0x376   : > { %7225 = vpow2.f32 %v2087_v11  ;;  %v2091_v33 = vmul.f32 1.442695, %v2030_v26  ;;  %2119 = vadd.xlane.f32.xlu1 %v2118_v1  ;;  %v9889_v27 = vpop.eup %7205  ;;  %2116 = vadd.xlane.f32.xlu0 %v2115_v41 }
 0x377   : > { %7227 = vpow2.f32 %v2083_v47  ;;  %v2093_v50 = vmul.f32 1.442695, %v2031_v60  ;;  %v2095_v5 = vmul.f32 1.442695, %v2032_v18  ;;  %15082 = vst [vmem:[#allocation63_spill] sm:$0xff] %v9889_v27  ;;  %v9891_v2 = vpop.eup %7207 }
 0x378   : > { %7229 = vpow2.f32 %v2089_v16  ;;  %15083 = vst [vmem:[#allocation69_spill] sm:$0xff] %v9891_v2  ;;  %v9893_v55 = vpop.eup %7209 }
 0x379   : > { %7231 = vpow2.f32 %v2093_v50  ;;  %15084 = vst [vmem:[#allocation57_spill] sm:$0xff] %v9893_v55  ;;  %v9895_v14 = vpop.eup %7211  ;;  %v2124_v34 = vadd.f32 %v9893_v55, %v9891_v2 }
 0x37a   : > { %7233 = vpow2.f32 %v2095_v5  ;;  %15085 = vst [vmem:[#allocation62_spill] sm:$0xff] %v9895_v14  ;;  %v2121_v42 = vadd.f32 %v9895_v14, %v9889_v27  ;;  %v15141_v14 = vld [vmem:[#allocation16_spill] sm:$0xff] }
 0x37b   : > { %7235 = vpow2.f32 %v2091_v33  ;;  %2125 = vadd.xlane.f32.xlu1 %v2124_v34 }
 0x37c   : > { %v9901_v6 = vpop.eup %7213  ;;  %2122 = vadd.xlane.f32.xlu0 %v2121_v42  ;;  %v7797_v42 = vld [vmem:[%s14419_s1 + $0x8] sm:$0xff]  }
 0x37d   : > { %15086 = vst [vmem:[#allocation70_spill] sm:$0xff] %v9901_v6 }
 0x37e   : > { %v9903_v32 = vpop.eup %7215 }
 0x37f   : > { %15087 = vst [vmem:[#allocation58_spill] sm:$0xff] %v9903_v32  ;;  %v9905_v57 = vpop.eup %7217 }
 0x380   : > { %15088 = vst [vmem:[#allocation61_spill] sm:$0xff] %v9905_v57  ;;  %v9907_v54 = vpop.eup %7219  ;;  %v2130_v63 = vadd.f32 %v9905_v57, %v9903_v32  ;;  %v15114_v32 = vld [vmem:[#allocation6_spill] sm:$0xff] }
 0x381   : > { %15089 = vst [vmem:[#allocation54_spill] sm:$0xff] %v9907_v54  ;;  %v9911_v20 = vpop.eup %7221  ;;  %v2127_v11 = vadd.f32 %v9907_v54, %v9901_v6 }
 0x382   : > { %15090 = vst [vmem:[#allocation65_spill] sm:$0xff] %v9911_v20  ;;  %v9915_v47 = vpop.eup %7223  ;;  %2131 = vadd.xlane.f32.xlu1 %v2130_v63 }
 0x383   : > { %15091 = vst [vmem:[#allocation66_spill] sm:$0xff] %v9915_v47  ;;  %v9917_v12 = vpop.eup %7225  ;;  %2128 = vadd.xlane.f32.xlu0 %v2127_v11 }
 0x384   : > { %15092 = vst [vmem:[#allocation71_spill] sm:$0xff] %v9917_v12  ;;  %v9919_v29 = vpop.eup %7227  ;;  %v2136_v31 = vadd.f32 %v9917_v12, %v9915_v47 }
 0x385   : > { %15093 = vst [vmem:[#allocation72_spill] sm:$0xff] %v9919_v29  ;;  %v9923_v26 = vpop.eup %7229  ;;  %v2133_v60 = vadd.f32 %v9919_v29, %v9911_v20  ;;  %v15113_v29 = vld [vmem:[#allocation5_spill] sm:$0xff] }
 0x386   : > { %15094 = vst [vmem:[#allocation73_spill] sm:$0xff] %v9923_v26  ;;  %v9927_v18 = vpop.eup %7231  ;;  %2137 = vadd.xlane.f32.xlu1 %v2136_v31  ;;  %v7798_v31 = vld [vmem:[%s14419_s1 + $0x10] sm:$0xff]  }
 0x387   : > { %15095 = vst [vmem:[#allocation74_spill] sm:$0xff] %v9927_v18  ;;  %v9929_v1 = vpop.eup %7233  ;;  %2134 = vadd.xlane.f32.xlu0 %v2133_v60 }
 0x388   : > { %15096 = vst [vmem:[#allocation42_spill] sm:$0xff] %v9929_v1  ;;  %v9931_v16 = vpop.eup %7235  ;;  %v2142_v41 = vadd.f32 %v9929_v1, %v9927_v18 }
 0x389   : > { %15097 = vst [vmem:[#allocation43_spill] sm:$0xff] %v9931_v16  ;;  %v2139_v50 = vadd.f32 %v9931_v16, %v9923_v26 }
 0x38a   : > { %2143 = vadd.xlane.f32.xlu1 %v2142_v41  ;;  %v7799_v41 = vld [vmem:[%s14419_s1] sm:$0xff]  }
 0x38b   : > { %2140 = vadd.xlane.f32.xlu0 %v2139_v50 }
 0x393   : > { %v9937_v5 = vpop.f32.mrf.mxu1 }
 0x394   : > { %15098 = vst [vmem:[#allocation47_spill] sm:$0xff] %v9937_v5 }
 0x395   : > { %v9939_v33 = vpop.f32.mrf.mxu1 }
 0x396   : > { %15099 = vst [vmem:[#allocation75_spill] sm:$0xff] %v9939_v33 }
 0x397   : > { %v9941_v34 = vpop.f32.mrf.mxu1 }
 0x398   : > { %15100 = vst [vmem:[#allocation76_spill] sm:$0xff] %v9941_v34 }
 0x399   : > { %v9947_v63 = vpop.f32.mrf.mxu1 }
 0x39a   : > { %15101 = vst [vmem:[#allocation77_spill] sm:$0xff] %v9947_v63 }
 0x39b   : > { %2211 = vrot.lane.b32.xlu1 %v7797_v42, %s8008_s6  ;;  %v7800_v42 = vld [vmem:[%s14419_s1 + $0x20] sm:$0xff]  }
 0x39c   : > { %v9949_v11 = vpop.f32.mrf.mxu1 }
 0x39d   : > { %15102 = vst [vmem:[#allocation78_spill] sm:$0xff] %v9949_v11 }
 0x39e   : > { %v9955_v60 = vpop.f32.mrf.mxu1 }
 0x39f   : > { %2213 = vrot.lane.b32.xlu1 %v7798_v31, %s8008_s6  ;;  %15103 = vst [vmem:[#allocation79_spill] sm:$0xff] %v9955_v60  ;;  %v7801_v31 = vld [vmem:[%s14419_s1 + $0x18] sm:$0xff]  }
 0x3a0   : > { %v9961_v50 = vpop.f32.mrf.mxu1 }
 0x3a1   : > { %2209 = vrot.lane.b32.xlu0 %v7799_v41, %s8008_s6  ;;  %15104 = vst [vmem:[#allocation80_spill] sm:$0xff] %v9961_v50  ;;  %v7802_v41 = vld [vmem:[%s14419_s1 + $0x30] sm:$0xff]  }
 0x3a2   : > { %v9967_v45 = vpop.f32.mrf.mxu1 }
 0x3a3   : > { %2217 = vrot.lane.b32.xlu1 %v7800_v42, %s8008_s6  ;;  %15105 = vst [vmem:[#allocation81_spill] sm:$0xff] %v9967_v45  ;;  %v7803_v42 = vld [vmem:[%s14419_s1 + $0x28] sm:$0xff]  }
 0x3a5   : > { %2215 = vrot.lane.b32.xlu0 %v7801_v31, %s8008_s6  ;;  %v7804_v31 = vld [vmem:[%s14419_s1 + $0x40] sm:$0xff]  }
 0x3a7   : > { %2221 = vrot.lane.b32.xlu1 %v7802_v41, %s8008_s6  ;;  %v7806_v41 = vld [vmem:[%s14419_s1 + $0x50] sm:$0xff]  }
 0x3a8   : > { %v6459_v61 = vpop.f32.mrf.mxu1 }
 0x3a9   : > { %2219 = vrot.lane.b32.xlu0 %v7803_v42, %s8008_s6 }
 0x3aa   : > { %v6460_v7 = vpop.f32.mrf.mxu1 }
 0x3ab   : > { %v9977_v28 = vadd.f32 %v6460_v7, %v6459_v61  ;;  %2225 = vrot.lane.b32.xlu1 %v7804_v31, %s8008_s6  ;;  %v7805_v7 = vld [vmem:[%s14419_s1 + $0x38] sm:$0xff]   ;;  %v7807_v31 = vld [vmem:[%s14419_s1 + $0x48] sm:$0xff]  }
 0x3ac   : > { %v9983_v24 = vpop.f32.mrf.mxu1 }
 0x3ad   : > { %15106 = vst [vmem:[#allocation82_spill] sm:$0xff] %v9977_v28  ;;  %15107 = vst [vmem:[#allocation83_spill] sm:$0xff] %v9983_v24  ;;  %2223 = vrot.lane.b32.xlu0 %v7805_v7, %s8008_s6  ;;  %v7808_v7 = vld [vmem:[%s14419_s1 + $0x60] sm:$0xff]  }
 0x3ae   : > { %v9989_v17 = vpop.f32.mrf.mxu1 }
 0x3af   : > { %15108 = vst [vmem:[#allocation84_spill] sm:$0xff] %v9989_v17  ;;  %2229 = vrot.lane.b32.xlu1 %v7806_v41, %s8008_s6  ;;  %v7809_v41 = vld [vmem:[%s14419_s1 + $0x58] sm:$0xff]  }
 0x3b0   : > { %v6465_v61 = vpop.f32.mrf.mxu1 }
 0x3b1   : > { %2227 = vrot.lane.b32.xlu0 %v7807_v31, %s8008_s6  ;;  %v7812_v31 = vld [vmem:[%s8098_s5] sm:$0xff] }
 0x3b2   : > { %v6466_v42 = vpop.f32.mrf.mxu1 }
 0x3b3   : > { %v9999_v21 = vadd.f32 %v6466_v42, %v6465_v61  ;;  %2233 = vrot.lane.b32.xlu1 %v7808_v7, %s8008_s6  ;;  %v7810_v61 = vld [vmem:[%s14419_s1 + $0x70] sm:$0xff]   ;;  %v7811_v42 = vld [vmem:[%s14419_s1 + $0x68] sm:$0xff]   ;;  %v7813_v7 = vld [vmem:[%s14419_s1 + $0x78] sm:$0xff]  }
 0x3b5   : > { %15109 = vst [vmem:[#allocation85_spill] sm:$0xff] %v9999_v21  ;;  %2231 = vrot.lane.b32.xlu0 %v7809_v41, %s8008_s6  ;;  %v7814_v41 = vld [vmem:[%s8098_s5 + $0x10] sm:$0xff] }
 0x3b6   : > { %v7827_v21 = vld [vmem:[%s8098_s5 + $0x70] sm:$0xff] }
 0x3b7   : > { %2237 = vrot.lane.b32.xlu1 %v7810_v61, %s8008_s6  ;;  %v7815_v61 = vld [vmem:[%s8098_s5 + $0x8] sm:$0xff] }
 0x3b9   : > { %2235 = vrot.lane.b32.xlu0 %v7811_v42, %s8008_s6  ;;  %v7817_v42 = vld [vmem:[%s8098_s5 + $0x20] sm:$0xff] }
 0x3bb   : > { %2357 = vperm.xlu1 %6941, %v7812_v31   ;;  %v7818_v31 = vld [vmem:[%s8098_s5 + $0x28] sm:$0xff] }
 0x3bd   : > { %2239 = vrot.lane.b32.xlu0 %v7813_v7, %s8008_s6  ;;  %v7821_v7 = vld [vmem:[%s8098_s5 + $0x40] sm:$0xff] }
 0x3bf   : > { %2365 = vperm.xlu1 %6941, %v7814_v41   ;;  %v7822_v41 = vld [vmem:[%s8098_s5 + $0x48] sm:$0xff] }
 0x3c1   : > { %2361 = vperm.xlu0 %6942, %v7815_v61   ;;  %v7823_v61 = vld [vmem:[%s8098_s5 + $0x50] sm:$0xff] }
 0x3c3   : > { %2369 = vperm.xlu1 %6941, %v7816_v8   ;;  %v7825_v8 = vld [vmem:[%s8098_s5 + $0x60] sm:$0xff] }
 0x3c5   : > { %2373 = vperm.xlu0 %6942, %v7817_v42   ;;  %v7826_v42 = vld [vmem:[%s8098_s5 + $0x68] sm:$0xff] }
 0x3c7   : > { %2377 = vperm.xlu1 %6941, %v7818_v31   ;;  %v7828_v31 = vld [vmem:[%s8098_s5 + $0x78] sm:$0xff] }
 0x3c9   : > { %2381 = vperm.xlu0 %6942, %v7819_v51  }
 0x3cb   : > { %2385 = vperm.xlu1 %6941, %v7820_v3  }
 0x3cd   : > { %2389 = vperm.xlu0 %6942, %v7821_v7  }
 0x3cf   : > { %2393 = vperm.xlu1 %6941, %v7822_v41  }
 0x3d1   : > { %2397 = vperm.xlu0 %6942, %v7823_v61  }
 0x3d3   : > { %2401 = vperm.xlu1 %6941, %v7824_v13  }
 0x3d5   : > { %2405 = vperm.xlu0 %6942, %v7825_v8  }
 0x3d7   : > { %2409 = vperm.xlu1 %6941, %v7826_v42  }
 0x3d9   : > { %2413 = vperm.xlu0 %6942, %v7827_v21  }
 0x3db   : > { %2417 = vperm.xlu1 %6941, %v7828_v31  }
 0x3e3   : > { %v2102_v51 = vpop.xlane.xlu1 %2101 }
 0x3e4   : > { %7237 = vrcp.f32 %v2102_v51 }
 0x3ea   : > { %v2099_v28 = vpop.xlane.xlu0 %2098 }
 0x3eb   : > { %7239 = vrcp.f32 %v2099_v28 }
 0x3f1   : > { %v2108_v3 = vpop.xlane.xlu1 %2107  ;;  %v7238_v63 = vpop.eup %7237 }
 0x3f2   : > { %v2105_v7 = vpop.xlane.xlu0 %2104  ;;  %v2164_v61 = vmul.f32 %v7238_v63, %v9823_v37  ;;  %v10043_v13 = vmul.f32 %v7238_v63, %v9821_v10  ;;  %7241 = vrcp.f32 %v2108_v3  ;;  %v6339_v3 = vld [vmem:[%s14421_s3 + $0x3] ss:$8 sm:$0x3] }
 0x3f3   : > { %7243 = vrcp.f32 %v2105_v7 }
 0x3f7   : > { %v2111_v34 = vpop.xlane.xlu0 %2110 }
 0x3f8   : > { %v7240_v8 = vpop.eup %7239 }
 0x3f9   : > { %v2114_v41 = vpop.xlane.xlu1 %2113  ;;  %v2162_v42 = vmul.f32 %v7240_v8, %v9833_v38  ;;  %v10047_v21 = vmul.f32 %v7240_v8, %v9831_v40 }
 0x3fa   : > { %7245 = vrcp.f32 %v2114_v41  ;;  %v10085_v41 = vrot.slane %v6339_v3, %v15113_v29 }
 0x3fb   : > { %v2194_v17 = vpack.c.bf16 %v2164_v61, %v2162_v42  ;;  %7247 = vrcp.f32 %v2111_v34  ;;  %v10088_v34 = vrot.slane %v6339_v3, %v15114_v32 }
 0x3fd   : > { %2289 = vmatprep.mubr.bf16.mxu0 %v2194_v17 }
 0x3ff   : > { %v2120_v31 = vpop.xlane.xlu1 %2119  ;;  %v2117_v51 = vpop.xlane.xlu0 %2116 }
 0x400   : > { %7249 = vrcp.f32 %v2120_v31  ;;  %v7242_v47 = vpop.eup %7241 }
 0x401   : > { %7251 = vrcp.f32 %v2117_v51  ;;  %v7244_v7 = vpop.eup %7243  ;;  %v10094_v6 = vmul.f32 %v7242_v47, %v9845_v48  ;;  %v10100_v54 = vmul.f32 %v7242_v47, %v9841_v30 }
 0x402   : > { %v10091_v51 = vmul.f32 %v7244_v7, %v9847_v44  ;;  %v10097_v57 = vmul.f32 %v7244_v7, %v9837_v0 }
 0x404   : > { %v2126_v24 = vpop.xlane.xlu1 %2125 }
 0x405   : > { %v2123_v45 = vpop.xlane.xlu0 %2122  ;;  %7253 = vrcp.f32 %v2126_v24 }
 0x406   : > { %7255 = vrcp.f32 %v2123_v45 }
 0x40b   : > { %v2132_v50 = vpop.xlane.xlu1 %2131 }
 0x40c   : > { %v10051_v37 = vpop.xlane.xlu0 %2128  ;;  %7257 = vrcp.f32 %v2132_v50 }
 0x40d   : > { %7259 = vrcp.f32 %v10051_v37 }
 0x40f   : > { %v10053_v10 = vpop.xlane.xlu1 %2137 }
 0x410   : > { %v10055_v63 = vpop.xlane.xlu0 %2134  ;;  %7261 = vrcp.f32 %v10053_v10 }
 0x411   : > { %15110 = vst [vmem:[#allocation86_spill] sm:$0xff] %v10055_v63  ;;  %v15144_v63 = vld [vmem:[#allocation13_spill] sm:$0xff] }
 0x413   : > { %v10057_v38 = vpop.xlane.xlu1 %2143 }
 0x414   : > { %15111 = vst [vmem:[#allocation87_spill] sm:$0xff] %v10057_v38  ;;  %v10059_v40 = vpop.xlane.xlu0 %2140 }
 0x415   : > { %15112 = vst [vmem:[#allocation88_spill] sm:$0xff] %v10059_v40  ;;  %v7246_v40 = vpop.eup %7245 }
 0x416   : > { %v7248_v29 = vpop.eup %7247  ;;  %v10116_v24 = vmul.f32 %v7246_v40, %v9861_v58 }
 0x417   : > { %v10061_v8 = vpop.permute.xlu1 %2211  ;;  %v10102_v2 = vpop.eup %7249  ;;  %v10113_v47 = vmul.f32 %v7248_v29, %v9863_v49 }
 0x418   : > { %v10063_v61 = vpop.permute.xlu0 %2209  ;;  %15115 = vst [vmem:[#allocation89_spill] sm:$0xff] %v10102_v2  ;;  %v10104_v44 = vpop.eup %7251  ;;  %v10130_v58 = vmul.f32 %v10102_v2, %v9877_v53 }
 0x419   : > { %v10126_v45 = vmul.f32 %v10104_v44, %v9881_v19  ;;  %v15119_v19 = vld [vmem:[#allocation8_spill] sm:$0xff] }
 0x41a   : > { %vm15120_vm9 = vcmp.gt.f32.partialorder %v15119_v19, 0.0 }
 0x41b   : > { %v10065_v42 = vpop.permute.xlu1 %2213 }
 0x41c   : > { %v10067_v17 = vpop.permute.xlu0 %2215 }
 0x41f   : > { %v10069_v28 = vpop.permute.xlu1 %2217 }
 0x420   : > { %v10071_v60 = vpop.permute.xlu0 %2219 }
 0x423   : > { %v2222_v11 = vpop.permute.xlu1 %2221 }
 0x424   : > { %v2224_v33 = vpop.permute.xlu0 %2223 }
 0x427   : > { %v10073_v5 = vpop.permute.xlu1 %2225 }
 0x428   : > { %v10075_v18 = vpop.permute.xlu0 %2227 }
 0x42b   : > { %v10077_v26 = vpop.permute.xlu1 %2229 }
 0x42c   : > { %v10079_v1 = vpop.permute.xlu0 %2231 }
 0x42f   : > { %v2234_v16 = vpop.permute.xlu1 %2233 }
 0x430   : > { %v2236_v20 = vpop.permute.xlu0 %2235 }
 0x433   : > { %v2238_v12 = vpop.permute.xlu1 %2237 }
 0x434   : > { %v2240_v31 = vpop.permute.xlu0 %2239 }
 0x435   : > { %6495 = vmatprep.subr.bf16.mxu0 %v2240_v31 }
 0x436   : > { %6496 = vmatpush3.bf16.msra.mxu0 %v2224_v33 }
 0x437   : > { %6497 = vmatprep.subr.bf16.mxu0 %v2238_v12  ;;  %v2358_v3 = vpop.permute.xlu1 %2357  ;;  %v10119_v12 = vmul.f32 %v7246_v40, %v9859_v39 }
 0x438   : > { %v2431_v48 = vadd.f32 %v10085_v41, %v2358_v3  ;;  %v2432_v32 = vadd.f32 %v10088_v34, %v2358_v3  ;;  %v10122_v3 = vmul.f32 %v7248_v29, %v9855_v46  ;;  %v15116_v29 = vld [vmem:[#allocation7_spill] sm:$0xff] }
 0x439   : > { %vm15117_vm11 = vcmp.gt.f32.partialorder %v15116_v29, 0.0 }
 0x43a   : > { %vm2463_vm2 = vcmp.ge.f32.partialorder %v2431_v48, 0.0  ;;  %vm2464_vm6 = vcmp.ge.f32.partialorder %v2432_v32, 0.0  ;;  %v2495_v33 = vmul.f32 0.2, %v2431_v48  ;;  %v2496_v7 = vmul.f32 0.2, %v2432_v32  ;;  %6498 = vmatpush3.bf16.msra.mxu0 %v2222_v11 }
 0x43b   : > { %6499 = vmatprep.subr.bf16.mxu0 %v2236_v20  ;;  %v2366_v31 = vpop.permute.xlu1 %2365 }
 0x43c   : > { %v2435_v39 = vadd.f32 %v10085_v41, %v2366_v31  ;;  %v2436_v49 = vadd.f32 %v10088_v34, %v2366_v31  ;;  %v2362_v40 = vpop.permute.xlu0 %2361  ;;  %v2527_v11 = vsel %vm2463_vm2, %v2431_v48, %v2495_v33  ;;  %v2528_v50 = vsel %vm2464_vm6, %v2432_v32, %v2496_v7 }
 0x43d   : > { %v2433_v20 = vadd.f32 %v10085_v41, %v2362_v40  ;;  %v2434_v46 = vadd.f32 %v10088_v34, %v2362_v40  ;;  %v10138_v30 = vsel %vm15117_vm11, %v2527_v11, -9e+15  ;;  %v10142_v0 = vsel %vm15120_vm9, %v2528_v50, -9e+15 }
 0x43e   : > { %15118 = vst [vmem:[#allocation90_spill] sm:$0xff] %v10138_v30  ;;  %15121 = vst [vmem:[#allocation91_spill] sm:$0xff] %v10142_v0  ;;  %vm2467_vm4 = vcmp.ge.f32.partialorder %v2435_v39, 0.0  ;;  %vm2468_vm13 = vcmp.ge.f32.partialorder %v2436_v49, 0.0  ;;  %v2499_v53 = vmul.f32 0.2, %v2435_v39  ;;  %6500 = vmatpush3.bf16.msra.mxu0 %v10071_v60  ;;  %v2591_v60 = vmax.f32 %v10138_v30, %v10142_v0 }
 0x43f   : > { %v2500_v27 = vmul.f32 0.2, %v2436_v49  ;;  %6501 = vmatprep.subr.bf16.mxu0 %v2234_v16  ;;  %v2370_v32 = vpop.permute.xlu1 %2369  ;;  %v2497_v37 = vmul.f32 0.2, %v2433_v20  ;;  %v2498_v50 = vmul.f32 0.2, %v2434_v46 }
 0x440   : > { %v2437_v31 = vadd.f32 %v10085_v41, %v2370_v32  ;;  %v10154_v40 = vadd.f32 %v10088_v34, %v2370_v32  ;;  %v2374_v11 = vpop.permute.xlu0 %2373  ;;  %v2531_v16 = vsel %vm2467_vm4, %v2435_v39, %v2499_v53  ;;  %vm2465_vm15 = vcmp.ge.f32.partialorder %v2433_v20, 0.0  ;;  %2592 = vmax.xlane.f32.xlu0 %v2591_v60  ;;  %v15122_v32 = vld [vmem:[#allocation11_spill] sm:$0xff] }
 0x441   : > { %v10159_v48 = vadd.f32 %v10085_v41, %v2374_v11  ;;  %v2532_v33 = vsel %vm2468_vm13, %v2436_v49, %v2500_v27  ;;  %vm2466_vm0 = vcmp.ge.f32.partialorder %v2434_v46, 0.0  ;;  %v2440_v7 = vadd.f32 %v10088_v34, %v2374_v11  ;;  %v10171_v49 = vpop.eup %7253 }
 0x442   : > { %6502 = vmatpush3.bf16.msra.mxu0 %v10069_v28  ;;  %vm15123_vm10 = vcmp.gt.f32.partialorder %v15122_v32, 0.0  ;;  %vm2469_vm14 = vcmp.ge.f32.partialorder %v2437_v31, 0.0  ;;  %vm2470_vm7 = vcmp.ge.f32.partialorder %v10154_v40, 0.0  ;;  %v2501_v39 = vmul.f32 0.2, %v2437_v31  ;;  %15125 = vst [vmem:[#allocation93_spill] sm:$0xff] %v10171_v49  ;;  %v10191_v38 = vpop.eup %7255 }
 0x443   : > { %v10166_v19 = vsel %vm15123_vm10, %v2531_v16, -9e+15  ;;  %v2502_v53 = vmul.f32 0.2, %v10154_v40  ;;  %6503 = vmatprep.subr.bf16.mxu0 %v10079_v1  ;;  %v2378_v27 = vpop.permute.xlu1 %2377  ;;  %vm2471_vm1 = vcmp.ge.f32.partialorder %v10159_v48, 0.0  ;;  %v15126_v16 = vld [vmem:[#allocation12_spill] sm:$0xff]  ;;  %v2529_v0 = vsel %vm2465_vm15, %v2433_v20, %v2497_v37  ;;  %v10203_v37 = vpop.eup %7257 }
 0x444   : > { %15124 = vst [vmem:[#allocation92_spill] sm:$0xff] %v10166_v19  ;;  %v10175_v11 = vadd.f32 %v10085_v41, %v2378_v27  ;;  %v10178_v28 = vadd.f32 %v10088_v34, %v2378_v27  ;;  %v2382_v60 = vpop.permute.xlu0 %2381  ;;  %vm15127_vm8 = vcmp.gt.f32.partialorder %v15126_v16, 0.0  ;;  %v2530_v30 = vsel %vm2466_vm0, %v2434_v46, %v2498_v50  ;;  %15129 = vst [vmem:[#allocation95_spill] sm:$0xff] %v10191_v38  ;;  %v15131_v50 = vld [vmem:[#allocation9_spill] sm:$0xff] }
 0x445   : > { %v10182_v32 = vsel %vm15127_vm8, %v2532_v33, -9e+15  ;;  %v10185_v29 = vadd.f32 %v10085_v41, %v2382_v60  ;;  %vm2472_vm5 = vcmp.ge.f32.partialorder %v2440_v7, 0.0  ;;  %v2503_v27 = vmul.f32 0.2, %v10159_v48  ;;  %15130 = vst [vmem:[#allocation96_spill] sm:$0xff] %v10203_v37 }
 0x446   : > { %15128 = vst [vmem:[#allocation94_spill] sm:$0xff] %v10182_v32  ;;  %v2597_v1 = vmax.f32 %v10166_v19, %v10182_v32  ;;  %v2504_v49 = vmul.f32 0.2, %v2440_v7  ;;  %v10195_v16 = vadd.f32 %v10088_v34, %v2382_v60  ;;  %6504 = vmatpush3.bf16.msra.mxu0 %v10067_v17  ;;  %vm2473_vm2 = vcmp.ge.f32.partialorder %v10175_v11, 0.0  ;;  %v15134_v32 = vld [vmem:[#allocation10_spill] sm:$0xff] }
 0x447   : > { %vm2474_vm6 = vcmp.ge.f32.partialorder %v10178_v28, 0.0  ;;  %v2505_v33 = vmul.f32 0.2, %v10175_v11  ;;  %v2506_v20 = vmul.f32 0.2, %v10178_v28  ;;  %6505 = vmatprep.subr.bf16.mxu0 %v10077_v26  ;;  %v2386_v46 = vpop.permute.xlu1 %2385  ;;  %vm15132_vm11 = vcmp.gt.f32.partialorder %v15131_v50, 0.0 }
 0x448   : > { %2598 = vmax.xlane.f32.xlu0 %v2597_v1  ;;  %v10207_v60 = vsel %vm15132_vm11, %v2529_v0, -9e+15  ;;  %vm15135_vm9 = vcmp.gt.f32.partialorder %v15134_v32, 0.0  ;;  %v10214_v19 = vadd.f32 %v10085_v41, %v2386_v46  ;;  %v10217_v55 = vadd.f32 %v10088_v34, %v2386_v46  ;;  %v2390_v1 = vpop.permute.xlu0 %2389 }
 0x449   : > { %15133 = vst [vmem:[#allocation97_spill] sm:$0xff] %v10207_v60  ;;  %v10211_v17 = vsel %vm15135_vm9, %v2530_v30, -9e+15  ;;  %vm2475_vm4 = vcmp.ge.f32.partialorder %v10185_v29, 0.0  ;;  %v10223_v50 = vadd.f32 %v10085_v41, %v2390_v1  ;;  %v2533_v0 = vsel %vm2469_vm14, %v2437_v31, %v2501_v39 }
 0x44a   : > { %15136 = vst [vmem:[#allocation98_spill] sm:$0xff] %v10211_v17  ;;  %v2594_v26 = vmax.f32 %v10207_v60, %v10211_v17  ;;  %vm2476_vm13 = vcmp.ge.f32.partialorder %v10195_v16, 0.0  ;;  %v2507_v30 = vmul.f32 0.2, %v10185_v29  ;;  %v2508_v32 = vmul.f32 0.2, %v10195_v16  ;;  %6506 = vmatpush3.bf16.msra.mxu0 %v10065_v42  ;;  %v10240_v60 = vpop.eup %7259 }
 0x44b   : > { %v10230_v46 = vadd.f32 %v10088_v34, %v2390_v1  ;;  %vm2477_vm15 = vcmp.ge.f32.partialorder %v10214_v19, 0.0  ;;  %vm2478_vm0 = vcmp.ge.f32.partialorder %v10217_v55, 0.0  ;;  %v2509_v17 = vmul.f32 0.2, %v10214_v19  ;;  %6507 = vmatprep.subr.bf16.mxu0 %v10075_v18  ;;  %v2394_v39 = vpop.permute.xlu1 %2393  ;;  %15137 = vst [vmem:[#allocation99_spill] sm:$0xff] %v10240_v60  ;;  %v15138_v1 = vld [vmem:[#allocation15_spill] sm:$0xff] }
 0x44c   : > { %2595 = vmax.xlane.f32.xlu1 %v2594_v26  ;;  %v10237_v31 = vmul.f32 0.2, %v10217_v55  ;;  %vm2479_vm10 = vcmp.ge.f32.partialorder %v10223_v50, 0.0  ;;  %v2534_v42 = vsel %vm2470_vm7, %v10154_v40, %v2502_v53  ;;  %vm15139_vm14 = vcmp.gt.f32.partialorder %v15138_v1, 0.0  ;;  %v2398_v18 = vpop.permute.xlu0 %2397  ;;  %v15146_v40 = vld [vmem:[#allocation14_spill] sm:$0xff] }
 0x44d   : > { %v10248_v26 = vsel %vm15139_vm14, %v2533_v0, -9e+15  ;;  %v2535_v37 = vsel %vm2471_vm1, %v10159_v48, %v2503_v27  ;;  %v2536_v38 = vsel %vm2472_vm5, %v2440_v7, %v2504_v49  ;;  %vm15142_vm8 = vcmp.gt.f32.partialorder %v15141_v14, 0.0 }
 0x44e   : > { %15140 = vst [vmem:[#allocation100_spill] sm:$0xff] %v10248_v26  ;;  %v10256_v60 = vsel %vm15142_vm8, %v2534_v42, -9e+15  ;;  %vm15145_vm11 = vcmp.gt.f32.partialorder %v15144_v63, 0.0  ;;  %vm15147_vm7 = vcmp.gt.f32.partialorder %v15146_v40, 0.0  ;;  %v10267_v0 = vadd.f32 %v10085_v41, %v2394_v39  ;;  %6508 = vmatpush3.bf16.msra.mxu0 %v10061_v8 }
 0x44f   : > { %15143 = vst [vmem:[#allocation101_spill] sm:$0xff] %v10256_v60  ;;  %v10260_v2 = vsel %vm15145_vm11, %v2535_v37, -9e+15  ;;  %v10264_v53 = vsel %vm15147_vm7, %v2536_v38, -9e+15  ;;  %v2600_v48 = vmax.f32 %v10248_v26, %v10256_v60  ;;  %v10274_v49 = vadd.f32 %v10088_v34, %v2394_v39  ;;  %6509 = vmatprep.subr.bf16.mxu0 %v10073_v5  ;;  %v2402_v39 = vpop.permute.xlu1 %2401 }
 0x450   : > { %v2603_v7 = vmax.f32 %v10260_v2, %v10264_v53  ;;  %v10277_v27 = vadd.f32 %v10085_v41, %v2398_v18  ;;  %v2511_v38 = vmul.f32 0.2, %v10223_v50  ;;  %v2512_v37 = vmul.f32 0.2, %v10230_v46  ;;  %v2406_v14 = vpop.permute.xlu0 %2405 }
 0x451   : > { %v10283_v42 = vadd.f32 %v10088_v34, %v2398_v18  ;;  %v2537_v40 = vsel %vm2473_vm2, %v10175_v11, %v2505_v33  ;;  %vm2480_vm1 = vcmp.ge.f32.partialorder %v10230_v46, 0.0  ;;  %2601 = vmax.xlane.f32.xlu0 %v2600_v48  ;;  %vm2481_vm5 = vcmp.ge.f32.partialorder %v10267_v0, 0.0  ;;  %v15148_v33 = vld [vmem:[#allocation17_spill] sm:$0xff] }
 0x452   : > { %2604 = vmax.xlane.f32.xlu1 %v2603_v7  ;;  %v2513_v8 = vmul.f32 0.2, %v10267_v0  ;;  %v2514_v63 = vmul.f32 0.2, %v10274_v49  ;;  %vm2482_vm9 = vcmp.ge.f32.partialorder %v10274_v49, 0.0  ;;  %v2538_v5 = vsel %vm2474_vm6, %v10178_v28, %v2506_v20  ;;  %v15150_v7 = vld [vmem:[#allocation18_spill] sm:$0xff]  ;;  %6510 = vmatpush3.bf16.msra.mxu0 %v10063_v61 }
 0x453   : > { %v2515_v18 = vmul.f32 0.2, %v10277_v27  ;;  %v2516_v11 = vmul.f32 0.2, %v10283_v42  ;;  %vm15149_vm2 = vcmp.gt.f32.partialorder %v15148_v33, 0.0  ;;  %vm2483_vm14 = vcmp.ge.f32.partialorder %v10277_v27, 0.0 }
 0x454   : > { %v10301_v48 = vsel %vm15149_vm2, %v2537_v40, -9e+15  ;;  %vm2484_vm8 = vcmp.ge.f32.partialorder %v10283_v42, 0.0  ;;  %vm15151_vm11 = vcmp.gt.f32.partialorder %v15150_v7, 0.0  ;;  %v2539_v60 = vsel %vm2475_vm4, %v10185_v29, %v2507_v30  ;;  %v15152_v33 = vld [vmem:[#allocation19_spill] sm:$0xff]  ;;  %v15155_v7 = vld [vmem:[#allocation20_spill] sm:$0xff]  ;;  %v2410_v30 = vpop.permute.xlu1 %2409 }
 0x455   : > { %v10307_v1 = vsel %vm15151_vm11, %v2538_v5, -9e+15  ;;  %v2540_v28 = vsel %vm2476_vm13, %v10195_v16, %v2508_v32  ;;  %v10316_v20 = vadd.f32 %v10085_v41, %v2402_v39  ;;  %vm15153_vm6 = vcmp.gt.f32.partialorder %v15152_v33, 0.0 }
 0x456   : > { %v2606_v40 = vmax.f32 %v10301_v48, %v10307_v1  ;;  %v10323_v5 = vsel %vm15153_vm6, %v2539_v60, -9e+15  ;;  %vm15156_vm7 = vcmp.gt.f32.partialorder %v15155_v7, 0.0  ;;  %v10330_v29 = vadd.f32 %v10088_v34, %v2402_v39 }
 0x457   : > { %15154 = vst [vmem:[#allocation102_spill] sm:$0xff] %v10323_v5  ;;  %v10327_v26 = vsel %vm15156_vm7, %v2540_v28, -9e+15  ;;  %vm2485_vm4 = vcmp.ge.f32.partialorder %v10316_v20, 0.0  ;;  %v2517_v61 = vmul.f32 0.2, %v10316_v20  ;;  %v10337_v16 = vadd.f32 %v10085_v41, %v2406_v14 }
 0x458   : > { %15157 = vst [vmem:[#allocation103_spill] sm:$0xff] %v10327_v26  ;;  %v2609_v32 = vmax.f32 %v10323_v5, %v10327_v26  ;;  %2607 = vmax.xlane.f32.xlu0 %v2606_v40  ;;  %vm2486_vm13 = vcmp.ge.f32.partialorder %v10330_v29, 0.0  ;;  %v2518_v60 = vmul.f32 0.2, %v10330_v29  ;;  %v2456_v28 = vadd.f32 %v10088_v34, %v2406_v14  ;;  %v15159_v26 = vld [vmem:[#allocation23_spill] sm:$0xff]  ;;  %v2414_v5 = vpop.permute.xlu0 %2413 }
 0x459   : > { %v2541_v39 = vsel %vm2477_vm15, %v10214_v19, %v2509_v17  ;;  %v15158_v7 = vpack.c.bf16 %v10043_v13, %v10047_v21  ;;  %vm2487_vm2 = vcmp.ge.f32.partialorder %v10337_v16, 0.0  ;;  %v2519_v33 = vmul.f32 0.2, %v10337_v16  ;;  %v15162_v21 = vld [vmem:[#allocation24_spill] sm:$0xff] }
 0x45a   : > { %2610 = vmax.xlane.f32.xlu1 %v2609_v32  ;;  %v2542_v40 = vsel %vm2478_vm0, %v10217_v55, %v10237_v31  ;;  %vm15160_vm11 = vcmp.gt.f32.partialorder %v15159_v26, 0.0  ;;  %v15161_v19 = vpack.c.bf16 %v10094_v6, %v10091_v51  ;;  %vm2488_vm15 = vcmp.ge.f32.partialorder %v2456_v28, 0.0  ;;  %v15164_v32 = vld [vmem:[#allocation21_spill] sm:$0xff] }
 0x45b   : > { %2290 = vmatmul.mubr.bf16.vlgmr.msra.gmra.mxu0 %v15158_v7  ;;  %v10356_v14 = vsel %vm15160_vm11, %v2541_v39, -9e+15  ;;  %v2520_v13 = vmul.f32 0.2, %v2456_v28  ;;  %vm15163_vm6 = vcmp.gt.f32.partialorder %v15162_v21, 0.0  ;;  %v2543_v7 = vsel %vm2479_vm10, %v10223_v50, %v2511_v38  ;;  %v15166_v39 = vld [vmem:[#allocation22_spill] sm:$0xff] }
 0x45c   : > { %2297 = vmatprep.mubr.bf16.mxu0 %v15161_v19  ;;  %v10363_v17 = vsel %vm15163_vm6, %v2542_v40, -9e+15  ;;  %v2544_v31 = vsel %vm2480_vm1, %v10230_v46, %v2512_v37  ;;  %vm15165_vm0 = vcmp.gt.f32.partialorder %v15164_v32, 0.0  ;;  %v2457_v51 = vadd.f32 %v10085_v41, %v2410_v30  ;;  %v2418_v32 = vpop.permute.xlu1 %2417 }
 0x45d   : > { %v2612_v55 = vmax.f32 %v10356_v14, %v10363_v17  ;;  %v10375_v6 = vsel %vm15165_vm0, %v2543_v7, -9e+15  ;;  %vm15167_vm7 = vcmp.gt.f32.partialorder %v15166_v39, 0.0  ;;  %v2458_v19 = vadd.f32 %v10088_v34, %v2410_v30 }
 0x45e   : > { %v10380_v40 = vsel %vm15167_vm7, %v2544_v31, -9e+15  ;;  %v2459_v50 = vadd.f32 %v10085_v41, %v2414_v5  ;;  %v2460_v38 = vadd.f32 %v10088_v34, %v2414_v5  ;;  %vm2489_vm10 = vcmp.ge.f32.partialorder %v2457_v51, 0.0 }
 0x45f   : > { %2613 = vmax.xlane.f32.xlu0 %v2612_v55  ;;  %v2615_v46 = vmax.f32 %v10375_v6, %v10380_v40  ;;  %v2521_v37 = vmul.f32 0.2, %v2457_v51  ;;  %v2545_v7 = vsel %vm2481_vm5, %v10267_v0, %v2513_v8  ;;  %vm2490_vm1 = vcmp.ge.f32.partialorder %v2458_v19, 0.0 }
 0x460   : > { %v2522_v31 = vmul.f32 0.2, %v2458_v19  ;;  %vm2491_vm11 = vcmp.ge.f32.partialorder %v2459_v50, 0.0  ;;  %vm2492_vm6 = vcmp.ge.f32.partialorder %v2460_v38, 0.0  ;;  %v2523_v30 = vmul.f32 0.2, %v2459_v50 }
 0x461   : > { %2616 = vmax.xlane.f32.xlu1 %v2615_v46  ;;  %v2524_v39 = vmul.f32 0.2, %v2460_v38  ;;  %v2546_v5 = vsel %vm2482_vm9, %v10274_v49, %v2514_v63  ;;  %v10395_v21 = vsel %vm315_vm3, %v2545_v7, -9e+15  ;;  %v2547_v0 = vsel %vm2483_vm14, %v10277_v27, %v2515_v18 }
 0x462   : > { %v10399_v26 = vsel %vm316_vm12, %v2546_v5, -9e+15  ;;  %v2548_v8 = vsel %vm2484_vm8, %v10283_v42, %v2516_v11  ;;  %v2461_v46 = vadd.f32 %v10085_v41, %v2418_v32  ;;  %v15169_v63 = vpack.c.bf16 %v10100_v54, %v10097_v57 }
 0x463   : > { %v2618_v49 = vmax.f32 %v10395_v21, %v10399_v26  ;;  %vm15170_vm5 = vcmp.gt.f32.partialorder %v15015_v4, 0.0  ;;  %vm15171_vm9 = vcmp.gt.f32.partialorder %v15017_v22, 0.0  ;;  %v2462_v18 = vadd.f32 %v10088_v34, %v2418_v32  ;;  %v15173_v32 = vld [vmem:[#allocation29_spill] sm:$0xff] }
 0x464   : > { %2298 = vmatmul.mubr.bf16.gmra.mxu0 %v15169_v63  ;;  %v10415_v7 = vsel %vm15170_vm5, %v2547_v0, -9e+15  ;;  %v10419_v27 = vsel %vm15171_vm9, %v2548_v8, -9e+15  ;;  %v15172_v41 = vpack.c.bf16 %v10116_v24, %v10113_v47  ;;  %vm2493_vm14 = vcmp.ge.f32.partialorder %v2461_v46, 0.0  ;;  %v15175_v24 = vld [vmem:[#allocation30_spill] sm:$0xff] }
 0x465   : > { %v2621_v57 = vmax.f32 %v10415_v7, %v10419_v27  ;;  %v2525_v54 = vmul.f32 0.2, %v2461_v46  ;;  %v2549_v42 = vsel %vm2485_vm4, %v10316_v20, %v2517_v61  ;;  %2619 = vmax.xlane.f32.xlu0 %v2618_v49  ;;  %vm2494_vm8 = vcmp.ge.f32.partialorder %v2462_v18, 0.0 }
 0x466   : > { %2305 = vmatprep.mubr.bf16.mxu0 %v15172_v41  ;;  %v2526_v11 = vmul.f32 0.2, %v2462_v18  ;;  %v2550_v34 = vsel %vm2486_vm13, %v10330_v29, %v2518_v60  ;;  %vm15174_vm0 = vcmp.gt.f32.partialorder %v15173_v32, 0.0  ;;  %vm15176_vm7 = vcmp.gt.f32.partialorder %v15175_v24, 0.0 }
 0x467   : > { %v10435_v47 = vsel %vm15174_vm0, %v2549_v42, -9e+15  ;;  %2622 = vmax.xlane.f32.xlu1 %v2621_v57  ;;  %v10439_v5 = vsel %vm15176_vm7, %v2550_v34, -9e+15  ;;  %v2551_v20 = vsel %vm2487_vm2, %v10337_v16, %v2519_v33  ;;  %v2552_v61 = vsel %vm2488_vm15, %v2456_v28, %v2520_v13  ;;  %v15187_v57 = vld [vmem:[#allocation89_spill] sm:$0xff]  ;;  %v15189_v42 = vld [vmem:[#allocation62_spill] sm:$0xff] }
 0x468   : > { %v2553_v0 = vsel %vm2489_vm10, %v2457_v51, %v2521_v37  ;;  %v2624_v29 = vmax.f32 %v10435_v47, %v10439_v5  ;;  %vm15177_vm4 = vcmp.gt.f32.partialorder %v15023_v25, 0.0  ;;  %vm15178_vm13 = vcmp.gt.f32.partialorder %v15025_v43, 0.0 }
 0x469   : > { %v10450_v60 = vsel %vm15177_vm4, %v2551_v20, -9e+15  ;;  %v10454_v8 = vsel %vm15178_vm13, %v2552_v61, -9e+15  ;;  %v2554_v63 = vsel %vm2490_vm1, %v2458_v19, %v2522_v31  ;;  %vm15179_vm2 = vcmp.gt.f32.partialorder %v15027_v52, 0.0  ;;  %v15191_v20 = vld [vmem:[#allocation57_spill] sm:$0xff] }
 0x46a   : > { %v2627_v33 = vmax.f32 %v10450_v60, %v10454_v8  ;;  %v10461_v16 = vsel %vm15179_vm2, %v2553_v0, -9e+15  ;;  %vm15180_vm15 = vcmp.gt.f32.partialorder %v15029_v15, 0.0  ;;  %v2555_v13 = vsel %vm2491_vm11, %v2459_v50, %v2523_v30  ;;  %2625 = vmax.xlane.f32.xlu0 %v2624_v29  ;;  %v15195_v0 = vld [vmem:[#allocation69_spill] sm:$0xff] }
 0x46b   : > { %v10465_v28 = vsel %vm15180_vm15, %v2554_v63, -9e+15  ;;  %v2556_v37 = vsel %vm2492_vm6, %v2460_v38, %v2524_v39  ;;  %vm15181_vm10 = vcmp.gt.f32.partialorder %v15031_v59, 0.0  ;;  %v2557_v31 = vsel %vm2493_vm14, %v2461_v46, %v2525_v54  ;;  %v15196_v63 = vld [vmem:[#allocation88_spill] sm:$0xff] }
 0x46c   : > { %v2630_v51 = vmax.f32 %v10461_v16, %v10465_v28  ;;  %v10473_v19 = vsel %vm15181_vm10, %v2555_v13, -9e+15  ;;  %2628 = vmax.xlane.f32.xlu1 %v2627_v33  ;;  %vm15182_vm1 = vcmp.gt.f32.partialorder %v15033_v35, 0.0  ;;  %v2558_v41 = vsel %vm2494_vm8, %v2462_v18, %v2526_v11  ;;  %v15190_v11 = vld [vmem:[#allocation95_spill] sm:$0xff]  ;;  %v15197_v33 = vld [vmem:[#allocation54_spill] sm:$0xff] }
 0x46d   : > { %v10478_v49 = vsel %vm15182_vm1, %v2556_v37, -9e+15  ;;  %vm15183_vm11 = vcmp.gt.f32.partialorder %v15035_v56, 0.0  ;;  %v15184_v39 = vpack.c.bf16 %v10119_v12, %v10122_v3  ;;  %vm15185_vm6 = vcmp.gt.f32.partialorder %v15037_v23, 0.0  ;;  %v15188_v3 = vld [vmem:[#allocation86_spill] sm:$0xff]  ;;  %v15198_v13 = vld [vmem:[#allocation99_spill] sm:$0xff] }
 0x46e   : > { %v10483_v50 = vsel %vm15183_vm11, %v2557_v31, -9e+15  ;;  %v2633_v38 = vmax.f32 %v10473_v19, %v10478_v49  ;;  %v10492_v30 = vsel %vm15185_vm6, %v2558_v41, -9e+15  ;;  %v15186_v46 = vpack.c.bf16 %v10130_v58, %v10126_v45  ;;  %2631 = vmax.xlane.f32.xlu0 %v2630_v51  ;;  %v15192_v45 = vld [vmem:[#allocation93_spill] sm:$0xff]  ;;  %v15200_v31 = vld [vmem:[#allocation96_spill] sm:$0xff] }
 0x46f   : > { %2306 = vmatmul.mubr.bf16.gmra.mxu0 %v15184_v39  ;;  %v2173_v18 = vmul.f32 %v10104_v44, %v9873_v62  ;;  %v2175_v12 = vmul.f32 %v15187_v57, %v9875_v36  ;;  %7263 = vrcp.f32 %v15188_v3  ;;  %v2636_v54 = vmax.f32 %v10483_v50, %v10492_v30  ;;  %v15193_v62 = vld [vmem:[#allocation87_spill] sm:$0xff]  ;;  %v15199_v37 = vld [vmem:[#allocation61_spill] sm:$0xff]  ;;  %v15201_v57 = vld [vmem:[#allocation70_spill] sm:$0xff] }
 0x470   : > { %2313 = vmatprep.mubr.bf16.mxu0 %v15186_v46  ;;  %v2178_v34 = vmul.f32 %v15190_v11, %v15189_v42  ;;  %v2180_v58 = vmul.f32 %v15192_v45, %v15191_v20  ;;  %2634 = vmax.xlane.f32.xlu1 %v2633_v38  ;;  %7265 = vrcp.f32 %v15193_v62  ;;  %v15194_v36 = vld [vmem:[#allocation63_spill] sm:$0xff]  ;;  %v2179_v29 = vmul.f32 %v15192_v45, %v15195_v0  ;;  %v7262_v38 = vpop.eup %7261  ;;  %v15202_v3 = vld [vmem:[#allocation58_spill] sm:$0xff]  ;;  %v15203_v42 = vld [vmem:[#allocation72_spill] sm:$0xff] }
 0x471   : > { %v2199_v10 = vpack.c.bf16 %v2175_v12, %v2173_v18  ;;  %v2177_v44 = vmul.f32 %v15190_v11, %v15194_v36  ;;  %7267 = vrcp.f32 %v15196_v63  ;;  %v2182_v51 = vmul.f32 %v15198_v13, %v15197_v33  ;;  %v15205_v62 = vld [vmem:[#allocation65_spill] sm:$0xff]  ;;  %v15208_v33 = vld [vmem:[#allocation42_spill] sm:$0xff] }
 0x472   : > { %2637 = vmax.xlane.f32.xlu0 %v2636_v54  ;;  %v2202_v61 = vpack.c.bf16 %v2180_v58, %v2178_v34  ;;  %v2184_v41 = vmul.f32 %v15200_v31, %v15199_v37  ;;  %v2181_v12 = vmul.f32 %v15198_v13, %v15201_v57  ;;  %v2183_v54 = vmul.f32 %v15200_v31, %v15202_v3  ;;  %v15204_v34 = vld [vmem:[#allocation71_spill] sm:$0xff]  ;;  %v15209_v31 = vld [vmem:[#allocation73_spill] sm:$0xff]  ;;  %v15211_v3 = vld [vmem:[#allocation90_spill] sm:$0xff] }
 0x473   : > { %v2201_v39 = vpack.c.bf16 %v2179_v29, %v2177_v44  ;;  %v2188_v20 = vmul.f32 %v7262_v38, %v15204_v34  ;;  %v15206_v44 = vld [vmem:[#allocation66_spill] sm:$0xff]  ;;  %v15207_v29 = vld [vmem:[#allocation43_spill] sm:$0xff] }
 0x474   : > { %v2204_v46 = vpack.c.bf16 %v2184_v41, %v2182_v51  ;;  %v2203_v45 = vpack.c.bf16 %v2183_v54, %v2181_v12  ;;  %v2187_v0 = vmul.f32 %v7262_v38, %v15206_v44  ;;  %v8009_v12 = vmov 4   ;;  %v15212_v54 = vld [vmem:[#allocation91_spill] sm:$0xff] }
 0x475   : > { %6944 = vset.pattern.permute.xlu1 %v8009_v12  ;;  %6943 = vset.pattern.permute.xlu0 %v8009_v12  ;;  %v15218_v12 = vld [vmem:[#allocation101_spill] sm:$0xff] }
 0x477   : > { %2314 = vmatmul.mubr.bf16.gmra.mxu0 %v2199_v10 }
 0x478   : > { %2321 = vmatprep.mubr.bf16.mxu0 %v2202_v61 }
 0x47c   : > { %v7264_v18 = vpop.eup %7263 }
 0x47d   : > { %v2186_v11 = vmul.f32 %v7264_v18, %v15203_v42  ;;  %v7266_v58 = vpop.eup %7265  ;;  %v2185_v36 = vmul.f32 %v7264_v18, %v15205_v62 }
 0x47e   : > { %v7268_v61 = vpop.eup %7267  ;;  %v2192_v13 = vmul.f32 %v7266_v58, %v15208_v33 }
 0x47f   : > { %2322 = vmatmul.mubr.bf16.gmra.mxu0 %v2201_v39  ;;  %v2206_v10 = vpack.c.bf16 %v2188_v20, %v2186_v11  ;;  %v2190_v63 = vmul.f32 %v7268_v61, %v15207_v29  ;;  %v2205_v51 = vpack.c.bf16 %v2187_v0, %v2185_v36  ;;  %v2189_v41 = vmul.f32 %v7268_v61, %v15209_v31  ;;  %v15210_v39 = vld [vmem:[#allocation74_spill] sm:$0xff]  ;;  %v15215_v0 = vld [vmem:[#allocation97_spill] sm:$0xff] }
 0x480   : > { %2329 = vmatprep.mubr.bf16.mxu0 %v2204_v46  ;;  %v2191_v46 = vmul.f32 %v7266_v58, %v15210_v39  ;;  %v15214_v61 = vld [vmem:[#allocation94_spill] sm:$0xff] }
 0x481   : > { %v2208_v37 = vpack.c.bf16 %v2192_v13, %v2190_v63  ;;  %v15216_v63 = vld [vmem:[#allocation98_spill] sm:$0xff] }
 0x482   : > { %v2207_v57 = vpack.c.bf16 %v2191_v46, %v2189_v41  ;;  %v15217_v46 = vld [vmem:[#allocation100_spill] sm:$0xff] }
 0x487   : > { %2330 = vmatmul.mubr.bf16.gmra.mxu0 %v2203_v45  ;;  %v15213_v45 = vld [vmem:[#allocation92_spill] sm:$0xff] }
 0x488   : > { %2337 = vmatprep.mubr.bf16.mxu0 %v2206_v10 }
 0x48f   : > { %2338 = vmatmul.mubr.bf16.gmra.mxu0 %v2205_v51 }
 0x490   : > { %2345 = vmatprep.mubr.bf16.mxu0 %v2208_v37 }
 0x497   : > { %2346 = vmatmul.mubr.bf16.gmra.mxu0 %v2207_v57 }
 0x4c9   : > { %v2593_v18 = vpop.xlane.xlu0 %2592 }
 0x4ca   : > { %v2639_v38 = vsub.f32 %v15211_v3, %v2593_v18  ;;  %v2640_v42 = vsub.f32 %v15212_v54, %v2593_v18 }
 0x4cc   : > { %v2671_v11 = vmul.f32 1.442695, %v2639_v38  ;;  %v2673_v34 = vmul.f32 1.442695, %v2640_v42 }
 0x4ce   : > { %7269 = vpow2.f32 %v2671_v11 }
 0x4cf   : > { %7271 = vpow2.f32 %v2673_v34 }
 0x4d1   : > { %v2599_v20 = vpop.xlane.xlu0 %2598 }
 0x4d2   : > { %v2643_v10 = vsub.f32 %v15213_v45, %v2599_v20  ;;  %v2644_v62 = vsub.f32 %v15214_v61, %v2599_v20  ;;  %v15219_v61 = vld [vmem:[#allocation102_spill] sm:$0xff] }
 0x4d4   : > { %v2679_v58 = vmul.f32 1.442695, %v2643_v10  ;;  %v2681_v36 = vmul.f32 1.442695, %v2644_v62 }
 0x4d5   : > { %v2596_v44 = vpop.xlane.xlu1 %2595 }
 0x4d6   : > { %v2641_v29 = vsub.f32 %v15215_v0, %v2596_v44  ;;  %v2642_v33 = vsub.f32 %v15216_v63, %v2596_v44  ;;  %7273 = vpow2.f32 %v2679_v58  ;;  %v15220_v58 = vld [vmem:[#allocation103_spill] sm:$0xff] }
 0x4d7   : > { %7275 = vpow2.f32 %v2681_v36 }
 0x4d8   : > { %v2675_v13 = vmul.f32 1.442695, %v2641_v29  ;;  %v2677_v51 = vmul.f32 1.442695, %v2642_v33 }
 0x4da   : > { %7277 = vpow2.f32 %v2675_v13  ;;  %v2602_v31 = vpop.xlane.xlu0 %2601 }
 0x4db   : > { %v2605_v37 = vpop.xlane.xlu1 %2604  ;;  %7279 = vpow2.f32 %v2677_v51  ;;  %v2645_v57 = vsub.f32 %v15217_v46, %v2602_v31  ;;  %v2646_v18 = vsub.f32 %v15218_v12, %v2602_v31  ;;  %v10541_v42 = vpop.eup %7269 }
 0x4dc   : > { %v2647_v41 = vsub.f32 %v10260_v2, %v2605_v37  ;;  %v2648_v39 = vsub.f32 %v10264_v53, %v2605_v37  ;;  %v10543_v34 = vpop.eup %7271 }
 0x4dd   : > { %v2683_v54 = vmul.f32 1.442695, %v2645_v57  ;;  %v2685_v11 = vmul.f32 1.442695, %v2646_v18  ;;  %v2735_v10 = vadd.f32 %v10543_v34, %v10541_v42 }
 0x4de   : > { %v2687_v3 = vmul.f32 1.442695, %v2647_v41  ;;  %v2689_v38 = vmul.f32 1.442695, %v2648_v39 }
 0x4df   : > { %2736 = vadd.xlane.f32.xlu1 %v2735_v10 }
 0x4e0   : > { %7281 = vpow2.f32 %v2687_v3 }
 0x4e1   : > { %v2608_v20 = vpop.xlane.xlu0 %2607  ;;  %7283 = vpow2.f32 %v2689_v38 }
 0x4e2   : > { %v2649_v2 = vsub.f32 %v10301_v48, %v2608_v20  ;;  %v2650_v53 = vsub.f32 %v10307_v1, %v2608_v20  ;;  %7285 = vpow2.f32 %v2683_v54 }
 0x4e3   : > { %v2611_v45 = vpop.xlane.xlu1 %2610  ;;  %7287 = vpow2.f32 %v2685_v11  ;;  %v10551_v0 = vpop.eup %7273 }
 0x4e4   : > { %v2651_v62 = vsub.f32 %v15219_v61, %v2611_v45  ;;  %v2652_v36 = vsub.f32 %v15220_v58, %v2611_v45  ;;  %v2691_v44 = vmul.f32 1.442695, %v2649_v2  ;;  %v2693_v33 = vmul.f32 1.442695, %v2650_v53  ;;  %v10553_v13 = vpop.eup %7275 }
 0x4e5   : > { %v2741_v37 = vadd.f32 %v10553_v13, %v10551_v0 }
 0x4e6   : > { %v2695_v29 = vmul.f32 1.442695, %v2651_v62  ;;  %v2697_v63 = vmul.f32 1.442695, %v2652_v36  ;;  %7289 = vpow2.f32 %v2691_v44 }
 0x4e7   : > { %v10559_v41 = vpop.eup %7277  ;;  %2742 = vadd.xlane.f32.xlu1 %v2741_v37 }
 0x4e8   : > { %v2614_v1 = vpop.xlane.xlu0 %2613  ;;  %7291 = vpow2.f32 %v2695_v29  ;;  %v10563_v12 = vpop.eup %7279 }
 0x4e9   : > { %v2653_v48 = vsub.f32 %v10356_v14, %v2614_v1  ;;  %v2654_v51 = vsub.f32 %v10363_v17, %v2614_v1  ;;  %7293 = vpow2.f32 %v2697_v63  ;;  %v2738_v17 = vadd.f32 %v10563_v12, %v10559_v41 }
 0x4ea   : > { %v2617_v31 = vpop.xlane.xlu1 %2616  ;;  %7295 = vpow2.f32 %v2693_v33 }
 0x4eb   : > { %v2655_v39 = vsub.f32 %v10375_v6, %v2617_v31  ;;  %v2656_v46 = vsub.f32 %v10380_v40, %v2617_v31  ;;  %v2699_v57 = vmul.f32 1.442695, %v2653_v48  ;;  %v2701_v18 = vmul.f32 1.442695, %v2654_v51  ;;  %2739 = vadd.xlane.f32.xlu0 %v2738_v17 }
 0x4ed   : > { %v2703_v14 = vmul.f32 1.442695, %v2655_v39  ;;  %v2705_v3 = vmul.f32 1.442695, %v2656_v46  ;;  %7297 = vpow2.f32 %v2699_v57  ;;  %v10569_v40 = vpop.eup %7281 }
 0x4ee   : > { %7299 = vpow2.f32 %v2701_v18  ;;  %v2620_v38 = vpop.xlane.xlu0 %2619  ;;  %v10573_v2 = vpop.eup %7283 }
 0x4ef   : > { %7301 = vpow2.f32 %v2703_v14  ;;  %v2657_v11 = vsub.f32 %v10395_v21, %v2620_v38  ;;  %v2658_v6 = vsub.f32 %v10399_v26, %v2620_v38  ;;  %v10575_v10 = vpop.eup %7285  ;;  %v2747_v26 = vadd.f32 %v10573_v2, %v10569_v40 }
 0x4f0   : > { %v2623_v54 = vpop.xlane.xlu1 %2622  ;;  %7303 = vpow2.f32 %v2705_v3  ;;  %v10579_v21 = vpop.eup %7287 }
 0x4f1   : > { %v2659_v20 = vsub.f32 %v10415_v7, %v2623_v54  ;;  %v2660_v45 = vsub.f32 %v10419_v27, %v2623_v54  ;;  %v2707_v53 = vmul.f32 1.442695, %v2657_v11  ;;  %v2709_v58 = vmul.f32 1.442695, %v2658_v6  ;;  %2748 = vadd.xlane.f32.xlu1 %v2747_v26 }
 0x4f2   : > { %v2744_v33 = vadd.f32 %v10579_v21, %v10575_v10 }
 0x4f3   : > { %v2711_v61 = vmul.f32 1.442695, %v2659_v20  ;;  %v2713_v62 = vmul.f32 1.442695, %v2660_v45  ;;  %v2626_v36 = vpop.xlane.xlu0 %2625  ;;  %7305 = vpow2.f32 %v2707_v53  ;;  %v10587_v1 = vpop.eup %7289 }
 0x4f4   : > { %v2661_v7 = vsub.f32 %v10435_v47, %v2626_v36  ;;  %v2662_v27 = vsub.f32 %v10439_v5, %v2626_v36  ;;  %2745 = vadd.xlane.f32.xlu0 %v2744_v33 }
 0x4f5   : > { %v2629_v44 = vpop.xlane.xlu1 %2628  ;;  %7307 = vpow2.f32 %v2711_v61  ;;  %v10589_v51 = vpop.eup %7291 }
 0x4f6   : > { %v2663_v29 = vsub.f32 %v10450_v60, %v2629_v44  ;;  %v2664_v63 = vsub.f32 %v10454_v8, %v2629_v44  ;;  %7309 = vpow2.f32 %v2713_v62  ;;  %v2715_v48 = vmul.f32 1.442695, %v2661_v7  ;;  %15221 = vst [vmem:[#allocation89_spill] sm:$0xff] %v10589_v51  ;;  %v10591_v39 = vpop.eup %7293 }
 0x4f7   : > { %7311 = vpow2.f32 %v2709_v58  ;;  %v2717_v31 = vmul.f32 1.442695, %v2662_v27  ;;  %v2632_v5 = vpop.xlane.xlu0 %2631  ;;  %v10595_v57 = vpop.eup %7295  ;;  %v2753_v3 = vadd.f32 %v10591_v39, %v10589_v51 }
 0x4f8   : > { %v2719_v37 = vmul.f32 1.442695, %v2663_v29  ;;  %v2721_v47 = vmul.f32 1.442695, %v2664_v63  ;;  %7313 = vpow2.f32 %v2715_v48  ;;  %v2665_v8 = vsub.f32 %v10461_v16, %v2632_v5 }
 0x4f9   : > { %v2635_v60 = vpop.xlane.xlu1 %2634  ;;  %v2666_v46 = vsub.f32 %v10465_v28, %v2632_v5  ;;  %v2750_v38 = vadd.f32 %v10595_v57, %v10587_v1  ;;  %2754 = vadd.xlane.f32.xlu1 %v2753_v3 }
 0x4fa   : > { %7315 = vpow2.f32 %v2719_v37  ;;  %v2667_v18 = vsub.f32 %v10473_v19, %v2635_v60  ;;  %v2668_v14 = vsub.f32 %v10478_v49, %v2635_v60  ;;  %v2723_v17 = vmul.f32 1.442695, %v2665_v8  ;;  %v10603_v54 = vpop.eup %7297 }
 0x4fb   : > { %7317 = vpow2.f32 %v2721_v47  ;;  %v2725_v11 = vmul.f32 1.442695, %v2666_v46  ;;  %v2638_v6 = vpop.xlane.xlu0 %2637  ;;  %v10605_v20 = vpop.eup %7299  ;;  %2751 = vadd.xlane.f32.xlu0 %v2750_v38 }
 0x4fc   : > { %7319 = vpow2.f32 %v2717_v31  ;;  %v2727_v16 = vmul.f32 1.442695, %v2667_v18  ;;  %v2729_v28 = vmul.f32 1.442695, %v2668_v14  ;;  %v2669_v19 = vsub.f32 %v10483_v50, %v2638_v6  ;;  %v10609_v45 = vpop.eup %7301  ;;  %v10659_v38 = vpop.f32.mrf.mxu0 }
 0x4fd   : > { %7321 = vpow2.f32 %v2723_v17  ;;  %v2670_v49 = vsub.f32 %v10492_v30, %v2638_v6  ;;  %15222 = vst [vmem:[#allocation86_spill] sm:$0xff] %v10609_v45  ;;  %v2756_v53 = vadd.f32 %v10605_v20, %v10603_v54  ;;  %v10613_v61 = vpop.eup %7303  ;;  %15238 = vst [vmem:[#allocation71_spill] sm:$0xff] %v10659_v38  ;;  %v7851_v38 = vld [vmem:[%s8098_s5 + $0x30] sm:$0xff] }
 0x4fe   : > { %7323 = vpow2.f32 %v2727_v16  ;;  %15223 = vst [vmem:[#allocation62_spill] sm:$0xff] %v10613_v61  ;;  %v2731_v62 = vmul.f32 1.442695, %v2669_v19  ;;  %v2759_v36 = vadd.f32 %v10613_v61, %v10609_v45  ;;  %v10661_v16 = vpop.f32.mrf.mxu0  ;;  %v7829_v19 = vld [vmem:[%s14419_s1] sm:$0xff]   ;;  %v15255_v45 = vld [vmem:[#allocation6_spill] sm:$0xff] }
 0x4ff   : > { %7325 = vpow2.f32 %v2729_v28  ;;  %v2733_v58 = vmul.f32 1.442695, %v2670_v49  ;;  %2757 = vadd.xlane.f32.xlu0 %v2756_v53  ;;  %15239 = vst [vmem:[#allocation65_spill] sm:$0xff] %v10661_v16  ;;  %v7850_v16 = vld [vmem:[%s8098_s5 + $0x28] sm:$0xff] }
 0x500   : > { %7327 = vpow2.f32 %v2725_v11  ;;  %v10617_v50 = vpop.eup %7305  ;;  %2760 = vadd.xlane.f32.xlu1 %v2759_v36 }
 0x501   : > { %7329 = vpow2.f32 %v2731_v62  ;;  %15224 = vst [vmem:[#allocation95_spill] sm:$0xff] %v10617_v50  ;;  %v7830_v62 = vld [vmem:[%s14419_s1 + $0x10] sm:$0xff]  }
 0x502   : > { %7331 = vpow2.f32 %v2733_v58  ;;  %v10619_v30 = vpop.eup %7307 }
 0x503   : > { %15225 = vst [vmem:[#allocation57_spill] sm:$0xff] %v10619_v30  ;;  %v10621_v26 = vpop.eup %7309 }
 0x504   : > { %15226 = vst [vmem:[#allocation93_spill] sm:$0xff] %v10621_v26  ;;  %v10623_v44 = vpop.eup %7311  ;;  %v2765_v7 = vadd.f32 %v10621_v26, %v10619_v30 }
 0x505   : > { %15227 = vst [vmem:[#allocation87_spill] sm:$0xff] %v10623_v44  ;;  %v10627_v27 = vpop.eup %7313  ;;  %v2762_v29 = vadd.f32 %v10623_v44, %v10617_v50 }
 0x506   : > { %15228 = vst [vmem:[#allocation63_spill] sm:$0xff] %v10627_v27  ;;  %2766 = vadd.xlane.f32.xlu1 %v2765_v7 }
 0x507   : > { %v10631_v63 = vpop.eup %7315  ;;  %2763 = vadd.xlane.f32.xlu0 %v2762_v29  ;;  %v7831_v29 = vld [vmem:[%s14419_s1 + $0x18] sm:$0xff]  }
 0x508   : > { %15229 = vst [vmem:[#allocation69_spill] sm:$0xff] %v10631_v63  ;;  %v10633_v33 = vpop.eup %7317 }
 0x509   : > { %15230 = vst [vmem:[#allocation88_spill] sm:$0xff] %v10633_v33  ;;  %v10635_v48 = vpop.eup %7319  ;;  %v2771_v37 = vadd.f32 %v10633_v33, %v10631_v63 }
 0x50a   : > { %15231 = vst [vmem:[#allocation54_spill] sm:$0xff] %v10635_v48  ;;  %v10639_v47 = vpop.eup %7321  ;;  %v2768_v31 = vadd.f32 %v10635_v48, %v10627_v27 }
 0x50b   : > { %15232 = vst [vmem:[#allocation99_spill] sm:$0xff] %v10639_v47  ;;  %v10643_v5 = vpop.eup %7323  ;;  %2772 = vadd.xlane.f32.xlu1 %v2771_v37 }
 0x50c   : > { %15233 = vst [vmem:[#allocation61_spill] sm:$0xff] %v10643_v5  ;;  %v10645_v60 = vpop.eup %7325  ;;  %2769 = vadd.xlane.f32.xlu0 %v2768_v31  ;;  %v7832_v31 = vld [vmem:[%s14419_s1 + $0x8] sm:$0xff]  }
 0x50d   : > { %15234 = vst [vmem:[#allocation96_spill] sm:$0xff] %v10645_v60  ;;  %v10647_v8 = vpop.eup %7327  ;;  %v2777_v46 = vadd.f32 %v10645_v60, %v10643_v5 }
 0x50e   : > { %15235 = vst [vmem:[#allocation70_spill] sm:$0xff] %v10647_v8  ;;  %v10651_v18 = vpop.eup %7329  ;;  %v2774_v14 = vadd.f32 %v10647_v8, %v10639_v47 }
 0x50f   : > { %15236 = vst [vmem:[#allocation58_spill] sm:$0xff] %v10651_v18  ;;  %v10655_v3 = vpop.eup %7331  ;;  %2778 = vadd.xlane.f32.xlu1 %v2777_v46 }
 0x510   : > { %15237 = vst [vmem:[#allocation72_spill] sm:$0xff] %v10655_v3  ;;  %2775 = vadd.xlane.f32.xlu0 %v2774_v14  ;;  %v2780_v17 = vadd.f32 %v10655_v3, %v10651_v18  ;;  %v7833_v14 = vld [vmem:[%s14419_s1 + $0x28] sm:$0xff]  }
 0x514   : > { %2781 = vadd.xlane.f32.xlu0 %v2780_v17 }
 0x51b   : > { %v6511_v28 = vpop.f32.mrf.mxu0 }
 0x51d   : > { %v6512_v11 = vpop.f32.mrf.mxu0 }
 0x51e   : > { %v10663_v6 = vadd.f32 %v6512_v11, %v6511_v28  ;;  %v7834_v28 = vld [vmem:[%s14419_s1 + $0x20] sm:$0xff]  }
 0x51f   : > { %v10669_v49 = vpop.f32.mrf.mxu0 }
 0x520   : > { %15240 = vst [vmem:[#allocation66_spill] sm:$0xff] %v10663_v6  ;;  %2847 = vrot.lane.b32.xlu1 %v7829_v19, %s8010_s13  ;;  %15241 = vst [vmem:[#allocation43_spill] sm:$0xff] %v10669_v49 }
 0x521   : > { %v10671_v53 = vpop.f32.mrf.mxu0 }
 0x522   : > { %15242 = vst [vmem:[#allocation42_spill] sm:$0xff] %v10671_v53 }
 0x524   : > { %2851 = vrot.lane.b32.xlu1 %v7830_v62, %s8010_s13  ;;  %v6517_v58 = vpop.f32.mrf.mxu0  ;;  %v7835_v62 = vld [vmem:[%s14419_s1 + $0x38] sm:$0xff]  }
 0x526   : > { %v6518_v36 = vpop.f32.mrf.mxu0 }
 0x527   : > { %v10677_v7 = vadd.f32 %v6518_v36, %v6517_v58  ;;  %v7836_v36 = vld [vmem:[%s14419_s1 + $0x30] sm:$0xff]  }
 0x528   : > { %2853 = vrot.lane.b32.xlu1 %v7831_v29, %s8010_s13  ;;  %v10683_v37 = vpop.f32.mrf.mxu0 }
 0x529   : > { %15243 = vst [vmem:[#allocation73_spill] sm:$0xff] %v10677_v7  ;;  %15244 = vst [vmem:[#allocation74_spill] sm:$0xff] %v10683_v37 }
 0x52a   : > { %2849 = vrot.lane.b32.xlu0 %v7832_v31, %s8010_s13  ;;  %v10689_v46 = vpop.f32.mrf.mxu0  ;;  %v7837_v31 = vld [vmem:[%s14419_s1 + $0x48] sm:$0xff]  }
 0x52b   : > { %15245 = vst [vmem:[#allocation90_spill] sm:$0xff] %v10689_v46 }
 0x52c   : > { %2857 = vrot.lane.b32.xlu1 %v7833_v14, %s8010_s13 }
 0x52e   : > { %2855 = vrot.lane.b32.xlu0 %v7834_v28, %s8010_s13 }
 0x52f   : > { %v6523_v17 = vpop.f32.mrf.mxu0 }
 0x530   : > { %2861 = vrot.lane.b32.xlu1 %v7835_v62, %s8010_s13  ;;  %v7839_v62 = vld [vmem:[%s14419_s1 + $0x58] sm:$0xff]  }
 0x531   : > { %v6524_v11 = vpop.f32.mrf.mxu0 }
 0x532   : > { %v10699_v19 = vadd.f32 %v6524_v11, %v6523_v17  ;;  %2859 = vrot.lane.b32.xlu0 %v7836_v36, %s8010_s13  ;;  %v7838_v17 = vld [vmem:[%s14419_s1 + $0x40] sm:$0xff]   ;;  %v7840_v36 = vld [vmem:[%s14419_s1 + $0x50] sm:$0xff]  }
 0x533   : > { %v10705_v58 = vpop.f32.mrf.mxu0 }
 0x534   : > { %15246 = vst [vmem:[#allocation91_spill] sm:$0xff] %v10699_v19  ;;  %15247 = vst [vmem:[#allocation92_spill] sm:$0xff] %v10705_v58  ;;  %2865 = vrot.lane.b32.xlu1 %v7837_v31, %s8010_s13  ;;  %v7841_v31 = vld [vmem:[%s14419_s1 + $0x68] sm:$0xff]   ;;  %v7859_v19 = vld [vmem:[%s8098_s5 + $0x70] sm:$0xff] }
 0x535   : > { %v10711_v29 = vpop.f32.mrf.mxu0 }
 0x536   : > { %15248 = vst [vmem:[#allocation94_spill] sm:$0xff] %v10711_v29  ;;  %2863 = vrot.lane.b32.xlu0 %v7838_v17, %s8010_s13  ;;  %v7843_v17 = vld [vmem:[%s14419_s1 + $0x78] sm:$0xff]  }
 0x537   : > { %v6529_v14 = vpop.f32.mrf.mxu0 }
 0x538   : > { %2869 = vrot.lane.b32.xlu1 %v7839_v62, %s8010_s13  ;;  %v7845_v62 = vld [vmem:[%s8098_s5 + $0x8] sm:$0xff] }
 0x539   : > { %v6530_v28 = vpop.f32.mrf.mxu0 }
 0x53a   : > { %v10721_v11 = vadd.f32 %v6530_v28, %v6529_v14  ;;  %2867 = vrot.lane.b32.xlu0 %v7840_v36, %s8010_s13  ;;  %v7842_v14 = vld [vmem:[%s14419_s1 + $0x60] sm:$0xff]   ;;  %v7844_v28 = vld [vmem:[%s14419_s1 + $0x70] sm:$0xff]  }
 0x53b   : > { %v7846_v36 = vld [vmem:[%s8098_s5] sm:$0xff] }
 0x53c   : > { %15249 = vst [vmem:[#allocation97_spill] sm:$0xff] %v10721_v11  ;;  %2873 = vrot.lane.b32.xlu1 %v7841_v31, %s8010_s13  ;;  %v7847_v31 = vld [vmem:[%s8098_s5 + $0x10] sm:$0xff]  ;;  %v7856_v11 = vld [vmem:[%s8098_s5 + $0x58] sm:$0xff] }
 0x53e   : > { %2871 = vrot.lane.b32.xlu0 %v7842_v14, %s8010_s13  ;;  %v7848_v14 = vld [vmem:[%s8098_s5 + $0x18] sm:$0xff] }
 0x540   : > { %2877 = vrot.lane.b32.xlu1 %v7843_v17, %s8010_s13  ;;  %v7849_v17 = vld [vmem:[%s8098_s5 + $0x20] sm:$0xff] }
 0x542   : > { %2875 = vrot.lane.b32.xlu0 %v7844_v28, %s8010_s13  ;;  %v7852_v28 = vld [vmem:[%s8098_s5 + $0x38] sm:$0xff] }
 0x544   : > { %2999 = vperm.xlu1 %6944, %v7845_v62   ;;  %v7853_v62 = vld [vmem:[%s8098_s5 + $0x40] sm:$0xff] }
 0x546   : > { %2995 = vperm.xlu0 %6943, %v7846_v36   ;;  %v7854_v36 = vld [vmem:[%s8098_s5 + $0x48] sm:$0xff] }
 0x548   : > { %3003 = vperm.xlu1 %6944, %v7847_v31   ;;  %v7855_v31 = vld [vmem:[%s8098_s5 + $0x50] sm:$0xff] }
 0x54a   : > { %3007 = vperm.xlu0 %6943, %v7848_v14   ;;  %v7857_v14 = vld [vmem:[%s8098_s5 + $0x60] sm:$0xff] }
 0x54c   : > { %3011 = vperm.xlu1 %6944, %v7849_v17   ;;  %v7858_v17 = vld [vmem:[%s8098_s5 + $0x68] sm:$0xff] }
 0x54e   : > { %3015 = vperm.xlu0 %6943, %v7850_v16   ;;  %v7860_v16 = vld [vmem:[%s8098_s5 + $0x78] sm:$0xff] }
 0x550   : > { %3019 = vperm.xlu1 %6944, %v7851_v38  }
 0x552   : > { %3023 = vperm.xlu0 %6943, %v7852_v28  }
 0x554   : > { %3027 = vperm.xlu1 %6944, %v7853_v62  }
 0x556   : > { %3031 = vperm.xlu0 %6943, %v7854_v36  }
 0x558   : > { %3035 = vperm.xlu1 %6944, %v7855_v31  }
 0x55a   : > { %3039 = vperm.xlu0 %6943, %v7856_v11  }
 0x55c   : > { %3043 = vperm.xlu1 %6944, %v7857_v14  }
 0x55e   : > { %3047 = vperm.xlu0 %6943, %v7858_v17  }
 0x560   : > { %3051 = vperm.xlu1 %6944, %v7859_v19  }
 0x562   : > { %3055 = vperm.xlu0 %6943, %v7860_v16  }
 0x568   : > { %v2737_v38 = vpop.xlane.xlu1 %2736 }
 0x569   : > { %7333 = vrcp.f32 %v2737_v38 }
 0x570   : > { %v2743_v7 = vpop.xlane.xlu1 %2742 }
 0x574   : > { %v2740_v28 = vpop.xlane.xlu0 %2739 }
 0x575   : > { %7335 = vrcp.f32 %v2740_v28 }
 0x576   : > { %v7334_v29 = vpop.eup %7333 }
 0x577   : > { %v2800_v11 = vmul.f32 %v7334_v29, %v10543_v34  ;;  %v10766_v17 = vmul.f32 %v7334_v29, %v10541_v42 }
 0x57a   : > { %v2749_v62 = vpop.xlane.xlu1 %2748 }
 0x57d   : > { %v2746_v6 = vpop.xlane.xlu0 %2745 }
 0x57e   : > { %7337 = vrcp.f32 %v2746_v6  ;;  %v6340_v6 = vld [vmem:[%s14421_s3 + $0x4] ss:$8 sm:$0x3] }
 0x57f   : > { %7339 = vrcp.f32 %v2743_v7 }
 0x580   : > { %7341 = vrcp.f32 %v2749_v62 }
 0x582   : > { %v2755_v36 = vpop.xlane.xlu1 %2754  ;;  %v7336_v58 = vpop.eup %7335 }
 0x583   : > { %v2802_v14 = vmul.f32 %v7336_v58, %v10563_v12  ;;  %v10769_v19 = vmul.f32 %v7336_v58, %v10559_v41  ;;  %7343 = vrcp.f32 %v2755_v36 }
 0x584   : > { %v2752_v31 = vpop.xlane.xlu0 %2751 }
 0x585   : > { %v2832_v46 = vpack.c.bf16 %v2802_v14, %v2800_v11  ;;  %7345 = vrcp.f32 %v2752_v31 }
 0x587   : > { %2927 = vmatprep.mubr.bf16.mxu1 %v2832_v46 }
 0x588   : > { %v2758_v38 = vpop.xlane.xlu0 %2757 }
 0x589   : > { %v2761_v16 = vpop.xlane.xlu1 %2760  ;;  %7347 = vrcp.f32 %v2758_v38  ;;  %v10813_v38 = vrot.slane %v6340_v6, %v15255_v45 }
 0x58a   : > { %7349 = vrcp.f32 %v2761_v16 }
 0x58b   : > { %v7338_v8 = vpop.eup %7337 }
 0x58c   : > { %v7340_v27 = vpop.eup %7339  ;;  %v10807_v7 = vmul.f32 %v7338_v8, %v10579_v21  ;;  %v10816_v48 = vmul.f32 %v7338_v8, %v10575_v10 }
 0x58d   : > { %v7342_v62 = vpop.eup %7341  ;;  %v10821_v50 = vmul.f32 %v7340_v27, %v10553_v13 }
 0x58e   : > { %v10829_v10 = vmul.f32 %v7342_v62, %v10573_v2  ;;  %v10832_v8 = vmul.f32 %v7342_v62, %v10569_v40 }
 0x58f   : > { %v2767_v37 = vpop.xlane.xlu1 %2766 }
 0x590   : > { %v2764_v53 = vpop.xlane.xlu0 %2763  ;;  %7351 = vrcp.f32 %v2767_v37 }
 0x591   : > { %7353 = vrcp.f32 %v2764_v53 }
 0x594   : > { %v10773_v49 = vpop.xlane.xlu1 %2772 }
 0x595   : > { %15250 = vst [vmem:[#allocation98_spill] sm:$0xff] %v10773_v49  ;;  %v10775_v34 = vpop.xlane.xlu0 %2769  ;;  %v15261_v49 = vld [vmem:[#allocation10_spill] sm:$0xff] }
 0x596   : > { %7355 = vrcp.f32 %v10775_v34  ;;  %v15258_v34 = vld [vmem:[#allocation9_spill] sm:$0xff]  ;;  %vm15262_vm0 = vcmp.gt.f32.partialorder %v15261_v49, 0.0 }
 0x597   : > { %vm15259_vm8 = vcmp.gt.f32.partialorder %v15258_v34, 0.0 }
 0x598   : > { %v10777_v12 = vpop.xlane.xlu1 %2778 }
 0x599   : > { %15251 = vst [vmem:[#allocation100_spill] sm:$0xff] %v10777_v12  ;;  %v10779_v42 = vpop.xlane.xlu0 %2775  ;;  %v15254_v12 = vld [vmem:[#allocation5_spill] sm:$0xff] }
 0x59a   : > { %15252 = vst [vmem:[#allocation101_spill] sm:$0xff] %v10779_v42  ;;  %v10810_v31 = vrot.slane %v6340_v6, %v15254_v12 }
 0x59c   : > { %v10781_v29 = vpop.permute.xlu1 %2847 }
 0x59d   : > { %v10783_v41 = vpop.xlane.xlu0 %2781 }
 0x59e   : > { %15253 = vst [vmem:[#allocation102_spill] sm:$0xff] %v10783_v41  ;;  %v10818_v41 = vpop.eup %7343 }
 0x59f   : > { %15256 = vst [vmem:[#allocation103_spill] sm:$0xff] %v10818_v41  ;;  %v7346_v21 = vpop.eup %7345 }
 0x5a0   : > { %v10785_v58 = vpop.permute.xlu1 %2851  ;;  %v10845_v40 = vmul.f32 %v7346_v21, %v10595_v57  ;;  %v10848_v16 = vmul.f32 %v7346_v21, %v10587_v1 }
 0x5a1   : > { %v10787_v11 = vpop.permute.xlu0 %2849 }
 0x5a4   : > { %v10789_v14 = vpop.permute.xlu1 %2853 }
 0x5a5   : > { %v10791_v46 = vpop.permute.xlu0 %2855 }
 0x5a8   : > { %v10793_v28 = vpop.permute.xlu1 %2857 }
 0x5a9   : > { %v2860_v5 = vpop.permute.xlu0 %2859 }
 0x5ac   : > { %v2862_v18 = vpop.permute.xlu1 %2861 }
 0x5ad   : > { %v10795_v60 = vpop.permute.xlu0 %2863 }
 0x5b0   : > { %v10797_v63 = vpop.permute.xlu1 %2865 }
 0x5b1   : > { %v10799_v3 = vpop.permute.xlu0 %2867 }
 0x5b4   : > { %v10801_v47 = vpop.permute.xlu1 %2869 }
 0x5b5   : > { %v2872_v33 = vpop.permute.xlu0 %2871 }
 0x5b8   : > { %v2874_v30 = vpop.permute.xlu1 %2873 }
 0x5b9   : > { %v2876_v36 = vpop.permute.xlu0 %2875 }
 0x5bc   : > { %v2878_v26 = vpop.permute.xlu1 %2877 }
 0x5bd   : > { %6559 = vmatprep.subr.bf16.mxu1 %v2878_v26  ;;  %v10824_v26 = vmul.f32 %v7340_v27, %v10551_v0  ;;  %v10840_v27 = vmul.f32 %v10818_v41, %v10591_v39 }
 0x5be   : > { %6560 = vmatpush3.bf16.msra.mxu1 %v2862_v18 }
 0x5bf   : > { %6561 = vmatprep.subr.bf16.mxu1 %v2876_v36  ;;  %v10850_v36 = vpop.eup %7347 }
 0x5c0   : > { %v3000_v12 = vpop.permute.xlu1 %2999  ;;  %15257 = vst [vmem:[#allocation104_spill] sm:$0xff] %v10850_v36  ;;  %v10894_v49 = vpop.eup %7349 }
 0x5c1   : > { %v3071_v13 = vadd.f32 %v10810_v31, %v3000_v12  ;;  %v3072_v18 = vadd.f32 %v10813_v38, %v3000_v12  ;;  %v2996_v37 = vpop.permute.xlu0 %2995  ;;  %15264 = vst [vmem:[#allocation107_spill] sm:$0xff] %v10894_v49 }
 0x5c2   : > { %v3069_v53 = vadd.f32 %v10810_v31, %v2996_v37  ;;  %v3070_v2 = vadd.f32 %v10813_v38, %v2996_v37  ;;  %6562 = vmatpush3.bf16.msra.mxu1 %v2860_v5 }
 0x5c3   : > { %vm3103_vm5 = vcmp.ge.f32.partialorder %v3071_v13, 0.0  ;;  %vm3104_vm9 = vcmp.ge.f32.partialorder %v3072_v18, 0.0  ;;  %v3135_v12 = vmul.f32 0.2, %v3071_v13  ;;  %v3136_v62 = vmul.f32 0.2, %v3072_v18  ;;  %6563 = vmatprep.subr.bf16.mxu1 %v2874_v30 }
 0x5c4   : > { %vm3101_vm14 = vcmp.ge.f32.partialorder %v3069_v53, 0.0  ;;  %v3133_v39 = vmul.f32 0.2, %v3069_v53  ;;  %v3134_v0 = vmul.f32 0.2, %v3070_v2  ;;  %v3004_v37 = vpop.permute.xlu1 %3003  ;;  %vm3102_vm7 = vcmp.ge.f32.partialorder %v3070_v2, 0.0 }
 0x5c5   : > { %v3073_v5 = vadd.f32 %v10810_v31, %v3004_v37  ;;  %v3074_v57 = vadd.f32 %v10813_v38, %v3004_v37  ;;  %v3008_v6 = vpop.permute.xlu0 %3007  ;;  %v3167_v1 = vsel %vm3103_vm5, %v3071_v13, %v3135_v12  ;;  %v3168_v21 = vsel %vm3104_vm9, %v3072_v18, %v3136_v62 }
 0x5c6   : > { %v10856_v45 = vadd.f32 %v10810_v31, %v3008_v6  ;;  %v10859_v30 = vadd.f32 %v10813_v38, %v3008_v6  ;;  %6564 = vmatpush3.bf16.msra.mxu1 %v10793_v28  ;;  %v10864_v61 = vsel %vm15259_vm8, %v3167_v1, -9e+15  ;;  %v10868_v41 = vsel %vm15262_vm0, %v3168_v21, -9e+15 }
 0x5c7   : > { %15260 = vst [vmem:[#allocation105_spill] sm:$0xff] %v10864_v61  ;;  %15263 = vst [vmem:[#allocation106_spill] sm:$0xff] %v10868_v41  ;;  %6565 = vmatprep.subr.bf16.mxu1 %v2872_v33  ;;  %v10876_v6 = vmul.f32 %v10850_v36, %v10605_v20  ;;  %vm3105_vm4 = vcmp.ge.f32.partialorder %v3073_v5, 0.0  ;;  %vm3106_vm13 = vcmp.ge.f32.partialorder %v3074_v57, 0.0  ;;  %v3137_v28 = vmul.f32 0.2, %v3073_v5 }
 0x5c8   : > { %v3138_v12 = vmul.f32 0.2, %v3074_v57  ;;  %v3012_v62 = vpop.permute.xlu1 %3011  ;;  %v3232_v21 = vmax.f32 %v10864_v61, %v10868_v41  ;;  %v3165_v18 = vsel %vm3101_vm14, %v3069_v53, %v3133_v39  ;;  %vm3107_vm2 = vcmp.ge.f32.partialorder %v10856_v45, 0.0  ;;  %v15265_v53 = vld [vmem:[#allocation7_spill] sm:$0xff]  ;;  %v10906_v61 = vpop.eup %7351 }
 0x5c9   : > { %v10879_v37 = vadd.f32 %v10810_v31, %v3012_v62  ;;  %v10882_v33 = vadd.f32 %v10813_v38, %v3012_v62  ;;  %v3016_v1 = vpop.permute.xlu0 %3015  ;;  %vm3108_vm15 = vcmp.ge.f32.partialorder %v10859_v30, 0.0  ;;  %v3166_v13 = vsel %vm3102_vm7, %v3070_v2, %v3134_v0  ;;  %15268 = vst [vmem:[#allocation109_spill] sm:$0xff] %v10906_v61  ;;  %v15278_v36 = vld [vmem:[#allocation15_spill] sm:$0xff] }
 0x5ca   : > { %v10890_v20 = vadd.f32 %v10810_v31, %v3016_v1  ;;  %6566 = vmatpush3.bf16.msra.mxu1 %v10791_v46  ;;  %v3139_v62 = vmul.f32 0.2, %v10856_v45  ;;  %v3140_v34 = vmul.f32 0.2, %v10859_v30  ;;  %v10899_v41 = vadd.f32 %v10813_v38, %v3016_v1  ;;  %3233 = vmax.xlane.f32.xlu0 %v3232_v21  ;;  %v10912_v1 = vpop.eup %7353  ;;  %v15270_v21 = vld [vmem:[#allocation8_spill] sm:$0xff] }
 0x5cb   : > { %vm15266_vm10 = vcmp.gt.f32.partialorder %v15265_v53, 0.0  ;;  %6567 = vmatprep.subr.bf16.mxu1 %v10801_v47  ;;  %vm3109_vm1 = vcmp.ge.f32.partialorder %v10879_v37, 0.0  ;;  %vm3110_vm11 = vcmp.ge.f32.partialorder %v10882_v33, 0.0  ;;  %v3141_v46 = vmul.f32 0.2, %v10879_v37  ;;  %15269 = vst [vmem:[#allocation110_spill] sm:$0xff] %v10912_v1 }
 0x5cc   : > { %v10903_v39 = vsel %vm15266_vm10, %v3165_v18, -9e+15  ;;  %v3142_v0 = vmul.f32 0.2, %v10882_v33  ;;  %v3020_v2 = vpop.permute.xlu1 %3019  ;;  %vm3111_vm6 = vcmp.ge.f32.partialorder %v10890_v20, 0.0  ;;  %vm15271_vm5 = vcmp.gt.f32.partialorder %v15270_v21, 0.0 }
 0x5cd   : > { %15267 = vst [vmem:[#allocation108_spill] sm:$0xff] %v10903_v39  ;;  %v10917_v18 = vsel %vm15271_vm5, %v3166_v13, -9e+15  ;;  %v10920_v47 = vadd.f32 %v10810_v31, %v3020_v2  ;;  %v10923_v53 = vadd.f32 %v10813_v38, %v3020_v2  ;;  %v3024_v61 = vpop.permute.xlu0 %3023  ;;  %v3169_v1 = vsel %vm3105_vm4, %v3073_v5, %v3137_v28  ;;  %v10948_v28 = vpop.eup %7355 }
 0x5ce   : > { %15272 = vst [vmem:[#allocation111_spill] sm:$0xff] %v10917_v18  ;;  %v3229_v49 = vmax.f32 %v10903_v39, %v10917_v18  ;;  %v10928_v51 = vadd.f32 %v10810_v31, %v3024_v61  ;;  %v3170_v44 = vsel %vm3106_vm13, %v3074_v57, %v3138_v12  ;;  %6568 = vmatpush3.bf16.msra.mxu1 %v10789_v14  ;;  %vm3112_vm9 = vcmp.ge.f32.partialorder %v10899_v41, 0.0 }
 0x5cf   : > { %v3143_v13 = vmul.f32 0.2, %v10890_v20  ;;  %v3144_v2 = vmul.f32 0.2, %v10899_v41  ;;  %v10937_v21 = vadd.f32 %v10813_v38, %v3024_v61  ;;  %6569 = vmatprep.subr.bf16.mxu1 %v10799_v3  ;;  %vm3113_vm14 = vcmp.ge.f32.partialorder %v10920_v47, 0.0  ;;  %15273 = vst [vmem:[#allocation112_spill] sm:$0xff] %v10948_v28 }
 0x5d0   : > { %3230 = vmax.xlane.f32.xlu1 %v3229_v49  ;;  %vm3114_vm8 = vcmp.ge.f32.partialorder %v10923_v53, 0.0  ;;  %v10943_v5 = vmul.f32 0.2, %v10920_v47  ;;  %v10946_v14 = vmul.f32 0.2, %v10923_v53  ;;  %v3028_v57 = vpop.permute.xlu1 %3027  ;;  %vm3115_vm0 = vcmp.ge.f32.partialorder %v10928_v51, 0.0 }
 0x5d1   : > { %v15274_v61 = vld [vmem:[#allocation11_spill] sm:$0xff]  ;;  %v15276_v3 = vld [vmem:[#allocation12_spill] sm:$0xff]  ;;  %v3171_v18 = vsel %vm3107_vm2, %v10856_v45, %v3139_v62  ;;  %v3172_v39 = vsel %vm3108_vm15, %v10859_v30, %v3140_v34  ;;  %v3032_v42 = vpop.permute.xlu0 %3031  ;;  %vm15279_vm13 = vcmp.gt.f32.partialorder %v15278_v36, 0.0  ;;  %vm3116_vm2 = vcmp.ge.f32.partialorder %v10937_v21, 0.0 }
 0x5d2   : > { %vm15275_vm7 = vcmp.gt.f32.partialorder %v15274_v61, 0.0  ;;  %vm15277_vm4 = vcmp.gt.f32.partialorder %v15276_v3, 0.0  ;;  %v15281_v61 = vld [vmem:[#allocation16_spill] sm:$0xff]  ;;  %v10976_v3 = vadd.f32 %v10810_v31, %v3028_v57  ;;  %6570 = vmatpush3.bf16.msra.mxu1 %v10785_v58  ;;  %v10983_v30 = vadd.f32 %v10813_v38, %v3028_v57 }
 0x5d3   : > { %v10953_v12 = vsel %vm15275_vm7, %v3169_v1, -9e+15  ;;  %v10957_v49 = vsel %vm15277_vm4, %v3170_v44, -9e+15  ;;  %v10969_v1 = vsel %vm15279_vm13, %v3171_v18, -9e+15  ;;  %v10986_v34 = vadd.f32 %v10810_v31, %v3032_v42  ;;  %6571 = vmatprep.subr.bf16.mxu1 %v10797_v63 }
 0x5d4   : > { %v3235_v28 = vmax.f32 %v10953_v12, %v10957_v49  ;;  %15280 = vst [vmem:[#allocation113_spill] sm:$0xff] %v10969_v1  ;;  %vm15282_vm10 = vcmp.gt.f32.partialorder %v15281_v61, 0.0  ;;  %v3147_v62 = vmul.f32 0.2, %v10928_v51  ;;  %v3173_v58 = vsel %vm3109_vm1, %v10879_v37, %v3141_v46  ;;  %v3036_v57 = vpop.permute.xlu1 %3035  ;;  %v15284_v37 = vld [vmem:[#allocation13_spill] sm:$0xff] }
 0x5d5   : > { %v10973_v44 = vsel %vm15282_vm10, %v3172_v39, -9e+15  ;;  %v3148_v39 = vmul.f32 0.2, %v10937_v21  ;;  %v3174_v18 = vsel %vm3110_vm11, %v10882_v33, %v3142_v0  ;;  %vm3117_vm15 = vcmp.ge.f32.partialorder %v10976_v3, 0.0  ;;  %v15286_v0 = vld [vmem:[#allocation14_spill] sm:$0xff] }
 0x5d6   : > { %15283 = vst [vmem:[#allocation114_spill] sm:$0xff] %v10973_v44  ;;  %v3238_v45 = vmax.f32 %v10969_v1, %v10973_v44  ;;  %3236 = vmax.xlane.f32.xlu0 %v3235_v28  ;;  %vm3118_vm5 = vcmp.ge.f32.partialorder %v10983_v30, 0.0  ;;  %v3149_v63 = vmul.f32 0.2, %v10976_v3  ;;  %v11001_v61 = vadd.f32 %v10813_v38, %v3032_v42  ;;  %v3040_v28 = vpop.permute.xlu0 %3039  ;;  %6572 = vmatpush3.bf16.msra.mxu1 %v10787_v11  ;;  %v15289_v44 = vld [vmem:[#allocation17_spill] sm:$0xff] }
 0x5d7   : > { %v3150_v36 = vmul.f32 0.2, %v10983_v30  ;;  %vm3119_vm1 = vcmp.ge.f32.partialorder %v10986_v34, 0.0  ;;  %vm15285_vm7 = vcmp.gt.f32.partialorder %v15284_v37, 0.0  ;;  %v3175_v33 = vsel %vm3111_vm6, %v10890_v20, %v3143_v13  ;;  %6573 = vmatprep.subr.bf16.mxu1 %v10795_v60  ;;  %v15292_v20 = vld [vmem:[#allocation18_spill] sm:$0xff] }
 0x5d8   : > { %3239 = vmax.xlane.f32.xlu1 %v3238_v45  ;;  %v11007_v46 = vsel %vm15285_vm7, %v3173_v58, -9e+15  ;;  %vm15287_vm11 = vcmp.gt.f32.partialorder %v15286_v0, 0.0  ;;  %v3176_v42 = vsel %vm3112_vm9, %v10899_v41, %v3144_v2  ;;  %vm15290_vm4 = vcmp.gt.f32.partialorder %v15289_v44, 0.0  ;;  %v3044_v44 = vpop.permute.xlu1 %3043 }
 0x5d9   : > { %v11015_v45 = vsel %vm15287_vm11, %v3174_v18, -9e+15  ;;  %v11022_v1 = vsel %vm15290_vm4, %v3175_v33, -9e+15  ;;  %v11025_v58 = vadd.f32 %v10810_v31, %v3036_v57  ;;  %vm15293_vm6 = vcmp.gt.f32.partialorder %v15292_v20, 0.0 }
 0x5da   : > { %15288 = vst [vmem:[#allocation115_spill] sm:$0xff] %v11015_v45  ;;  %15291 = vst [vmem:[#allocation116_spill] sm:$0xff] %v11022_v1  ;;  %v3241_v11 = vmax.f32 %v11007_v46, %v11015_v45  ;;  %v11032_v13 = vsel %vm15293_vm6, %v3176_v42, -9e+15  ;;  %v11035_v18 = vadd.f32 %v10813_v38, %v3036_v57  ;;  %v11038_v41 = vadd.f32 %v10810_v31, %v3040_v28  ;;  %v3048_v0 = vpop.permute.xlu0 %3047 }
 0x5db   : > { %15294 = vst [vmem:[#allocation117_spill] sm:$0xff] %v11032_v13  ;;  %vm3120_vm9 = vcmp.ge.f32.partialorder %v11001_v61, 0.0  ;;  %v3151_v2 = vmul.f32 0.2, %v10986_v34  ;;  %v3244_v60 = vmax.f32 %v11022_v1, %v11032_v13  ;;  %v11045_v33 = vadd.f32 %v10813_v38, %v3040_v28  ;;  %6574 = vmatpush3.bf16.msra.mxu1 %v10781_v29  ;;  %v15297_v1 = vld [vmem:[#allocation20_spill] sm:$0xff] }
 0x5dc   : > { %v3152_v42 = vmul.f32 0.2, %v11001_v61  ;;  %3242 = vmax.xlane.f32.xlu0 %v3241_v11  ;;  %v11049_v57 = vmul.f32 0.2, %v11025_v58  ;;  %v11052_v20 = vmul.f32 0.2, %v11035_v18  ;;  %v3177_v13 = vsel %vm3113_vm14, %v10920_v47, %v10943_v5 }
 0x5dd   : > { %3245 = vmax.xlane.f32.xlu1 %v3244_v60  ;;  %vm3121_vm13 = vcmp.ge.f32.partialorder %v11025_v58, 0.0  ;;  %vm3122_vm10 = vcmp.ge.f32.partialorder %v11035_v18, 0.0  ;;  %v11060_v28 = vmul.f32 0.2, %v11038_v41  ;;  %v11063_v11 = vmul.f32 0.2, %v11045_v33 }
 0x5de   : > { %v3178_v29 = vsel %vm3114_vm8, %v10923_v53, %v10946_v14  ;;  %vm3123_vm7 = vcmp.ge.f32.partialorder %v11038_v41, 0.0  ;;  %vm3124_vm11 = vcmp.ge.f32.partialorder %v11045_v33, 0.0  ;;  %v15295_v60 = vld [vmem:[#allocation19_spill] sm:$0xff]  ;;  %vm15298_vm6 = vcmp.gt.f32.partialorder %v15297_v1, 0.0 }
 0x5df   : > { %vm15296_vm4 = vcmp.gt.f32.partialorder %v15295_v60, 0.0  ;;  %v11081_v45 = vsel %vm15298_vm6, %v3178_v29, -9e+15  ;;  %v3179_v47 = vsel %vm3115_vm0, %v10928_v51, %v3147_v62  ;;  %v3180_v53 = vsel %vm3116_vm2, %v10937_v21, %v3148_v39  ;;  %v15299_v14 = vld [vmem:[#allocation23_spill] sm:$0xff] }
 0x5e0   : > { %v11077_v37 = vsel %vm15296_vm4, %v3177_v13, -9e+15  ;;  %vm15300_vm14 = vcmp.gt.f32.partialorder %v15299_v14, 0.0  ;;  %v15301_v13 = vld [vmem:[#allocation24_spill] sm:$0xff]  ;;  %v3093_v29 = vadd.f32 %v10810_v31, %v3044_v44  ;;  %v15303_v51 = vpack.c.bf16 %v10769_v19, %v10766_v17 }
 0x5e1   : > { %v3247_v5 = vmax.f32 %v11077_v37, %v11081_v45  ;;  %v11093_v60 = vsel %vm15300_vm14, %v3179_v47, -9e+15  ;;  %vm15302_vm8 = vcmp.gt.f32.partialorder %v15301_v13, 0.0  ;;  %v3094_v62 = vadd.f32 %v10813_v38, %v3044_v44  ;;  %v3052_v44 = vpop.permute.xlu1 %3051 }
 0x5e2   : > { %v11097_v1 = vsel %vm15302_vm8, %v3180_v53, -9e+15  ;;  %2928 = vmatmul.mubr.bf16.vlgmr.msra.gmra.mxu1 %v15303_v51  ;;  %v3095_v39 = vadd.f32 %v10810_v31, %v3048_v0  ;;  %v3096_v47 = vadd.f32 %v10813_v38, %v3048_v0  ;;  %v15304_v13 = vpack.c.bf16 %v10807_v7, %v10821_v50  ;;  %v3056_v0 = vpop.permute.xlu0 %3055 }
 0x5e3   : > { %v3250_v21 = vmax.f32 %v11093_v60, %v11097_v1  ;;  %3248 = vmax.xlane.f32.xlu0 %v3247_v5  ;;  %vm3125_vm0 = vcmp.ge.f32.partialorder %v3093_v29, 0.0  ;;  %v3157_v53 = vmul.f32 0.2, %v3093_v29  ;;  %v3181_v17 = vsel %vm3117_vm15, %v10976_v3, %v3149_v63  ;;  %v15305_v5 = vld [vmem:[#allocation21_spill] sm:$0xff]  ;;  %v15307_v63 = vld [vmem:[#allocation22_spill] sm:$0xff] }
 0x5e4   : > { %2935 = vmatprep.mubr.bf16.mxu1 %v15304_v13  ;;  %v3182_v19 = vsel %vm3118_vm5, %v10983_v30, %v3150_v36  ;;  %vm3126_vm2 = vcmp.ge.f32.partialorder %v3094_v62, 0.0  ;;  %v3158_v51 = vmul.f32 0.2, %v3094_v62  ;;  %vm3127_vm4 = vcmp.ge.f32.partialorder %v3095_v39, 0.0 }
 0x5e5   : > { %3251 = vmax.xlane.f32.xlu1 %v3250_v21  ;;  %vm3128_vm6 = vcmp.ge.f32.partialorder %v3096_v47, 0.0  ;;  %v3159_v50 = vmul.f32 0.2, %v3095_v39  ;;  %v3160_v7 = vmul.f32 0.2, %v3096_v47  ;;  %vm15306_vm14 = vcmp.gt.f32.partialorder %v15305_v5, 0.0 }
 0x5e6   : > { %v11119_v13 = vsel %vm15306_vm14, %v3181_v17, -9e+15  ;;  %v3183_v3 = vsel %vm3119_vm1, %v10986_v34, %v3151_v2  ;;  %vm15308_vm15 = vcmp.gt.f32.partialorder %v15307_v63, 0.0  ;;  %v3184_v30 = vsel %vm3120_vm9, %v11001_v61, %v3152_v42 }
 0x5e7   : > { %v11126_v36 = vsel %vm15308_vm15, %v3182_v19, -9e+15  ;;  %v11133_v21 = vsel %vm315_vm3, %v3183_v3, -9e+15  ;;  %v3097_v5 = vadd.f32 %v10810_v31, %v3052_v44  ;;  %v11140_v34 = vsel %vm316_vm12, %v3184_v30, -9e+15 }
 0x5e8   : > { %v3253_v17 = vmax.f32 %v11119_v13, %v11126_v36  ;;  %v3098_v2 = vadd.f32 %v10813_v38, %v3052_v44  ;;  %v3099_v19 = vadd.f32 %v10810_v31, %v3056_v0  ;;  %v3256_v61 = vmax.f32 %v11133_v21, %v11140_v34 }
 0x5e9   : > { %vm3129_vm5 = vcmp.ge.f32.partialorder %v3097_v5, 0.0  ;;  %v3161_v42 = vmul.f32 0.2, %v3097_v5  ;;  %v3100_v3 = vadd.f32 %v10813_v38, %v3056_v0  ;;  %v15309_v30 = vpack.c.bf16 %v10816_v48, %v10824_v26 }
 0x5ea   : > { %3254 = vmax.xlane.f32.xlu0 %v3253_v17  ;;  %vm3130_vm1 = vcmp.ge.f32.partialorder %v3098_v2, 0.0  ;;  %v3162_v55 = vmul.f32 0.2, %v3098_v2  ;;  %vm3131_vm9 = vcmp.ge.f32.partialorder %v3099_v19, 0.0  ;;  %v3163_v63 = vmul.f32 0.2, %v3099_v19  ;;  %3257 = vmax.xlane.f32.xlu1 %v3256_v61 }
 0x5eb   : > { %2936 = vmatmul.mubr.bf16.gmra.mxu1 %v15309_v30  ;;  %vm3132_vm8 = vcmp.ge.f32.partialorder %v3100_v3, 0.0  ;;  %v3164_v44 = vmul.f32 0.2, %v3100_v3  ;;  %v3185_v31 = vsel %vm3121_vm13, %v11025_v58, %v11049_v57  ;;  %v3186_v38 = vsel %vm3122_vm10, %v11035_v18, %v11052_v20 }
 0x5ec   : > { %v15310_v0 = vpack.c.bf16 %v10845_v40, %v10829_v10  ;;  %vm15311_vm14 = vcmp.gt.f32.partialorder %v15015_v4, 0.0  ;;  %vm15312_vm15 = vcmp.gt.f32.partialorder %v15017_v22, 0.0  ;;  %v3187_v58 = vsel %vm3123_vm7, %v11038_v41, %v11060_v28 }
 0x5ed   : > { %v11163_v48 = vsel %vm15311_vm14, %v3185_v31, -9e+15  ;;  %v11167_v26 = vsel %vm15312_vm15, %v3186_v38, -9e+15  ;;  %v3188_v20 = vsel %vm3124_vm11, %v11045_v33, %v11063_v11  ;;  %vm15313_vm13 = vcmp.gt.f32.partialorder %v15173_v32, 0.0  ;;  %v15326_v38 = vld [vmem:[#allocation101_spill] sm:$0xff] }
 0x5ee   : > { %2943 = vmatprep.mubr.bf16.mxu1 %v15310_v0  ;;  %v3259_v10 = vmax.f32 %v11163_v48, %v11167_v26  ;;  %v11181_v40 = vsel %vm15313_vm13, %v3187_v58, -9e+15  ;;  %vm15314_vm10 = vcmp.gt.f32.partialorder %v15175_v24, 0.0  ;;  %v3189_v57 = vsel %vm3125_vm0, %v3093_v29, %v3157_v53  ;;  %v15327_v0 = vld [vmem:[#allocation87_spill] sm:$0xff]  ;;  %v15329_v58 = vld [vmem:[#allocation89_spill] sm:$0xff] }
 0x5ef   : > { %v11185_v18 = vsel %vm15314_vm10, %v3188_v20, -9e+15  ;;  %v3190_v28 = vsel %vm3126_vm2, %v3094_v62, %v3158_v51  ;;  %vm15315_vm7 = vcmp.gt.f32.partialorder %v15023_v25, 0.0  ;;  %v3191_v11 = vsel %vm3127_vm4, %v3095_v39, %v3159_v50  ;;  %v15330_v20 = vld [vmem:[#allocation103_spill] sm:$0xff] }
 0x5f0   : > { %v3262_v41 = vmax.f32 %v11181_v40, %v11185_v18  ;;  %v11193_v33 = vsel %vm15315_vm7, %v3189_v57, -9e+15  ;;  %3260 = vmax.xlane.f32.xlu0 %v3259_v10  ;;  %vm15316_vm11 = vcmp.gt.f32.partialorder %v15025_v43, 0.0  ;;  %v3192_v61 = vsel %vm3128_vm6, %v3096_v47, %v3160_v7  ;;  %v15331_v57 = vld [vmem:[#allocation98_spill] sm:$0xff] }
 0x5f1   : > { %v11198_v17 = vsel %vm15316_vm11, %v3190_v28, -9e+15  ;;  %vm15317_vm0 = vcmp.gt.f32.partialorder %v15027_v52, 0.0  ;;  %v3193_v53 = vsel %vm3129_vm5, %v3097_v5, %v3161_v42  ;;  %vm15318_vm2 = vcmp.gt.f32.partialorder %v15029_v15, 0.0 }
 0x5f2   : > { %v11203_v29 = vsel %vm15317_vm0, %v3191_v11, -9e+15  ;;  %3263 = vmax.xlane.f32.xlu1 %v3262_v41  ;;  %v3265_v62 = vmax.f32 %v11193_v33, %v11198_v17  ;;  %v11210_v39 = vsel %vm15318_vm2, %v3192_v61, -9e+15  ;;  %v3194_v51 = vsel %vm3130_vm1, %v3098_v2, %v3162_v55 }
 0x5f3   : > { %vm15319_vm4 = vcmp.gt.f32.partialorder %v15031_v59, 0.0  ;;  %v3268_v47 = vmax.f32 %v11203_v29, %v11210_v39  ;;  %vm15320_vm6 = vcmp.gt.f32.partialorder %v15033_v35, 0.0  ;;  %v3195_v5 = vsel %vm3131_vm9, %v3099_v19, %v3163_v63 }
 0x5f4   : > { %v11215_v50 = vsel %vm15319_vm4, %v3193_v53, -9e+15  ;;  %v11221_v7 = vsel %vm15320_vm6, %v3194_v51, -9e+15  ;;  %v3196_v42 = vsel %vm3132_vm8, %v3100_v3, %v3164_v44  ;;  %vm15321_vm5 = vcmp.gt.f32.partialorder %v15035_v56, 0.0  ;;  %3266 = vmax.xlane.f32.xlu0 %v3265_v62  ;;  %v15325_v3 = vld [vmem:[#allocation104_spill] sm:$0xff] }
 0x5f5   : > { %v11227_v30 = vsel %vm15321_vm5, %v3195_v5, -9e+15  ;;  %vm15322_vm1 = vcmp.gt.f32.partialorder %v15037_v23, 0.0  ;;  %v15323_v2 = vpack.c.bf16 %v10848_v16, %v10832_v8  ;;  %v3271_v31 = vmax.f32 %v11215_v50, %v11221_v7  ;;  %v15328_v8 = vld [vmem:[#allocation110_spill] sm:$0xff]  ;;  %v15337_v51 = vld [vmem:[#allocation112_spill] sm:$0xff] }
 0x5f6   : > { %v11231_v55 = vsel %vm15322_vm1, %v3196_v42, -9e+15  ;;  %v15324_v63 = vpack.c.bf16 %v10876_v6, %v10840_v27  ;;  %3269 = vmax.xlane.f32.xlu1 %v3268_v47  ;;  %v2813_v44 = vmul.f32 %v15325_v3, %v10603_v54  ;;  %7357 = vrcp.f32 %v15326_v38  ;;  %v15332_v27 = vld [vmem:[#allocation62_spill] sm:$0xff]  ;;  %v15333_v6 = vld [vmem:[#allocation107_spill] sm:$0xff] }
 0x5f7   : > { %2944 = vmatmul.mubr.bf16.gmra.mxu1 %v15323_v2  ;;  %v3274_v19 = vmax.f32 %v11227_v30, %v11231_v55  ;;  %v2818_v16 = vmul.f32 %v15328_v8, %v15327_v0  ;;  %v2811_v10 = vmul.f32 %v15330_v20, %v15329_v58  ;;  %7359 = vrcp.f32 %v15331_v57  ;;  %v15334_v54 = vld [vmem:[#allocation95_spill] sm:$0xff]  ;;  %v15335_v53 = vld [vmem:[#allocation102_spill] sm:$0xff]  ;;  %v15339_v2 = vld [vmem:[#allocation100_spill] sm:$0xff] }
 0x5f8   : > { %2951 = vmatprep.mubr.bf16.mxu1 %v15324_v63  ;;  %3272 = vmax.xlane.f32.xlu0 %v3271_v31  ;;  %v2816_v41 = vmul.f32 %v15333_v6, %v15332_v27  ;;  %v2817_v61 = vmul.f32 %v15328_v8, %v15334_v54  ;;  %7361 = vrcp.f32 %v15335_v53  ;;  %v15336_v62 = vld [vmem:[#allocation54_spill] sm:$0xff]  ;;  %v15340_v31 = vld [vmem:[#allocation93_spill] sm:$0xff]  ;;  %v15342_v8 = vld [vmem:[#allocation63_spill] sm:$0xff] }
 0x5f9   : > { %v2837_v28 = vpack.c.bf16 %v2813_v44, %v2811_v10  ;;  %v2822_v47 = vmul.f32 %v15337_v51, %v15336_v62  ;;  %v15338_v5 = vld [vmem:[#allocation86_spill] sm:$0xff]  ;;  %7363 = vrcp.f32 %v15339_v2  ;;  %v15341_v63 = vld [vmem:[#allocation109_spill] sm:$0xff]  ;;  %v15345_v27 = vld [vmem:[#allocation88_spill] sm:$0xff] }
 0x5fa   : > { %3275 = vmax.xlane.f32.xlu1 %v3274_v19  ;;  %v2840_v11 = vpack.c.bf16 %v2818_v16, %v2816_v41  ;;  %v2815_v42 = vmul.f32 %v15333_v6, %v15338_v5  ;;  %v2820_v19 = vmul.f32 %v15341_v63, %v15340_v31  ;;  %v2821_v16 = vmul.f32 %v15337_v51, %v15342_v8  ;;  %v15343_v58 = vld [vmem:[#allocation70_spill] sm:$0xff]  ;;  %v15344_v10 = vld [vmem:[#allocation57_spill] sm:$0xff]  ;;  %v15347_v62 = vld [vmem:[#allocation72_spill] sm:$0xff] }
 0x5fb   : > { %v2819_v57 = vmul.f32 %v15341_v63, %v15344_v10  ;;  %v15348_v5 = vld [vmem:[#allocation69_spill] sm:$0xff]  ;;  %v15349_v51 = vld [vmem:[#allocation96_spill] sm:$0xff]  ;;  %v15350_v63 = vld [vmem:[#allocation58_spill] sm:$0xff] }
 0x5fc   : > { %v2839_v3 = vpack.c.bf16 %v2817_v61, %v2815_v42  ;;  %v2842_v44 = vpack.c.bf16 %v2822_v47, %v2820_v19  ;;  %v15346_v61 = vld [vmem:[#allocation99_spill] sm:$0xff] }
 0x5fd   : > { %v2841_v41 = vpack.c.bf16 %v2821_v16, %v2819_v57  ;;  %v15353_v57 = vld [vmem:[#allocation106_spill] sm:$0xff] }
 0x5ff   : > { %2952 = vmatmul.mubr.bf16.gmra.mxu1 %v2837_v28 }
 0x600   : > { %2959 = vmatprep.mubr.bf16.mxu1 %v2840_v11 }
 0x603   : > { %v7358_v38 = vpop.eup %7357 }
 0x604   : > { %v7360_v0 = vpop.eup %7359  ;;  %v2826_v20 = vmul.f32 %v7358_v38, %v15343_v58  ;;  %v2825_v53 = vmul.f32 %v7358_v38, %v15346_v61  ;;  %v8011_v58 = vmov 5   ;;  %v15355_v61 = vld [vmem:[#allocation108_spill] sm:$0xff] }
 0x605   : > { %v2824_v6 = vmul.f32 %v7360_v0, %v15345_v27  ;;  %v7362_v11 = vpop.eup %7361  ;;  %v2823_v42 = vmul.f32 %v7360_v0, %v15348_v5  ;;  %6945 = vset.pattern.permute.xlu1 %v8011_v58  ;;  %6946 = vset.pattern.permute.xlu0 %v8011_v58  ;;  %v11277_v27 = vpop.f32.mrf.mxu1 }
 0x606   : > { %v7364_v54 = vpop.eup %7363  ;;  %v2830_v47 = vmul.f32 %v7362_v11, %v15347_v62  ;;  %15354 = vst [vmem:[#allocation104_spill] sm:$0xff] %v11277_v27 }
 0x607   : > { %2960 = vmatmul.mubr.bf16.gmra.mxu1 %v2839_v3  ;;  %v2844_v28 = vpack.c.bf16 %v2826_v20, %v2824_v6  ;;  %v2828_v2 = vmul.f32 %v7364_v54, %v15349_v51  ;;  %v2843_v31 = vpack.c.bf16 %v2825_v53, %v2823_v42  ;;  %v2829_v3 = vmul.f32 %v7362_v11, %v15350_v63  ;;  %v15352_v20 = vld [vmem:[#allocation105_spill] sm:$0xff]  ;;  %v15356_v53 = vld [vmem:[#allocation111_spill] sm:$0xff]  ;;  %v11281_v62 = vpop.f32.mrf.mxu1 }
 0x608   : > { %2967 = vmatprep.mubr.bf16.mxu1 %v2842_v44  ;;  %v15351_v44 = vld [vmem:[#allocation61_spill] sm:$0xff]  ;;  %15357 = vst [vmem:[#allocation101_spill] sm:$0xff] %v11281_v62 }
 0x609   : > { %v2846_v19 = vpack.c.bf16 %v2830_v47, %v2828_v2  ;;  %v2827_v8 = vmul.f32 %v7364_v54, %v15351_v44  ;;  %v15359_v63 = vld [vmem:[#allocation113_spill] sm:$0xff]  ;;  %v15360_v44 = vld [vmem:[#allocation114_spill] sm:$0xff] }
 0x60b   : > { %v2845_v16 = vpack.c.bf16 %v2829_v3, %v2827_v8 }
 0x60f   : > { %2968 = vmatmul.mubr.bf16.gmra.mxu1 %v2841_v41 }
 0x610   : > { %2975 = vmatprep.mubr.bf16.mxu1 %v2844_v28 }
 0x617   : > { %2976 = vmatmul.mubr.bf16.gmra.mxu1 %v2843_v31 }
 0x618   : > { %2983 = vmatprep.mubr.bf16.mxu1 %v2846_v19  ;;  %v11285_v19 = vpop.f32.mrf.mxu1 }
 0x619   : > { %15358 = vst [vmem:[#allocation87_spill] sm:$0xff] %v11285_v19  ;;  %v7861_v19 = vld [vmem:[%s14419_s1 + $0x8] sm:$0xff]  }
 0x61f   : > { %2984 = vmatmul.mubr.bf16.gmra.mxu1 %v2845_v16 }
 0x653   : > { %v3234_v38 = vpop.xlane.xlu0 %3233 }
 0x654   : > { %v3279_v10 = vsub.f32 %v15352_v20, %v3234_v38  ;;  %v3280_v0 = vsub.f32 %v15353_v57, %v3234_v38 }
 0x656   : > { %v3313_v6 = vmul.f32 1.442695, %v3279_v10  ;;  %v3315_v41 = vmul.f32 1.442695, %v3280_v0  ;;  %v11289_v10 = vpop.f32.mrf.mxu1  ;;  %v15362_v0 = vld [vmem:[#allocation115_spill] sm:$0xff] }
 0x657   : > { %15361 = vst [vmem:[#allocation110_spill] sm:$0xff] %v11289_v10 }
 0x658   : > { %7365 = vpow2.f32 %v3313_v6 }
 0x659   : > { %v3231_v28 = vpop.xlane.xlu1 %3230  ;;  %7367 = vpow2.f32 %v3315_v41  ;;  %v15363_v41 = vld [vmem:[#allocation116_spill] sm:$0xff] }
 0x65a   : > { %v3277_v11 = vsub.f32 %v15355_v61, %v3231_v28  ;;  %v3278_v54 = vsub.f32 %v15356_v53, %v3231_v28  ;;  %v15364_v61 = vld [vmem:[#allocation117_spill] sm:$0xff] }
 0x65c   : > { %v3309_v47 = vmul.f32 1.442695, %v3277_v11  ;;  %v3311_v5 = vmul.f32 1.442695, %v3278_v54 }
 0x65e   : > { %7369 = vpow2.f32 %v3309_v47 }
 0x65f   : > { %v3237_v42 = vpop.xlane.xlu0 %3236  ;;  %7371 = vpow2.f32 %v3311_v5  ;;  %v11299_v5 = vpop.f32.mrf.mxu1 }
 0x660   : > { %v3281_v2 = vsub.f32 %v10953_v12, %v3237_v42  ;;  %v3282_v31 = vsub.f32 %v10957_v49, %v3237_v42  ;;  %15365 = vst [vmem:[#allocation89_spill] sm:$0xff] %v11299_v5 }
 0x661   : > { %v3240_v51 = vpop.xlane.xlu1 %3239 }
 0x662   : > { %v3283_v3 = vsub.f32 %v15359_v63, %v3240_v51  ;;  %v3284_v8 = vsub.f32 %v15360_v44, %v3240_v51  ;;  %v3317_v16 = vmul.f32 1.442695, %v3281_v2  ;;  %v3319_v20 = vmul.f32 1.442695, %v3282_v31 }
 0x664   : > { %v3321_v58 = vmul.f32 1.442695, %v3283_v3  ;;  %v3323_v38 = vmul.f32 1.442695, %v3284_v8  ;;  %7373 = vpow2.f32 %v3317_v16 }
 0x665   : > { %v3243_v57 = vpop.xlane.xlu0 %3242  ;;  %v11295_v53 = vpop.eup %7365 }
 0x666   : > { %7375 = vpow2.f32 %v3321_v58  ;;  %v3246_v12 = vpop.xlane.xlu1 %3245  ;;  %v3285_v49 = vsub.f32 %v11007_v46, %v3243_v57  ;;  %v3286_v6 = vsub.f32 %v15362_v0, %v3243_v57  ;;  %v11297_v47 = vpop.eup %7367 }
 0x667   : > { %7377 = vpow2.f32 %v3323_v38  ;;  %v3287_v28 = vsub.f32 %v15363_v41, %v3246_v12  ;;  %v3288_v11 = vsub.f32 %v15364_v61, %v3246_v12  ;;  %v3376_v46 = vadd.f32 %v11297_v47, %v11295_v53  ;;  %v11309_v38 = vpop.f32.mrf.mxu1 }
 0x668   : > { %7379 = vpow2.f32 %v3319_v20  ;;  %v3325_v54 = vmul.f32 1.442695, %v3285_v49  ;;  %v3327_v2 = vmul.f32 1.442695, %v3286_v6  ;;  %15366 = vst [vmem:[#allocation103_spill] sm:$0xff] %v11309_v38 }
 0x669   : > { %v3329_v42 = vmul.f32 1.442695, %v3287_v28  ;;  %v3331_v51 = vmul.f32 1.442695, %v3288_v11  ;;  %3377 = vadd.xlane.f32.xlu1 %v3376_v46 }
 0x66a   : > { %7381 = vpow2.f32 %v3325_v54 }
 0x66b   : > { %7383 = vpow2.f32 %v3329_v42  ;;  %v11307_v58 = vpop.eup %7369 }
 0x66c   : > { %v3249_v31 = vpop.xlane.xlu0 %3248  ;;  %7385 = vpow2.f32 %v3331_v51  ;;  %v11311_v57 = vpop.eup %7371 }
 0x66d   : > { %v3289_v3 = vsub.f32 %v11077_v37, %v3249_v31  ;;  %v3290_v44 = vsub.f32 %v11081_v45, %v3249_v31  ;;  %7387 = vpow2.f32 %v3327_v2  ;;  %v3373_v37 = vadd.f32 %v11311_v57, %v11307_v58 }
 0x66e   : > { %v3252_v63 = vpop.xlane.xlu1 %3251 }
 0x66f   : > { %v3291_v8 = vsub.f32 %v11093_v60, %v3252_v63  ;;  %v3292_v16 = vsub.f32 %v11097_v1, %v3252_v63  ;;  %v3333_v20 = vmul.f32 1.442695, %v3289_v3  ;;  %v3335_v0 = vmul.f32 1.442695, %v3290_v44  ;;  %v11317_v1 = vpop.f32.mrf.mxu1  ;;  %3374 = vadd.xlane.f32.xlu0 %v3373_v37 }
 0x670   : > { %15367 = vst [vmem:[#allocation98_spill] sm:$0xff] %v11317_v1 }
 0x671   : > { %v3337_v12 = vmul.f32 1.442695, %v3291_v8  ;;  %v3339_v49 = vmul.f32 1.442695, %v3292_v16  ;;  %7389 = vpow2.f32 %v3333_v20  ;;  %v11315_v60 = vpop.eup %7373 }
 0x673   : > { %7391 = vpow2.f32 %v3337_v12  ;;  %v3255_v45 = vpop.xlane.xlu0 %3254  ;;  %v3258_v6 = vpop.xlane.xlu1 %3257 }
 0x674   : > { %7393 = vpow2.f32 %v3339_v49  ;;  %v3293_v41 = vsub.f32 %v11119_v13, %v3255_v45  ;;  %v3294_v28 = vsub.f32 %v11126_v36, %v3255_v45  ;;  %v11321_v61 = vpop.eup %7375  ;;  %v3295_v11 = vsub.f32 %v11133_v21, %v3258_v6  ;;  %v11331_v36 = vpop.f32.mrf.mxu1 }
 0x675   : > { %7395 = vpow2.f32 %v3335_v0  ;;  %v3296_v54 = vsub.f32 %v11140_v34, %v3258_v6  ;;  %v11325_v42 = vpop.eup %7377  ;;  %15368 = vst [vmem:[#allocation62_spill] sm:$0xff] %v11331_v36 }
 0x676   : > { %v3341_v51 = vmul.f32 1.442695, %v3293_v41  ;;  %v11327_v2 = vpop.eup %7379  ;;  %v3345_v31 = vmul.f32 1.442695, %v3295_v11  ;;  %v3343_v63 = vmul.f32 1.442695, %v3294_v28  ;;  %v3382_v13 = vadd.f32 %v11325_v42, %v11321_v61  ;;  %v11345_v45 = vpop.f32.mrf.mxu1 }
 0x677   : > { %v3347_v46 = vmul.f32 1.442695, %v3296_v54  ;;  %v3379_v21 = vadd.f32 %v11327_v2, %v11315_v60  ;;  %v11337_v16 = vpop.eup %7381  ;;  %15369 = vst [vmem:[#allocation107_spill] sm:$0xff] %v11345_v45 }
 0x678   : > { %7397 = vpow2.f32 %v3341_v51  ;;  %3383 = vadd.xlane.f32.xlu1 %v3382_v13  ;;  %v11341_v49 = vpop.eup %7383 }
 0x679   : > { %v3261_v3 = vpop.xlane.xlu0 %3260  ;;  %7399 = vpow2.f32 %v3345_v31  ;;  %3380 = vadd.xlane.f32.xlu0 %v3379_v21  ;;  %v11343_v37 = vpop.eup %7385 }
 0x67a   : > { %v3297_v44 = vsub.f32 %v11163_v48, %v3261_v3  ;;  %v3298_v8 = vsub.f32 %v11167_v26, %v3261_v3  ;;  %7401 = vpow2.f32 %v3347_v46  ;;  %v11347_v28 = vpop.eup %7387  ;;  %v3388_v54 = vadd.f32 %v11343_v37, %v11341_v49 }
 0x67b   : > { %v3264_v34 = vpop.xlane.xlu1 %3263  ;;  %7403 = vpow2.f32 %v3343_v63  ;;  %v3385_v46 = vadd.f32 %v11347_v28, %v11337_v16 }
 0x67c   : > { %v3299_v20 = vsub.f32 %v11181_v40, %v3264_v34  ;;  %v3300_v12 = vsub.f32 %v11185_v18, %v3264_v34  ;;  %v3349_v0 = vmul.f32 1.442695, %v3297_v44  ;;  %v3351_v26 = vmul.f32 1.442695, %v3298_v8  ;;  %3389 = vadd.xlane.f32.xlu1 %v3388_v54 }
 0x67d   : > { %v3267_v41 = vpop.xlane.xlu0 %3266  ;;  %3386 = vadd.xlane.f32.xlu0 %v3385_v46 }
 0x67e   : > { %v3353_v48 = vmul.f32 1.442695, %v3299_v20  ;;  %v3355_v6 = vmul.f32 1.442695, %v3300_v12  ;;  %7405 = vpow2.f32 %v3349_v0  ;;  %v3301_v40 = vsub.f32 %v11193_v33, %v3267_v41  ;;  %v11357_v63 = vpop.eup %7389  ;;  %v11361_v33 = vpop.f32.mrf.mxu1 }
 0x67f   : > { %v3270_v11 = vpop.xlane.xlu1 %3269  ;;  %v3302_v18 = vsub.f32 %v11198_v17, %v3267_v41  ;;  %15370 = vst [vmem:[#allocation95_spill] sm:$0xff] %v11357_v63  ;;  %15372 = vst [vmem:[#allocation54_spill] sm:$0xff] %v11361_v33 }
 0x680   : > { %7407 = vpow2.f32 %v3353_v48  ;;  %v3303_v51 = vsub.f32 %v11203_v29, %v3270_v11  ;;  %v3304_v31 = vsub.f32 %v11210_v39, %v3270_v11  ;;  %v3357_v13 = vmul.f32 1.442695, %v3301_v40  ;;  %v11359_v3 = vpop.eup %7391  ;;  %v11375_v11 = vpop.f32.mrf.mxu1 }
 0x681   : > { %7409 = vpow2.f32 %v3355_v6  ;;  %15371 = vst [vmem:[#allocation102_spill] sm:$0xff] %v11359_v3  ;;  %v3359_v34 = vmul.f32 1.442695, %v3302_v18  ;;  %v3273_v44 = vpop.xlane.xlu0 %3272  ;;  %v11363_v29 = vpop.eup %7393  ;;  %15373 = vst [vmem:[#allocation112_spill] sm:$0xff] %v11375_v11 }
 0x682   : > { %7411 = vpow2.f32 %v3351_v26  ;;  %v3361_v17 = vmul.f32 1.442695, %v3303_v51  ;;  %v3363_v21 = vmul.f32 1.442695, %v3304_v31  ;;  %v3305_v8 = vsub.f32 %v11215_v50, %v3273_v44  ;;  %v11367_v12 = vpop.eup %7395  ;;  %v11385_v51 = vpop.f32.mrf.mxu1 }
 0x683   : > { %7413 = vpow2.f32 %v3357_v13  ;;  %v3276_v39 = vpop.xlane.xlu1 %3275  ;;  %v3306_v20 = vsub.f32 %v11221_v7, %v3273_v44  ;;  %v3394_v6 = vadd.f32 %v11363_v29, %v11359_v3  ;;  %v3391_v41 = vadd.f32 %v11367_v12, %v11357_v63  ;;  %15378 = vst [vmem:[#allocation63_spill] sm:$0xff] %v11385_v51  ;;  %v15439_v3 = vld [vmem:[#allocation16_spill] sm:$0xff] }
 0x684   : > { %7415 = vpow2.f32 %v3361_v17  ;;  %v3307_v0 = vsub.f32 %v11227_v30, %v3276_v39  ;;  %v3308_v48 = vsub.f32 %v11231_v55, %v3276_v39  ;;  %v3365_v26 = vmul.f32 1.442695, %v3305_v8 }
 0x685   : > { %7417 = vpow2.f32 %v3363_v21  ;;  %v3367_v40 = vmul.f32 1.442695, %v3306_v20  ;;  %3395 = vadd.xlane.f32.xlu1 %v3394_v6  ;;  %v11377_v18 = vpop.eup %7397  ;;  %3392 = vadd.xlane.f32.xlu0 %v3391_v41 }
 0x686   : > { %7419 = vpow2.f32 %v3359_v34  ;;  %v3369_v50 = vmul.f32 1.442695, %v3307_v0  ;;  %v3371_v7 = vmul.f32 1.442695, %v3308_v48  ;;  %15374 = vst [vmem:[#allocation86_spill] sm:$0xff] %v11377_v18  ;;  %v11379_v30 = vpop.eup %7399  ;;  %v11397_v34 = vpop.f32.mrf.mxu1 }
 0x687   : > { %7421 = vpow2.f32 %v3365_v26  ;;  %15375 = vst [vmem:[#allocation100_spill] sm:$0xff] %v11379_v30  ;;  %v11381_v55 = vpop.eup %7401  ;;  %15382 = vst [vmem:[#allocation99_spill] sm:$0xff] %v11397_v34 }
 0x688   : > { %7423 = vpow2.f32 %v3369_v50  ;;  %15376 = vst [vmem:[#allocation93_spill] sm:$0xff] %v11381_v55  ;;  %v11383_v54 = vpop.eup %7403  ;;  %v3400_v31 = vadd.f32 %v11381_v55, %v11379_v30  ;;  %v11411_v6 = vpop.f32.mrf.mxu1 }
 0x689   : > { %7425 = vpow2.f32 %v3371_v7  ;;  %15377 = vst [vmem:[#allocation109_spill] sm:$0xff] %v11383_v54  ;;  %v3397_v46 = vadd.f32 %v11383_v54, %v11377_v18  ;;  %15387 = vst [vmem:[#allocation61_spill] sm:$0xff] %v11411_v6 }
 0x68a   : > { %7427 = vpow2.f32 %v3367_v40  ;;  %3401 = vadd.xlane.f32.xlu1 %v3400_v31 }
 0x68b   : > { %v11391_v13 = vpop.eup %7405  ;;  %3398 = vadd.xlane.f32.xlu0 %v3397_v46  ;;  %v11425_v46 = vpop.f32.mrf.mxu1 }
 0x68c   : > { %15379 = vst [vmem:[#allocation70_spill] sm:$0xff] %v11391_v13  ;;  %15392 = vst [vmem:[#allocation113_spill] sm:$0xff] %v11425_v46 }
 0x68d   : > { %v11393_v17 = vpop.eup %7407  ;;  %v11433_v11 = vpop.f32.mrf.mxu1 }
 0x68e   : > { %15380 = vst [vmem:[#allocation57_spill] sm:$0xff] %v11393_v17  ;;  %v11395_v21 = vpop.eup %7409  ;;  %15394 = vst [vmem:[#allocation115_spill] sm:$0xff] %v11433_v11  ;;  %v7862_v11 = vld [vmem:[%s14419_s1 + $0x10] sm:$0xff]  }
 0x68f   : > { %15381 = vst [vmem:[#allocation88_spill] sm:$0xff] %v11395_v21  ;;  %v11399_v44 = vpop.eup %7411  ;;  %v3406_v39 = vadd.f32 %v11395_v21, %v11393_v17  ;;  %v11435_v36 = vpop.f32.mrf.mxu1  ;;  %v15410_v21 = vld [vmem:[#allocation5_spill] sm:$0xff] }
 0x690   : > { %15383 = vst [vmem:[#allocation72_spill] sm:$0xff] %v11399_v44  ;;  %v11403_v8 = vpop.eup %7413  ;;  %v3403_v20 = vadd.f32 %v11399_v44, %v11391_v13  ;;  %15395 = vst [vmem:[#allocation116_spill] sm:$0xff] %v11435_v36  ;;  %v7891_v36 = vld [vmem:[%s8098_s5 + $0x70] sm:$0xff]  ;;  %v15411_v44 = vld [vmem:[#allocation6_spill] sm:$0xff] }
 0x691   : > { %15384 = vst [vmem:[#allocation69_spill] sm:$0xff] %v11403_v8  ;;  %v11407_v0 = vpop.eup %7415  ;;  %3407 = vadd.xlane.f32.xlu1 %v3406_v39 }
 0x692   : > { %15385 = vst [vmem:[#allocation96_spill] sm:$0xff] %v11407_v0  ;;  %v11409_v48 = vpop.eup %7417  ;;  %3404 = vadd.xlane.f32.xlu0 %v3403_v20 }
 0x693   : > { %15386 = vst [vmem:[#allocation58_spill] sm:$0xff] %v11409_v48  ;;  %v11413_v26 = vpop.eup %7419  ;;  %v3412_v41 = vadd.f32 %v11409_v48, %v11407_v0 }
 0x694   : > { %15388 = vst [vmem:[#allocation105_spill] sm:$0xff] %v11413_v26  ;;  %v11417_v50 = vpop.eup %7421  ;;  %v3409_v7 = vadd.f32 %v11413_v26, %v11403_v8 }
 0x695   : > { %15389 = vst [vmem:[#allocation106_spill] sm:$0xff] %v11417_v50  ;;  %v11421_v40 = vpop.eup %7423  ;;  %3413 = vadd.xlane.f32.xlu1 %v3412_v41  ;;  %v11437_v41 = vpop.f32.mrf.mxu1 }
 0x696   : > { %15390 = vst [vmem:[#allocation108_spill] sm:$0xff] %v11421_v40  ;;  %v11423_v31 = vpop.eup %7425  ;;  %3410 = vadd.xlane.f32.xlu0 %v3409_v7  ;;  %15396 = vst [vmem:[#allocation117_spill] sm:$0xff] %v11437_v41  ;;  %v7888_v41 = vld [vmem:[%s8098_s5 + $0x58] sm:$0xff] }
 0x697   : > { %15391 = vst [vmem:[#allocation111_spill] sm:$0xff] %v11423_v31  ;;  %v11427_v39 = vpop.eup %7427  ;;  %v3418_v20 = vadd.f32 %v11423_v31, %v11421_v40 }
 0x698   : > { %15393 = vst [vmem:[#allocation114_spill] sm:$0xff] %v11427_v39  ;;  %v3415_v51 = vadd.f32 %v11427_v39, %v11417_v50 }
 0x699   : > { %3419 = vadd.xlane.f32.xlu1 %v3418_v20 }
 0x69a   : > { %3416 = vadd.xlane.f32.xlu0 %v3415_v51 }
 0x6a2   : > { %v6575_v1 = vpop.f32.mrf.mxu1 }
 0x6a4   : > { %v6576_v10 = vpop.f32.mrf.mxu1 }
 0x6a5   : > { %v11439_v46 = vadd.f32 %v6576_v10, %v6575_v1 }
 0x6a6   : > { %v11441_v7 = vpop.f32.mrf.mxu1 }
 0x6a7   : > { %15397 = vst [vmem:[#allocation118_spill] sm:$0xff] %v11439_v46  ;;  %15398 = vst [vmem:[#allocation119_spill] sm:$0xff] %v11441_v7  ;;  %v7863_v46 = vld [vmem:[%s14419_s1] sm:$0xff]  }
 0x6a8   : > { %v11447_v20 = vpop.f32.mrf.mxu1 }
 0x6a9   : > { %15399 = vst [vmem:[#allocation120_spill] sm:$0xff] %v11447_v20 }
 0x6aa   : > { %3487 = vrot.lane.b32.xlu1 %v7861_v19, %s8012_s8  ;;  %v7864_v19 = vld [vmem:[%s14419_s1 + $0x20] sm:$0xff]  }
 0x6ab   : > { %v6581_v51 = vpop.f32.mrf.mxu1 }
 0x6ad   : > { %v6582_v10 = vpop.f32.mrf.mxu1 }
 0x6ae   : > { %3489 = vrot.lane.b32.xlu1 %v7862_v11, %s8012_s8  ;;  %v11453_v1 = vadd.f32 %v6582_v10, %v6581_v51  ;;  %v7865_v11 = vld [vmem:[%s14419_s1 + $0x18] sm:$0xff]  }
 0x6af   : > { %v11459_v7 = vpop.f32.mrf.mxu1 }
 0x6b0   : > { %15400 = vst [vmem:[#allocation121_spill] sm:$0xff] %v11453_v1  ;;  %3485 = vrot.lane.b32.xlu0 %v7863_v46, %s8012_s8  ;;  %15401 = vst [vmem:[#allocation122_spill] sm:$0xff] %v11459_v7  ;;  %v7866_v46 = vld [vmem:[%s14419_s1 + $0x30] sm:$0xff]  }
 0x6b1   : > { %v11465_v20 = vpop.f32.mrf.mxu1 }
 0x6b2   : > { %3493 = vrot.lane.b32.xlu1 %v7864_v19, %s8012_s8  ;;  %15402 = vst [vmem:[#allocation123_spill] sm:$0xff] %v11465_v20  ;;  %v7867_v19 = vld [vmem:[%s14419_s1 + $0x28] sm:$0xff]  }
 0x6b4   : > { %3491 = vrot.lane.b32.xlu0 %v7865_v11, %s8012_s8  ;;  %v7868_v11 = vld [vmem:[%s14419_s1 + $0x40] sm:$0xff]  }
 0x6b6   : > { %3497 = vrot.lane.b32.xlu1 %v7866_v46, %s8012_s8 }
 0x6b7   : > { %v6587_v51 = vpop.f32.mrf.mxu1 }
 0x6b8   : > { %3495 = vrot.lane.b32.xlu0 %v7867_v19, %s8012_s8 }
 0x6b9   : > { %v6588_v10 = vpop.f32.mrf.mxu1 }
 0x6ba   : > { %v11475_v1 = vadd.f32 %v6588_v10, %v6587_v51  ;;  %3501 = vrot.lane.b32.xlu1 %v7868_v11, %s8012_s8  ;;  %v7869_v51 = vld [vmem:[%s14419_s1 + $0x38] sm:$0xff]   ;;  %v7870_v10 = vld [vmem:[%s14419_s1 + $0x50] sm:$0xff]   ;;  %v7871_v11 = vld [vmem:[%s14419_s1 + $0x48] sm:$0xff]  }
 0x6bb   : > { %v11481_v20 = vpop.f32.mrf.mxu1 }
 0x6bc   : > { %15403 = vst [vmem:[#allocation124_spill] sm:$0xff] %v11475_v1  ;;  %15404 = vst [vmem:[#allocation125_spill] sm:$0xff] %v11481_v20  ;;  %3499 = vrot.lane.b32.xlu0 %v7869_v51, %s8012_s8  ;;  %v7872_v51 = vld [vmem:[%s14419_s1 + $0x60] sm:$0xff]   ;;  %v7884_v20 = vld [vmem:[%s8098_s5 + $0x38] sm:$0xff] }
 0x6bd   : > { %v11487_v7 = vpop.f32.mrf.mxu1 }
 0x6be   : > { %15405 = vst [vmem:[#allocation126_spill] sm:$0xff] %v11487_v7  ;;  %3505 = vrot.lane.b32.xlu1 %v7870_v10, %s8012_s8  ;;  %v7873_v10 = vld [vmem:[%s14419_s1 + $0x58] sm:$0xff]   ;;  %v7883_v7 = vld [vmem:[%s8098_s5 + $0x30] sm:$0xff] }
 0x6bf   : > { %v6593_v46 = vpop.f32.mrf.mxu1 }
 0x6c0   : > { %3503 = vrot.lane.b32.xlu0 %v7871_v11, %s8012_s8  ;;  %v7876_v11 = vld [vmem:[%s8098_s5] sm:$0xff] }
 0x6c1   : > { %v6594_v19 = vpop.f32.mrf.mxu1 }
 0x6c2   : > { %v11497_v1 = vadd.f32 %v6594_v19, %v6593_v46  ;;  %3509 = vrot.lane.b32.xlu1 %v7872_v51, %s8012_s8  ;;  %v7874_v46 = vld [vmem:[%s14419_s1 + $0x70] sm:$0xff]   ;;  %v7875_v19 = vld [vmem:[%s14419_s1 + $0x68] sm:$0xff]   ;;  %v7877_v51 = vld [vmem:[%s14419_s1 + $0x78] sm:$0xff]  }
 0x6c4   : > { %15406 = vst [vmem:[#allocation127_spill] sm:$0xff] %v11497_v1  ;;  %3507 = vrot.lane.b32.xlu0 %v7873_v10, %s8012_s8  ;;  %v7878_v10 = vld [vmem:[%s8098_s5 + $0x10] sm:$0xff]  ;;  %v7880_v1 = vld [vmem:[%s8098_s5 + $0x18] sm:$0xff] }
 0x6c6   : > { %3513 = vrot.lane.b32.xlu1 %v7874_v46, %s8012_s8  ;;  %v7879_v46 = vld [vmem:[%s8098_s5 + $0x8] sm:$0xff] }
 0x6c8   : > { %3511 = vrot.lane.b32.xlu0 %v7875_v19, %s8012_s8  ;;  %v7881_v19 = vld [vmem:[%s8098_s5 + $0x20] sm:$0xff] }
 0x6ca   : > { %3633 = vperm.xlu1 %6945, %v7876_v11   ;;  %v7882_v11 = vld [vmem:[%s8098_s5 + $0x28] sm:$0xff] }
 0x6cc   : > { %3515 = vrot.lane.b32.xlu0 %v7877_v51, %s8012_s8  ;;  %v7885_v51 = vld [vmem:[%s8098_s5 + $0x40] sm:$0xff] }
 0x6ce   : > { %3641 = vperm.xlu1 %6945, %v7878_v10   ;;  %v7886_v10 = vld [vmem:[%s8098_s5 + $0x48] sm:$0xff] }
 0x6d0   : > { %3637 = vperm.xlu0 %6946, %v7879_v46   ;;  %v7887_v46 = vld [vmem:[%s8098_s5 + $0x50] sm:$0xff] }
 0x6d2   : > { %3645 = vperm.xlu1 %6945, %v7880_v1   ;;  %v7889_v1 = vld [vmem:[%s8098_s5 + $0x60] sm:$0xff] }
 0x6d4   : > { %3649 = vperm.xlu0 %6946, %v7881_v19   ;;  %v7890_v19 = vld [vmem:[%s8098_s5 + $0x68] sm:$0xff] }
 0x6d6   : > { %3653 = vperm.xlu1 %6945, %v7882_v11   ;;  %v7892_v11 = vld [vmem:[%s8098_s5 + $0x78] sm:$0xff] }
 0x6d8   : > { %3657 = vperm.xlu0 %6946, %v7883_v7  }
 0x6da   : > { %3661 = vperm.xlu1 %6945, %v7884_v20  }
 0x6dc   : > { %3665 = vperm.xlu0 %6946, %v7885_v51  }
 0x6de   : > { %3669 = vperm.xlu1 %6945, %v7886_v10  }
 0x6e0   : > { %3673 = vperm.xlu0 %6946, %v7887_v46  }
 0x6e2   : > { %3677 = vperm.xlu1 %6945, %v7888_v41  }
 0x6e4   : > { %3681 = vperm.xlu0 %6946, %v7889_v1  }
 0x6e6   : > { %3685 = vperm.xlu1 %6945, %v7890_v19  }
 0x6e8   : > { %3689 = vperm.xlu0 %6946, %v7891_v36  }
 0x6ea   : > { %3693 = vperm.xlu1 %6945, %v7892_v11  }
 0x6f2   : > { %v3378_v7 = vpop.xlane.xlu1 %3377 }
 0x6f3   : > { %7429 = vrcp.f32 %v3378_v7 }
 0x6f8   : > { %v3375_v6 = vpop.xlane.xlu0 %3374 }
 0x6f9   : > { %7431 = vrcp.f32 %v3375_v6 }
 0x700   : > { %v7430_v34 = vpop.eup %7429 }
 0x701   : > { %v3384_v20 = vpop.xlane.xlu1 %3383  ;;  %v3440_v46 = vmul.f32 %v7430_v34, %v11297_v47  ;;  %v11541_v41 = vmul.f32 %v7430_v34, %v11295_v53 }
 0x702   : > { %v3381_v51 = vpop.xlane.xlu0 %3380  ;;  %7433 = vrcp.f32 %v3384_v20  ;;  %v6341_v20 = vld [vmem:[%s14421_s3 + $0x5] ss:$8 sm:$0x3] }
 0x703   : > { %7435 = vrcp.f32 %v3381_v51 }
 0x705   : > { %v3390_v10 = vpop.xlane.xlu1 %3389 }
 0x706   : > { %v3387_v33 = vpop.xlane.xlu0 %3386  ;;  %v7432_v1 = vpop.eup %7431  ;;  %7437 = vrcp.f32 %v3390_v10  ;;  %v11583_v10 = vrot.slane %v6341_v20, %v15410_v21 }
 0x707   : > { %v3438_v19 = vmul.f32 %v7432_v1, %v11311_v57  ;;  %v11545_v36 = vmul.f32 %v7432_v1, %v11307_v58  ;;  %7439 = vrcp.f32 %v3387_v33  ;;  %v11586_v33 = vrot.slane %v6341_v20, %v15411_v44 }
 0x709   : > { %v3470_v45 = vpack.c.bf16 %v3440_v46, %v3438_v19 }
 0x70b   : > { %3565 = vmatprep.mubr.bf16.mxu0 %v3470_v45 }
 0x70e   : > { %v3396_v11 = vpop.xlane.xlu1 %3395  ;;  %v3393_v7 = vpop.xlane.xlu0 %3392 }
 0x70f   : > { %7441 = vrcp.f32 %v3396_v11  ;;  %v7434_v26 = vpop.eup %7433 }
 0x710   : > { %7443 = vrcp.f32 %v3393_v7  ;;  %v7436_v51 = vpop.eup %7435  ;;  %v11598_v18 = vmul.f32 %v7434_v26, %v11321_v61 }
 0x711   : > { %v11589_v7 = vmul.f32 %v7436_v51, %v11327_v2  ;;  %v11595_v30 = vmul.f32 %v7436_v51, %v11315_v60 }
 0x713   : > { %v3402_v38 = vpop.xlane.xlu1 %3401 }
 0x714   : > { %v3399_v5 = vpop.xlane.xlu0 %3398  ;;  %7445 = vrcp.f32 %v3402_v38 }
 0x715   : > { %7447 = vrcp.f32 %v3399_v5 }
 0x71a   : > { %v3408_v62 = vpop.xlane.xlu1 %3407 }
 0x71b   : > { %v11549_v47 = vpop.xlane.xlu0 %3404  ;;  %7449 = vrcp.f32 %v3408_v62 }
 0x71c   : > { %7451 = vrcp.f32 %v11549_v47 }
 0x71e   : > { %v11551_v53 = vpop.xlane.xlu1 %3413 }
 0x71f   : > { %v11553_v34 = vpop.xlane.xlu0 %3410  ;;  %7453 = vrcp.f32 %v11551_v53 }
 0x720   : > { %15407 = vst [vmem:[#allocation128_spill] sm:$0xff] %v11553_v34 }
 0x722   : > { %v11555_v57 = vpop.xlane.xlu1 %3419 }
 0x723   : > { %15408 = vst [vmem:[#allocation129_spill] sm:$0xff] %v11555_v57  ;;  %v11557_v58 = vpop.xlane.xlu0 %3416  ;;  %v7438_v57 = vpop.eup %7437 }
 0x724   : > { %15409 = vst [vmem:[#allocation130_spill] sm:$0xff] %v11557_v58  ;;  %v11592_v58 = vmul.f32 %v7434_v26, %v11325_v42  ;;  %v7440_v21 = vpop.eup %7439  ;;  %v11614_v38 = vmul.f32 %v7438_v57, %v11343_v37 }
 0x725   : > { %v11600_v55 = vpop.eup %7441  ;;  %v11611_v26 = vmul.f32 %v7440_v21, %v11347_v28 }
 0x726   : > { %v11559_v1 = vpop.permute.xlu1 %3487  ;;  %15412 = vst [vmem:[#allocation131_spill] sm:$0xff] %v11600_v55  ;;  %v11602_v2 = vpop.eup %7443  ;;  %v11628_v37 = vmul.f32 %v11600_v55, %v11363_v29 }
 0x727   : > { %v11561_v46 = vpop.permute.xlu0 %3485  ;;  %15413 = vst [vmem:[#allocation132_spill] sm:$0xff] %v11602_v2  ;;  %v11624_v5 = vmul.f32 %v11602_v2, %v11367_v12  ;;  %v15417_v12 = vld [vmem:[#allocation8_spill] sm:$0xff]  ;;  %v15442_v2 = vld [vmem:[#allocation13_spill] sm:$0xff] }
 0x728   : > { %vm15418_vm15 = vcmp.gt.f32.partialorder %v15417_v12, 0.0 }
 0x72a   : > { %v11563_v19 = vpop.permute.xlu1 %3489 }
 0x72b   : > { %v11565_v45 = vpop.permute.xlu0 %3491 }
 0x72e   : > { %v11567_v6 = vpop.permute.xlu1 %3493 }
 0x72f   : > { %v11569_v27 = vpop.permute.xlu0 %3495 }
 0x732   : > { %v3498_v40 = vpop.permute.xlu1 %3497 }
 0x733   : > { %v3500_v50 = vpop.permute.xlu0 %3499 }
 0x736   : > { %v11571_v31 = vpop.permute.xlu1 %3501 }
 0x737   : > { %v11573_v39 = vpop.permute.xlu0 %3503 }
 0x73a   : > { %v11575_v0 = vpop.permute.xlu1 %3505 }
 0x73b   : > { %v11577_v8 = vpop.permute.xlu0 %3507 }
 0x73e   : > { %v3510_v48 = vpop.permute.xlu1 %3509 }
 0x73f   : > { %v3512_v17 = vpop.permute.xlu0 %3511 }
 0x742   : > { %v3514_v13 = vpop.permute.xlu1 %3513 }
 0x743   : > { %v3516_v11 = vpop.permute.xlu0 %3515 }
 0x744   : > { %6623 = vmatprep.subr.bf16.mxu0 %v3516_v11 }
 0x745   : > { %6624 = vmatpush3.bf16.msra.mxu0 %v3500_v50 }
 0x746   : > { %6625 = vmatprep.subr.bf16.mxu0 %v3514_v13  ;;  %v3634_v20 = vpop.permute.xlu1 %3633  ;;  %v11617_v13 = vmul.f32 %v7438_v57, %v11341_v49 }
 0x747   : > { %v3707_v42 = vadd.f32 %v11583_v10, %v3634_v20  ;;  %v3708_v44 = vadd.f32 %v11586_v33, %v3634_v20  ;;  %v11620_v20 = vmul.f32 %v7440_v21, %v11337_v16  ;;  %v15414_v21 = vld [vmem:[#allocation7_spill] sm:$0xff] }
 0x748   : > { %vm15415_vm14 = vcmp.gt.f32.partialorder %v15414_v21, 0.0 }
 0x749   : > { %vm3739_vm9 = vcmp.ge.f32.partialorder %v3707_v42, 0.0  ;;  %vm3740_vm8 = vcmp.ge.f32.partialorder %v3708_v44, 0.0  ;;  %v3771_v50 = vmul.f32 0.2, %v3707_v42  ;;  %v3772_v51 = vmul.f32 0.2, %v3708_v44  ;;  %6626 = vmatpush3.bf16.msra.mxu0 %v3498_v40 }
 0x74a   : > { %6627 = vmatprep.subr.bf16.mxu0 %v3512_v17  ;;  %v3642_v11 = vpop.permute.xlu1 %3641 }
 0x74b   : > { %v3711_v49 = vadd.f32 %v11583_v10, %v3642_v11  ;;  %v3712_v28 = vadd.f32 %v11586_v33, %v3642_v11  ;;  %v3638_v57 = vpop.permute.xlu0 %3637  ;;  %v3803_v40 = vsel %vm3739_vm9, %v3707_v42, %v3771_v50  ;;  %v3804_v62 = vsel %vm3740_vm8, %v3708_v44, %v3772_v51 }
 0x74c   : > { %v3709_v17 = vadd.f32 %v11583_v10, %v3638_v57  ;;  %v3710_v16 = vadd.f32 %v11586_v33, %v3638_v57  ;;  %v11636_v61 = vsel %vm15415_vm14, %v3803_v40, -9e+15  ;;  %v11640_v60 = vsel %vm15418_vm15, %v3804_v62, -9e+15 }
 0x74d   : > { %15416 = vst [vmem:[#allocation133_spill] sm:$0xff] %v11636_v61  ;;  %15419 = vst [vmem:[#allocation134_spill] sm:$0xff] %v11640_v60  ;;  %vm3743_vm13 = vcmp.ge.f32.partialorder %v3711_v49, 0.0  ;;  %vm3744_vm10 = vcmp.ge.f32.partialorder %v3712_v28, 0.0  ;;  %v3775_v29 = vmul.f32 0.2, %v3711_v49  ;;  %6628 = vmatpush3.bf16.msra.mxu0 %v11569_v27  ;;  %v3867_v27 = vmax.f32 %v11636_v61, %v11640_v60 }
 0x74e   : > { %v3776_v54 = vmul.f32 0.2, %v3712_v28  ;;  %6629 = vmatprep.subr.bf16.mxu0 %v3510_v48  ;;  %v3646_v44 = vpop.permute.xlu1 %3645  ;;  %v3773_v47 = vmul.f32 0.2, %v3709_v17  ;;  %v3774_v62 = vmul.f32 0.2, %v3710_v16 }
 0x74f   : > { %v3713_v11 = vadd.f32 %v11583_v10, %v3646_v44  ;;  %v11652_v57 = vadd.f32 %v11586_v33, %v3646_v44  ;;  %v3650_v40 = vpop.permute.xlu0 %3649  ;;  %v3807_v48 = vsel %vm3743_vm13, %v3711_v49, %v3775_v29  ;;  %vm3741_vm7 = vcmp.ge.f32.partialorder %v3709_v17, 0.0  ;;  %3868 = vmax.xlane.f32.xlu0 %v3867_v27  ;;  %v15420_v44 = vld [vmem:[#allocation11_spill] sm:$0xff] }
 0x750   : > { %v11657_v42 = vadd.f32 %v11583_v10, %v3650_v40  ;;  %v3808_v50 = vsel %vm3744_vm10, %v3712_v28, %v3776_v54  ;;  %vm3742_vm11 = vcmp.ge.f32.partialorder %v3710_v16, 0.0  ;;  %v3716_v51 = vadd.f32 %v11586_v33, %v3650_v40  ;;  %v11669_v28 = vpop.eup %7445 }
 0x751   : > { %6630 = vmatpush3.bf16.msra.mxu0 %v11567_v6  ;;  %vm15421_vm0 = vcmp.gt.f32.partialorder %v15420_v44, 0.0  ;;  %vm3745_vm2 = vcmp.ge.f32.partialorder %v3713_v11, 0.0  ;;  %vm3746_vm4 = vcmp.ge.f32.partialorder %v11652_v57, 0.0  ;;  %v3777_v49 = vmul.f32 0.2, %v3713_v11  ;;  %15423 = vst [vmem:[#allocation136_spill] sm:$0xff] %v11669_v28  ;;  %v11689_v28 = vpop.eup %7447 }
 0x752   : > { %v11664_v12 = vsel %vm15421_vm0, %v3807_v48, -9e+15  ;;  %v3778_v29 = vmul.f32 0.2, %v11652_v57  ;;  %6631 = vmatprep.subr.bf16.mxu0 %v11577_v8  ;;  %v3654_v54 = vpop.permute.xlu1 %3653  ;;  %vm3747_vm6 = vcmp.ge.f32.partialorder %v11657_v42, 0.0  ;;  %v15424_v48 = vld [vmem:[#allocation12_spill] sm:$0xff]  ;;  %v3805_v60 = vsel %vm3741_vm7, %v3709_v17, %v3773_v47  ;;  %v11701_v47 = vpop.eup %7449 }
 0x753   : > { %15422 = vst [vmem:[#allocation135_spill] sm:$0xff] %v11664_v12  ;;  %v11673_v40 = vadd.f32 %v11583_v10, %v3654_v54  ;;  %v11676_v6 = vadd.f32 %v11586_v33, %v3654_v54  ;;  %v3658_v27 = vpop.permute.xlu0 %3657  ;;  %vm15425_vm5 = vcmp.gt.f32.partialorder %v15424_v48, 0.0  ;;  %v3806_v61 = vsel %vm3742_vm11, %v3710_v16, %v3774_v62  ;;  %15427 = vst [vmem:[#allocation138_spill] sm:$0xff] %v11689_v28  ;;  %v15429_v62 = vld [vmem:[#allocation9_spill] sm:$0xff] }
 0x754   : > { %v11680_v44 = vsel %vm15425_vm5, %v3808_v50, -9e+15  ;;  %v11683_v21 = vadd.f32 %v11583_v10, %v3658_v27  ;;  %vm3748_vm1 = vcmp.ge.f32.partialorder %v3716_v51, 0.0  ;;  %v3779_v54 = vmul.f32 0.2, %v11657_v42  ;;  %15428 = vst [vmem:[#allocation139_spill] sm:$0xff] %v11701_v47 }
 0x755   : > { %15426 = vst [vmem:[#allocation137_spill] sm:$0xff] %v11680_v44  ;;  %v3873_v8 = vmax.f32 %v11664_v12, %v11680_v44  ;;  %v3780_v34 = vmul.f32 0.2, %v3716_v51  ;;  %v11693_v48 = vadd.f32 %v11586_v33, %v3658_v27  ;;  %6632 = vmatpush3.bf16.msra.mxu0 %v11565_v45  ;;  %vm3749_vm9 = vcmp.ge.f32.partialorder %v11673_v40, 0.0  ;;  %v15432_v44 = vld [vmem:[#allocation10_spill] sm:$0xff] }
 0x756   : > { %vm3750_vm8 = vcmp.ge.f32.partialorder %v11676_v6, 0.0  ;;  %v3781_v50 = vmul.f32 0.2, %v11673_v40  ;;  %v3782_v17 = vmul.f32 0.2, %v11676_v6  ;;  %6633 = vmatprep.subr.bf16.mxu0 %v11575_v0  ;;  %v3662_v16 = vpop.permute.xlu1 %3661  ;;  %vm15430_vm14 = vcmp.gt.f32.partialorder %v15429_v62, 0.0 }
 0x757   : > { %3874 = vmax.xlane.f32.xlu0 %v3873_v8  ;;  %v11705_v27 = vsel %vm15430_vm14, %v3805_v60, -9e+15  ;;  %vm15433_vm15 = vcmp.gt.f32.partialorder %v15432_v44, 0.0  ;;  %v11712_v12 = vadd.f32 %v11583_v10, %v3662_v16  ;;  %v11715_v28 = vadd.f32 %v11586_v33, %v3662_v16  ;;  %v3666_v8 = vpop.permute.xlu0 %3665 }
 0x758   : > { %15431 = vst [vmem:[#allocation140_spill] sm:$0xff] %v11705_v27  ;;  %v11709_v45 = vsel %vm15433_vm15, %v3806_v61, -9e+15  ;;  %vm3751_vm13 = vcmp.ge.f32.partialorder %v11683_v21, 0.0  ;;  %v11721_v62 = vadd.f32 %v11583_v10, %v3666_v8  ;;  %v3809_v60 = vsel %vm3745_vm2, %v3713_v11, %v3777_v49 }
 0x759   : > { %15434 = vst [vmem:[#allocation141_spill] sm:$0xff] %v11709_v45  ;;  %v3870_v0 = vmax.f32 %v11705_v27, %v11709_v45  ;;  %vm3752_vm10 = vcmp.ge.f32.partialorder %v11693_v48, 0.0  ;;  %v3783_v61 = vmul.f32 0.2, %v11683_v21  ;;  %v3784_v44 = vmul.f32 0.2, %v11693_v48  ;;  %6634 = vmatpush3.bf16.msra.mxu0 %v11563_v19  ;;  %v11738_v27 = vpop.eup %7451 }
 0x75a   : > { %v11728_v16 = vadd.f32 %v11586_v33, %v3666_v8  ;;  %vm3753_vm7 = vcmp.ge.f32.partialorder %v11712_v12, 0.0  ;;  %vm3754_vm11 = vcmp.ge.f32.partialorder %v11715_v28, 0.0  ;;  %v3785_v45 = vmul.f32 0.2, %v11712_v12  ;;  %6635 = vmatprep.subr.bf16.mxu0 %v11573_v39  ;;  %v3670_v49 = vpop.permute.xlu1 %3669  ;;  %15435 = vst [vmem:[#allocation142_spill] sm:$0xff] %v11738_v27  ;;  %v15436_v8 = vld [vmem:[#allocation15_spill] sm:$0xff] }
 0x75b   : > { %3871 = vmax.xlane.f32.xlu1 %v3870_v0  ;;  %v11735_v11 = vmul.f32 0.2, %v11715_v28  ;;  %vm3755_vm0 = vcmp.ge.f32.partialorder %v11721_v62, 0.0  ;;  %v3810_v19 = vsel %vm3746_vm4, %v11652_v57, %v3778_v29  ;;  %vm15437_vm2 = vcmp.gt.f32.partialorder %v15436_v8, 0.0  ;;  %v3674_v39 = vpop.permute.xlu0 %3673  ;;  %v15444_v57 = vld [vmem:[#allocation14_spill] sm:$0xff] }
 0x75c   : > { %v11746_v0 = vsel %vm15437_vm2, %v3809_v60, -9e+15  ;;  %v3811_v47 = vsel %vm3747_vm6, %v11657_v42, %v3779_v54  ;;  %v3812_v55 = vsel %vm3748_vm1, %v3716_v51, %v3780_v34  ;;  %vm15440_vm5 = vcmp.gt.f32.partialorder %v15439_v3, 0.0 }
 0x75d   : > { %15438 = vst [vmem:[#allocation143_spill] sm:$0xff] %v11746_v0  ;;  %v11754_v27 = vsel %vm15440_vm5, %v3810_v19, -9e+15  ;;  %vm15443_vm14 = vcmp.gt.f32.partialorder %v15442_v2, 0.0  ;;  %vm15445_vm4 = vcmp.gt.f32.partialorder %v15444_v57, 0.0  ;;  %v11765_v60 = vadd.f32 %v11583_v10, %v3670_v49  ;;  %6636 = vmatpush3.bf16.msra.mxu0 %v11559_v1 }
 0x75e   : > { %15441 = vst [vmem:[#allocation144_spill] sm:$0xff] %v11754_v27  ;;  %v11758_v63 = vsel %vm15443_vm14, %v3811_v47, -9e+15  ;;  %v11762_v29 = vsel %vm15445_vm4, %v3812_v55, -9e+15  ;;  %v3876_v42 = vmax.f32 %v11746_v0, %v11754_v27  ;;  %v11772_v51 = vadd.f32 %v11586_v33, %v3670_v49  ;;  %6637 = vmatprep.subr.bf16.mxu0 %v11571_v31  ;;  %v3678_v49 = vpop.permute.xlu1 %3677 }
 0x75f   : > { %v3879_v34 = vmax.f32 %v11758_v63, %v11762_v29  ;;  %v11775_v54 = vadd.f32 %v11583_v10, %v3674_v39  ;;  %v3787_v55 = vmul.f32 0.2, %v11721_v62  ;;  %v3788_v47 = vmul.f32 0.2, %v11728_v16  ;;  %v3682_v3 = vpop.permute.xlu0 %3681 }
 0x760   : > { %v11781_v19 = vadd.f32 %v11586_v33, %v3674_v39  ;;  %v3813_v57 = vsel %vm3749_vm9, %v11673_v40, %v3781_v50  ;;  %vm3756_vm6 = vcmp.ge.f32.partialorder %v11728_v16, 0.0  ;;  %3877 = vmax.xlane.f32.xlu0 %v3876_v42  ;;  %vm3757_vm1 = vcmp.ge.f32.partialorder %v11765_v60, 0.0  ;;  %v15446_v50 = vld [vmem:[#allocation17_spill] sm:$0xff] }
 0x761   : > { %3880 = vmax.xlane.f32.xlu1 %v3879_v34  ;;  %v3789_v1 = vmul.f32 0.2, %v11765_v60  ;;  %v3790_v2 = vmul.f32 0.2, %v11772_v51  ;;  %vm3758_vm15 = vcmp.ge.f32.partialorder %v11772_v51, 0.0  ;;  %v3814_v31 = vsel %vm3750_vm8, %v11676_v6, %v3782_v17  ;;  %v15448_v34 = vld [vmem:[#allocation18_spill] sm:$0xff]  ;;  %6638 = vmatpush3.bf16.msra.mxu0 %v11561_v46 }
 0x762   : > { %v3791_v39 = vmul.f32 0.2, %v11775_v54  ;;  %v3792_v40 = vmul.f32 0.2, %v11781_v19  ;;  %vm15447_vm9 = vcmp.gt.f32.partialorder %v15446_v50, 0.0  ;;  %vm3759_vm2 = vcmp.ge.f32.partialorder %v11775_v54, 0.0 }
 0x763   : > { %v11799_v42 = vsel %vm15447_vm9, %v3813_v57, -9e+15  ;;  %vm3760_vm5 = vcmp.ge.f32.partialorder %v11781_v19, 0.0  ;;  %vm15449_vm14 = vcmp.gt.f32.partialorder %v15448_v34, 0.0  ;;  %v3815_v27 = vsel %vm3751_vm13, %v11683_v21, %v3783_v61  ;;  %v15450_v50 = vld [vmem:[#allocation19_spill] sm:$0xff]  ;;  %v15452_v34 = vld [vmem:[#allocation20_spill] sm:$0xff]  ;;  %v3686_v61 = vpop.permute.xlu1 %3685 }
 0x764   : > { %v11805_v8 = vsel %vm15449_vm14, %v3814_v31, -9e+15  ;;  %v3816_v6 = vsel %vm3752_vm10, %v11693_v48, %v3784_v44  ;;  %v11814_v17 = vadd.f32 %v11583_v10, %v3678_v49  ;;  %vm15451_vm8 = vcmp.gt.f32.partialorder %v15450_v50, 0.0 }
 0x765   : > { %v3882_v57 = vmax.f32 %v11799_v42, %v11805_v8  ;;  %v11821_v31 = vsel %vm15451_vm8, %v3815_v27, -9e+15  ;;  %vm15453_vm4 = vcmp.gt.f32.partialorder %v15452_v34, 0.0  ;;  %v11828_v21 = vadd.f32 %v11586_v33, %v3678_v49 }
 0x766   : > { %v11825_v0 = vsel %vm15453_vm4, %v3816_v6, -9e+15  ;;  %vm3761_vm13 = vcmp.ge.f32.partialorder %v11814_v17, 0.0  ;;  %v3793_v46 = vmul.f32 0.2, %v11814_v17  ;;  %v11835_v48 = vadd.f32 %v11583_v10, %v3682_v3 }
 0x767   : > { %15454 = vst [vmem:[#allocation145_spill] sm:$0xff] %v11825_v0  ;;  %v3885_v44 = vmax.f32 %v11821_v31, %v11825_v0  ;;  %3883 = vmax.xlane.f32.xlu0 %v3882_v57  ;;  %vm3762_vm10 = vcmp.ge.f32.partialorder %v11828_v21, 0.0  ;;  %v3794_v27 = vmul.f32 0.2, %v11828_v21  ;;  %v3732_v6 = vadd.f32 %v11586_v33, %v3682_v3  ;;  %v3690_v0 = vpop.permute.xlu0 %3689 }
 0x768   : > { %v3817_v49 = vsel %vm3753_vm7, %v11712_v12, %v3785_v45  ;;  %v15455_v34 = vpack.c.bf16 %v11541_v41, %v11545_v36  ;;  %vm3763_vm9 = vcmp.ge.f32.partialorder %v11835_v48, 0.0  ;;  %v3795_v50 = vmul.f32 0.2, %v11835_v48  ;;  %v15458_v36 = vld [vmem:[#allocation24_spill] sm:$0xff] }
 0x769   : > { %3886 = vmax.xlane.f32.xlu1 %v3885_v44  ;;  %v3818_v57 = vsel %vm3754_vm11, %v11715_v28, %v11735_v11  ;;  %vm15456_vm14 = vcmp.gt.f32.partialorder %v15299_v14, 0.0  ;;  %v15457_v12 = vpack.c.bf16 %v11592_v58, %v11589_v7  ;;  %vm3764_vm7 = vcmp.ge.f32.partialorder %v3732_v6, 0.0  ;;  %v15460_v44 = vld [vmem:[#allocation21_spill] sm:$0xff] }
 0x76a   : > { %3566 = vmatmul.mubr.bf16.vlgmr.msra.gmra.mxu0 %v15455_v34  ;;  %v11854_v3 = vsel %vm15456_vm14, %v3817_v49, -9e+15  ;;  %v3796_v41 = vmul.f32 0.2, %v3732_v6  ;;  %vm15459_vm8 = vcmp.gt.f32.partialorder %v15458_v36, 0.0  ;;  %v3819_v34 = vsel %vm3755_vm0, %v11721_v62, %v3787_v55  ;;  %v15462_v49 = vld [vmem:[#allocation22_spill] sm:$0xff] }
 0x76b   : > { %3573 = vmatprep.mubr.bf16.mxu0 %v15457_v12  ;;  %v11861_v45 = vsel %vm15459_vm8, %v3818_v57, -9e+15  ;;  %v3820_v11 = vsel %vm3756_vm6, %v11728_v16, %v3788_v47  ;;  %vm15461_vm11 = vcmp.gt.f32.partialorder %v15460_v44, 0.0  ;;  %v3733_v7 = vadd.f32 %v11583_v10, %v3686_v61  ;;  %v3694_v44 = vpop.permute.xlu1 %3693 }
 0x76c   : > { %v3888_v28 = vmax.f32 %v11854_v3, %v11861_v45  ;;  %v11873_v58 = vsel %vm15461_vm11, %v3819_v34, -9e+15  ;;  %vm15463_vm4 = vcmp.gt.f32.partialorder %v15462_v49, 0.0  ;;  %v3734_v12 = vadd.f32 %v11586_v33, %v3686_v61 }
 0x76d   : > { %v11878_v57 = vsel %vm15463_vm4, %v3820_v11, -9e+15  ;;  %v3735_v62 = vadd.f32 %v11583_v10, %v3690_v0  ;;  %v3736_v55 = vadd.f32 %v11586_v33, %v3690_v0  ;;  %vm3765_vm0 = vcmp.ge.f32.partialorder %v3733_v7, 0.0 }
 0x76e   : > { %3889 = vmax.xlane.f32.xlu0 %v3888_v28  ;;  %v3891_v16 = vmax.f32 %v11873_v58, %v11878_v57  ;;  %v3797_v47 = vmul.f32 0.2, %v3733_v7  ;;  %v3821_v34 = vsel %vm3757_vm1, %v11765_v60, %v3789_v1  ;;  %vm3766_vm6 = vcmp.ge.f32.partialorder %v3734_v12, 0.0 }
 0x76f   : > { %v3798_v11 = vmul.f32 0.2, %v3734_v12  ;;  %vm3767_vm14 = vcmp.ge.f32.partialorder %v3735_v62, 0.0  ;;  %vm3768_vm8 = vcmp.ge.f32.partialorder %v3736_v55, 0.0  ;;  %v3799_v61 = vmul.f32 0.2, %v3735_v62 }
 0x770   : > { %3892 = vmax.xlane.f32.xlu1 %v3891_v16  ;;  %v3800_v49 = vmul.f32 0.2, %v3736_v55  ;;  %v3822_v0 = vsel %vm3758_vm15, %v11772_v51, %v3790_v2  ;;  %v11893_v36 = vsel %vm315_vm3, %v3821_v34, -9e+15  ;;  %v3823_v60 = vsel %vm3759_vm2, %v11775_v54, %v3791_v39 }
 0x771   : > { %v11897_v14 = vsel %vm316_vm12, %v3822_v0, -9e+15  ;;  %v3824_v1 = vsel %vm3760_vm5, %v11781_v19, %v3792_v40  ;;  %v3737_v16 = vadd.f32 %v11583_v10, %v3694_v44  ;;  %v15465_v2 = vpack.c.bf16 %v11598_v18, %v11595_v30 }
 0x772   : > { %v3894_v51 = vmax.f32 %v11893_v36, %v11897_v14  ;;  %vm15466_vm1 = vcmp.gt.f32.partialorder %v15015_v4, 0.0  ;;  %vm15467_vm15 = vcmp.gt.f32.partialorder %v15017_v22, 0.0  ;;  %v3738_v39 = vadd.f32 %v11586_v33, %v3694_v44 }
 0x773   : > { %3574 = vmatmul.mubr.bf16.gmra.mxu0 %v15465_v2  ;;  %v11913_v34 = vsel %vm15466_vm1, %v3823_v60, -9e+15  ;;  %v11917_v54 = vsel %vm15467_vm15, %v3824_v1, -9e+15  ;;  %v15468_v10 = vpack.c.bf16 %v11614_v38, %v11611_v26  ;;  %vm3769_vm2 = vcmp.ge.f32.partialorder %v3737_v16, 0.0 }
 0x774   : > { %v3897_v18 = vmax.f32 %v11913_v34, %v11917_v54  ;;  %v3801_v30 = vmul.f32 0.2, %v3737_v16  ;;  %v3825_v19 = vsel %vm3761_vm13, %v11814_v17, %v3793_v46  ;;  %3895 = vmax.xlane.f32.xlu0 %v3894_v51  ;;  %vm3770_vm5 = vcmp.ge.f32.partialorder %v3738_v39, 0.0  ;;  %v15481_v51 = vld [vmem:[#allocation95_spill] sm:$0xff] }
 0x775   : > { %3581 = vmatprep.mubr.bf16.mxu0 %v15468_v10  ;;  %v3802_v40 = vmul.f32 0.2, %v3738_v39  ;;  %v3826_v33 = vsel %vm3762_vm10, %v11828_v21, %v3794_v27  ;;  %vm15469_vm11 = vcmp.gt.f32.partialorder %v15173_v32, 0.0  ;;  %vm15470_vm4 = vcmp.gt.f32.partialorder %v15175_v24, 0.0 }
 0x776   : > { %v11933_v26 = vsel %vm15469_vm11, %v3825_v19, -9e+15  ;;  %3898 = vmax.xlane.f32.xlu1 %v3897_v18  ;;  %v11937_v38 = vsel %vm15470_vm4, %v3826_v33, -9e+15  ;;  %v3827_v17 = vsel %vm3763_vm9, %v11835_v48, %v3795_v50  ;;  %v3828_v46 = vsel %vm3764_vm7, %v3732_v6, %v3796_v41  ;;  %v15483_v18 = vld [vmem:[#allocation102_spill] sm:$0xff] }
 0x777   : > { %v3829_v44 = vsel %vm3765_vm0, %v3733_v7, %v3797_v47  ;;  %v3900_v21 = vmax.f32 %v11933_v26, %v11937_v38  ;;  %vm15471_vm13 = vcmp.gt.f32.partialorder %v15023_v25, 0.0  ;;  %vm15472_vm10 = vcmp.gt.f32.partialorder %v15025_v43, 0.0  ;;  %v15487_v33 = vld [vmem:[#allocation138_spill] sm:$0xff] }
 0x778   : > { %v11948_v27 = vsel %vm15471_vm13, %v3827_v17, -9e+15  ;;  %v11952_v0 = vsel %vm15472_vm10, %v3828_v46, -9e+15  ;;  %v3830_v60 = vsel %vm3766_vm6, %v3734_v12, %v3798_v11  ;;  %vm15473_vm9 = vcmp.gt.f32.partialorder %v15027_v52, 0.0  ;;  %v15488_v46 = vld [vmem:[#allocation93_spill] sm:$0xff] }
 0x779   : > { %v3903_v50 = vmax.f32 %v11948_v27, %v11952_v0  ;;  %v11959_v48 = vsel %vm15473_vm9, %v3829_v44, -9e+15  ;;  %vm15474_vm7 = vcmp.gt.f32.partialorder %v15029_v15, 0.0  ;;  %v3831_v41 = vsel %vm3767_vm14, %v3735_v62, %v3799_v61  ;;  %3901 = vmax.xlane.f32.xlu0 %v3900_v21  ;;  %v15490_v21 = vld [vmem:[#allocation129_spill] sm:$0xff]  ;;  %v15549_v43 = vld [vmem:[#allocation6_spill] sm:$0xff] }
 0x77a   : > { %v11963_v6 = vsel %vm15474_vm7, %v3830_v60, -9e+15  ;;  %v3832_v47 = vsel %vm3768_vm8, %v3736_v55, %v3800_v49  ;;  %vm15475_vm0 = vcmp.gt.f32.partialorder %v15031_v59, 0.0  ;;  %v3833_v11 = vsel %vm3769_vm2, %v3737_v16, %v3801_v30  ;;  %v15484_v30 = vld [vmem:[#allocation131_spill] sm:$0xff]  ;;  %v15491_v60 = vld [vmem:[#allocation86_spill] sm:$0xff] }
 0x77b   : > { %v3906_v7 = vmax.f32 %v11959_v48, %v11963_v6  ;;  %v11971_v12 = vsel %vm15475_vm0, %v3831_v41, -9e+15  ;;  %3904 = vmax.xlane.f32.xlu1 %v3903_v50  ;;  %vm15476_vm6 = vcmp.gt.f32.partialorder %v15033_v35, 0.0  ;;  %v3834_v2 = vsel %vm3770_vm5, %v3738_v39, %v3802_v40  ;;  %v15482_v39 = vld [vmem:[#allocation132_spill] sm:$0xff]  ;;  %v15486_v40 = vld [vmem:[#allocation109_spill] sm:$0xff] }
 0x77c   : > { %v11976_v1 = vsel %vm15476_vm6, %v3832_v47, -9e+15  ;;  %vm15477_vm14 = vcmp.gt.f32.partialorder %v15035_v56, 0.0  ;;  %v15478_v49 = vpack.c.bf16 %v11617_v13, %v11620_v20  ;;  %vm15479_vm8 = vcmp.gt.f32.partialorder %v15037_v23, 0.0  ;;  %v15485_v20 = vld [vmem:[#allocation128_spill] sm:$0xff]  ;;  %v15493_v47 = vld [vmem:[#allocation130_spill] sm:$0xff] }
 0x77d   : > { %v11981_v62 = vsel %vm15477_vm14, %v3833_v11, -9e+15  ;;  %v3909_v55 = vmax.f32 %v11971_v12, %v11976_v1  ;;  %v11990_v61 = vsel %vm15479_vm8, %v3834_v2, -9e+15  ;;  %v15480_v16 = vpack.c.bf16 %v11628_v37, %v11624_v5  ;;  %3907 = vmax.xlane.f32.xlu0 %v3906_v7  ;;  %v15489_v5 = vld [vmem:[#allocation136_spill] sm:$0xff]  ;;  %v15495_v2 = vld [vmem:[#allocation142_spill] sm:$0xff] }
 0x77e   : > { %3582 = vmatmul.mubr.bf16.gmra.mxu0 %v15478_v49  ;;  %v3449_v10 = vmul.f32 %v15482_v39, %v15481_v51  ;;  %v3451_v13 = vmul.f32 %v15484_v30, %v15483_v18  ;;  %7455 = vrcp.f32 %v15485_v20  ;;  %v3912_v19 = vmax.f32 %v11981_v62, %v11990_v61  ;;  %v15492_v41 = vld [vmem:[#allocation100_spill] sm:$0xff] }
 0x77f   : > { %3589 = vmatprep.mubr.bf16.mxu0 %v15480_v16  ;;  %v3454_v17 = vmul.f32 %v15487_v33, %v15486_v40  ;;  %v3456_v37 = vmul.f32 %v15489_v5, %v15488_v46  ;;  %3910 = vmax.xlane.f32.xlu1 %v3909_v55  ;;  %7457 = vrcp.f32 %v15490_v21  ;;  %v3453_v50 = vmul.f32 %v15487_v33, %v15491_v60  ;;  %v15494_v11 = vld [vmem:[#allocation72_spill] sm:$0xff]  ;;  %v15497_v55 = vld [vmem:[#allocation139_spill] sm:$0xff]  ;;  %v15500_v33 = vld [vmem:[#allocation105_spill] sm:$0xff] }
 0x780   : > { %v3475_v53 = vpack.c.bf16 %v3451_v13, %v3449_v10  ;;  %v3455_v7 = vmul.f32 %v15489_v5, %v15492_v41  ;;  %7459 = vrcp.f32 %v15493_v47  ;;  %v3458_v49 = vmul.f32 %v15495_v2, %v15494_v11  ;;  %v15496_v16 = vld [vmem:[#allocation88_spill] sm:$0xff]  ;;  %v7454_v10 = vpop.eup %7453  ;;  %v15498_v13 = vld [vmem:[#allocation70_spill] sm:$0xff]  ;;  %v15502_v60 = vld [vmem:[#allocation69_spill] sm:$0xff] }
 0x781   : > { %3913 = vmax.xlane.f32.xlu0 %v3912_v19  ;;  %v3478_v44 = vpack.c.bf16 %v3456_v37, %v3454_v17  ;;  %v3460_v51 = vmul.f32 %v15497_v55, %v15496_v16  ;;  %v3457_v20 = vmul.f32 %v15495_v2, %v15498_v13  ;;  %v15499_v19 = vld [vmem:[#allocation57_spill] sm:$0xff]  ;;  %v15501_v46 = vld [vmem:[#allocation58_spill] sm:$0xff]  ;;  %v15503_v41 = vld [vmem:[#allocation96_spill] sm:$0xff] }
 0x782   : > { %v3477_v39 = vpack.c.bf16 %v3455_v7, %v3453_v50  ;;  %v3459_v40 = vmul.f32 %v15497_v55, %v15499_v19  ;;  %v3464_v5 = vmul.f32 %v7454_v10, %v15501_v46  ;;  %v3463_v7 = vmul.f32 %v7454_v10, %v15503_v41  ;;  %v15504_v47 = vld [vmem:[#allocation114_spill] sm:$0xff]  ;;  %v15505_v2 = vld [vmem:[#allocation111_spill] sm:$0xff]  ;;  %v7924_v35 = vld [vmem:[%s8098_s5 + $0x78] sm:$0xff] }
 0x783   : > { %v3480_v18 = vpack.c.bf16 %v3460_v51, %v3458_v49  ;;  %v15506_v51 = vld [vmem:[#allocation106_spill] sm:$0xff]  ;;  %v14694_v19 = vmov 6  }
 0x784   : > { %v3479_v37 = vpack.c.bf16 %v3459_v40, %v3457_v20  ;;  %6948 = vset.pattern.permute.xlu1 %v14694_v19  ;;  %6947 = vset.pattern.permute.xlu0 %v14694_v19 }
 0x786   : > { %3590 = vmatmul.mubr.bf16.gmra.mxu0 %v3475_v53 }
 0x787   : > { %3597 = vmatprep.mubr.bf16.mxu0 %v3478_v44 }
 0x78b   : > { %v7456_v30 = vpop.eup %7455 }
 0x78c   : > { %v3462_v17 = vmul.f32 %v7456_v30, %v15500_v33  ;;  %v7458_v53 = vpop.eup %7457  ;;  %v3461_v50 = vmul.f32 %v7456_v30, %v15502_v60  ;;  %v15508_v30 = vld [vmem:[#allocation133_spill] sm:$0xff]  ;;  %v15509_v33 = vld [vmem:[#allocation134_spill] sm:$0xff] }
 0x78d   : > { %v7460_v21 = vpop.eup %7459  ;;  %v3468_v49 = vmul.f32 %v7458_v53, %v15505_v2  ;;  %v15512_v60 = vld [vmem:[#allocation137_spill] sm:$0xff]  ;;  %v15514_v2 = vld [vmem:[#allocation140_spill] sm:$0xff] }
 0x78e   : > { %3598 = vmatmul.mubr.bf16.gmra.mxu0 %v3477_v39  ;;  %v3482_v44 = vpack.c.bf16 %v3464_v5, %v3462_v17  ;;  %v3466_v11 = vmul.f32 %v7460_v21, %v15504_v47  ;;  %v3481_v16 = vpack.c.bf16 %v3463_v7, %v3461_v50  ;;  %v3465_v39 = vmul.f32 %v7460_v21, %v15506_v51 }
 0x78f   : > { %3605 = vmatprep.mubr.bf16.mxu0 %v3480_v18  ;;  %v15507_v18 = vld [vmem:[#allocation108_spill] sm:$0xff] }
 0x790   : > { %v3484_v55 = vpack.c.bf16 %v3468_v49, %v3466_v11  ;;  %v3467_v13 = vmul.f32 %v7458_v53, %v15507_v18  ;;  %v15511_v53 = vld [vmem:[#allocation135_spill] sm:$0xff] }
 0x792   : > { %v3483_v20 = vpack.c.bf16 %v3467_v13, %v3465_v39 }
 0x796   : > { %3606 = vmatmul.mubr.bf16.gmra.mxu0 %v3479_v37  ;;  %v12033_v37 = vpop.f32.mrf.mxu0 }
 0x797   : > { %3613 = vmatprep.mubr.bf16.mxu0 %v3482_v44  ;;  %15510 = vst [vmem:[#allocation95_spill] sm:$0xff] %v12033_v37 }
 0x798   : > { %v12037_v41 = vpop.f32.mrf.mxu0 }
 0x799   : > { %15513 = vst [vmem:[#allocation132_spill] sm:$0xff] %v12037_v41 }
 0x79a   : > { %v12041_v51 = vpop.f32.mrf.mxu0 }
 0x79b   : > { %15516 = vst [vmem:[#allocation102_spill] sm:$0xff] %v12041_v51  ;;  %v7893_v51 = vld [vmem:[%s14419_s1] sm:$0xff]  }
 0x79e   : > { %3614 = vmatmul.mubr.bf16.gmra.mxu0 %v3481_v16  ;;  %v15515_v16 = vld [vmem:[#allocation141_spill] sm:$0xff] }
 0x79f   : > { %3621 = vmatprep.mubr.bf16.mxu0 %v3484_v55 }
 0x7a6   : > { %3622 = vmatmul.mubr.bf16.gmra.mxu0 %v3483_v20 }
 0x7d8   : > { %v3869_v10 = vpop.xlane.xlu0 %3868 }
 0x7d9   : > { %v3915_v40 = vsub.f32 %v15508_v30, %v3869_v10  ;;  %v3916_v17 = vsub.f32 %v15509_v33, %v3869_v10 }
 0x7db   : > { %v3947_v46 = vmul.f32 1.442695, %v3915_v40  ;;  %v3949_v5 = vmul.f32 1.442695, %v3916_v17  ;;  %v15517_v40 = vld [vmem:[#allocation143_spill] sm:$0xff]  ;;  %v12046_v17 = vpop.f32.mrf.mxu0 }
 0x7dc   : > { %15518 = vst [vmem:[#allocation131_spill] sm:$0xff] %v12046_v17 }
 0x7dd   : > { %7461 = vpow2.f32 %v3947_v46  ;;  %v15519_v46 = vld [vmem:[#allocation144_spill] sm:$0xff] }
 0x7de   : > { %7463 = vpow2.f32 %v3949_v5 }
 0x7e0   : > { %v3875_v44 = vpop.xlane.xlu0 %3874 }
 0x7e1   : > { %v3919_v21 = vsub.f32 %v15511_v53, %v3875_v44  ;;  %v3920_v50 = vsub.f32 %v15512_v60, %v3875_v44 }
 0x7e3   : > { %v3955_v7 = vmul.f32 1.442695, %v3919_v21  ;;  %v3957_v47 = vmul.f32 1.442695, %v3920_v50 }
 0x7e4   : > { %v3872_v11 = vpop.xlane.xlu1 %3871 }
 0x7e5   : > { %v3917_v49 = vsub.f32 %v15514_v2, %v3872_v11  ;;  %v3918_v55 = vsub.f32 %v15515_v16, %v3872_v11  ;;  %7465 = vpow2.f32 %v3955_v7  ;;  %v12053_v11 = vpop.f32.mrf.mxu0 }
 0x7e6   : > { %7467 = vpow2.f32 %v3957_v47  ;;  %15520 = vst [vmem:[#allocation128_spill] sm:$0xff] %v12053_v11 }
 0x7e7   : > { %v3951_v39 = vmul.f32 1.442695, %v3917_v49  ;;  %v3953_v18 = vmul.f32 1.442695, %v3918_v55  ;;  %v15521_v55 = vld [vmem:[#allocation145_spill] sm:$0xff] }
 0x7e9   : > { %7469 = vpow2.f32 %v3951_v39  ;;  %v3878_v20 = vpop.xlane.xlu0 %3877 }
 0x7ea   : > { %v3881_v13 = vpop.xlane.xlu1 %3880  ;;  %7471 = vpow2.f32 %v3953_v18  ;;  %v3921_v33 = vsub.f32 %v15517_v40, %v3878_v20  ;;  %v3922_v5 = vsub.f32 %v15519_v46, %v3878_v20  ;;  %v12049_v60 = vpop.eup %7461 }
 0x7eb   : > { %v3923_v10 = vsub.f32 %v11758_v63, %v3881_v13  ;;  %v3924_v30 = vsub.f32 %v11762_v29, %v3881_v13  ;;  %v12051_v7 = vpop.eup %7463 }
 0x7ec   : > { %v3959_v21 = vmul.f32 1.442695, %v3921_v33  ;;  %v3961_v50 = vmul.f32 1.442695, %v3922_v5  ;;  %v4011_v49 = vadd.f32 %v12051_v7, %v12049_v60 }
 0x7ed   : > { %v3963_v44 = vmul.f32 1.442695, %v3923_v10  ;;  %v3965_v53 = vmul.f32 1.442695, %v3924_v30 }
 0x7ee   : > { %4012 = vadd.xlane.f32.xlu1 %v4011_v49 }
 0x7ef   : > { %7473 = vpow2.f32 %v3963_v44 }
 0x7f0   : > { %v3884_v47 = vpop.xlane.xlu0 %3883  ;;  %7475 = vpow2.f32 %v3965_v53 }
 0x7f1   : > { %v3925_v29 = vsub.f32 %v11799_v42, %v3884_v47  ;;  %v3926_v2 = vsub.f32 %v11805_v8, %v3884_v47  ;;  %7477 = vpow2.f32 %v3959_v21  ;;  %v12065_v42 = vpop.f32.mrf.mxu0 }
 0x7f2   : > { %v3887_v63 = vpop.xlane.xlu1 %3886  ;;  %7479 = vpow2.f32 %v3961_v50  ;;  %v12061_v13 = vpop.eup %7465  ;;  %15522 = vst [vmem:[#allocation109_spill] sm:$0xff] %v12065_v42 }
 0x7f3   : > { %v3927_v16 = vsub.f32 %v11821_v31, %v3887_v63  ;;  %v3928_v39 = vsub.f32 %v15521_v55, %v3887_v63  ;;  %v3967_v18 = vmul.f32 1.442695, %v3925_v29  ;;  %v3969_v30 = vmul.f32 1.442695, %v3926_v2  ;;  %v12063_v40 = vpop.eup %7467  ;;  %v12077_v63 = vpop.f32.mrf.mxu0 }
 0x7f4   : > { %v4017_v46 = vadd.f32 %v12063_v40, %v12061_v13  ;;  %15523 = vst [vmem:[#allocation138_spill] sm:$0xff] %v12077_v63 }
 0x7f5   : > { %v3971_v20 = vmul.f32 1.442695, %v3927_v16  ;;  %v3973_v10 = vmul.f32 1.442695, %v3928_v39  ;;  %7481 = vpow2.f32 %v3967_v18  ;;  %v12085_v39 = vpop.f32.mrf.mxu0 }
 0x7f6   : > { %v12071_v44 = vpop.eup %7469  ;;  %4018 = vadd.xlane.f32.xlu1 %v4017_v46  ;;  %15524 = vst [vmem:[#allocation93_spill] sm:$0xff] %v12085_v39 }
 0x7f7   : > { %v3890_v8 = vpop.xlane.xlu0 %3889  ;;  %7483 = vpow2.f32 %v3971_v20  ;;  %v12075_v47 = vpop.eup %7471 }
 0x7f8   : > { %v3929_v33 = vsub.f32 %v11854_v3, %v3890_v8  ;;  %v3930_v31 = vsub.f32 %v11861_v45, %v3890_v8  ;;  %7485 = vpow2.f32 %v3973_v10  ;;  %v4014_v2 = vadd.f32 %v12075_v47, %v12071_v44 }
 0x7f9   : > { %v3893_v5 = vpop.xlane.xlu1 %3892  ;;  %7487 = vpow2.f32 %v3969_v30 }
 0x7fa   : > { %v3931_v53 = vsub.f32 %v11873_v58, %v3893_v5  ;;  %v3932_v21 = vsub.f32 %v11878_v57, %v3893_v5  ;;  %v3975_v50 = vmul.f32 1.442695, %v3929_v33  ;;  %v3977_v3 = vmul.f32 1.442695, %v3930_v31  ;;  %4015 = vadd.xlane.f32.xlu0 %v4014_v2 }
 0x7fc   : > { %v3979_v45 = vmul.f32 1.442695, %v3931_v53  ;;  %v3981_v29 = vmul.f32 1.442695, %v3932_v21  ;;  %7489 = vpow2.f32 %v3975_v50  ;;  %v12083_v55 = vpop.eup %7473  ;;  %v12099_v21 = vpop.f32.mrf.mxu0 }
 0x7fd   : > { %7491 = vpow2.f32 %v3977_v3  ;;  %v3896_v49 = vpop.xlane.xlu0 %3895  ;;  %v12089_v10 = vpop.eup %7475  ;;  %15525 = vst [vmem:[#allocation136_spill] sm:$0xff] %v12099_v21  ;;  %v7923_v21 = vld [vmem:[%s8098_s5 + $0x58] sm:$0xff] }
 0x7fe   : > { %7493 = vpow2.f32 %v3979_v45  ;;  %v3933_v58 = vsub.f32 %v11893_v36, %v3896_v49  ;;  %v3934_v57 = vsub.f32 %v11897_v14, %v3896_v49  ;;  %v12091_v8 = vpop.eup %7477  ;;  %v4023_v14 = vadd.f32 %v12089_v10, %v12083_v55 }
 0x7ff   : > { %v3899_v16 = vpop.xlane.xlu1 %3898  ;;  %7495 = vpow2.f32 %v3981_v29  ;;  %v12095_v5 = vpop.eup %7479 }
 0x800   : > { %v3935_v18 = vsub.f32 %v11913_v34, %v3899_v16  ;;  %v3936_v20 = vsub.f32 %v11917_v54, %v3899_v16  ;;  %v3983_v30 = vmul.f32 1.442695, %v3933_v58  ;;  %v3985_v36 = vmul.f32 1.442695, %v3934_v57  ;;  %4024 = vadd.xlane.f32.xlu1 %v4023_v14 }
 0x801   : > { %v4020_v45 = vadd.f32 %v12095_v5, %v12091_v8 }
 0x802   : > { %v3987_v33 = vmul.f32 1.442695, %v3935_v18  ;;  %v3989_v31 = vmul.f32 1.442695, %v3936_v20  ;;  %v3902_v46 = vpop.xlane.xlu0 %3901  ;;  %7497 = vpow2.f32 %v3983_v30  ;;  %v12105_v29 = vpop.eup %7481 }
 0x803   : > { %v3937_v34 = vsub.f32 %v11933_v26, %v3902_v46  ;;  %v3938_v54 = vsub.f32 %v11937_v38, %v3902_v46  ;;  %4021 = vadd.xlane.f32.xlu0 %v4020_v45  ;;  %v12115_v30 = vpop.f32.mrf.mxu0 }
 0x804   : > { %v3905_v53 = vpop.xlane.xlu1 %3904  ;;  %7499 = vpow2.f32 %v3987_v33  ;;  %v12107_v49 = vpop.eup %7483  ;;  %15526 = vst [vmem:[#allocation129_spill] sm:$0xff] %v12115_v30 }
 0x805   : > { %v3939_v50 = vsub.f32 %v11948_v27, %v3905_v53  ;;  %v3940_v3 = vsub.f32 %v11952_v0, %v3905_v53  ;;  %7501 = vpow2.f32 %v3989_v31  ;;  %v3991_v2 = vmul.f32 1.442695, %v3937_v34  ;;  %v12109_v57 = vpop.eup %7485  ;;  %v12131_v45 = vpop.f32.mrf.mxu0 }
 0x806   : > { %7503 = vpow2.f32 %v3985_v36  ;;  %v3993_v16 = vmul.f32 1.442695, %v3938_v54  ;;  %v3908_v58 = vpop.xlane.xlu0 %3907  ;;  %v12113_v20 = vpop.eup %7487  ;;  %v4029_v36 = vadd.f32 %v12109_v57, %v12107_v49  ;;  %15527 = vst [vmem:[#allocation86_spill] sm:$0xff] %v12131_v45 }
 0x807   : > { %v3995_v26 = vmul.f32 1.442695, %v3939_v50  ;;  %v3997_v38 = vmul.f32 1.442695, %v3940_v3  ;;  %7505 = vpow2.f32 %v3991_v2  ;;  %v3941_v0 = vsub.f32 %v11959_v48, %v3908_v58 }
 0x808   : > { %v3911_v27 = vpop.xlane.xlu1 %3910  ;;  %v3942_v18 = vsub.f32 %v11963_v6, %v3908_v58  ;;  %v4026_v14 = vadd.f32 %v12113_v20, %v12105_v29  ;;  %4030 = vadd.xlane.f32.xlu1 %v4029_v36  ;;  %v12141_v58 = vpop.f32.mrf.mxu0 }
 0x809   : > { %7507 = vpow2.f32 %v3995_v26  ;;  %v3943_v33 = vsub.f32 %v11971_v12, %v3911_v27  ;;  %v3944_v31 = vsub.f32 %v11976_v1, %v3911_v27  ;;  %v3999_v46 = vmul.f32 1.442695, %v3941_v0  ;;  %v12123_v48 = vpop.eup %7489  ;;  %15528 = vst [vmem:[#allocation100_spill] sm:$0xff] %v12141_v58 }
 0x80a   : > { %7509 = vpow2.f32 %v3997_v38  ;;  %v4001_v34 = vmul.f32 1.442695, %v3942_v18  ;;  %v3914_v54 = vpop.xlane.xlu0 %3913  ;;  %v12125_v50 = vpop.eup %7491  ;;  %4027 = vadd.xlane.f32.xlu0 %v4026_v14 }
 0x80b   : > { %7511 = vpow2.f32 %v3993_v16  ;;  %v4003_v6 = vmul.f32 1.442695, %v3943_v33  ;;  %v4005_v53 = vmul.f32 1.442695, %v3944_v31  ;;  %v3945_v12 = vsub.f32 %v11981_v62, %v3914_v54  ;;  %v12129_v3 = vpop.eup %7493  ;;  %v12153_v36 = vpop.f32.mrf.mxu0 }
 0x80c   : > { %7513 = vpow2.f32 %v3999_v46  ;;  %v3946_v1 = vsub.f32 %v11990_v61, %v3914_v54  ;;  %v4032_v2 = vadd.f32 %v12125_v50, %v12123_v48  ;;  %v12135_v26 = vpop.eup %7495  ;;  %15529 = vst [vmem:[#allocation130_spill] sm:$0xff] %v12153_v36 }
 0x80d   : > { %7515 = vpow2.f32 %v4003_v6  ;;  %v4007_v38 = vmul.f32 1.442695, %v3945_v12  ;;  %v4035_v62 = vadd.f32 %v12135_v26, %v12129_v3  ;;  %v12167_v12 = vpop.f32.mrf.mxu0 }
 0x80e   : > { %7517 = vpow2.f32 %v4005_v53  ;;  %v4009_v16 = vmul.f32 1.442695, %v3946_v1  ;;  %4033 = vadd.xlane.f32.xlu0 %v4032_v2  ;;  %15530 = vst [vmem:[#allocation72_spill] sm:$0xff] %v12167_v12  ;;  %v7918_v12 = vld [vmem:[%s8098_s5 + $0x48] sm:$0xff] }
 0x80f   : > { %7519 = vpow2.f32 %v4001_v34  ;;  %v12139_v61 = vpop.eup %7497  ;;  %4036 = vadd.xlane.f32.xlu1 %v4035_v62 }
 0x810   : > { %7521 = vpow2.f32 %v4007_v38 }
 0x811   : > { %7523 = vpow2.f32 %v4009_v16  ;;  %v12143_v27 = vpop.eup %7499 }
 0x812   : > { %v12145_v0 = vpop.eup %7501 }
 0x813   : > { %v12147_v18 = vpop.eup %7503  ;;  %v4041_v33 = vadd.f32 %v12145_v0, %v12143_v27 }
 0x814   : > { %v12151_v31 = vpop.eup %7505  ;;  %v4038_v46 = vadd.f32 %v12147_v18, %v12139_v61 }
 0x815   : > { %4042 = vadd.xlane.f32.xlu1 %v4041_v33 }
 0x816   : > { %v12157_v14 = vpop.eup %7507  ;;  %4039 = vadd.xlane.f32.xlu0 %v4038_v46  ;;  %v12181_v46 = vpop.f32.mrf.mxu0 }
 0x817   : > { %v12159_v6 = vpop.eup %7509  ;;  %15533 = vst [vmem:[#allocation139_spill] sm:$0xff] %v12181_v46 }
 0x818   : > { %v12161_v53 = vpop.eup %7511  ;;  %v4047_v34 = vadd.f32 %v12159_v6, %v12157_v14 }
 0x819   : > { %v12165_v54 = vpop.eup %7513  ;;  %v4044_v1 = vadd.f32 %v12161_v53, %v12151_v31 }
 0x81a   : > { %v12171_v2 = vpop.eup %7515  ;;  %4048 = vadd.xlane.f32.xlu1 %v4047_v34 }
 0x81b   : > { %15531 = vst [vmem:[#allocation142_spill] sm:$0xff] %v12171_v2  ;;  %v12173_v38 = vpop.eup %7517  ;;  %4045 = vadd.xlane.f32.xlu0 %v4044_v1  ;;  %v12189_v1 = vpop.f32.mrf.mxu0 }
 0x81c   : > { %v12175_v16 = vpop.eup %7519  ;;  %v4053_v62 = vadd.f32 %v12173_v38, %v12171_v2  ;;  %15534 = vst [vmem:[#allocation70_spill] sm:$0xff] %v12189_v1 }
 0x81d   : > { %v12179_v33 = vpop.eup %7521  ;;  %v4050_v19 = vadd.f32 %v12175_v16, %v12165_v54  ;;  %v12191_v45 = vpop.f32.mrf.mxu0 }
 0x81e   : > { %15532 = vst [vmem:[#allocation88_spill] sm:$0xff] %v12179_v33  ;;  %v12185_v58 = vpop.eup %7523  ;;  %4054 = vadd.xlane.f32.xlu1 %v4053_v62  ;;  %15535 = vst [vmem:[#allocation57_spill] sm:$0xff] %v12191_v45  ;;  %v7917_v45 = vld [vmem:[%s8098_s5 + $0x30] sm:$0xff] }
 0x81f   : > { %4051 = vadd.xlane.f32.xlu0 %v4050_v19  ;;  %v4056_v34 = vadd.f32 %v12185_v58, %v12179_v33  ;;  %v12193_v39 = vpop.f32.mrf.mxu0 }
 0x820   : > { %15536 = vst [vmem:[#allocation105_spill] sm:$0xff] %v12193_v39  ;;  %v7915_v39 = vld [vmem:[%s8098_s5 + $0x18] sm:$0xff] }
 0x823   : > { %4057 = vadd.xlane.f32.xlu0 %v4056_v34  ;;  %v7894_v34 = vld [vmem:[%s14419_s1 + $0x10] sm:$0xff]  }
 0x82a   : > { %v6639_v63 = vpop.f32.mrf.mxu0 }
 0x82c   : > { %v6640_v17 = vpop.f32.mrf.mxu0 }
 0x82d   : > { %v12195_v46 = vadd.f32 %v6640_v17, %v6639_v63 }
 0x82e   : > { %v12201_v19 = vpop.f32.mrf.mxu0 }
 0x82f   : > { %15537 = vst [vmem:[#allocation58_spill] sm:$0xff] %v12195_v46  ;;  %4123 = vrot.lane.b32.xlu1 %v7893_v51, %s8014_s30  ;;  %15538 = vst [vmem:[#allocation69_spill] sm:$0xff] %v12201_v19  ;;  %v7895_v46 = vld [vmem:[%s14419_s1 + $0x18] sm:$0xff]  }
 0x830   : > { %v12203_v62 = vpop.f32.mrf.mxu0 }
 0x831   : > { %15539 = vst [vmem:[#allocation96_spill] sm:$0xff] %v12203_v62  ;;  %v7896_v62 = vld [vmem:[%s14419_s1 + $0x8] sm:$0xff]  }
 0x833   : > { %4127 = vrot.lane.b32.xlu1 %v7894_v34, %s8014_s30  ;;  %v6645_v1 = vpop.f32.mrf.mxu0 }
 0x835   : > { %v6646_v17 = vpop.f32.mrf.mxu0 }
 0x836   : > { %v12209_v63 = vadd.f32 %v6646_v17, %v6645_v1  ;;  %v7897_v1 = vld [vmem:[%s14419_s1 + $0x28] sm:$0xff]  }
 0x837   : > { %4129 = vrot.lane.b32.xlu1 %v7895_v46, %s8014_s30  ;;  %v12215_v51 = vpop.f32.mrf.mxu0  ;;  %v7898_v46 = vld [vmem:[%s14419_s1 + $0x20] sm:$0xff]  }
 0x838   : > { %15540 = vst [vmem:[#allocation114_spill] sm:$0xff] %v12209_v63  ;;  %15541 = vst [vmem:[#allocation111_spill] sm:$0xff] %v12215_v51 }
 0x839   : > { %4125 = vrot.lane.b32.xlu0 %v7896_v62, %s8014_s30  ;;  %v12221_v19 = vpop.f32.mrf.mxu0  ;;  %v7899_v62 = vld [vmem:[%s14419_s1 + $0x38] sm:$0xff]  }
 0x83a   : > { %15542 = vst [vmem:[#allocation106_spill] sm:$0xff] %v12221_v19 }
 0x83b   : > { %4133 = vrot.lane.b32.xlu1 %v7897_v1, %s8014_s30  ;;  %v7900_v1 = vld [vmem:[%s14419_s1 + $0x30] sm:$0xff]  }
 0x83d   : > { %4131 = vrot.lane.b32.xlu0 %v7898_v46, %s8014_s30 }
 0x83e   : > { %v6651_v34 = vpop.f32.mrf.mxu0 }
 0x83f   : > { %4137 = vrot.lane.b32.xlu1 %v7899_v62, %s8014_s30 }
 0x840   : > { %v6652_v17 = vpop.f32.mrf.mxu0 }
 0x841   : > { %v12231_v63 = vadd.f32 %v6652_v17, %v6651_v34  ;;  %4135 = vrot.lane.b32.xlu0 %v7900_v1, %s8014_s30  ;;  %v7901_v34 = vld [vmem:[%s14419_s1 + $0x48] sm:$0xff]   ;;  %v7902_v17 = vld [vmem:[%s14419_s1 + $0x40] sm:$0xff]   ;;  %v7903_v1 = vld [vmem:[%s14419_s1 + $0x58] sm:$0xff]  }
 0x842   : > { %v12237_v19 = vpop.f32.mrf.mxu0 }
 0x843   : > { %15543 = vst [vmem:[#allocation108_spill] sm:$0xff] %v12231_v63  ;;  %15544 = vst [vmem:[#allocation133_spill] sm:$0xff] %v12237_v19  ;;  %4141 = vrot.lane.b32.xlu1 %v7901_v34, %s8014_s30  ;;  %v7904_v34 = vld [vmem:[%s14419_s1 + $0x50] sm:$0xff]  }
 0x844   : > { %v12243_v51 = vpop.f32.mrf.mxu0  ;;  %v7913_v19 = vld [vmem:[%s8098_s5 + $0x10] sm:$0xff] }
 0x845   : > { %15545 = vst [vmem:[#allocation134_spill] sm:$0xff] %v12243_v51  ;;  %4139 = vrot.lane.b32.xlu0 %v7902_v17, %s8014_s30  ;;  %v7905_v17 = vld [vmem:[%s14419_s1 + $0x68] sm:$0xff]   ;;  %v15547_v51 = vmov 6  }
 0x846   : > { %v6657_v46 = vpop.f32.mrf.mxu0 }
 0x847   : > { %4145 = vrot.lane.b32.xlu1 %v7903_v1, %s8014_s30  ;;  %v7908_v1 = vld [vmem:[%s14419_s1 + $0x70] sm:$0xff]  }
 0x848   : > { %v6658_v62 = vpop.f32.mrf.mxu0 }
 0x849   : > { %v12253_v63 = vadd.f32 %v6658_v62, %v6657_v46  ;;  %4143 = vrot.lane.b32.xlu0 %v7904_v34, %s8014_s30  ;;  %v7906_v46 = vld [vmem:[%s14419_s1 + $0x60] sm:$0xff]   ;;  %v7907_v62 = vld [vmem:[%s14419_s1 + $0x78] sm:$0xff]   ;;  %v7909_v34 = vld [vmem:[%s8098_s5 + $0x8] sm:$0xff] }
 0x84b   : > { %15546 = vst [vmem:[#allocation135_spill] sm:$0xff] %v12253_v63  ;;  %4149 = vrot.lane.b32.xlu1 %v7905_v17, %s8014_s30  ;;  %v7910_v17 = vld [vmem:[%s8098_s5] sm:$0xff] }
 0x84c   : > { %v7911_v63 = vld [vmem:[%s8098_s5 + $0x20] sm:$0xff] }
 0x84d   : > { %4147 = vrot.lane.b32.xlu0 %v7906_v46, %s8014_s30  ;;  %v8015_v46 = vmov 7  }
 0x84f   : > { %4153 = vrot.lane.b32.xlu1 %v7907_v62, %s8014_s30  ;;  %v7912_v62 = vld [vmem:[%s8098_s5 + $0x40] sm:$0xff] }
 0x851   : > { %4151 = vrot.lane.b32.xlu0 %v7908_v1, %s8014_s30  ;;  %v12287_v1 = vld [vmem:[%s8098_s5 + $0x60] sm:$0xff] }
 0x853   : > { %4275 = vperm.xlu1 %6948, %v7909_v34  }
 0x855   : > { %4271 = vperm.xlu0 %6947, %v7910_v17  }
 0x857   : > { %6949 = vset.pattern.permute.xlu1 %v8015_v46 }
 0x858   : > { %4909 = vperm.xlu1 %6949, %v7910_v17   ;;  %v7916_v17 = vld [vmem:[%s8098_s5 + $0x28] sm:$0xff] }
 0x859   : > { %4287 = vperm.xlu0 %6947, %v7911_v63  }
 0x85c   : > { %6950 = vset.pattern.permute.xlu1 %v15547_v51 }
 0x85d   : > { %4303 = vperm.xlu0 %6947, %v7912_v62   ;;  %4279 = vperm.xlu1 %6950, %v7913_v19  }
 0x861   : > { %4319 = vperm.xlu0 %6947, %v12287_v1   ;;  %4283 = vperm.xlu1 %6950, %v7915_v39  }
 0x865   : > { %6960 = vset.pattern.permute.xlu0 %v8015_v46  ;;  %6951 = vset.pattern.permute.xlu1 %v8015_v46 }
 0x866   : > { %4913 = vperm.xlu0 %6960, %v7909_v34   ;;  %4921 = vperm.xlu1 %6951, %v7915_v39   ;;  %v7919_v39 = vld [vmem:[%s8098_s5 + $0x38] sm:$0xff]  ;;  %v7921_v34 = vld [vmem:[%s8098_s5 + $0x68] sm:$0xff] }
 0x86a   : > { %4917 = vperm.xlu0 %6960, %v7913_v19   ;;  %6952 = vset.pattern.permute.xlu1 %v15547_v51  ;;  %v7920_v19 = vld [vmem:[%s8098_s5 + $0x50] sm:$0xff] }
 0x86b   : > { %4291 = vperm.xlu1 %6952, %v7916_v17  }
 0x86e   : > { %4929 = vperm.xlu0 %6960, %v7916_v17   ;;  %v7922_v17 = vld [vmem:[%s8098_s5 + $0x70] sm:$0xff]  ;;  %s7947_s5 = scalar_lea.vmem %s7946_s22, 4096 }
 0x86f   : > { %6953 = vset.pattern.permute.xlu1 %v8015_v46 }
 0x870   : > { %4925 = vperm.xlu1 %6953, %v7911_v63  }
 0x872   : > { %4933 = vperm.xlu0 %6960, %v7917_v45  }
 0x874   : > { %6954 = vset.pattern.permute.xlu1 %v15547_v51 }
 0x875   : > { %4295 = vperm.xlu1 %6954, %v7917_v45  }
 0x876   : > { %4945 = vperm.xlu0 %6960, %v7918_v12  }
 0x877   : > { %v4013_v63 = vpop.xlane.xlu1 %4012 }
 0x878   : > { %7525 = vrcp.f32 %v4013_v63 }
 0x879   : > { %4299 = vperm.xlu1 %6954, %v7919_v39  }
 0x87a   : > { %4949 = vperm.xlu0 %6960, %v7920_v19  }
 0x87d   : > { %6955 = vset.pattern.permute.xlu1 %v8015_v46 }
 0x87e   : > { %4937 = vperm.xlu1 %6955, %v7919_v39   ;;  %4961 = vperm.xlu0 %6960, %v7921_v34  }
 0x87f   : > { %v4019_v45 = vpop.xlane.xlu1 %4018 }
 0x882   : > { %6956 = vset.pattern.permute.xlu1 %v15547_v51  ;;  %4965 = vperm.xlu0 %6960, %v7922_v17  }
 0x883   : > { %4307 = vperm.xlu1 %6956, %v7918_v12   ;;  %v4016_v36 = vpop.xlane.xlu0 %4015 }
 0x884   : > { %7527 = vrcp.f32 %v4016_v36 }
 0x885   : > { %v7526_v11 = vpop.eup %7525  ;;  %7529 = vrcp.f32 %v4019_v45 }
 0x886   : > { %v12312_v36 = vmul.f32 %v7526_v11, %v12049_v60 }
 0x887   : > { %6957 = vset.pattern.permute.xlu1 %v8015_v46 }
 0x888   : > { %4941 = vperm.xlu1 %6957, %v7912_v62   ;;  %v4076_v62 = vmul.f32 %v7526_v11, %v12051_v7 }
 0x889   : > { %v4025_v39 = vpop.xlane.xlu1 %4024 }
 0x88a   : > { %7531 = vrcp.f32 %v4025_v39 }
 0x88c   : > { %6958 = vset.pattern.permute.xlu1 %v15547_v51  ;;  %v4022_v30 = vpop.xlane.xlu0 %4021 }
 0x88d   : > { %4311 = vperm.xlu1 %6958, %v7920_v19   ;;  %7533 = vrcp.f32 %v4022_v30  ;;  %v6343_v30 = vld [vmem:[%s14421_s3 + $0x7] ss:$8 sm:$0x3] }
 0x891   : > { %4315 = vperm.xlu1 %6958, %v7923_v21   ;;  %v4031_v42 = vpop.xlane.xlu1 %4030  ;;  %v7528_v12 = vpop.eup %7527 }
 0x892   : > { %v4078_v63 = vmul.f32 %v7528_v12, %v12075_v47  ;;  %v12315_v19 = vmul.f32 %v7528_v12, %v12071_v44  ;;  %v7530_v39 = vpop.eup %7529 }
 0x893   : > { %v4028_v41 = vpop.xlane.xlu0 %4027  ;;  %v12379_v28 = vmul.f32 %v7530_v39, %v12063_v40 }
 0x894   : > { %v4108_v56 = vpack.c.bf16 %v4078_v63, %v4076_v62  ;;  %7535 = vrcp.f32 %v4028_v41 }
 0x895   : > { %6959 = vset.pattern.permute.xlu1 %v8015_v46 }
 0x896   : > { %4953 = vperm.xlu1 %6959, %v7923_v21   ;;  %4203 = vmatprep.mubr.bf16.mxu1 %v4108_v56 }
 0x897   : > { %v4034_v23 = vpop.xlane.xlu0 %4033  ;;  %v7532_v33 = vpop.eup %7531 }
 0x898   : > { %v4037_v37 = vpop.xlane.xlu1 %4036  ;;  %7537 = vrcp.f32 %v4034_v23  ;;  %v6342_v23 = vld [vmem:[%s14421_s3 + $0x6] ss:$8 sm:$0x3]  ;;  %v12397_v40 = vmul.f32 %v7532_v33, %v12083_v55 }
 0x899   : > { %7539 = vrcp.f32 %v4031_v42 }
 0x89a   : > { %6961 = vset.pattern.permute.xlu1 %v15547_v51  ;;  %v7534_v15 = vpop.eup %7533 }
 0x89b   : > { %4323 = vperm.xlu1 %6961, %v7921_v34   ;;  %v12364_v25 = vmul.f32 %v7534_v15, %v12095_v5 }
 0x89e   : > { %v4043_v7 = vpop.xlane.xlu1 %4042 }
 0x89f   : > { %6962 = vset.pattern.permute.xlu1 %v8015_v46  ;;  %v4040_v47 = vpop.xlane.xlu0 %4039 }
 0x8a0   : > { %4957 = vperm.xlu1 %6962, %v12287_v1   ;;  %7541 = vrcp.f32 %v4040_v47 }
 0x8a1   : > { %7543 = vrcp.f32 %v4037_v37  ;;  %v7536_v42 = vpop.eup %7535 }
 0x8a2   : > { %7545 = vrcp.f32 %v4043_v7  ;;  %v12373_v22 = vmul.f32 %v7536_v42, %v12113_v20  ;;  %v12376_v4 = vmul.f32 %v7536_v42, %v12105_v29  ;;  %v12391_v29 = vmul.f32 %v7530_v39, %v12061_v13 }
 0x8a3   : > { %v4049_v60 = vpop.xlane.xlu1 %4048  ;;  %v12394_v20 = vmul.f32 %v7532_v33, %v12089_v10 }
 0x8a4   : > { %v4046_v11 = vpop.xlane.xlu0 %4045  ;;  %6963 = vset.pattern.permute.xlu1 %v15547_v51  ;;  %7547 = vrcp.f32 %v4049_v60  ;;  %v15548_v60 = vld [vmem:[#allocation5_spill] sm:$0xff] }
 0x8a5   : > { %4327 = vperm.xlu1 %6963, %v7922_v17   ;;  %7549 = vrcp.f32 %v4046_v11  ;;  %v7538_v7 = vpop.eup %7537  ;;  %v12358_v52 = vrot.slane %v6342_v23, %v15548_v60  ;;  %v12361_v11 = vrot.slane %v6342_v23, %v15549_v43  ;;  %v12367_v32 = vrot.slane %v6343_v30, %v15548_v60 }
 0x8a6   : > { %v7540_v47 = vpop.eup %7539  ;;  %v12382_v5 = vmul.f32 %v7538_v7, %v12125_v50  ;;  %v12385_v60 = vmul.f32 %v7538_v7, %v12123_v48 }
 0x8a7   : > { %v4055_v44 = vpop.xlane.xlu1 %4054  ;;  %v12402_v50 = vmul.f32 %v7540_v47, %v12109_v57 }
 0x8a8   : > { %v4052_v12 = vpop.xlane.xlu0 %4051 }
 0x8a9   : > { %4331 = vperm.xlu1 %6963, %v7924_v35   ;;  %7551 = vrcp.f32 %v4052_v12  ;;  %v12370_v12 = vmul.f32 %v7534_v15, %v12091_v8  ;;  %v12388_v8 = vrot.slane %v6343_v30, %v15549_v43  ;;  %v12405_v43 = vmul.f32 %v7540_v47, %v12107_v49 }
 0x8aa   : > { %7553 = vrcp.f32 %v4055_v44 }
 0x8ab   : > { %v12324_v62 = vpop.permute.xlu1 %4123 }
 0x8ac   : > { %v12326_v63 = vpop.xlane.xlu0 %4057 }
 0x8ad   : > { %6964 = vset.pattern.permute.xlu1 %v8015_v46  ;;  %v7542_v24 = vpop.eup %7541  ;;  %7555 = vrcp.f32 %v12326_v63 }
 0x8ae   : > { %4969 = vperm.xlu1 %6964, %v7924_v35   ;;  %v7544_v9 = vpop.eup %7543  ;;  %v12408_v13 = vmul.f32 %v7542_v24, %v12147_v18  ;;  %v12427_v42 = vmul.f32 %v7542_v24, %v12139_v61 }
 0x8af   : > { %v12329_v56 = vpop.permute.xlu1 %4127  ;;  %v7546_v44 = vpop.eup %7545  ;;  %v12417_v33 = vmul.f32 %v7544_v9, %v12135_v26  ;;  %v12424_v39 = vmul.f32 %v7544_v9, %v12129_v3 }
 0x8b0   : > { %v12331_v34 = vpop.permute.xlu0 %4125  ;;  %15551 = vst [vmem:[#allocation140_spill] sm:$0xff] %v12427_v42  ;;  %v12441_v24 = vmul.f32 %v7546_v44, %v12143_v27 }
 0x8b1   : > { %15550 = vst [vmem:[#allocation137_spill] sm:$0xff] %v12424_v39  ;;  %v7548_v30 = vpop.eup %7547 }
 0x8b2   : > { %v7550_v63 = vpop.eup %7549 }
 0x8b3   : > { %v12333_v1 = vpop.permute.xlu1 %4129 }
 0x8b4   : > { %v12335_v21 = vpop.permute.xlu0 %4131 }
 0x8b7   : > { %v12337_v51 = vpop.permute.xlu1 %4133 }
 0x8b8   : > { %v12339_v17 = vpop.permute.xlu0 %4135 }
 0x8bb   : > { %v4138_v59 = vpop.permute.xlu1 %4137 }
 0x8bc   : > { %v12341_v35 = vpop.permute.xlu0 %4139 }
 0x8bf   : > { %v12343_v46 = vpop.permute.xlu1 %4141 }
 0x8c0   : > { %v12345_v2 = vpop.permute.xlu0 %4143 }
 0x8c3   : > { %v12347_v45 = vpop.permute.xlu1 %4145 }
 0x8c4   : > { %v12349_v41 = vpop.permute.xlu0 %4147 }
 0x8c7   : > { %v4150_v37 = vpop.permute.xlu1 %4149 }
 0x8c8   : > { %v4152_v15 = vpop.permute.xlu0 %4151 }
 0x8cb   : > { %v4154_v23 = vpop.permute.xlu1 %4153 }
 0x8cc   : > { %6687 = vmatprep.subr.bf16.mxu1 %v4154_v23  ;;  %v12433_v23 = vmul.f32 %v7546_v44, %v12145_v0 }
 0x8cd   : > { %6688 = vmatpush3.bf16.msra.mxu1 %v4138_v59  ;;  %v7552_v59 = vpop.eup %7551 }
 0x8ce   : > { %6689 = vmatprep.subr.bf16.mxu1 %v4152_v15 }
 0x8cf   : > { %v4276_v57 = vpop.permute.xlu1 %4275 }
 0x8d0   : > { %v4347_v7 = vadd.f32 %v12358_v52, %v4276_v57  ;;  %v4348_v26 = vadd.f32 %v12361_v11, %v4276_v57  ;;  %v4272_v47 = vpop.permute.xlu0 %4271 }
 0x8d1   : > { %v4345_v15 = vadd.f32 %v12358_v52, %v4272_v47  ;;  %v4346_v18 = vadd.f32 %v12361_v11, %v4272_v47  ;;  %6690 = vmatpush3.bf16.msra.mxu1 %v12339_v17  ;;  %v12446_v17 = vmul.f32 %v7548_v30, %v12159_v6  ;;  %v15555_v47 = vld [vmem:[#allocation10_spill] sm:$0xff] }
 0x8d2   : > { %vm4379_vm1 = vcmp.ge.f32.partialorder %v4347_v7, 0.0  ;;  %vm4380_vm15 = vcmp.ge.f32.partialorder %v4348_v26, 0.0  ;;  %v4411_v3 = vmul.f32 0.2, %v4347_v7  ;;  %v4412_v61 = vmul.f32 0.2, %v4348_v26  ;;  %6691 = vmatprep.subr.bf16.mxu1 %v4150_v37 }
 0x8d3   : > { %v4409_v0 = vmul.f32 0.2, %v4345_v15  ;;  %v4410_v57 = vmul.f32 0.2, %v4346_v18  ;;  %v4910_v49 = vpop.permute.xlu1 %4909  ;;  %vm4377_vm2 = vcmp.ge.f32.partialorder %v4345_v15, 0.0  ;;  %vm4378_vm5 = vcmp.ge.f32.partialorder %v4346_v18, 0.0 }
 0x8d4   : > { %v4983_v9 = vadd.f32 %v12367_v32, %v4910_v49  ;;  %v4984_v27 = vadd.f32 %v12388_v8, %v4910_v49  ;;  %v4288_v44 = vpop.permute.xlu0 %4287  ;;  %v4443_v55 = vsel %vm4379_vm1, %v4347_v7, %v4411_v3  ;;  %v4444_v10 = vsel %vm4380_vm15, %v4348_v26, %v4412_v61  ;;  %v15552_v37 = vld [vmem:[#allocation9_spill] sm:$0xff] }
 0x8d5   : > { %6692 = vmatpush3.bf16.msra.mxu1 %v12337_v51  ;;  %vm15553_vm11 = vcmp.gt.f32.partialorder %v15552_v37, 0.0  ;;  %vm15556_vm4 = vcmp.gt.f32.partialorder %v15555_v47, 0.0  ;;  %v12461_v49 = vmul.f32 %v7550_v63, %v12161_v53  ;;  %v12464_v7 = vmul.f32 %v7550_v63, %v12151_v31 }
 0x8d6   : > { %v12453_v48 = vsel %vm15553_vm11, %v4443_v55, -9e+15  ;;  %v12457_v6 = vsel %vm15556_vm4, %v4444_v10, -9e+15  ;;  %vm5015_vm13 = vcmp.ge.f32.partialorder %v4983_v9, 0.0  ;;  %6693 = vmatprep.subr.bf16.mxu1 %v12349_v41  ;;  %vm5016_vm10 = vcmp.ge.f32.partialorder %v4984_v27, 0.0  ;;  %v12472_v10 = vpop.eup %7553 }
 0x8d7   : > { %15554 = vst [vmem:[#allocation141_spill] sm:$0xff] %v12453_v48  ;;  %15557 = vst [vmem:[#allocation143_spill] sm:$0xff] %v12457_v6  ;;  %v5047_v39 = vmul.f32 0.2, %v4983_v9  ;;  %v5048_v42 = vmul.f32 0.2, %v4984_v27  ;;  %v12467_v51 = vmul.f32 %v7552_v59, %v12175_v16  ;;  %v12470_v55 = vmul.f32 %v7548_v30, %v12157_v14 }
 0x8d8   : > { %15558 = vst [vmem:[#allocation144_spill] sm:$0xff] %v12472_v10  ;;  %v4304_v26 = vpop.permute.xlu0 %4303  ;;  %v4508_v3 = vmax.f32 %v12453_v48, %v12457_v6  ;;  %v4280_v41 = vpop.permute.xlu1 %4279  ;;  %v4441_v53 = vsel %vm4377_vm2, %v4345_v15, %v4409_v0  ;;  %v4442_v61 = vsel %vm4378_vm5, %v4346_v18, %v4410_v57  ;;  %v12479_v31 = vmul.f32 %v7552_v59, %v12165_v54  ;;  %v15559_v6 = vld [vmem:[#allocation7_spill] sm:$0xff]  ;;  %v15562_v15 = vld [vmem:[#allocation8_spill] sm:$0xff] }
 0x8d9   : > { %v4353_v16 = vadd.f32 %v12358_v52, %v4288_v44  ;;  %v4349_v63 = vadd.f32 %v12358_v52, %v4280_v41  ;;  %v4350_v14 = vadd.f32 %v12361_v11, %v4280_v41  ;;  %6694 = vmatpush3.bf16.msra.mxu1 %v12335_v21  ;;  %v5079_v30 = vsel %vm5015_vm13, %v4983_v9, %v5047_v39 }
 0x8da   : > { %4509 = vmax.xlane.f32.xlu1 %v4508_v3  ;;  %vm15560_vm9 = vcmp.gt.f32.partialorder %v15559_v6, 0.0  ;;  %vm15563_vm7 = vcmp.gt.f32.partialorder %v15562_v15, 0.0  ;;  %6695 = vmatprep.subr.bf16.mxu1 %v12347_v45  ;;  %v5080_v54 = vsel %vm5016_vm10, %v4984_v27, %v5048_v42  ;;  %v4354_v21 = vadd.f32 %v12361_v11, %v4288_v44  ;;  %v12515_v3 = vpop.eup %7555 }
 0x8db   : > { %v12488_v48 = vsel %vm15560_vm9, %v4441_v53, -9e+15  ;;  %v12492_v18 = vsel %vm15563_vm7, %v4442_v61, -9e+15  ;;  %v12505_v0 = vmul.f32 %v12472_v10, %v12173_v38  ;;  %vm4381_vm0 = vcmp.ge.f32.partialorder %v4349_v63, 0.0  ;;  %vm15565_vm6 = vmmov %vm15560_vm9 }
 0x8dc   : > { %15561 = vst [vmem:[#allocation145_spill] sm:$0xff] %v12488_v48  ;;  %15564 = vst [vmem:[#allocation5_spill] sm:$0xff] %v12492_v18  ;;  %v4413_v57 = vmul.f32 0.2, %v4349_v63  ;;  %v12507_v45 = vpop.permute.xlu0 %4319  ;;  %v12511_v42 = vsel %vm15565_vm6, %v5079_v30, -9e+15  ;;  %v4284_v27 = vpop.permute.xlu1 %4283  ;;  %v4505_v38 = vmax.f32 %v12488_v48, %v12492_v18 }
 0x8dd   : > { %15566 = vst [vmem:[#allocation6_spill] sm:$0xff] %v12511_v42  ;;  %vm4385_vm14 = vcmp.ge.f32.partialorder %v4353_v16, 0.0  ;;  %v4414_v41 = vmul.f32 0.2, %v4350_v14  ;;  %vm15567_vm8 = vmmov %vm15563_vm7  ;;  %6696 = vmatpush3.bf16.msra.mxu1 %v12333_v1  ;;  %vm4382_vm1 = vcmp.ge.f32.partialorder %v4350_v14, 0.0  ;;  %v4351_v6 = vadd.f32 %v12358_v52, %v4284_v27 }
 0x8de   : > { %v12521_v53 = vsel %vm15567_vm8, %v5080_v54, -9e+15  ;;  %6697 = vmatprep.subr.bf16.mxu1 %v12345_v2  ;;  %v4352_v61 = vadd.f32 %v12361_v11, %v4284_v27  ;;  %v4445_v30 = vsel %vm4381_vm0, %v4349_v63, %v4413_v57  ;;  %vm4386_vm15 = vcmp.ge.f32.partialorder %v4354_v21, 0.0  ;;  %4506 = vmax.xlane.f32.xlu0 %v4505_v38  ;;  %v15569_v57 = vld [vmem:[#allocation11_spill] sm:$0xff] }
 0x8df   : > { %15568 = vst [vmem:[#allocation9_spill] sm:$0xff] %v12521_v53  ;;  %v4417_v44 = vmul.f32 0.2, %v4353_v16  ;;  %v4418_v9 = vmul.f32 0.2, %v4354_v21  ;;  %v5143_v15 = vmax.f32 %v12511_v42, %v12521_v53  ;;  %v12531_v54 = vadd.f32 %v12358_v52, %v4304_v26 }
 0x8e0   : > { %v12534_v1 = vadd.f32 %v12361_v11, %v4304_v26  ;;  %vm4383_vm2 = vcmp.ge.f32.partialorder %v4351_v6, 0.0  ;;  %vm4384_vm5 = vcmp.ge.f32.partialorder %v4352_v61, 0.0  ;;  %v4415_v2 = vmul.f32 0.2, %v4351_v6  ;;  %v15572_v26 = vld [vmem:[#allocation12_spill] sm:$0xff] }
 0x8e1   : > { %v4416_v39 = vmul.f32 0.2, %v4352_v61  ;;  %v4914_v27 = vpop.permute.xlu0 %4913  ;;  %v4446_v63 = vsel %vm4382_vm1, %v4350_v14, %v4414_v41  ;;  %vm15570_vm11 = vcmp.gt.f32.partialorder %v15569_v57, 0.0  ;;  %6698 = vmatpush3.bf16.msra.mxu1 %v12329_v56  ;;  %v4922_v38 = vpop.permute.xlu1 %4921  ;;  %vm15573_vm4 = vcmp.gt.f32.partialorder %v15572_v26, 0.0 }
 0x8e2   : > { %v12539_v59 = vsel %vm15570_vm11, %v4445_v30, -9e+15  ;;  %v4985_v53 = vadd.f32 %v12367_v32, %v4914_v27  ;;  %v4986_v42 = vadd.f32 %v12388_v8, %v4914_v27  ;;  %v12546_v18 = vsel %vm15573_vm4, %v4446_v63, -9e+15  ;;  %6699 = vmatprep.subr.bf16.mxu1 %v12343_v46  ;;  %5144 = vmax.xlane.f32.xlu0 %v5143_v15 }
 0x8e3   : > { %15571 = vst [vmem:[#allocation10_spill] sm:$0xff] %v12539_v59  ;;  %15574 = vst [vmem:[#allocation7_spill] sm:$0xff] %v12546_v18  ;;  %v4989_v48 = vadd.f32 %v12367_v32, %v4922_v38  ;;  %v12552_v14 = vadd.f32 %v12358_v52, %v12507_v45  ;;  %v4511_v56 = vmax.f32 %v12539_v59, %v12546_v18  ;;  %vm15575_vm7 = vcmp.gt.f32.partialorder %v15552_v37, 0.0 }
 0x8e4   : > { %v12557_v41 = vsel %vm4385_vm14, %v4353_v16, %v4417_v44  ;;  %v12560_v30 = vsel %vm4386_vm15, %v4354_v21, %v4418_v9  ;;  %vm5017_vm13 = vcmp.ge.f32.partialorder %v4985_v53, 0.0  ;;  %vm5018_vm10 = vcmp.ge.f32.partialorder %v4986_v42, 0.0 }
 0x8e5   : > { %v5049_v27 = vmul.f32 0.2, %v4985_v53  ;;  %v5050_v46 = vmul.f32 0.2, %v4986_v42  ;;  %4512 = vmax.xlane.f32.xlu1 %v4511_v56  ;;  %v4990_v63 = vadd.f32 %v12388_v8, %v4922_v38  ;;  %vm5021_vm9 = vcmp.ge.f32.partialorder %v4989_v48, 0.0  ;;  %v4918_v10 = vpop.permute.xlu0 %4917  ;;  %6700 = vmatpush3.bf16.msra.mxu1 %v12331_v34 }
 0x8e6   : > { %v4447_v15 = vsel %vm4383_vm2, %v4351_v6, %v4415_v2  ;;  %v4448_v18 = vsel %vm4384_vm5, %v4352_v61, %v4416_v39  ;;  %v4987_v16 = vadd.f32 %v12367_v32, %v4918_v10  ;;  %v4988_v21 = vadd.f32 %v12388_v8, %v4918_v10  ;;  %6701 = vmatprep.subr.bf16.mxu1 %v12341_v35  ;;  %v4292_v9 = vpop.permute.xlu1 %4291  ;;  %v15579_v61 = vld [vmem:[#allocation15_spill] sm:$0xff] }
 0x8e7   : > { %v5081_v44 = vsel %vm5017_vm13, %v4985_v53, %v5049_v27  ;;  %v5082_v59 = vsel %vm5018_vm10, %v4986_v42, %v5050_v46  ;;  %v4355_v56 = vadd.f32 %v12358_v52, %v4292_v9  ;;  %v12571_v38 = vadd.f32 %v12361_v11, %v4292_v9 }
 0x8e8   : > { %v12575_v34 = vsel %vm15575_vm7, %v5081_v44, -9e+15  ;;  %vm15577_vm0 = vcmp.gt.f32.partialorder %v15555_v47, 0.0  ;;  %vm5019_vm6 = vcmp.ge.f32.partialorder %v4987_v16, 0.0  ;;  %vm5020_vm14 = vcmp.ge.f32.partialorder %v4988_v21, 0.0  ;;  %v15581_v47 = vld [vmem:[#allocation16_spill] sm:$0xff] }
 0x8e9   : > { %15576 = vst [vmem:[#allocation8_spill] sm:$0xff] %v12575_v34  ;;  %v12579_v39 = vsel %vm15577_vm0, %v5082_v59, -9e+15  ;;  %v5051_v10 = vmul.f32 0.2, %v4987_v16  ;;  %vm5022_vm8 = vcmp.ge.f32.partialorder %v4990_v63, 0.0  ;;  %6702 = vmatpush3.bf16.msra.mxu1 %v12324_v62  ;;  %v4930_v6 = vpop.permute.xlu0 %4929 }
 0x8ea   : > { %15578 = vst [vmem:[#allocation11_spill] sm:$0xff] %v12579_v39  ;;  %v5052_v35 = vmul.f32 0.2, %v4988_v21  ;;  %v5053_v53 = vmul.f32 0.2, %v4989_v48  ;;  %vm4387_vm1 = vcmp.ge.f32.partialorder %v4355_v56, 0.0  ;;  %v5146_v37 = vmax.f32 %v12575_v34, %v12579_v39 }
 0x8eb   : > { %v5054_v42 = vmul.f32 0.2, %v4990_v63  ;;  %vm15580_vm15 = vcmp.gt.f32.partialorder %v15579_v61, 0.0  ;;  %vm15582_vm2 = vcmp.gt.f32.partialorder %v15581_v47, 0.0  ;;  %v5083_v27 = vsel %vm5019_vm6, %v4987_v16, %v5051_v10  ;;  %v4926_v46 = vpop.permute.xlu1 %4925 }
 0x8ec   : > { %v12586_v2 = vsel %vm15580_vm15, %v4447_v15, -9e+15  ;;  %v12590_v59 = vsel %vm15582_vm2, %v4448_v18, -9e+15  ;;  %vm4388_vm5 = vcmp.ge.f32.partialorder %v12571_v38, 0.0  ;;  %v5084_v9 = vsel %vm5020_vm14, %v4988_v21, %v5052_v35  ;;  %5147 = vmax.xlane.f32.xlu0 %v5146_v37  ;;  %vm15585_vm0 = vmmov %vm15580_vm15 }
 0x8ed   : > { %v12595_v62 = vsel %vm15570_vm11, %v5083_v27, -9e+15  ;;  %v12598_v44 = vadd.f32 %v12367_v32, %v4930_v6  ;;  %v4419_v39 = vmul.f32 0.2, %v4355_v56  ;;  %v4991_v15 = vadd.f32 %v12367_v32, %v4926_v46 }
 0x8ee   : > { %v4992_v34 = vadd.f32 %v12388_v8, %v4926_v46  ;;  %v15583_v18 = vpack.c.bf16 %v12315_v19, %v12312_v36  ;;  %v12607_v16 = vsel %vm15573_vm4, %v5084_v9, -9e+15  ;;  %v4420_v57 = vmul.f32 0.2, %v12571_v38  ;;  %v4934_v36 = vpop.permute.xlu0 %4933  ;;  %v15591_v9 = vld [vmem:[#allocation14_spill] sm:$0xff] }
 0x8ef   : > { %v15584_v21 = vpack.c.bf16 %v12364_v25, %v12379_v28  ;;  %v4514_v10 = vmax.f32 %v12586_v2, %v12590_v59  ;;  %v5149_v35 = vmax.f32 %v12595_v62, %v12607_v16  ;;  %v5085_v37 = vsel %vm5021_vm9, %v4989_v48, %v5053_v53  ;;  %vm15586_vm9 = vmmov %vm15582_vm2  ;;  %v15588_v53 = vld [vmem:[#allocation13_spill] sm:$0xff] }
 0x8f0   : > { %4204 = vmatmul.mubr.bf16.vlgmr.msra.gmra.mxu1 %v15583_v18  ;;  %vm5023_vm13 = vcmp.ge.f32.partialorder %v4991_v15, 0.0  ;;  %v4994_v19 = vadd.f32 %v12388_v8, %v4930_v6  ;;  %vm5025_vm10 = vcmp.ge.f32.partialorder %v12598_v44, 0.0  ;;  %v5057_v26 = vmul.f32 0.2, %v12598_v44  ;;  %v4296_v46 = vpop.permute.xlu1 %4295 }
 0x8f1   : > { %4211 = vmatprep.mubr.bf16.mxu1 %v15584_v21  ;;  %vm5024_vm7 = vcmp.ge.f32.partialorder %v4992_v34, 0.0  ;;  %v5055_v27 = vmul.f32 0.2, %v4991_v15  ;;  %5150 = vmax.xlane.f32.xlu1 %v5149_v35  ;;  %v5086_v25 = vsel %vm5022_vm8, %v4990_v63, %v5054_v42  ;;  %v12624_v28 = vsel %vm15585_vm0, %v5085_v37, -9e+15 }
 0x8f2   : > { %4515 = vmax.xlane.f32.xlu0 %v4514_v10  ;;  %v12628_v48 = vsel %vm15586_vm9, %v5086_v25, -9e+15  ;;  %vm15589_vm6 = vcmp.gt.f32.partialorder %v15588_v53, 0.0  ;;  %vm15592_vm14 = vcmp.gt.f32.partialorder %v15591_v9, 0.0  ;;  %v12641_v63 = vadd.f32 %v12367_v32, %v4934_v36 }
 0x8f3   : > { %15587 = vst [vmem:[#allocation12_spill] sm:$0xff] %v12628_v48  ;;  %v12633_v6 = vsel %vm15589_vm6, %v12557_v41, -9e+15  ;;  %v12638_v18 = vsel %vm15592_vm14, %v12560_v30, -9e+15  ;;  %v4357_v42 = vadd.f32 %v12358_v52, %v4296_v46  ;;  %v4358_v61 = vadd.f32 %v12361_v11, %v4296_v46  ;;  %vm15600_vm0 = vmmov %vm15589_vm6 }
 0x8f4   : > { %15590 = vst [vmem:[#allocation15_spill] sm:$0xff] %v12633_v6  ;;  %15593 = vst [vmem:[#allocation16_spill] sm:$0xff] %v12638_v18  ;;  %v5152_v47 = vmax.f32 %v12624_v28, %v12628_v48  ;;  %v4517_v21 = vmax.f32 %v12633_v6, %v12638_v18  ;;  %v5056_v41 = vmul.f32 0.2, %v4992_v34  ;;  %vm5026_vm8 = vcmp.ge.f32.partialorder %v4994_v19, 0.0  ;;  %v4300_v46 = vpop.permute.xlu1 %4299  ;;  %v15598_v6 = vld [vmem:[#allocation18_spill] sm:$0xff] }
 0x8f5   : > { %v5058_v10 = vmul.f32 0.2, %v4994_v19  ;;  %v4451_v35 = vsel %vm4387_vm1, %v4355_v56, %v4419_v39  ;;  %vm4389_vm15 = vcmp.ge.f32.partialorder %v4357_v42, 0.0  ;;  %v4421_v30 = vmul.f32 0.2, %v4357_v42  ;;  %v15595_v56 = vld [vmem:[#allocation17_spill] sm:$0xff] }
 0x8f6   : > { %4518 = vmax.xlane.f32.xlu1 %v4517_v21  ;;  %v4996_v37 = vadd.f32 %v12388_v8, %v4934_v36  ;;  %vm5027_vm2 = vcmp.ge.f32.partialorder %v12641_v63, 0.0  ;;  %vm4390_vm11 = vcmp.ge.f32.partialorder %v4358_v61, 0.0  ;;  %v4422_v25 = vmul.f32 0.2, %v4358_v61  ;;  %5153 = vmax.xlane.f32.xlu0 %v5152_v47 }
 0x8f7   : > { %v15594_v48 = vpack.c.bf16 %v12370_v12, %v12391_v29  ;;  %v4452_v18 = vsel %vm4388_vm5, %v12571_v38, %v4420_v57  ;;  %vm15596_vm1 = vcmp.gt.f32.partialorder %v15595_v56, 0.0  ;;  %v4359_v36 = vadd.f32 %v12358_v52, %v4300_v46 }
 0x8f8   : > { %v12660_v39 = vsel %vm15596_vm1, %v4451_v35, -9e+15  ;;  %v4360_v21 = vadd.f32 %v12361_v11, %v4300_v46  ;;  %v15597_v47 = vpack.c.bf16 %v12373_v22, %v12394_v20  ;;  %vm15599_vm4 = vcmp.gt.f32.partialorder %v15598_v6, 0.0  ;;  %v15603_v46 = vld [vmem:[#allocation20_spill] sm:$0xff] }
 0x8f9   : > { %4212 = vmatmul.mubr.bf16.gmra.mxu1 %v15594_v48  ;;  %v12669_v12 = vsel %vm15599_vm4, %v4452_v18, -9e+15  ;;  %v5087_v29 = vsel %vm5023_vm13, %v4991_v15, %v5055_v27  ;;  %vm4393_vm5 = vcmp.ge.f32.partialorder %v12531_v54, 0.0  ;;  %v5088_v57 = vsel %vm5024_vm7, %v4992_v34, %v5056_v41  ;;  %v15601_v27 = vld [vmem:[#allocation19_spill] sm:$0xff]  ;;  %v4946_v41 = vpop.permute.xlu0 %4945 }
 0x8fa   : > { %4219 = vmatprep.mubr.bf16.mxu1 %v15597_v47  ;;  %v4520_v38 = vmax.f32 %v12660_v39, %v12669_v12  ;;  %v12678_v48 = vsel %vm15600_vm0, %v5087_v29, -9e+15  ;;  %v4453_v22 = vsel %vm4389_vm15, %v4357_v42, %v4421_v30  ;;  %vm4391_vm9 = vcmp.ge.f32.partialorder %v4359_v36, 0.0  ;;  %v4938_v30 = vpop.permute.xlu1 %4937 }
 0x8fb   : > { %v4423_v20 = vmul.f32 0.2, %v4359_v36  ;;  %vm5028_vm6 = vcmp.ge.f32.partialorder %v4996_v37, 0.0  ;;  %v5059_v18 = vmul.f32 0.2, %v12641_v63  ;;  %vm4394_vm13 = vcmp.ge.f32.partialorder %v12534_v1, 0.0 }
 0x8fc   : > { %4521 = vmax.xlane.f32.xlu0 %v4520_v38  ;;  %v12685_v15 = vsel %vm15592_vm14, %v5088_v57, -9e+15  ;;  %v4454_v34 = vsel %vm4390_vm11, %v4358_v61, %v4422_v25  ;;  %vm15602_vm7 = vcmp.gt.f32.partialorder %v15601_v27, 0.0  ;;  %v5089_v42 = vsel %vm5025_vm10, %v12598_v44, %v5057_v26  ;;  %vm15606_vm11 = vmmov %vm15596_vm1 }
 0x8fd   : > { %v12690_v53 = vsel %vm15602_vm7, %v4453_v22, -9e+15  ;;  %v5155_v35 = vmax.f32 %v12678_v48, %v12685_v15  ;;  %vm15604_vm15 = vcmp.gt.f32.partialorder %v15603_v46, 0.0  ;;  %v5090_v47 = vsel %vm5026_vm8, %v4994_v19, %v5058_v10  ;;  %vm15607_vm1 = vmmov %vm15599_vm4 }
 0x8fe   : > { %v12699_v9 = vsel %vm15604_vm15, %v4454_v34, -9e+15  ;;  %v12704_v61 = vsel %vm15606_vm11, %v5089_v42, -9e+15  ;;  %v4424_v25 = vmul.f32 0.2, %v4360_v21  ;;  %v12712_v26 = vmul.f32 %v12515_v3, %v12185_v58  ;;  %vm15615_vm0 = vmmov %vm15602_vm7 }
 0x8ff   : > { %15605 = vst [vmem:[#allocation13_spill] sm:$0xff] %v12699_v9  ;;  %v5060_v29 = vmul.f32 0.2, %v4996_v37  ;;  %v12708_v44 = vsel %vm15607_vm1, %v5090_v47, -9e+15  ;;  %vm4392_vm10 = vcmp.ge.f32.partialorder %v4360_v21, 0.0  ;;  %5156 = vmax.xlane.f32.xlu1 %v5155_v35  ;;  %v4523_v38 = vmax.f32 %v12690_v53, %v12699_v9 }
 0x900   : > { %v5158_v19 = vmax.f32 %v12704_v61, %v12708_v44  ;;  %v4455_v10 = vsel %vm4391_vm9, %v4359_v36, %v4423_v20  ;;  %v4425_v56 = vmul.f32 0.2, %v12531_v54  ;;  %v4426_v6 = vmul.f32 0.2, %v12534_v1  ;;  %vm15617_vm9 = vmmov %vm15604_vm15 }
 0x901   : > { %v4997_v57 = vadd.f32 %v12367_v32, %v4938_v30  ;;  %v4998_v22 = vadd.f32 %v12388_v8, %v4938_v30  ;;  %v15608_v58 = vpack.c.bf16 %v12376_v4, %v12397_v40  ;;  %v12728_v34 = vadd.f32 %v12361_v11, %v12507_v45  ;;  %v15610_v40 = vld [vmem:[#allocation23_spill] sm:$0xff] }
 0x902   : > { %v12731_v42 = vmul.f32 0.2, %v12552_v14  ;;  %5159 = vmax.xlane.f32.xlu0 %v5158_v19  ;;  %v12734_v36 = vadd.f32 %v12367_v32, %v4946_v41  ;;  %v12737_v20 = vadd.f32 %v12388_v8, %v4946_v41  ;;  %v15609_v35 = vpack.c.bf16 %v12382_v5, %v12402_v50  ;;  %v4308_v19 = vpop.permute.xlu1 %4307  ;;  %v15612_v41 = vld [vmem:[#allocation24_spill] sm:$0xff] }
 0x903   : > { %4220 = vmatmul.mubr.bf16.gmra.mxu1 %v15608_v58  ;;  %v4456_v4 = vsel %vm4392_vm10, %v4360_v21, %v4424_v25  ;;  %vm15611_vm8 = vcmp.gt.f32.partialorder %v15610_v40, 0.0  ;;  %v5091_v30 = vsel %vm5027_vm2, %v12641_v63, %v5059_v18  ;;  %v5092_v47 = vsel %vm5028_vm6, %v4996_v37, %v5060_v29  ;;  %v4950_v58 = vpop.permute.xlu0 %4949  ;;  %4524 = vmax.xlane.f32.xlu1 %v4523_v38 }
 0x904   : > { %4227 = vmatprep.mubr.bf16.mxu1 %v15609_v35  ;;  %v12745_v45 = vsel %vm15611_vm8, %v4455_v10, -9e+15  ;;  %vm15613_vm4 = vcmp.gt.f32.partialorder %v15612_v41, 0.0  ;;  %v12757_v5 = vsel %vm15615_vm0, %v5091_v30, -9e+15  ;;  %v4363_v21 = vadd.f32 %v12358_v52, %v4308_v19 }
 0x905   : > { %v12753_v9 = vsel %vm15613_vm4, %v4456_v4, -9e+15  ;;  %15616 = vst [vmem:[#allocation17_spill] sm:$0xff] %v12757_v5  ;;  %v12761_v50 = vsel %vm15617_vm9, %v5092_v47, -9e+15  ;;  %vm5029_vm2 = vcmp.ge.f32.partialorder %v4997_v57, 0.0  ;;  %v4457_v27 = vsel %vm4393_vm5, %v12531_v54, %v4425_v56  ;;  %vm15628_vm1 = vmmov %vm15613_vm4 }
 0x906   : > { %15614 = vst [vmem:[#allocation14_spill] sm:$0xff] %v12753_v9  ;;  %15618 = vst [vmem:[#allocation18_spill] sm:$0xff] %v12761_v50  ;;  %v5061_v63 = vmul.f32 0.2, %v4997_v57  ;;  %v5062_v18 = vmul.f32 0.2, %v4998_v22  ;;  %v4526_v37 = vmax.f32 %v12745_v45, %v12753_v9  ;;  %v5161_v25 = vmax.f32 %v12757_v5, %v12761_v50  ;;  %v4942_v56 = vpop.permute.xlu1 %4941 }
 0x907   : > { %v12769_v29 = vmul.f32 0.2, %v12728_v34  ;;  %vm5030_vm6 = vcmp.ge.f32.partialorder %v4998_v22, 0.0  ;;  %vm5033_vm14 = vcmp.ge.f32.partialorder %v12734_v36, 0.0  ;;  %vm5034_vm7 = vcmp.ge.f32.partialorder %v12737_v20, 0.0  ;;  %v15619_v4 = vld [vmem:[#allocation21_spill] sm:$0xff]  ;;  %v4962_v50 = vpop.permute.xlu0 %4961 }
 0x908   : > { %4527 = vmax.xlane.f32.xlu0 %v4526_v37  ;;  %v4364_v46 = vadd.f32 %v12361_v11, %v4308_v19  ;;  %v12778_v38 = vadd.f32 %v12367_v32, %v4950_v58  ;;  %5162 = vmax.xlane.f32.xlu1 %v5161_v25  ;;  %vm4395_vm15 = vcmp.ge.f32.partialorder %v4363_v21, 0.0  ;;  %v4427_v10 = vmul.f32 0.2, %v4363_v21  ;;  %v15622_v47 = vld [vmem:[#allocation22_spill] sm:$0xff] }
 0x909   : > { %v4458_v35 = vsel %vm4394_vm13, %v12534_v1, %v4426_v6  ;;  %vm15620_vm11 = vcmp.gt.f32.partialorder %v15619_v4, 0.0  ;;  %v12788_v30 = vadd.f32 %v12388_v8, %v4950_v58  ;;  %vm15623_vm5 = vcmp.gt.f32.partialorder %v15622_v47, 0.0  ;;  %vm15626_vm13 = vmmov %vm15611_vm8  ;;  %v15644_v4 = vld [vmem:[#allocation27_spill] sm:$0xff] }
 0x90a   : > { %v12785_v54 = vsel %vm15620_vm11, %v4457_v27, -9e+15  ;;  %v12792_v19 = vsel %vm15623_vm5, %v4458_v35, -9e+15  ;;  %v5093_v37 = vsel %vm5029_vm2, %v4997_v57, %v5061_v63  ;;  %v5094_v25 = vsel %vm5030_vm6, %v4998_v22, %v5062_v18 }
 0x90b   : > { %15621 = vst [vmem:[#allocation19_spill] sm:$0xff] %v12785_v54  ;;  %15624 = vst [vmem:[#allocation20_spill] sm:$0xff] %v12792_v19  ;;  %v15625_v1 = vpack.c.bf16 %v12385_v60, %v12405_v43  ;;  %v4529_v6 = vmax.f32 %v12785_v54, %v12792_v19  ;;  %v12803_v58 = vsel %vm15626_vm13, %v5093_v37, -9e+15  ;;  %v12807_v27 = vsel %vm15628_vm1, %v5094_v25, -9e+15  ;;  %v4312_v37 = vpop.permute.xlu1 %4311 }
 0x90c   : > { %15627 = vst [vmem:[#allocation23_spill] sm:$0xff] %v12803_v58  ;;  %15629 = vst [vmem:[#allocation24_spill] sm:$0xff] %v12807_v27  ;;  %v12810_v57 = vadd.f32 %v12367_v32, %v4962_v50  ;;  %v15630_v22 = vpack.c.bf16 %v12408_v13, %v12417_v33  ;;  %v5065_v60 = vmul.f32 0.2, %v12734_v36  ;;  %v4428_v43 = vmul.f32 0.2, %v4364_v46 }
 0x90d   : > { %4228 = vmatmul.mubr.bf16.gmra.mxu1 %v15625_v1  ;;  %v5164_v63 = vmax.f32 %v12803_v58, %v12807_v27  ;;  %v4999_v40 = vadd.f32 %v12367_v32, %v4942_v56  ;;  %v5066_v18 = vmul.f32 0.2, %v12737_v20  ;;  %vm4396_vm10 = vcmp.ge.f32.partialorder %v4364_v46, 0.0  ;;  %4530 = vmax.xlane.f32.xlu1 %v4529_v6  ;;  %v15635_v58 = vld [vmem:[#allocation140_spill] sm:$0xff] }
 0x90e   : > { %4235 = vmatprep.mubr.bf16.mxu1 %v15630_v22  ;;  %vm5035_vm8 = vcmp.ge.f32.partialorder %v12778_v38, 0.0  ;;  %v5000_v41 = vadd.f32 %v12388_v8, %v4942_v56  ;;  %vm5036_vm4 = vcmp.ge.f32.partialorder %v12788_v30, 0.0  ;;  %v5067_v13 = vmul.f32 0.2, %v12778_v38 }
 0x90f   : > { %5165 = vmax.xlane.f32.xlu0 %v5164_v63  ;;  %v5063_v33 = vmul.f32 0.2, %v4999_v40  ;;  %v4459_v35 = vsel %vm4395_vm15, %v4363_v21, %v4427_v10  ;;  %v5068_v25 = vmul.f32 0.2, %v12788_v30  ;;  %v12827_v1 = vadd.f32 %v12388_v8, %v4962_v50 }
 0x910   : > { %v12830_v22 = vmul.f32 0.2, %v12810_v57  ;;  %vm5031_vm0 = vcmp.ge.f32.partialorder %v4999_v40, 0.0  ;;  %vm5032_vm9 = vcmp.ge.f32.partialorder %v5000_v41, 0.0  ;;  %v5064_v56 = vmul.f32 0.2, %v5000_v41 }
 0x911   : > { %v4460_v6 = vsel %vm4396_vm10, %v4364_v46, %v4428_v43  ;;  %v12835_v63 = vsel %vm315_vm3, %v4459_v35, -9e+15  ;;  %vm4401_vm2 = vcmp.ge.f32.partialorder %v12552_v14, 0.0  ;;  %v4365_v50 = vadd.f32 %v12358_v52, %v4312_v37 }
 0x912   : > { %v12840_v10 = vsel %vm316_vm12, %v4460_v6, -9e+15  ;;  %v4366_v54 = vadd.f32 %v12361_v11, %v4312_v37  ;;  %v5097_v27 = vsel %vm5033_vm14, %v12734_v36, %v5065_v60  ;;  %vm4402_vm6 = vcmp.ge.f32.partialorder %v12728_v34, 0.0  ;;  %v4316_v6 = vpop.permute.xlu1 %4315  ;;  %v15636_v37 = vld [vmem:[#allocation137_spill] sm:$0xff] }
 0x913   : > { %15633 = vst [vmem:[#allocation21_spill] sm:$0xff] %v12840_v10  ;;  %v4532_v46 = vmax.f32 %v12835_v63, %v12840_v10  ;;  %v5098_v43 = vsel %vm5034_vm7, %v12737_v20, %v5066_v18  ;;  %v12855_v35 = vsel %vm315_vm3, %v5097_v27, -9e+15  ;;  %v15637_v5 = vpack.c.bf16 %v15635_v58, %v15636_v37  ;;  %vm15640_vm7 = vmmov %vm15620_vm11 }
 0x914   : > { %15634 = vst [vmem:[#allocation22_spill] sm:$0xff] %v12855_v35  ;;  %v5095_v36 = vsel %vm5031_vm0, %v4999_v40, %v5063_v33  ;;  %vm4397_vm14 = vcmp.ge.f32.partialorder %v4365_v50, 0.0  ;;  %vm4398_vm15 = vcmp.ge.f32.partialorder %v4366_v54, 0.0  ;;  %v4429_v60 = vmul.f32 0.2, %v4365_v50  ;;  %vm15642_vm11 = vmmov %vm15623_vm5 }
 0x915   : > { %4236 = vmatmul.mubr.bf16.gmra.mxu1 %v15637_v5  ;;  %v4430_v9 = vmul.f32 0.2, %v4366_v54  ;;  %v15638_v10 = vpack.c.bf16 %v12461_v49, %v12433_v23  ;;  %4533 = vmax.xlane.f32.xlu0 %v4532_v46  ;;  %v12866_v20 = vsel %vm316_vm12, %v5098_v43, -9e+15  ;;  %v4367_v19 = vadd.f32 %v12358_v52, %v4316_v6  ;;  %v15646_v43 = vld [vmem:[#allocation28_spill] sm:$0xff] }
 0x916   : > { %15639 = vst [vmem:[#allocation25_spill] sm:$0xff] %v12866_v20  ;;  %v4368_v58 = vadd.f32 %v12361_v11, %v4316_v6  ;;  %v5096_v5 = vsel %vm5032_vm9, %v5000_v41, %v5064_v56  ;;  %vm5041_vm3 = vcmp.ge.f32.partialorder %v12810_v57, 0.0  ;;  %v5170_v27 = vmax.f32 %v12855_v35, %v12866_v20  ;;  %v4954_v56 = vpop.permute.xlu1 %4953 }
 0x917   : > { %4243 = vmatprep.mubr.bf16.mxu1 %v15638_v10  ;;  %v12876_v23 = vsel %vm15640_vm7, %v5095_v36, -9e+15  ;;  %v12880_v49 = vsel %vm15642_vm11, %v5096_v5, -9e+15  ;;  %v4461_v40 = vsel %vm4397_vm14, %v4365_v50, %v4429_v60  ;;  %vm5042_vm12 = vcmp.ge.f32.partialorder %v12827_v1, 0.0  ;;  %v4966_v36 = vpop.permute.xlu0 %4965  ;;  %v15648_v60 = vld [vmem:[#allocation29_spill] sm:$0xff] }
 0x918   : > { %15641 = vst [vmem:[#allocation26_spill] sm:$0xff] %v12876_v23  ;;  %15643 = vst [vmem:[#allocation140_spill] sm:$0xff] %v12880_v49  ;;  %vm4399_vm5 = vcmp.ge.f32.partialorder %v4367_v19, 0.0  ;;  %vm4400_vm13 = vcmp.ge.f32.partialorder %v4368_v58, 0.0  ;;  %v4431_v18 = vmul.f32 0.2, %v4367_v19  ;;  %v5167_v33 = vmax.f32 %v12876_v23, %v12880_v49 }
 0x919   : > { %v4432_v41 = vmul.f32 0.2, %v4368_v58  ;;  %v4462_v21 = vsel %vm4398_vm15, %v4366_v54, %v4430_v9  ;;  %vm15645_vm1 = vcmp.gt.f32.partialorder %v15644_v4, 0.0  ;;  %v5099_v47 = vsel %vm5035_vm8, %v12778_v38, %v5067_v13  ;;  %5171 = vmax.xlane.f32.xlu0 %v5170_v27 }
 0x91a   : > { %v12888_v10 = vsel %vm15645_vm1, %v4461_v40, -9e+15  ;;  %v5005_v50 = vadd.f32 %v12367_v32, %v4954_v56  ;;  %v5006_v46 = vadd.f32 %v12388_v8, %v4954_v56  ;;  %vm15647_vm10 = vcmp.gt.f32.partialorder %v15646_v43, 0.0  ;;  %5168 = vmax.xlane.f32.xlu1 %v5167_v33  ;;  %vm15656_vm15 = vmmov %vm15645_vm1 }
 0x91b   : > { %v12897_v6 = vsel %vm15647_vm10, %v4462_v21, -9e+15  ;;  %v4463_v37 = vsel %vm4399_vm5, %v4367_v19, %v4431_v18  ;;  %v4464_v54 = vsel %vm4400_vm13, %v4368_v58, %v4432_v41  ;;  %vm15649_vm0 = vcmp.gt.f32.partialorder %v15648_v60, 0.0  ;;  %v15653_v58 = vld [vmem:[#allocation30_spill] sm:$0xff] }
 0x91c   : > { %v4535_v9 = vmax.f32 %v12888_v10, %v12897_v6  ;;  %v12904_v38 = vsel %vm15649_vm0, %v4463_v37, -9e+15  ;;  %v5100_v13 = vsel %vm5036_vm4, %v12788_v30, %v5068_v25  ;;  %vm5037_vm8 = vcmp.ge.f32.partialorder %v5005_v50, 0.0  ;;  %vm15657_vm4 = vmmov %vm15647_vm10  ;;  %v4324_v25 = vpop.permute.xlu1 %4323 }
 0x91d   : > { %15650 = vst [vmem:[#allocation137_spill] sm:$0xff] %v12904_v38  ;;  %vm5038_vm9 = vcmp.ge.f32.partialorder %v5006_v46, 0.0  ;;  %v5069_v5 = vmul.f32 0.2, %v5005_v50  ;;  %v5070_v27 = vmul.f32 0.2, %v5006_v46  ;;  %v15651_v19 = vpack.c.bf16 %v12464_v7, %v12441_v24 }
 0x91e   : > { %v15652_v40 = vpack.c.bf16 %v12467_v51, %v12446_v17  ;;  %vm15654_vm14 = vcmp.gt.f32.partialorder %v15653_v58, 0.0  ;;  %v12921_v41 = vsel %vm15656_vm15, %v5099_v47, -9e+15  ;;  %v12925_v30 = vsel %vm15657_vm4, %v5100_v13, -9e+15  ;;  %4536 = vmax.xlane.f32.xlu1 %v4535_v9  ;;  %v15660_v9 = vld [vmem:[#allocation31_spill] sm:$0xff] }
 0x91f   : > { %4244 = vmatmul.mubr.bf16.gmra.mxu1 %v15651_v19  ;;  %v12917_v18 = vsel %vm15654_vm14, %v4464_v54, -9e+15  ;;  %v4122_v24 = vpack.c.bf16 %v12712_v26, %v12505_v0  ;;  %v5074_v7 = vmul.f32 0.2, %v12827_v1  ;;  %v12931_v17 = vadd.f32 %v12367_v32, %v4966_v36  ;;  %vm15664_vm13 = vmmov %vm15654_vm14 }
 0x920   : > { %4251 = vmatprep.mubr.bf16.mxu1 %v15652_v40  ;;  %15655 = vst [vmem:[#allocation27_spill] sm:$0xff] %v12917_v18  ;;  %v4538_v51 = vmax.f32 %v12904_v38, %v12917_v18  ;;  %v4465_v33 = vsel %vm4401_vm2, %v12552_v14, %v12731_v42  ;;  %v4371_v56 = vadd.f32 %v12358_v52, %v4324_v25  ;;  %vm15658_vm2 = vmmov %vm15649_vm0  ;;  %v4958_v60 = vpop.permute.xlu1 %4957 }
 0x921   : > { %v4372_v21 = vadd.f32 %v12361_v11, %v4324_v25  ;;  %v4466_v0 = vsel %vm4402_vm6, %v12728_v34, %v12769_v29  ;;  %v5101_v26 = vsel %vm5037_vm8, %v5005_v50, %v5069_v5  ;;  %v5012_v4 = vadd.f32 %v12388_v8, %v4966_v36  ;;  %v15662_v29 = vld [vmem:[#allocation32_spill] sm:$0xff] }
 0x922   : > { %4539 = vmax.xlane.f32.xlu0 %v4538_v51  ;;  %v5173_v47 = vmax.f32 %v12921_v41, %v12925_v30  ;;  %v5102_v14 = vsel %vm5038_vm9, %v5006_v46, %v5070_v27  ;;  %v12952_v42 = vsel %vm15658_vm2, %v5101_v26, -9e+15  ;;  %vm4403_vm7 = vcmp.ge.f32.partialorder %v4371_v56, 0.0  ;;  %v15670_v51 = vld [vmem:[#allocation34_spill] sm:$0xff] }
 0x923   : > { %15659 = vst [vmem:[#allocation28_spill] sm:$0xff] %v12952_v42  ;;  %vm4404_vm11 = vcmp.ge.f32.partialorder %v4372_v21, 0.0  ;;  %v4435_v43 = vmul.f32 0.2, %v4371_v56  ;;  %v4436_v37 = vmul.f32 0.2, %v4372_v21  ;;  %v5105_v46 = vsel %vm5041_vm3, %v12810_v57, %v12830_v22 }
 0x924   : > { %vm15661_vm6 = vcmp.gt.f32.partialorder %v15660_v9, 0.0  ;;  %vm15663_vm5 = vcmp.gt.f32.partialorder %v15662_v29, 0.0  ;;  %v12964_v36 = vsel %vm15664_vm13, %v5102_v14, -9e+15  ;;  %5174 = vmax.xlane.f32.xlu1 %v5173_v47  ;;  %v5106_v27 = vsel %vm5042_vm12, %v12827_v1, %v5074_v7  ;;  %v15667_v57 = vld [vmem:[#allocation33_spill] sm:$0xff]  ;;  %v15678_v26 = vld [vmem:[#allocation142_spill] sm:$0xff] }
 0x925   : > { %v12956_v34 = vsel %vm15661_vm6, %v4465_v33, -9e+15  ;;  %v12960_v50 = vsel %vm15663_vm5, %v4466_v0, -9e+15  ;;  %15665 = vst [vmem:[#allocation29_spill] sm:$0xff] %v12964_v36  ;;  %v5176_v54 = vmax.f32 %v12952_v42, %v12964_v36  ;;  %v4467_v13 = vsel %vm4403_vm7, %v4371_v56, %v4435_v43  ;;  %v15679_v47 = vld [vmem:[#allocation144_spill] sm:$0xff]  ;;  %v4328_v43 = vpop.permute.xlu1 %4327  ;;  %vm15680_vm15 = vmmov %vm15661_vm6 }
 0x926   : > { %v4468_v5 = vsel %vm4404_vm11, %v4372_v21, %v4436_v37  ;;  %v5007_v19 = vadd.f32 %v12367_v32, %v4958_v60  ;;  %v5008_v40 = vadd.f32 %v12388_v8, %v4958_v60  ;;  %v15666_v58 = vpack.c.bf16 %v12479_v31, %v12470_v55  ;;  %v15673_v55 = vld [vmem:[#allocation88_spill] sm:$0xff]  ;;  %vm15681_vm4 = vmmov %vm15663_vm5 }
 0x927   : > { %vm15668_vm3 = vcmp.gt.f32.partialorder %v15667_v57, 0.0  ;;  %vm15671_vm1 = vcmp.gt.f32.partialorder %v15670_v51, 0.0  ;;  %vm5043_vm10 = vcmp.ge.f32.partialorder %v12931_v17, 0.0  ;;  %v4541_v1 = vmax.f32 %v12956_v34, %v12960_v50  ;;  %5177 = vmax.xlane.f32.xlu0 %v5176_v54 }
 0x928   : > { %4252 = vmatmul.mubr.bf16.gmra.mxu1 %v15666_v58  ;;  %v12982_v22 = vsel %vm15668_vm3, %v4467_v13, -9e+15  ;;  %v12986_v25 = vsel %vm15671_vm1, %v4468_v5, -9e+15  ;;  %v4105_v31 = vmul.f32 %v12515_v3, %v15673_v55  ;;  %vm5039_vm12 = vcmp.ge.f32.partialorder %v5007_v19, 0.0  ;;  %vm15674_vm8 = vmmov %vm15668_vm3 }
 0x929   : > { %15669 = vst [vmem:[#allocation30_spill] sm:$0xff] %v12982_v22  ;;  %15672 = vst [vmem:[#allocation31_spill] sm:$0xff] %v12986_v25  ;;  %4259 = vmatprep.mubr.bf16.mxu1 %v4122_v24  ;;  %v4544_v7 = vmax.f32 %v12982_v22, %v12986_v25  ;;  %vm5040_vm0 = vcmp.ge.f32.partialorder %v5008_v40, 0.0  ;;  %v5071_v33 = vmul.f32 0.2, %v5007_v19  ;;  %4542 = vmax.xlane.f32.xlu1 %v4541_v1  ;;  %vm5044_vm14 = vcmp.ge.f32.partialorder %v5012_v4, 0.0  ;;  %v4332_v51 = vpop.permute.xlu1 %4331 }
 0x92a   : > { %v5072_v56 = vmul.f32 0.2, %v5008_v40  ;;  %v5075_v21 = vmul.f32 0.2, %v12931_v17  ;;  %v12998_v0 = vsel %vm15674_vm8, %v5105_v46, -9e+15  ;;  %vm15676_vm9 = vmmov %vm15671_vm1  ;;  %v4103_v14 = vmul.f32 %v15679_v47, %v15678_v26 }
 0x92b   : > { %15675 = vst [vmem:[#allocation32_spill] sm:$0xff] %v12998_v0  ;;  %v13002_v24 = vsel %vm15676_vm9, %v5106_v27, -9e+15  ;;  %v5076_v3 = vmul.f32 0.2, %v5012_v4  ;;  %v5103_v37 = vsel %vm5039_vm12, %v5007_v19, %v5071_v33  ;;  %4545 = vmax.xlane.f32.xlu0 %v4544_v7  ;;  %v4373_v60 = vadd.f32 %v12358_v52, %v4328_v43  ;;  %v15682_v33 = vld [vmem:[#allocation35_spill] sm:$0xff] }
 0x92c   : > { %15677 = vst [vmem:[#allocation33_spill] sm:$0xff] %v13002_v24  ;;  %v5104_v54 = vsel %vm5040_vm0, %v5008_v40, %v5072_v56  ;;  %v4374_v13 = vadd.f32 %v12361_v11, %v4328_v43  ;;  %v13010_v46 = vsel %vm15680_vm15, %v5103_v37, -9e+15  ;;  %v5182_v27 = vmax.f32 %v12998_v0, %v13002_v24  ;;  %v15684_v26 = vld [vmem:[#allocation36_spill] sm:$0xff]  ;;  %v15724_v22 = vld [vmem:[#allocation7_spill] sm:$0xff] }
 0x92d   : > { %v13014_v5 = vsel %vm15681_vm4, %v5104_v54, -9e+15  ;;  %v4121_v58 = vpack.c.bf16 %v4105_v31, %v4103_v14  ;;  %vm4405_vm2 = vcmp.ge.f32.partialorder %v4373_v60, 0.0  ;;  %v4437_v40 = vmul.f32 0.2, %v4373_v60  ;;  %v4970_v14 = vpop.permute.xlu1 %4969 }
 0x92e   : > { %v5179_v19 = vmax.f32 %v13010_v46, %v13014_v5  ;;  %vm4406_vm7 = vcmp.ge.f32.partialorder %v4374_v13, 0.0  ;;  %v4438_v57 = vmul.f32 0.2, %v4374_v13  ;;  %v5107_v9 = vsel %vm5043_vm10, %v12931_v17, %v5075_v21 }
 0x92f   : > { %v5108_v29 = vsel %vm5044_vm14, %v5012_v4, %v5076_v3  ;;  %5183 = vmax.xlane.f32.xlu0 %v5182_v27  ;;  %v4375_v1 = vadd.f32 %v12358_v52, %v4332_v51  ;;  %v4376_v7 = vadd.f32 %v12361_v11, %v4332_v51  ;;  %v4469_v55 = vsel %vm4405_vm2, %v4373_v60, %v4437_v40  ;;  %v15688_v60 = vld [vmem:[#allocation40_spill] sm:$0xff]  ;;  %v15691_v27 = vld [vmem:[#allocation46_spill] sm:$0xff] }
 0x930   : > { %4260 = vmatmul.mubr.bf16.gmra.mxu1 %v4121_v58  ;;  %5180 = vmax.xlane.f32.xlu1 %v5179_v19  ;;  %v4470_v31 = vsel %vm4406_vm7, %v4374_v13, %v4438_v57  ;;  %vm15683_vm11 = vcmp.gt.f32.partialorder %v15682_v33, 0.0  ;;  %vm15685_vm6 = vcmp.gt.f32.partialorder %v15684_v26, 0.0  ;;  %v5013_v37 = vadd.f32 %v12367_v32, %v4970_v14  ;;  %v15699_v33 = vld [vmem:[#allocation141_spill] sm:$0xff] }
 0x931   : > { %v13028_v56 = vsel %vm15683_vm11, %v4469_v55, -9e+15  ;;  %v13032_v47 = vsel %vm15685_vm6, %v4470_v31, -9e+15  ;;  %vm4407_vm5 = vcmp.ge.f32.partialorder %v4375_v1, 0.0  ;;  %vm4408_vm13 = vcmp.ge.f32.partialorder %v4376_v7, 0.0  ;;  %vm15686_vm3 = vmmov %vm15683_vm11  ;;  %v13073_v31 = vpop.f32.mrf.mxu1 }
 0x932   : > { %v4439_v17 = vmul.f32 0.2, %v4375_v1  ;;  %v4440_v21 = vmul.f32 0.2, %v4376_v7  ;;  %v4547_v4 = vmax.f32 %v13028_v56, %v13032_v47  ;;  %v13038_v52 = vsel %vm15686_vm3, %v5107_v9, -9e+15  ;;  %vm15687_vm1 = vmmov %vm15685_vm6 }
 0x933   : > { %v13042_v11 = vsel %vm15687_vm1, %v5108_v29, -9e+15  ;;  %v5014_v54 = vadd.f32 %v12388_v8, %v4970_v14  ;;  %vm15689_vm10 = vcmp.gt.f32.partialorder %v15688_v60, 0.0  ;;  %vm15692_vm12 = vcmp.gt.f32.partialorder %v15691_v27, 0.0  ;;  %15698 = vst [vmem:[#allocation35_spill] sm:$0xff] %v13073_v31  ;;  %v15701_v14 = vld [vmem:[#allocation145_spill] sm:$0xff] }
 0x934   : > { %v4471_v3 = vsel %vm4407_vm5, %v4375_v1, %v4439_v17  ;;  %v4472_v43 = vsel %vm4408_vm13, %v4376_v7, %v4440_v21  ;;  %4548 = vmax.xlane.f32.xlu1 %v4547_v4  ;;  %v5185_v40 = vmax.f32 %v13038_v52, %v13042_v11  ;;  %vm5045_vm0 = vcmp.ge.f32.partialorder %v5013_v37, 0.0  ;;  %vm15694_vm9 = vmmov %vm15689_vm10  ;;  %v7925_v7 = vld [vmem:[%s14419_s1 + $0x78] sm:$0xff]   ;;  %v15700_v17 = vld [vmem:[#allocation143_spill] sm:$0xff] }
 0x935   : > { %v13048_v13 = vsel %vm15689_vm10, %v4471_v3, -9e+15  ;;  %v13052_v58 = vsel %vm15692_vm12, %v4472_v43, -9e+15  ;;  %vm5046_vm8 = vcmp.ge.f32.partialorder %v5014_v54, 0.0  ;;  %vm15696_vm14 = vmmov %vm15692_vm12  ;;  %v15702_v43 = vld [vmem:[#allocation5_spill] sm:$0xff] }
 0x936   : > { %15690 = vst [vmem:[#allocation34_spill] sm:$0xff] %v13048_v13  ;;  %15693 = vst [vmem:[#allocation88_spill] sm:$0xff] %v13052_v58  ;;  %v4550_v19 = vmax.f32 %v13048_v13, %v13052_v58  ;;  %v5077_v32 = vmul.f32 0.2, %v5013_v37  ;;  %v5078_v57 = vmul.f32 0.2, %v5014_v54 }
 0x937   : > { %v15719_v31 = vld [vmem:[#allocation11_spill] sm:$0xff]  ;;  %vm5992_vm15 = vcmask 130048   ;;  %vm6009_vm4 = vcmask 261120   ;;  %vm6026_vm2 = vcmask 392192   ;;  %vm6043_vm7 = vcmask 523264  }
 0x938   : > { %4551 = vmax.xlane.f32.xlu0 %v4550_v19  ;;  %5186 = vmax.xlane.f32.xlu1 %v5185_v40  ;;  %v5109_v8 = vsel %vm5045_vm0, %v5013_v37, %v5077_v32  ;;  %v5110_v51 = vsel %vm5046_vm8, %v5014_v54, %v5078_v57  ;;  %v13079_v54 = vpop.f32.mrf.mxu1  ;;  %v15704_v57 = vld [vmem:[#allocation6_spill] sm:$0xff]  ;;  %vm6077_vm11 = vcmask 785408   ;;  %vm6060_vm6 = vcmask 654336  }
 0x939   : > { %v13060_v9 = vsel %vm15694_vm9, %v5109_v8, -9e+15  ;;  %v13064_v29 = vsel %vm15696_vm14, %v5110_v51, -9e+15  ;;  %15703 = vst [vmem:[#allocation36_spill] sm:$0xff] %v13079_v54  ;;  %v15705_v51 = vld [vmem:[#allocation9_spill] sm:$0xff] }
 0x93a   : > { %15695 = vst [vmem:[#allocation142_spill] sm:$0xff] %v13060_v9  ;;  %15697 = vst [vmem:[#allocation144_spill] sm:$0xff] %v13064_v29  ;;  %v5188_v1 = vmax.f32 %v13060_v9, %v13064_v29  ;;  %vm6094_vm5 = vcmask 916480  }
 0x93c   : > { %5189 = vmax.xlane.f32.xlu0 %v5188_v1 }
 0x949   : > { %4791 = vrot.lane.b32.xlu1 %v7925_v7, %s8016_s10 }
 0x94d   : > { %5429 = vrot.lane.b32.xlu1 %v7925_v7, %s8017_s11  ;;  %v13083_v7 = vpop.f32.mrf.mxu1 }
 0x94e   : > { %15706 = vst [vmem:[#allocation40_spill] sm:$0xff] %v13083_v7 }
 0x963   : > { %v4510_v55 = vpop.xlane.xlu1 %4509 }
 0x964   : > { %v4555_v26 = vsub.f32 %v15699_v33, %v4510_v55  ;;  %v4556_v21 = vsub.f32 %v15700_v17, %v4510_v55  ;;  %v13085_v17 = vpop.f32.mrf.mxu1 }
 0x965   : > { %15707 = vst [vmem:[#allocation46_spill] sm:$0xff] %v13085_v17 }
 0x966   : > { %v4589_v60 = vmul.f32 1.442695, %v4555_v26  ;;  %v4591_v40 = vmul.f32 1.442695, %v4556_v21  ;;  %v13087_v26 = vpop.f32.mrf.mxu1 }
 0x967   : > { %v4507_v4 = vpop.xlane.xlu0 %4506  ;;  %15708 = vst [vmem:[#allocation141_spill] sm:$0xff] %v13087_v26 }
 0x968   : > { %v4553_v3 = vsub.f32 %v15701_v14, %v4507_v4  ;;  %v4554_v37 = vsub.f32 %v15702_v43, %v4507_v4  ;;  %v13091_v14 = vpop.f32.mrf.mxu1 }
 0x969   : > { %15709 = vst [vmem:[#allocation143_spill] sm:$0xff] %v13091_v14 }
 0x96a   : > { %v4585_v27 = vmul.f32 1.442695, %v4553_v3  ;;  %v4587_v19 = vmul.f32 1.442695, %v4554_v37 }
 0x96b   : > { %v5145_v32 = vpop.xlane.xlu0 %5144 }
 0x96c   : > { %7557 = vpow2.f32 %v4585_v27  ;;  %v5191_v8 = vsub.f32 %v15704_v57, %v5145_v32  ;;  %v5192_v1 = vsub.f32 %v15705_v51, %v5145_v32 }
 0x96d   : > { %7559 = vpow2.f32 %v4587_v19 }
 0x96e   : > { %7561 = vpow2.f32 %v4589_v60  ;;  %v5223_v55 = vmul.f32 1.442695, %v5191_v8  ;;  %v5225_v33 = vmul.f32 1.442695, %v5192_v1  ;;  %v4513_v21 = vpop.xlane.xlu1 %4512 }
 0x96f   : > { %7563 = vpow2.f32 %v4591_v40  ;;  %v13105_v40 = vpop.f32.mrf.mxu1 }
 0x970   : > { %7565 = vpow2.f32 %v5223_v55  ;;  %15710 = vst [vmem:[#allocation145_spill] sm:$0xff] %v13105_v40 }
 0x971   : > { %7567 = vpow2.f32 %v5225_v33  ;;  %v13115_v1 = vpop.f32.mrf.mxu1 }
 0x972   : > { %15711 = vst [vmem:[#allocation5_spill] sm:$0xff] %v13115_v1  ;;  %v7926_v1 = vld [vmem:[%s14419_s1 + $0x38] sm:$0xff]  }
 0x973   : > { %v13117_v55 = vpop.f32.mrf.mxu1 }
 0x974   : > { %15712 = vst [vmem:[#allocation6_spill] sm:$0xff] %v13117_v55  ;;  %v7928_v55 = vld [vmem:[%s14419_s1 + $0x70] sm:$0xff]  }
 0x975   : > { %v13121_v40 = vpop.f32.mrf.mxu1 }
 0x976   : > { %15713 = vst [vmem:[#allocation9_spill] sm:$0xff] %v13121_v40 }
 0x977   : > { %v13125_v17 = vpop.f32.mrf.mxu1 }
 0x978   : > { %15714 = vst [vmem:[#allocation146_spill] sm:$0xff] %v13125_v17 }
 0x979   : > { %v13089_v4 = vpop.eup %7557  ;;  %v13127_v7 = vpop.f32.mrf.mxu1 }
 0x97a   : > { %v13093_v3 = vpop.xlane.xlu1 %5150  ;;  %v13095_v43 = vpop.eup %7559  ;;  %15715 = vst [vmem:[#allocation147_spill] sm:$0xff] %v13127_v7 }
 0x97b   : > { %v13097_v37 = vpop.eup %7561  ;;  %v4649_v60 = vadd.f32 %v13095_v43, %v13089_v4  ;;  %v5148_v7 = vpop.xlane.xlu0 %5147 }
 0x97c   : > { %v13101_v27 = vpop.eup %7563  ;;  %v5194_v29 = vsub.f32 %v15719_v31, %v5148_v7  ;;  %v4558_v31 = vsub.f32 %v15724_v22, %v4513_v21 }
 0x97d   : > { %v13103_v19 = vpop.eup %7565  ;;  %4650 = vadd.xlane.f32.xlu0 %v4649_v60  ;;  %v4652_v8 = vadd.f32 %v13101_v27, %v13097_v37 }
 0x97e   : > { %v13107_v32 = vpop.eup %7567  ;;  %v4595_v36 = vmul.f32 1.442695, %v4558_v31 }
 0x97f   : > { %v13109_v57 = vpop.xlane.xlu1 %4518  ;;  %v5287_v51 = vadd.f32 %v13107_v32, %v13103_v19 }
 0x981   : > { %4653 = vadd.xlane.f32.xlu0 %v4652_v8  ;;  %5288 = vadd.xlane.f32.xlu1 %v5287_v51  ;;  %v13135_v8 = vpop.f32.mrf.mxu1  ;;  %v7927_v51 = vld [vmem:[%s14419_s1 + $0x30] sm:$0xff]  }
 0x982   : > { %15716 = vst [vmem:[#allocation148_spill] sm:$0xff] %v13135_v8  ;;  %v15718_v8 = vld [vmem:[#allocation8_spill] sm:$0xff] }
 0x983   : > { %v13144_v17 = vpop.f32.mrf.mxu1  ;;  %v5193_v26 = vsub.f32 %v15718_v8, %v5148_v7  ;;  %v15723_v8 = vld [vmem:[#allocation10_spill] sm:$0xff] }
 0x984   : > { %15717 = vst [vmem:[#allocation149_spill] sm:$0xff] %v13144_v17  ;;  %v5229_v17 = vmul.f32 1.442695, %v5194_v29  ;;  %v4557_v25 = vsub.f32 %v15723_v8, %v4513_v21 }
 0x985   : > { %v13154_v9 = vpop.f32.mrf.mxu1 }
 0x986   : > { %15720 = vst [vmem:[#allocation8_spill] sm:$0xff] %v13154_v9 }
 0x987   : > { %v13159_v13 = vpop.f32.mrf.mxu1 }
 0x988   : > { %v13119_v33 = vpop.xlane.xlu1 %5156  ;;  %15721 = vst [vmem:[#allocation11_spill] sm:$0xff] %v13159_v13 }
 0x989   : > { %v13163_v0 = vpop.f32.mrf.mxu1 }
 0x98a   : > { %15722 = vst [vmem:[#allocation150_spill] sm:$0xff] %v13163_v0 }
 0x98b   : > { %v13169_v9 = vpop.f32.mrf.mxu1 }
 0x98c   : > { %v13123_v60 = vpop.xlane.xlu1 %4524  ;;  %15725 = vst [vmem:[#allocation10_spill] sm:$0xff] %v13169_v9 }
 0x991   : > { %v13129_v14 = vpop.xlane.xlu1 %5162 }
 0x992   : > { %5413 = vrot.lane.b32.xlu1 %v7926_v1, %s8017_s11 }
 0x996   : > { %4773 = vrot.lane.b32.xlu1 %v7927_v51, %s8016_s10  ;;  %v13141_v40 = vpop.xlane.xlu1 %4530 }
 0x997   : > { %4775 = vrot.lane.b32.xlu0 %v7926_v1, %s8016_s10  ;;  %v5227_v1 = vmul.f32 1.442695, %v5193_v26  ;;  %v4593_v26 = vmul.f32 1.442695, %v4557_v25 }
 0x999   : > { %7569 = vpow2.f32 %v5227_v1 }
 0x99a   : > { %5427 = vrot.lane.b32.xlu1 %v7928_v55, %s8017_s11  ;;  %7571 = vpow2.f32 %v5229_v17 }
 0x99b   : > { %7573 = vpow2.f32 %v4593_v26 }
 0x99c   : > { %7575 = vpow2.f32 %v4595_v36 }
 0x99e   : > { %5411 = vrot.lane.b32.xlu1 %v7927_v51, %s8017_s11 }
 0x9a3   : > { %v13151_v54 = vpop.xlane.xlu1 %5168 }
 0x9a6   : > { %v13177_v0 = vpop.eup %7569 }
 0x9a7   : > { %v13157_v58 = vpop.xlane.xlu1 %4536  ;;  %v13179_v8 = vpop.eup %7571 }
 0x9a8   : > { %v5290_v31 = vadd.f32 %v13179_v8, %v13177_v0 }
 0x9ad   : > { %v13161_v24 = vpop.xlane.xlu1 %5174 }
 0x9b0   : > { %v6703_v51 = vpop.f32.mrf.mxu1 }
 0x9b2   : > { %v13167_v7 = vpop.xlane.xlu1 %4542  ;;  %v6704_v13 = vpop.f32.mrf.mxu1 }
 0x9b3   : > { %v13173_v1 = vadd.f32 %v6704_v13, %v6703_v51 }
 0x9b4   : > { %v13175_v17 = vpop.f32.mrf.mxu1 }
 0x9b5   : > { %15726 = vst [vmem:[#allocation7_spill] sm:$0xff] %v13173_v1  ;;  %15727 = vst [vmem:[#allocation151_spill] sm:$0xff] %v13175_v17  ;;  %v4516_v1 = vpop.xlane.xlu0 %4515 }
 0x9b6   : > { %v13181_v22 = vpop.f32.mrf.mxu1  ;;  %5291 = vadd.xlane.f32.xlu0 %v5290_v31 }
 0x9b7   : > { %15728 = vst [vmem:[#allocation152_spill] sm:$0xff] %v13181_v22  ;;  %v13195_v22 = vpop.eup %7573 }
 0x9b8   : > { %15732 = vst [vmem:[#allocation156_spill] sm:$0xff] %v13195_v22  ;;  %v13197_v18 = vpop.eup %7575 }
 0x9b9   : > { %v13171_v29 = vpop.xlane.xlu1 %5180  ;;  %v6709_v25 = vpop.f32.mrf.mxu1  ;;  %15733 = vst [vmem:[#allocation157_spill] sm:$0xff] %v13197_v18  ;;  %v4655_v31 = vadd.f32 %v13197_v18, %v13195_v22 }
 0x9ba   : > { %v5154_v20 = vpop.xlane.xlu0 %5153 }
 0x9bb   : > { %v6710_v9 = vpop.f32.mrf.mxu1 }
 0x9bc   : > { %v13187_v13 = vadd.f32 %v6710_v9, %v6709_v25 }
 0x9bd   : > { %v13183_v21 = vpop.xlane.xlu1 %4548  ;;  %v13191_v51 = vpop.f32.mrf.mxu1 }
 0x9be   : > { %15729 = vst [vmem:[#allocation153_spill] sm:$0xff] %v13187_v13  ;;  %15730 = vst [vmem:[#allocation154_spill] sm:$0xff] %v13191_v51 }
 0x9bf   : > { %v13193_v36 = vpop.f32.mrf.mxu1 }
 0x9c0   : > { %15731 = vst [vmem:[#allocation155_spill] sm:$0xff] %v13193_v36 }
 0x9c1   : > { %v13189_v26 = vpop.xlane.xlu1 %5186 }
 0x9c2   : > { %4656 = vadd.xlane.f32.xlu1 %v4655_v31  ;;  %v4560_v31 = vsub.f32 %v12590_v59, %v4516_v1 }
 0x9c3   : > { %v6715_v42 = vpop.f32.mrf.mxu1 }
 0x9c5   : > { %v4792_v17 = vpop.permute.xlu1 %4791  ;;  %v6716_v38 = vpop.f32.mrf.mxu1 }
 0x9c6   : > { %6751 = vmatprep.subr.bf16.mxu0 %v4792_v17  ;;  %v13199_v35 = vadd.f32 %v6716_v38, %v6715_v42  ;;  %v13207_v17 = vpop.xlane.xlu0 %4521  ;;  %v7929_v42 = vld [vmem:[%s14419_s1 + $0x68] sm:$0xff]  }
 0x9c7   : > { %v13201_v25 = vpop.f32.mrf.mxu1 }
 0x9c8   : > { %15734 = vst [vmem:[#allocation158_spill] sm:$0xff] %v13199_v35  ;;  %15735 = vst [vmem:[#allocation159_spill] sm:$0xff] %v13201_v25 }
 0x9c9   : > { %v5430_v9 = vpop.permute.xlu1 %5429  ;;  %v13205_v13 = vpop.f32.mrf.mxu1 }
 0x9ca   : > { %6815 = vmatprep.subr.bf16.mxu1 %v5430_v9  ;;  %15736 = vst [vmem:[#allocation160_spill] sm:$0xff] %v13205_v13  ;;  %v13211_v23 = vpop.xlane.xlu0 %5159  ;;  %v4559_v9 = vsub.f32 %v12586_v2, %v4516_v1  ;;  %v5196_v13 = vsub.f32 %v12607_v16, %v13093_v3 }
 0x9cc   : > { %4789 = vrot.lane.b32.xlu0 %v7928_v55, %s8016_s10  ;;  %v5195_v55 = vsub.f32 %v12595_v62, %v13093_v3 }
 0x9cd   : > { %v6721_v36 = vpop.f32.mrf.mxu1 }
 0x9ce   : > { %v13214_v38 = vpop.xlane.xlu0 %4527  ;;  %v5231_v25 = vmul.f32 1.442695, %v5195_v55  ;;  %v7930_v55 = vld [vmem:[%s14419_s1 + $0x28] sm:$0xff]  }
 0x9cf   : > { %v6722_v51 = vpop.f32.mrf.mxu1 }
 0x9d0   : > { %v13209_v49 = vadd.f32 %v6722_v51, %v6721_v36  ;;  %4787 = vrot.lane.b32.xlu0 %v7929_v42, %s8016_s10  ;;  %v4597_v36 = vmul.f32 1.442695, %v4559_v9 }
 0x9d2   : > { %15737 = vst [vmem:[#allocation161_spill] sm:$0xff] %v13209_v49  ;;  %v13223_v51 = vpop.xlane.xlu0 %5165  ;;  %v4599_v49 = vmul.f32 1.442695, %v4560_v31  ;;  %7577 = vpow2.f32 %v4597_v36 }
 0x9d3   : > { %5425 = vrot.lane.b32.xlu1 %v7929_v42, %s8017_s11  ;;  %v5233_v42 = vmul.f32 1.442695, %v5196_v13 }
 0x9d4   : > { %7579 = vpow2.f32 %v4599_v49 }
 0x9d5   : > { %7581 = vpow2.f32 %v5231_v25 }
 0x9d6   : > { %v13227_v35 = vpop.xlane.xlu0 %4533  ;;  %7583 = vpow2.f32 %v5233_v42 }
 0x9da   : > { %v13231_v22 = vpop.xlane.xlu0 %5171 }
 0x9db   : > { %15738 = vst [vmem:[#allocation162_spill] sm:$0xff] %v13231_v22 }
 0x9de   : > { %v13233_v2 = vpop.xlane.xlu0 %4539 }
 0x9df   : > { %15739 = vst [vmem:[#allocation163_spill] sm:$0xff] %v13233_v2  ;;  %v13235_v59 = vpop.eup %7577  ;;  %v15751_v2 = vld [vmem:[#allocation16_spill] sm:$0xff] }
 0x9e0   : > { %15740 = vst [vmem:[#allocation164_spill] sm:$0xff] %v13235_v59 }
 0x9e1   : > { %v13237_v1 = vpop.eup %7579 }
 0x9e2   : > { %15741 = vst [vmem:[#allocation165_spill] sm:$0xff] %v13237_v1  ;;  %v13239_v62 = vpop.xlane.xlu0 %5177  ;;  %v4658_v9 = vadd.f32 %v13237_v1, %v13235_v59  ;;  %v13243_v16 = vpop.eup %7581  ;;  %v7932_v1 = vld [vmem:[%s14419_s1 + $0x20] sm:$0xff]  }
 0x9e3   : > { %15742 = vst [vmem:[#allocation166_spill] sm:$0xff] %v13239_v62  ;;  %15743 = vst [vmem:[#allocation167_spill] sm:$0xff] %v13243_v16  ;;  %v13245_v49 = vpop.eup %7583 }
 0x9e4   : > { %15744 = vst [vmem:[#allocation168_spill] sm:$0xff] %v13245_v49  ;;  %v5293_v13 = vadd.f32 %v13245_v49, %v13243_v16  ;;  %v15749_v16 = vld [vmem:[#allocation12_spill] sm:$0xff] }
 0x9e5   : > { %v5198_v49 = vsub.f32 %v15749_v16, %v5154_v20 }
 0x9e6   : > { %v13247_v3 = vpop.xlane.xlu0 %4545 }
 0x9e7   : > { %15745 = vst [vmem:[#allocation169_spill] sm:$0xff] %v13247_v3 }
 0x9ea   : > { %v13251_v25 = vpop.xlane.xlu0 %5183 }
 0x9eb   : > { %15746 = vst [vmem:[#allocation170_spill] sm:$0xff] %v13251_v25 }
 0x9ee   : > { %v13253_v31 = vpop.xlane.xlu0 %4551 }
 0x9ef   : > { %4659 = vadd.xlane.f32.xlu0 %v4658_v9  ;;  %15747 = vst [vmem:[#allocation171_spill] sm:$0xff] %v13253_v31  ;;  %v7931_v9 = vld [vmem:[%s14419_s1 + $0x60] sm:$0xff]   ;;  %v5237_v31 = vmul.f32 1.442695, %v5198_v49 }
 0x9f2   : > { %v13255_v36 = vpop.xlane.xlu0 %5189 }
 0x9f3   : > { %15748 = vst [vmem:[#allocation172_spill] sm:$0xff] %v13255_v36 }
 0x9f7   : > { %5294 = vadd.xlane.f32.xlu1 %v5293_v13  ;;  %v5197_v13 = vsub.f32 %v12624_v28, %v5154_v20 }
 0x9f9   : > { %v5235_v36 = vmul.f32 1.442695, %v5197_v13  ;;  %v4562_v13 = vsub.f32 %v15751_v2, %v13109_v57 }
 0xa05   : > { %4771 = vrot.lane.b32.xlu0 %v7930_v55, %s8016_s10 }
 0xa06   : > { %v4651_v42 = vpop.xlane.xlu0 %4650 }
 0xa07   : > { %7585 = vrcp.f32 %v4651_v42  ;;  %v15750_v42 = vld [vmem:[#allocation15_spill] sm:$0xff] }
 0xa08   : > { %4785 = vrot.lane.b32.xlu1 %v7931_v9, %s8016_s10  ;;  %v4561_v62 = vsub.f32 %v15750_v42, %v13109_v57  ;;  %v4603_v57 = vmul.f32 1.442695, %v4562_v13  ;;  %v4563_v13 = vsub.f32 %v12660_v39, %v13207_v17 }
 0xa0a   : > { %v5289_v59 = vpop.xlane.xlu1 %5288  ;;  %v4654_v18 = vpop.xlane.xlu0 %4653  ;;  %v4601_v42 = vmul.f32 1.442695, %v4561_v62 }
 0xa0b   : > { %7587 = vrcp.f32 %v4654_v18 }
 0xa0c   : > { %4769 = vrot.lane.b32.xlu1 %v7932_v1, %s8016_s10  ;;  %7589 = vpow2.f32 %v5235_v36 }
 0xa0d   : > { %7591 = vpow2.f32 %v5237_v31 }
 0xa0e   : > { %v4776_v25 = vpop.permute.xlu0 %4775  ;;  %v5414_v3 = vpop.permute.xlu1 %5413  ;;  %7593 = vpow2.f32 %v4601_v42  ;;  %v5199_v42 = vsub.f32 %v12678_v48, %v13119_v33 }
 0xa0f   : > { %6752 = vmatpush3.bf16.msra.mxu0 %v4776_v25  ;;  %6816 = vmatpush3.bf16.msra.mxu1 %v5414_v3  ;;  %7595 = vpow2.f32 %v4603_v57 }
 0xa10   : > { %5407 = vrot.lane.b32.xlu1 %v7932_v1, %s8017_s11  ;;  %7597 = vrcp.f32 %v5289_v59  ;;  %v4564_v59 = vsub.f32 %v12669_v12, %v13207_v17  ;;  %v5200_v17 = vsub.f32 %v12685_v15, %v13119_v33 }
 0xa12   : > { %v4774_v28 = vpop.permute.xlu1 %4773 }
 0xa14   : > { %v7586_v16 = vpop.eup %7585 }
 0xa15   : > { %v4714_v49 = vmul.f32 %v7586_v16, %v13095_v43  ;;  %v13279_v1 = vmul.f32 %v7586_v16, %v13089_v4  ;;  %v7933_v16 = vld [vmem:[%s14419_s1 + $0x58] sm:$0xff]  }
 0xa16   : > { %v5428_v20 = vpop.permute.xlu1 %5427 }
 0xa17   : > { %6817 = vmatprep.subr.bf16.mxu1 %v5428_v20 }
 0xa18   : > { %v7588_v18 = vpop.eup %7587 }
 0xa19   : > { %v4716_v25 = vmul.f32 %v7588_v18, %v13101_v27  ;;  %v13282_v31 = vmul.f32 %v7588_v18, %v13097_v37  ;;  %v13286_v22 = vpop.eup %7589 }
 0xa1a   : > { %v5412_v3 = vpop.permute.xlu1 %5411  ;;  %v13288_v43 = vpop.eup %7591 }
 0xa1b   : > { %6818 = vmatpush3.bf16.msra.mxu1 %v5412_v3  ;;  %v4746_v36 = vpack.c.bf16 %v4716_v25, %v4714_v49  ;;  %v5296_v4 = vadd.f32 %v13288_v43, %v13286_v22  ;;  %v13292_v37 = vpop.eup %7593  ;;  %v4607_v25 = vmul.f32 1.442695, %v4564_v59  ;;  %v7935_v59 = vld [vmem:[%s14419_s1 + $0x50] sm:$0xff]  }
 0xa1c   : > { %v13294_v27 = vpop.eup %7595 }
 0xa1d   : > { %4841 = vmatprep.mubr.bf16.mxu0 %v4746_v36  ;;  %v4661_v2 = vadd.f32 %v13294_v27, %v13292_v37  ;;  %v7598_v49 = vpop.eup %7597 }
 0xa1e   : > { %v5352_v39 = vmul.f32 %v7598_v49, %v13107_v32  ;;  %v5241_v32 = vmul.f32 1.442695, %v5200_v17 }
 0xa24   : > { %5297 = vadd.xlane.f32.xlu0 %v5296_v4 }
 0xa34   : > { %4662 = vadd.xlane.f32.xlu1 %v4661_v2 }
 0xa3a   : > { %5409 = vrot.lane.b32.xlu0 %v7930_v55, %s8017_s11 }
 0xa3e   : > { %5423 = vrot.lane.b32.xlu0 %v7931_v9, %s8017_s11  ;;  %v4605_v9 = vmul.f32 1.442695, %v4563_v13 }
 0xa3f   : > { %v5292_v62 = vpop.xlane.xlu0 %5291 }
 0xa40   : > { %7599 = vrcp.f32 %v5292_v62  ;;  %v5239_v62 = vmul.f32 1.442695, %v5199_v42 }
 0xa41   : > { %7601 = vpow2.f32 %v4605_v9  ;;  %v5202_v9 = vsub.f32 %v12708_v44, %v13211_v23  ;;  %v4565_v44 = vsub.f32 %v12690_v53, %v13123_v60 }
 0xa42   : > { %4783 = vrot.lane.b32.xlu0 %v7933_v16, %s8016_s10  ;;  %7603 = vpow2.f32 %v4607_v25  ;;  %v7936_v25 = vld [vmem:[%s14419_s1 + $0x10] sm:$0xff]  }
 0xa43   : > { %v4790_v18 = vpop.permute.xlu0 %4789  ;;  %7605 = vpow2.f32 %v5239_v62  ;;  %v5245_v42 = vmul.f32 1.442695, %v5202_v9 }
 0xa44   : > { %6753 = vmatprep.subr.bf16.mxu0 %v4790_v18  ;;  %7607 = vpow2.f32 %v5241_v32  ;;  %v7934_v18 = vld [vmem:[%s14419_s1 + $0x18] sm:$0xff]  }
 0xa45   : > { %5421 = vrot.lane.b32.xlu1 %v7933_v16, %s8017_s11  ;;  %6754 = vmatpush3.bf16.msra.mxu0 %v4774_v28  ;;  %v13316_v28 = vmul.f32 %v7598_v49, %v13103_v19 }
 0xa47   : > { %v4788_v55 = vpop.permute.xlu0 %4787 }
 0xa48   : > { %6755 = vmatprep.subr.bf16.mxu0 %v4788_v55  ;;  %v5201_v55 = vsub.f32 %v12704_v61, %v13211_v23  ;;  %v15752_v23 = vld [vmem:[#allocation13_spill] sm:$0xff] }
 0xa49   : > { %v4566_v17 = vsub.f32 %v15752_v23, %v13123_v60 }
 0xa4b   : > { %v13309_v3 = vpop.xlane.xlu1 %4656  ;;  %v4611_v62 = vmul.f32 1.442695, %v4566_v17  ;;  %v15754_v17 = vld [vmem:[#allocation17_spill] sm:$0xff] }
 0xa4d   : > { %v7600_v36 = vpop.eup %7599 }
 0xa4e   : > { %v5354_v57 = vmul.f32 %v7600_v36, %v13179_v8  ;;  %v13319_v12 = vmul.f32 %v7600_v36, %v13177_v0  ;;  %v13325_v19 = vpop.eup %7601  ;;  %v5243_v36 = vmul.f32 1.442695, %v5201_v55 }
 0xa4f   : > { %v5426_v4 = vpop.permute.xlu1 %5425  ;;  %v13327_v8 = vpop.eup %7603 }
 0xa50   : > { %v5384_v2 = vpack.c.bf16 %v5354_v57, %v5352_v39  ;;  %6819 = vmatprep.subr.bf16.mxu1 %v5426_v4  ;;  %v4664_v0 = vadd.f32 %v13327_v8, %v13325_v19  ;;  %v13331_v15 = vpop.eup %7605  ;;  %7609 = vpow2.f32 %v5243_v36  ;;  %v4609_v4 = vmul.f32 1.442695, %v4565_v44 }
 0xa51   : > { %v13333_v33 = vpop.eup %7607  ;;  %7611 = vpow2.f32 %v5245_v42  ;;  %v15753_v42 = vld [vmem:[#allocation14_spill] sm:$0xff] }
 0xa52   : > { %5479 = vmatprep.mubr.bf16.mxu1 %v5384_v2  ;;  %v5299_v16 = vadd.f32 %v13333_v33, %v13331_v15  ;;  %7613 = vpow2.f32 %v4609_v4  ;;  %v5203_v4 = vsub.f32 %v15754_v17, %v13129_v14  ;;  %v15757_v17 = vld [vmem:[#allocation24_spill] sm:$0xff] }
 0xa53   : > { %7615 = vpow2.f32 %v4611_v62  ;;  %v15755_v62 = vld [vmem:[#allocation18_spill] sm:$0xff] }
 0xa5d   : > { %v13362_v2 = vpop.eup %7609 }
 0xa5e   : > { %v13364_v32 = vpop.eup %7611 }
 0xa61   : > { %4665 = vadd.xlane.f32.xlu0 %v4664_v0  ;;  %v5302_v0 = vadd.f32 %v13364_v32, %v13362_v2 }
 0xa69   : > { %5300 = vadd.xlane.f32.xlu1 %v5299_v16  ;;  %v13368_v16 = vpop.eup %7613 }
 0xa6a   : > { %v13370_v55 = vpop.eup %7615 }
 0xa6b   : > { %v4667_v53 = vadd.f32 %v13370_v55, %v13368_v16 }
 0xa77   : > { %4767 = vrot.lane.b32.xlu0 %v7934_v18, %s8016_s10 }
 0xa78   : > { %v13341_v13 = vpop.xlane.xlu0 %4659 }
 0xa7a   : > { %4781 = vrot.lane.b32.xlu1 %v7935_v59, %s8016_s10 }
 0xa7c   : > { %v4772_v49 = vpop.permute.xlu0 %4771 }
 0xa7d   : > { %6756 = vmatpush3.bf16.msra.mxu0 %v4772_v49  ;;  %v7937_v49 = vld [vmem:[%s14419_s1 + $0x48] sm:$0xff]  }
 0xa7e   : > { %4765 = vrot.lane.b32.xlu1 %v7936_v25, %s8016_s10 }
 0xa80   : > { %v13355_v39 = vpop.xlane.xlu1 %5294 }
 0xa82   : > { %5403 = vrot.lane.b32.xlu1 %v7936_v25, %s8017_s11 }
 0xa84   : > { %v4786_v61 = vpop.permute.xlu1 %4785 }
 0xa85   : > { %6757 = vmatprep.subr.bf16.mxu0 %v4786_v61 }
 0xa88   : > { %v4770_v57 = vpop.permute.xlu1 %4769 }
 0xa89   : > { %6758 = vmatpush3.bf16.msra.mxu0 %v4770_v57 }
 0xa8c   : > { %v5408_v36 = vpop.permute.xlu1 %5407 }
 0xa96   : > { %5303 = vadd.xlane.f32.xlu0 %v5302_v0  ;;  %v5204_v0 = vsub.f32 %v15755_v62, %v13129_v14 }
 0xaa6   : > { %4668 = vadd.xlane.f32.xlu1 %v4667_v53 }
 0xaac   : > { %5405 = vrot.lane.b32.xlu0 %v7934_v18, %s8017_s11  ;;  %v4567_v18 = vsub.f32 %v12745_v45, %v13214_v38  ;;  %v5247_v45 = vmul.f32 1.442695, %v5203_v4  ;;  %v5206_v4 = vsub.f32 %v15757_v17, %v13223_v51 }
 0xaad   : > { %v13375_v60 = vpop.xlane.xlu0 %5297 }
 0xaae   : > { %v4613_v57 = vmul.f32 1.442695, %v4567_v18 }
 0xab0   : > { %5419 = vrot.lane.b32.xlu0 %v7935_v59, %s8017_s11  ;;  %v4568_v59 = vsub.f32 %v15753_v42, %v13214_v38  ;;  %7617 = vpow2.f32 %v4613_v57  ;;  %v13408_v42 = vld [vmem:[%s14419_s1 + $0x8] sm:$0xff]   ;;  %v15756_v57 = vld [vmem:[#allocation23_spill] sm:$0xff] }
 0xab1   : > { %v5410_v9 = vpop.permute.xlu0 %5409 }
 0xab2   : > { %6820 = vmatpush3.bf16.msra.mxu1 %v5410_v9  ;;  %v4615_v44 = vmul.f32 1.442695, %v4568_v59  ;;  %v5249_v9 = vmul.f32 1.442695, %v5204_v0  ;;  %v7940_v0 = vld [vmem:[%s14419_s1] sm:$0xff]  }
 0xab4   : > { %4779 = vrot.lane.b32.xlu0 %v7937_v49, %s8016_s10  ;;  %7619 = vpow2.f32 %v4615_v44  ;;  %v5205_v44 = vsub.f32 %v15756_v57, %v13223_v51  ;;  %v4571_v51 = vsub.f32 %v12835_v63, %v13227_v35  ;;  %v15758_v57 = vld [vmem:[#allocation21_spill] sm:$0xff]  ;;  %v5211_v63 = vsub.f32 %v12921_v41, %v13161_v24 }
 0xab5   : > { %v5424_v25 = vpop.permute.xlu0 %5423  ;;  %7621 = vpow2.f32 %v5247_v45  ;;  %v5253_v45 = vmul.f32 1.442695, %v5206_v4  ;;  %v4572_v17 = vsub.f32 %v15758_v57, %v13227_v35  ;;  %v5212_v35 = vsub.f32 %v12925_v30, %v13161_v24 }
 0xab6   : > { %6821 = vmatprep.subr.bf16.mxu1 %v5424_v25  ;;  %7623 = vpow2.f32 %v5249_v9  ;;  %v5216_v24 = vsub.f32 %v13014_v5, %v13171_v29 }
 0xab7   : > { %5417 = vrot.lane.b32.xlu1 %v7937_v49, %s8017_s11  ;;  %6822 = vmatpush3.bf16.msra.mxu1 %v5408_v36  ;;  %v4623_v48 = vmul.f32 1.442695, %v4572_v17 }
 0xab9   : > { %v4784_v61 = vpop.permute.xlu0 %4783 }
 0xaba   : > { %6759 = vmatprep.subr.bf16.mxu0 %v4784_v61  ;;  %v13417_v61 = vld [vmem:[%s14419_s1 + $0x40] sm:$0xff]  }
 0xabd   : > { %v13387_v23 = vpop.xlane.xlu1 %4662  ;;  %v13393_v38 = vpop.eup %7617 }
 0xac1   : > { %v5422_v53 = vpop.permute.xlu1 %5421  ;;  %v13395_v49 = vpop.eup %7619 }
 0xac2   : > { %6823 = vmatprep.subr.bf16.mxu1 %v5422_v53  ;;  %v4670_v25 = vadd.f32 %v13395_v49, %v13393_v38  ;;  %v13399_v36 = vpop.eup %7621  ;;  %v5251_v53 = vmul.f32 1.442695, %v5205_v44  ;;  %v4573_v44 = vsub.f32 %v12888_v10, %v13157_v58 }
 0xac3   : > { %v13401_v18 = vpop.eup %7623 }
 0xac4   : > { %v5305_v14 = vadd.f32 %v13401_v18, %v13399_v36  ;;  %7625 = vpow2.f32 %v5251_v53 }
 0xac5   : > { %7627 = vpow2.f32 %v5253_v45  ;;  %v4625_v45 = vmul.f32 1.442695, %v4573_v44  ;;  %v5219_v44 = vsub.f32 %v13038_v52, %v13189_v26 }
 0xad1   : > { %v13438_v4 = vpop.eup %7625 }
 0xad2   : > { %v13442_v53 = vpop.eup %7627 }
 0xad3   : > { %4671 = vadd.xlane.f32.xlu0 %v4670_v25  ;;  %v5308_v10 = vadd.f32 %v13442_v53, %v13438_v4 }
 0xadb   : > { %5306 = vadd.xlane.f32.xlu1 %v5305_v14 }
 0xae9   : > { %4763 = vrot.lane.b32.xlu0 %v13408_v42, %s8016_s10 }
 0xaea   : > { %v13412_v59 = vpop.xlane.xlu0 %4665 }
 0xaec   : > { %4777 = vrot.lane.b32.xlu1 %v13417_v61, %s8016_s10 }
 0xaee   : > { %v4768_v62 = vpop.permute.xlu0 %4767 }
 0xaef   : > { %6760 = vmatpush3.bf16.msra.mxu0 %v4768_v62  ;;  %v4621_v62 = vmul.f32 1.442695, %v4571_v51  ;;  %v4578_v51 = vsub.f32 %v12960_v50, %v13167_v7  ;;  %v4582_v50 = vsub.f32 %v13032_v47, %v13183_v21  ;;  %v5279_v47 = vmul.f32 1.442695, %v5219_v44  ;;  %v15767_v44 = vld [vmem:[#allocation26_spill] sm:$0xff] }
 0xaf0   : > { %4761 = vrot.lane.b32.xlu1 %v7940_v0, %s8016_s10 }
 0xaf1   : > { %7629 = vpow2.f32 %v4621_v62  ;;  %v4635_v30 = vmul.f32 1.442695, %v4578_v51  ;;  %v5273_v62 = vmul.f32 1.442695, %v5216_v24 }
 0xaf2   : > { %v13429_v9 = vpop.xlane.xlu1 %5300  ;;  %7631 = vpow2.f32 %v4623_v48  ;;  %v5215_v48 = vsub.f32 %v13010_v46, %v13171_v29  ;;  %v4643_v29 = vmul.f32 1.442695, %v4582_v50 }
 0xaf3   : > { %7633 = vpow2.f32 %v4625_v45 }
 0xaf4   : > { %5399 = vrot.lane.b32.xlu1 %v7940_v0, %s8017_s11  ;;  %v4574_v0 = vsub.f32 %v12897_v6, %v13157_v58  ;;  %v4577_v6 = vsub.f32 %v12956_v34, %v13167_v7  ;;  %v5265_v58 = vmul.f32 1.442695, %v5212_v35  ;;  %v5271_v57 = vmul.f32 1.442695, %v5215_v48 }
 0xaf5   : > { %v4581_v34 = vsub.f32 %v13028_v56, %v13183_v21  ;;  %v5220_v56 = vsub.f32 %v13042_v11, %v13189_v26 }
 0xaf6   : > { %v4782_v25 = vpop.permute.xlu1 %4781  ;;  %v4633_v41 = vmul.f32 1.442695, %v4577_v6 }
 0xaf7   : > { %6761 = vmatprep.subr.bf16.mxu0 %v4782_v25  ;;  %v4627_v25 = vmul.f32 1.442695, %v4574_v0  ;;  %v4641_v46 = vmul.f32 1.442695, %v4581_v34 }
 0xaf9   : > { %7635 = vpow2.f32 %v4627_v25 }
 0xafa   : > { %v4766_v14 = vpop.permute.xlu1 %4765 }
 0xafb   : > { %6762 = vmatpush3.bf16.msra.mxu0 %v4766_v14  ;;  %v5263_v14 = vmul.f32 1.442695, %v5211_v63  ;;  %v5281_v63 = vmul.f32 1.442695, %v5220_v56 }
 0xafd   : > { %7637 = vpow2.f32 %v5263_v14 }
 0xafe   : > { %7639 = vpow2.f32 %v5265_v58  ;;  %v13460_v17 = vpop.eup %7629 }
 0xaff   : > { %7641 = vpow2.f32 %v4633_v41  ;;  %v13464_v7 = vpop.eup %7631  ;;  %v15763_v41 = vld [vmem:[#allocation19_spill] sm:$0xff] }
 0xb00   : > { %7643 = vpow2.f32 %v4635_v30  ;;  %v13468_v5 = vpop.eup %7633  ;;  %v4676_v0 = vadd.f32 %v13464_v7, %v13460_v17  ;;  %v4569_v48 = vsub.f32 %v15763_v41, %v13141_v40 }
 0xb01   : > { %7645 = vpow2.f32 %v5271_v57 }
 0xb02   : > { %7647 = vpow2.f32 %v5273_v62  ;;  %v5404_v62 = vpop.permute.xlu1 %5403 }
 0xb03   : > { %7649 = vpow2.f32 %v4641_v46  ;;  %v4617_v46 = vmul.f32 1.442695, %v4569_v48 }
 0xb04   : > { %7651 = vpow2.f32 %v4643_v29  ;;  %v5207_v29 = vsub.f32 %v15767_v44, %v13151_v54  ;;  %v15774_v44 = vld [vmem:[#allocation137_spill] sm:$0xff] }
 0xb05   : > { %7653 = vpow2.f32 %v5279_v47 }
 0xb06   : > { %v13474_v45 = vpop.eup %7635  ;;  %7655 = vpow2.f32 %v5281_v63  ;;  %v15769_v63 = vld [vmem:[#allocation140_spill] sm:$0xff]  ;;  %v5255_v41 = vmul.f32 1.442695, %v5207_v29  ;;  %v15775_v29 = vld [vmem:[#allocation27_spill] sm:$0xff] }
 0xb07   : > { %v4679_v52 = vadd.f32 %v13474_v45, %v13468_v5  ;;  %7657 = vpow2.f32 %v4617_v46 }
 0xb08   : > { %5309 = vadd.xlane.f32.xlu0 %v5308_v10 }
 0xb0a   : > { %v13476_v21 = vpop.eup %7637 }
 0xb0b   : > { %v13480_v25 = vpop.eup %7639 }
 0xb0c   : > { %v13482_v11 = vpop.eup %7641  ;;  %v5317_v26 = vadd.f32 %v13480_v25, %v13476_v21 }
 0xb0d   : > { %15759 = vst [vmem:[#allocation12_spill] sm:$0xff] %v13482_v11  ;;  %v13488_v35 = vpop.eup %7643 }
 0xb0e   : > { %v13492_v14 = vpop.eup %7645  ;;  %v4685_v6 = vadd.f32 %v13488_v35, %v13482_v11 }
 0xb0f   : > { %15760 = vst [vmem:[#allocation15_spill] sm:$0xff] %v13492_v14  ;;  %v13498_v58 = vpop.eup %7647 }
 0xb10   : > { %15761 = vst [vmem:[#allocation16_spill] sm:$0xff] %v13498_v58  ;;  %v5323_v30 = vadd.f32 %v13498_v58, %v13492_v14  ;;  %v15812_v58 = vld [vmem:[#allocation61_spill] sm:$0xff] }
 0xb18   : > { %4677 = vadd.xlane.f32.xlu1 %v4676_v0 }
 0xb1c   : > { %4680 = vadd.xlane.f32.xlu1 %v4679_v52 }
 0xb1e   : > { %5401 = vrot.lane.b32.xlu0 %v13408_v42, %s8017_s11  ;;  %v13500_v42 = vpop.eup %7649 }
 0xb1f   : > { %v13490_v10 = vpop.xlane.xlu0 %5303  ;;  %15762 = vst [vmem:[#allocation13_spill] sm:$0xff] %v13500_v42  ;;  %v13506_v24 = vpop.eup %7651 }
 0xb20   : > { %5318 = vadd.xlane.f32.xlu1 %v5317_v26  ;;  %15764 = vst [vmem:[#allocation14_spill] sm:$0xff] %v13506_v24  ;;  %v13510_v50 = vpop.eup %7653  ;;  %v4691_v56 = vadd.f32 %v13506_v24, %v13500_v42  ;;  %v15770_v26 = vld [vmem:[#allocation162_spill] sm:$0xff] }
 0xb21   : > { %15766 = vst [vmem:[#allocation17_spill] sm:$0xff] %v13510_v50  ;;  %v13516_v0 = vpop.eup %7655 }
 0xb22   : > { %5415 = vrot.lane.b32.xlu0 %v13417_v61, %s8017_s11  ;;  %v15765_v61 = vld [vmem:[#allocation20_spill] sm:$0xff]  ;;  %15768 = vst [vmem:[#allocation18_spill] sm:$0xff] %v13516_v0  ;;  %v5329_v48 = vadd.f32 %v13516_v0, %v13510_v50  ;;  %v13538_v20 = vpop.eup %7657  ;;  %v15790_v50 = vld [vmem:[#allocation34_spill] sm:$0xff] }
 0xb23   : > { %v5406_v51 = vpop.permute.xlu0 %5405  ;;  %v4570_v57 = vsub.f32 %v15765_v61, %v13141_v40  ;;  %v5208_v40 = vsub.f32 %v15769_v63, %v13151_v54 }
 0xb24   : > { %4686 = vadd.xlane.f32.xlu1 %v4685_v6  ;;  %6824 = vmatpush3.bf16.msra.mxu1 %v5406_v51  ;;  %v15771_v6 = vld [vmem:[#allocation22_spill] sm:$0xff] }
 0xb25   : > { %v4619_v47 = vmul.f32 1.442695, %v4570_v57  ;;  %v5209_v51 = vsub.f32 %v15771_v6, %v15770_v26  ;;  %v15776_v6 = vld [vmem:[#allocation166_spill] sm:$0xff] }
 0xb27   : > { %v5420_v34 = vpop.permute.xlu0 %5419  ;;  %7659 = vpow2.f32 %v4619_v47  ;;  %v5259_v54 = vmul.f32 1.442695, %v5209_v51  ;;  %v15778_v51 = vld [vmem:[#allocation29_spill] sm:$0xff] }
 0xb28   : > { %5324 = vadd.xlane.f32.xlu1 %v5323_v30  ;;  %6825 = vmatprep.subr.bf16.mxu1 %v5420_v34  ;;  %v15772_v30 = vld [vmem:[#allocation25_spill] sm:$0xff]  ;;  %v5257_v34 = vmul.f32 1.442695, %v5208_v40  ;;  %7661 = vpow2.f32 %v5255_v41  ;;  %v5214_v41 = vsub.f32 %v15778_v51, %v15776_v6 }
 0xb29   : > { %6826 = vmatpush3.bf16.msra.mxu1 %v5404_v62  ;;  %v5210_v61 = vsub.f32 %v15772_v30, %v15770_v26  ;;  %v15773_v62 = vld [vmem:[#allocation163_spill] sm:$0xff]  ;;  %v15777_v26 = vld [vmem:[#allocation28_spill] sm:$0xff] }
 0xb2a   : > { %v4575_v46 = vsub.f32 %v15774_v44, %v15773_v62  ;;  %7663 = vpow2.f32 %v5257_v34  ;;  %v4576_v63 = vsub.f32 %v15775_v29, %v15773_v62  ;;  %v5213_v40 = vsub.f32 %v15777_v26, %v15776_v6  ;;  %v15779_v44 = vld [vmem:[#allocation169_spill] sm:$0xff]  ;;  %v15784_v6 = vld [vmem:[#allocation170_spill] sm:$0xff] }
 0xb2b   : > { %v4780_v52 = vpop.permute.xlu0 %4779  ;;  %7665 = vpow2.f32 %v5259_v54  ;;  %v5269_v62 = vmul.f32 1.442695, %v5214_v41  ;;  %v15781_v54 = vld [vmem:[#allocation31_spill] sm:$0xff] }
 0xb2c   : > { %4692 = vadd.xlane.f32.xlu1 %v4691_v56  ;;  %6763 = vmatprep.subr.bf16.mxu0 %v4780_v52  ;;  %v5261_v56 = vmul.f32 1.442695, %v5210_v61  ;;  %v4629_v47 = vmul.f32 1.442695, %v4575_v46  ;;  %v4631_v30 = vmul.f32 1.442695, %v4576_v63  ;;  %v4580_v46 = vsub.f32 %v15781_v54, %v15779_v44 }
 0xb2d   : > { %v15780_v61 = vld [vmem:[#allocation30_spill] sm:$0xff] }
 0xb2e   : > { %7667 = vpow2.f32 %v5261_v56  ;;  %v4579_v34 = vsub.f32 %v15780_v61, %v15779_v44  ;;  %v15783_v56 = vld [vmem:[#allocation75_spill] sm:$0xff]  ;;  %v4639_v61 = vmul.f32 1.442695, %v4580_v46 }
 0xb2f   : > { %v13526_v57 = vpop.xlane.xlu1 %4668  ;;  %7669 = vpow2.f32 %v4629_v47  ;;  %v15785_v47 = vld [vmem:[#allocation32_spill] sm:$0xff] }
 0xb30   : > { %5330 = vadd.xlane.f32.xlu1 %v5329_v48  ;;  %v5267_v48 = vmul.f32 1.442695, %v5213_v40  ;;  %7671 = vpow2.f32 %v4631_v30  ;;  %v4637_v26 = vmul.f32 1.442695, %v4579_v34  ;;  %v5217_v40 = vsub.f32 %v15785_v47, %v15784_v6  ;;  %v15786_v30 = vld [vmem:[#allocation33_spill] sm:$0xff]  ;;  %v15788_v34 = vld [vmem:[#allocation79_spill] sm:$0xff] }
 0xb31   : > { %v5218_v41 = vsub.f32 %v15786_v30, %v15784_v6  ;;  %v15789_v47 = vld [vmem:[#allocation171_spill] sm:$0xff]  ;;  %v15791_v30 = vld [vmem:[#allocation88_spill] sm:$0xff] }
 0xb32   : > { %7673 = vpow2.f32 %v5267_v48  ;;  %v15787_v48 = vld [vmem:[#allocation78_spill] sm:$0xff]  ;;  %v4584_v0 = vsub.f32 %v15791_v30, %v15789_v47  ;;  %v15796_v30 = vld [vmem:[#allocation144_spill] sm:$0xff] }
 0xb33   : > { %v5418_v52 = vpop.permute.xlu1 %5417  ;;  %7675 = vpow2.f32 %v5269_v62  ;;  %v4583_v62 = vsub.f32 %v15790_v50, %v15789_v47  ;;  %v5277_v6 = vmul.f32 1.442695, %v5218_v41 }
 0xb34   : > { %6827 = vmatprep.subr.bf16.mxu1 %v5418_v52  ;;  %v13542_v29 = vpop.eup %7659  ;;  %v15782_v52 = vld [vmem:[#allocation47_spill] sm:$0xff]  ;;  %7677 = vpow2.f32 %v4637_v26  ;;  %v15793_v26 = vld [vmem:[#allocation81_spill] sm:$0xff]  ;;  %v4647_v47 = vmul.f32 1.442695, %v4584_v0 }
 0xb35   : > { %v6449_v63 = vadd.f32 %v15783_v56, %v15782_v52  ;;  %v13548_v51 = vpop.eup %7661  ;;  %v4673_v44 = vadd.f32 %v13542_v29, %v13538_v20  ;;  %v6455_v52 = vadd.f32 %v15788_v34, %v15787_v48  ;;  %v5275_v56 = vmul.f32 1.442695, %v5217_v40  ;;  %v15794_v48 = vld [vmem:[#allocation172_spill] sm:$0xff]  ;;  %v15795_v34 = vld [vmem:[#allocation142_spill] sm:$0xff] }
 0xb36   : > { %7679 = vpow2.f32 %v4639_v61  ;;  %v4645_v50 = vmul.f32 1.442695, %v4583_v62  ;;  %v5221_v61 = vsub.f32 %v15795_v34, %v15794_v48  ;;  %v5222_v24 = vsub.f32 %v15796_v30, %v15794_v48  ;;  %v15797_v62 = vld [vmem:[#allocation83_spill] sm:$0xff]  ;;  %v15801_v34 = vld [vmem:[#allocation101_spill] sm:$0xff] }
 0xb37   : > { %v13554_v54 = vpop.eup %7663  ;;  %7681 = vpow2.f32 %v5275_v56 }
 0xb38   : > { %v13561_v46 = vpop.eup %7665  ;;  %7683 = vpow2.f32 %v5277_v6  ;;  %v5285_v0 = vmul.f32 1.442695, %v5222_v24 }
 0xb39   : > { %7685 = vpow2.f32 %v4645_v50  ;;  %v15800_v50 = vld [vmem:[#allocation104_spill] sm:$0xff] }
 0xb3a   : > { %7687 = vpow2.f32 %v4647_v47 }
 0xb3b   : > { %v13567_v42 = vpop.eup %7667 }
 0xb3c   : > { %v13574_v41 = vpop.eup %7669 }
 0xb3d   : > { %v13580_v14 = vpop.eup %7671 }
 0xb3e   : > { %v4682_v6 = vadd.f32 %v13580_v14, %v13574_v41 }
 0xb3f   : > { %v13583_v56 = vpop.eup %7673 }
 0xb40   : > { %v13589_v48 = vpop.eup %7675 }
 0xb41   : > { %4674 = vadd.xlane.f32.xlu0 %v4673_v44  ;;  %5560 = vrot.lane.b32.xlu1 %v6449_v63, %s8017_s11  ;;  %v5311_v44 = vadd.f32 %v13554_v54, %v13548_v51  ;;  %v15792_v63 = vld [vmem:[#allocation80_spill] sm:$0xff]  ;;  %v5320_v30 = vadd.f32 %v13589_v48, %v13583_v56 }
 0xb42   : > { %v6458_v40 = vadd.f32 %v15793_v26, %v15792_v63  ;;  %v15798_v63 = vld [vmem:[#allocation84_spill] sm:$0xff] }
 0xb43   : > { %v6464_v26 = vadd.f32 %v15798_v63, %v15797_v62  ;;  %v15804_v62 = vld [vmem:[#allocation103_spill] sm:$0xff] }
 0xb45   : > { %5312 = vadd.xlane.f32.xlu0 %v5311_v44  ;;  %5564 = vrot.lane.b32.xlu1 %v6455_v52, %s8017_s11  ;;  %v5314_v44 = vadd.f32 %v13567_v42, %v13561_v46  ;;  %v5283_v52 = vmul.f32 1.442695, %v5221_v61  ;;  %v6470_v61 = vadd.f32 %v15801_v34, %v15800_v50  ;;  %v15808_v50 = vld [vmem:[#allocation54_spill] sm:$0xff] }
 0xb47   : > { %7689 = vpow2.f32 %v5283_v52 }
 0xb48   : > { %7691 = vpow2.f32 %v5285_v0 }
 0xb49   : > { %5566 = vrot.lane.b32.xlu1 %v6458_v40, %s8017_s11  ;;  %5315 = vadd.xlane.f32.xlu0 %v5314_v44  ;;  %v13592_v40 = vpop.eup %7677  ;;  %v15803_v44 = vld [vmem:[#allocation89_spill] sm:$0xff]  ;;  %7693 = vrcp.f32 %v13341_v13  ;;  %v15816_v13 = vld [vmem:[#allocation43_spill] sm:$0xff] }
 0xb4a   : > { %15799 = vst [vmem:[#allocation23_spill] sm:$0xff] %v13592_v40  ;;  %v13598_v47 = vpop.eup %7679  ;;  %v6476_v63 = vadd.f32 %v15804_v62, %v15803_v44  ;;  %v15811_v62 = vld [vmem:[#allocation99_spill] sm:$0xff]  ;;  %7695 = vrcp.f32 %v13309_v3 }
 0xb4b   : > { %v13601_v24 = vpop.eup %7681  ;;  %v4688_v52 = vadd.f32 %v13598_v47, %v13592_v40  ;;  %v6488_v40 = vadd.f32 %v15812_v58, %v15811_v62  ;;  %v15817_v62 = vld [vmem:[#allocation42_spill] sm:$0xff]  ;;  %7697 = vrcp.f32 %v13412_v59  ;;  %v15822_v59 = vld [vmem:[#allocation165_spill] sm:$0xff] }
 0xb4c   : > { %15802 = vst [vmem:[#allocation24_spill] sm:$0xff] %v13601_v24  ;;  %7699 = vrcp.f32 %v13387_v23  ;;  %v15823_v23 = vld [vmem:[#allocation157_spill] sm:$0xff] }
 0xb4d   : > { %5570 = vrot.lane.b32.xlu1 %v6464_v26, %s8017_s11  ;;  %4683 = vadd.xlane.f32.xlu0 %v4682_v6  ;;  %v13607_v26 = vpop.eup %7683  ;;  %v15807_v6 = vld [vmem:[#allocation107_spill] sm:$0xff] }
 0xb4e   : > { %15805 = vst [vmem:[#allocation21_spill] sm:$0xff] %v13607_v26  ;;  %v13610_v0 = vpop.eup %7685  ;;  %v6482_v34 = vadd.f32 %v15808_v50, %v15807_v6  ;;  %v15814_v50 = vld [vmem:[#allocation116_spill] sm:$0xff] }
 0xb4f   : > { %15806 = vst [vmem:[#allocation19_spill] sm:$0xff] %v13610_v0 }
 0xb51   : > { %5574 = vrot.lane.b32.xlu1 %v6470_v61, %s8017_s11  ;;  %5321 = vadd.xlane.f32.xlu0 %v5320_v30  ;;  %v5326_v61 = vadd.f32 %v13607_v26, %v13601_v24  ;;  %v13616_v30 = vpop.eup %7687  ;;  %v15826_v26 = vpack.c.bf16 %v13282_v31, %v13279_v1 }
 0xb52   : > { %15809 = vst [vmem:[#allocation20_spill] sm:$0xff] %v13616_v30 }
 0xb54   : > { %v13619_v44 = vpop.eup %7689 }
 0xb55   : > { %5578 = vrot.lane.b32.xlu1 %v6476_v63, %s8017_s11  ;;  %4689 = vadd.xlane.f32.xlu0 %v4688_v52  ;;  %15810 = vst [vmem:[#allocation26_spill] sm:$0xff] %v13619_v44  ;;  %v4694_v63 = vadd.f32 %v13616_v30, %v13610_v0  ;;  %v13626_v52 = vpop.eup %7691  ;;  %v6516_v0 = vadd.f32 %v15817_v62, %v15816_v13 }
 0xb56   : > { %15813 = vst [vmem:[#allocation140_spill] sm:$0xff] %v13626_v52  ;;  %v5332_v24 = vadd.f32 %v13626_v52, %v13619_v44 }
 0xb59   : > { %5582 = vrot.lane.b32.xlu1 %v6482_v34, %s8017_s11  ;;  %5327 = vadd.xlane.f32.xlu0 %v5326_v61  ;;  %v15815_v34 = vld [vmem:[#allocation117_spill] sm:$0xff] }
 0xb5a   : > { %v6494_v61 = vadd.f32 %v15815_v34, %v15814_v50  ;;  %v7694_v34 = vpop.eup %7693 }
 0xb5b   : > { %v4720_v62 = vmul.f32 %v7694_v34, %v15822_v59 }
 0xb5c   : > { %v4672_v6 = vpop.xlane.xlu0 %4671 }
 0xb5d   : > { %5586 = vrot.lane.b32.xlu1 %v6488_v40, %s8017_s11  ;;  %4695 = vadd.xlane.f32.xlu0 %v4694_v63  ;;  %v15818_v40 = vld [vmem:[#allocation74_spill] sm:$0xff]  ;;  %7701 = vrcp.f32 %v4672_v6 }
 0xb5e   : > { %v15819_v63 = vld [vmem:[#allocation90_spill] sm:$0xff]  ;;  %7703 = vrcp.f32 %v13526_v57 }
 0xb5f   : > { %v6522_v50 = vadd.f32 %v15819_v63, %v15818_v40  ;;  %v15824_v40 = vld [vmem:[#allocation95_spill] sm:$0xff]  ;;  %v15825_v63 = vld [vmem:[#allocation132_spill] sm:$0xff]  ;;  %7705 = vrcp.f32 %v13375_v60 }
 0xb60   : > { %v4764_v58 = vpop.permute.xlu0 %4763  ;;  %v6534_v30 = vadd.f32 %v15825_v63, %v15824_v40  ;;  %v15831_v40 = vld [vmem:[#allocation76_spill] sm:$0xff]  ;;  %7707 = vrcp.f32 %v13355_v39 }
 0xb61   : > { %5590 = vrot.lane.b32.xlu1 %v6494_v61, %s8017_s11  ;;  %5333 = vadd.xlane.f32.xlu0 %v5332_v24  ;;  %v7696_v24 = vpop.eup %7695  ;;  %v15820_v61 = vld [vmem:[#allocation92_spill] sm:$0xff]  ;;  %7709 = vrcp.f32 %v13490_v10  ;;  %v15861_v10 = vld [vmem:[#allocation9_spill] sm:$0xff] }
 0xb62   : > { %6764 = vmatpush3.bf16.msra.mxu0 %v4764_v58  ;;  %v15821_v58 = vld [vmem:[#allocation94_spill] sm:$0xff]  ;;  %7711 = vrcp.f32 %v13429_v9  ;;  %v13741_v9 = vpop.f32.mrf.mxu1 }
 0xb63   : > { %v6528_v13 = vadd.f32 %v15821_v58, %v15820_v61  ;;  %v15827_v61 = vld [vmem:[#allocation164_spill] sm:$0xff] }
 0xb64   : > { %v13638_v3 = vpop.xlane.xlu1 %5306  ;;  %v4719_v57 = vmul.f32 %v7694_v34, %v15827_v61  ;;  %v15828_v58 = vld [vmem:[#allocation128_spill] sm:$0xff]  ;;  %v13669_v61 = vpop.f32.mrf.mxu0 }
 0xb65   : > { %5626 = vrot.lane.b32.xlu1 %v6516_v0, %s8016_s10  ;;  %v4718_v0 = vmul.f32 %v7696_v24, %v15823_v23  ;;  %v15830_v23 = vld [vmem:[#allocation156_spill] sm:$0xff] }
 0xb66   : > { %v4717_v11 = vmul.f32 %v7696_v24, %v15830_v23 }
 0xb68   : > { %v4778_v44 = vpop.permute.xlu1 %4777  ;;  %v4747_v31 = vpack.c.bf16 %v4719_v57, %v4717_v11  ;;  %v15837_v11 = vld [vmem:[#allocation82_spill] sm:$0xff] }
 0xb69   : > { %5630 = vrot.lane.b32.xlu1 %v6522_v50, %s8016_s10  ;;  %6765 = vmatprep.subr.bf16.mxu0 %v4778_v44  ;;  %v4748_v50 = vpack.c.bf16 %v4720_v62, %v4718_v0  ;;  %v7698_v44 = vpop.eup %7697  ;;  %v15832_v62 = vld [vmem:[#allocation77_spill] sm:$0xff] }
 0xb6a   : > { %v7700_v6 = vpop.eup %7699  ;;  %v4724_v59 = vmul.f32 %v7698_v44, %v13327_v8  ;;  %v6452_v0 = vadd.f32 %v15832_v62, %v15831_v40  ;;  %v4723_v24 = vmul.f32 %v7698_v44, %v13325_v19  ;;  %v15838_v62 = vld [vmem:[#allocation57_spill] sm:$0xff] }
 0xb6b   : > { %v4722_v1 = vmul.f32 %v7700_v6, %v13294_v27  ;;  %v15840_v44 = vld [vmem:[#allocation85_spill] sm:$0xff] }
 0xb6c   : > { %v4762_v52 = vpop.permute.xlu1 %4761 }
 0xb6d   : > { %5634 = vrot.lane.b32.xlu1 %v6528_v13, %s8016_s10  ;;  %6766 = vmatpush3.bf16.msra.mxu0 %v4762_v52  ;;  %v15829_v13 = vld [vmem:[#allocation109_spill] sm:$0xff]  ;;  %v4750_v34 = vpack.c.bf16 %v4724_v59, %v4722_v1  ;;  %v4721_v59 = vmul.f32 %v7700_v6, %v13292_v37  ;;  %v15844_v6 = vld [vmem:[#allocation120_spill] sm:$0xff] }
 0xb6e   : > { %v6540_v52 = vadd.f32 %v15829_v13, %v15828_v58  ;;  %v15835_v58 = vld [vmem:[#allocation130_spill] sm:$0xff]  ;;  %v15836_v13 = vld [vmem:[#allocation72_spill] sm:$0xff] }
 0xb6f   : > { %v6552_v27 = vadd.f32 %v15836_v13, %v15835_v58  ;;  %v4749_v40 = vpack.c.bf16 %v4723_v24, %v4721_v59  ;;  %v15845_v58 = vld [vmem:[#allocation98_spill] sm:$0xff]  ;;  %v15848_v59 = vld [vmem:[#allocation123_spill] sm:$0xff] }
 0xb70   : > { %4842 = vmatmul.mubr.bf16.vlgmr.msra.gmra.mxu0 %v15826_v26  ;;  %v15833_v26 = vld [vmem:[#allocation136_spill] sm:$0xff]  ;;  %v15846_v13 = vld [vmem:[#allocation62_spill] sm:$0xff] }
 0xb71   : > { %5638 = vrot.lane.b32.xlu1 %v6534_v30, %s8016_s10  ;;  %4849 = vmatprep.mubr.bf16.mxu0 %v4748_v50  ;;  %v15834_v30 = vld [vmem:[#allocation129_spill] sm:$0xff]  ;;  %v7702_v50 = vpop.eup %7701 }
 0xb72   : > { %v6546_v63 = vadd.f32 %v15834_v30, %v15833_v26  ;;  %v7704_v8 = vpop.eup %7703  ;;  %v4728_v57 = vmul.f32 %v7702_v50, %v13395_v49  ;;  %v15841_v49 = vld [vmem:[#allocation87_spill] sm:$0xff]  ;;  %v15842_v26 = vld [vmem:[#allocation110_spill] sm:$0xff]  ;;  %v4727_v37 = vmul.f32 %v7702_v50, %v13393_v38  ;;  %v15849_v50 = vld [vmem:[#allocation112_spill] sm:$0xff] }
 0xb73   : > { %v4726_v23 = vmul.f32 %v7704_v8, %v13370_v55  ;;  %v6473_v30 = vadd.f32 %v15842_v26, %v15841_v49  ;;  %v15843_v55 = vld [vmem:[#allocation119_spill] sm:$0xff]  ;;  %v4725_v24 = vmul.f32 %v7704_v8, %v13368_v16  ;;  %v15851_v16 = vld [vmem:[#allocation125_spill] sm:$0xff]  ;;  %v15852_v8 = vld [vmem:[#allocation126_spill] sm:$0xff] }
 0xb74   : > { %v15855_v26 = vld [vmem:[#allocation35_spill] sm:$0xff] }
 0xb75   : > { %5642 = vrot.lane.b32.xlu1 %v6540_v52, %s8016_s10  ;;  %v13678_v52 = vpop.f32.mrf.mxu0  ;;  %v4752_v1 = vpack.c.bf16 %v4728_v57, %v4726_v23  ;;  %v15847_v57 = vld [vmem:[#allocation122_spill] sm:$0xff] }
 0xb76   : > { %v6586_v23 = vadd.f32 %v15848_v59, %v15847_v57  ;;  %v15862_v59 = vld [vmem:[#allocation73_spill] sm:$0xff] }
 0xb77   : > { %5562 = vrot.lane.b32.xlu0 %v6452_v0, %s8017_s11  ;;  %v15839_v0 = vld [vmem:[#allocation105_spill] sm:$0xff] }
 0xb78   : > { %4850 = vmatmul.mubr.bf16.gmra.mxu0 %v4747_v31  ;;  %v6558_v19 = vadd.f32 %v15839_v0, %v15838_v62  ;;  %v13687_v31 = vpop.f32.mrf.mxu0  ;;  %v6592_v0 = vadd.f32 %v15852_v8, %v15851_v16  ;;  %v5400_v16 = vpop.permute.xlu1 %5399  ;;  %v15863_v8 = vld [vmem:[#allocation148_spill] sm:$0xff] }
 0xb79   : > { %5646 = vrot.lane.b32.xlu1 %v6546_v63, %s8016_s10  ;;  %4857 = vmatprep.mubr.bf16.mxu0 %v4750_v34  ;;  %v6580_v63 = vadd.f32 %v15844_v6, %v15843_v55  ;;  %v15857_v55 = vld [vmem:[#allocation141_spill] sm:$0xff]  ;;  %v15858_v6 = vld [vmem:[#allocation143_spill] sm:$0xff] }
 0xb7a   : > { %v13696_v34 = vpop.f32.mrf.mxu0 }
 0xb7b   : > { %5568 = vrot.lane.b32.xlu0 %v15837_v11, %s8017_s11  ;;  %v4751_v11 = vpack.c.bf16 %v4727_v37, %v4725_v24  ;;  %v15859_v24 = vld [vmem:[#allocation66_spill] sm:$0xff] }
 0xb7c   : > { %v13705_v38 = vpop.f32.mrf.mxu0 }
 0xb7d   : > { %5650 = vrot.lane.b32.xlu1 %v6552_v27, %s8016_s10  ;;  %v6479_v27 = vadd.f32 %v15846_v13, %v15845_v58 }
 0xb7f   : > { %5572 = vrot.lane.b32.xlu0 %v15840_v44, %s8017_s11  ;;  %v15853_v44 = vld [vmem:[#allocation113_spill] sm:$0xff] }
 0xb80   : > { %4858 = vmatmul.mubr.bf16.gmra.mxu0 %v4749_v40  ;;  %v15850_v40 = vld [vmem:[#allocation63_spill] sm:$0xff] }
 0xb81   : > { %5654 = vrot.lane.b32.xlu1 %v6558_v19, %s8016_s10  ;;  %4865 = vmatprep.mubr.bf16.mxu0 %v4752_v1  ;;  %v6485_v62 = vadd.f32 %v15850_v40, %v15849_v50  ;;  %v13715_v19 = vpop.f32.mrf.mxu0  ;;  %v15854_v1 = vld [vmem:[#allocation115_spill] sm:$0xff] }
 0xb82   : > { %v6491_v49 = vadd.f32 %v15854_v1, %v15853_v44  ;;  %v15865_v1 = vld [vmem:[#allocation91_spill] sm:$0xff] }
 0xb83   : > { %5576 = vrot.lane.b32.xlu0 %v6473_v30, %s8017_s11  ;;  %v15856_v30 = vld [vmem:[#allocation36_spill] sm:$0xff]  ;;  %v13723_v60 = vpop.f32.mrf.mxu0 }
 0xb84   : > { %v6598_v37 = vadd.f32 %v15856_v30, %v15855_v26 }
 0xb85   : > { %5690 = vrot.lane.b32.xlu1 %v6580_v63, %s8014_s30  ;;  %v6604_v63 = vadd.f32 %v15858_v6, %v15857_v55  ;;  %v13732_v58 = vpop.f32.mrf.mxu0  ;;  %v15867_v55 = vpack.c.bf16 %v13319_v12, %v13316_v28  ;;  %v15868_v6 = vld [vmem:[#allocation150_spill] sm:$0xff] }
 0xb87   : > { %5580 = vrot.lane.b32.xlu0 %v6479_v27, %s8017_s11  ;;  %v7706_v27 = vpop.eup %7705  ;;  %v13739_v50 = vpop.f32.mrf.mxu0 }
 0xb88   : > { %4866 = vmatmul.mubr.bf16.gmra.mxu0 %v4751_v11  ;;  %v15860_v11 = vld [vmem:[#allocation6_spill] sm:$0xff] }
 0xb89   : > { %5694 = vrot.lane.b32.xlu1 %v6586_v23, %s8014_s30  ;;  %v6610_v57 = vadd.f32 %v15861_v10, %v15860_v11  ;;  %v7708_v23 = vpop.eup %7707  ;;  %v13751_v30 = vpop.f32.mrf.mxu0 }
 0xb8b   : > { %5584 = vrot.lane.b32.xlu0 %v6485_v62, %s8017_s11  ;;  %v5358_v62 = vmul.f32 %v7706_v27, %v13288_v43  ;;  %v13763_v11 = vpop.f32.mrf.mxu0 }
 0xb8d   : > { %5698 = vrot.lane.b32.xlu1 %v6592_v0, %s8014_s30  ;;  %v15864_v0 = vld [vmem:[#allocation149_spill] sm:$0xff] }
 0xb8e   : > { %v6616_v44 = vadd.f32 %v15864_v0, %v15863_v8  ;;  %v15874_v0 = vld [vmem:[#allocation69_spill] sm:$0xff] }
 0xb8f   : > { %5588 = vrot.lane.b32.xlu0 %v6491_v49, %s8017_s11  ;;  %v15866_v49 = vld [vmem:[#allocation168_spill] sm:$0xff] }
 0xb90   : > { %v5356_v26 = vmul.f32 %v7708_v23, %v15866_v49 }
 0xb91   : > { %5702 = vrot.lane.b32.xlu1 %v6598_v37, %s8014_s30  ;;  %v5310_v39 = vpop.xlane.xlu0 %5309  ;;  %v13753_v37 = vpop.f32.mrf.mxu1 }
 0xb92   : > { %7713 = vrcp.f32 %v5310_v39  ;;  %v5386_v43 = vpack.c.bf16 %v5358_v62, %v5356_v26  ;;  %v7710_v39 = vpop.eup %7709  ;;  %v13779_v26 = vpop.f32.mrf.mxu0 }
 0xb93   : > { %5624 = vrot.lane.b32.xlu0 %v15859_v24, %s8016_s10  ;;  %7715 = vrcp.f32 %v13638_v3  ;;  %v15869_v3 = vld [vmem:[#allocation10_spill] sm:$0xff]  ;;  %v15870_v24 = vld [vmem:[#allocation97_spill] sm:$0xff]  ;;  %v13765_v10 = vpop.f32.mrf.mxu1  ;;  %v5362_v12 = vmul.f32 %v7710_v39, %v13364_v32 }
 0xb95   : > { %5706 = vrot.lane.b32.xlu1 %v6604_v63, %s8014_s30  ;;  %v5402_v13 = vpop.permute.xlu0 %5401  ;;  %v6622_v63 = vadd.f32 %v15869_v3, %v15868_v6 }
 0xb96   : > { %6828 = vmatpush3.bf16.msra.mxu1 %v5402_v13  ;;  %v7712_v13 = vpop.eup %7711 }
 0xb97   : > { %5628 = vrot.lane.b32.xlu0 %v15862_v59, %s8016_s10  ;;  %v15871_v59 = vld [vmem:[#allocation102_spill] sm:$0xff]  ;;  %v5360_v49 = vmul.f32 %v7712_v13, %v13333_v33 }
 0xb99   : > { %5710 = vrot.lane.b32.xlu1 %v6610_v57, %s8014_s30  ;;  %v5416_v40 = vpop.permute.xlu0 %5415  ;;  %v5357_v57 = vmul.f32 %v7706_v27, %v13286_v22  ;;  %v13781_v22 = vpop.f32.mrf.mxu1 }
 0xb9a   : > { %6829 = vmatprep.subr.bf16.mxu1 %v5416_v40  ;;  %v15872_v40 = vld [vmem:[#allocation131_spill] sm:$0xff] }
 0xb9b   : > { %5632 = vrot.lane.b32.xlu0 %v15865_v1, %s8016_s10  ;;  %6830 = vmatpush3.bf16.msra.mxu1 %v5400_v16  ;;  %v6537_v62 = vadd.f32 %v15872_v40, %v15871_v59  ;;  %v15873_v16 = vld [vmem:[#allocation167_spill] sm:$0xff]  ;;  %v6678_v40 = vpop.f32.mrf.mxu0 }
 0xb9c   : > { %v5355_v8 = vmul.f32 %v7708_v23, %v15873_v16  ;;  %v5388_v23 = vpack.c.bf16 %v5362_v12, %v5360_v49  ;;  %v15880_v16 = vld [vmem:[#allocation86_spill] sm:$0xff]  ;;  %v15882_v49 = vld [vmem:[#allocation133_spill] sm:$0xff] }
 0xb9d   : > { %5714 = vrot.lane.b32.xlu1 %v6616_v44, %s8014_s30  ;;  %v15875_v44 = vld [vmem:[#allocation96_spill] sm:$0xff] }
 0xb9e   : > { %5480 = vmatmul.mubr.bf16.vlgmr.msra.gmra.mxu1 %v15867_v55  ;;  %v6644_v1 = vadd.f32 %v15875_v44, %v15874_v0  ;;  %v5385_v27 = vpack.c.bf16 %v5357_v57, %v5355_v8  ;;  %v15877_v55 = vld [vmem:[#allocation93_spill] sm:$0xff]  ;;  %v5361_v57 = vmul.f32 %v7710_v39, %v13362_v2  ;;  %v15881_v8 = vld [vmem:[#allocation100_spill] sm:$0xff] }
 0xb9f   : > { %5636 = vrot.lane.b32.xlu0 %v15870_v24, %s8016_s10  ;;  %5487 = vmatprep.mubr.bf16.mxu1 %v5386_v43  ;;  %v15876_v43 = vld [vmem:[#allocation138_spill] sm:$0xff]  ;;  %v7714_v3 = vpop.eup %7713  ;;  %v6549_v0 = vadd.f32 %v15881_v8, %v15880_v16 }
 0xba0   : > { %v6543_v6 = vadd.f32 %v15877_v55, %v15876_v43  ;;  %v15879_v24 = vld [vmem:[#allocation106_spill] sm:$0xff]  ;;  %v7716_v33 = vpop.eup %7715  ;;  %v5366_v44 = vmul.f32 %v7714_v3, %v13442_v53 }
 0xba1   : > { %5718 = vrot.lane.b32.xlu1 %v6622_v63, %s8014_s30  ;;  %v13771_v28 = vpop.xlane.xlu1 %4677  ;;  %v15878_v63 = vld [vmem:[#allocation111_spill] sm:$0xff]  ;;  %v5364_v55 = vmul.f32 %v7716_v33, %v13401_v18  ;;  %v5363_v8 = vmul.f32 %v7716_v33, %v13399_v36  ;;  %v15887_v36 = vld [vmem:[#allocation121_spill] sm:$0xff] }
 0xba2   : > { %v6650_v59 = vadd.f32 %v15879_v24, %v15878_v63  ;;  %v15885_v63 = vld [vmem:[#allocation70_spill] sm:$0xff]  ;;  %7717 = vrcp.f32 %v13771_v28 }
 0xba3   : > { %5640 = vrot.lane.b32.xlu0 %v6537_v62, %s8016_s10  ;;  %v13791_v62 = vpop.f32.mrf.mxu1  ;;  %v5390_v53 = vpack.c.bf16 %v5366_v44, %v5364_v55 }
 0xba5   : > { %5754 = vrot.lane.b32.xlu1 %v6644_v1, %s8012_s8  ;;  %v13786_v32 = vpop.xlane.xlu1 %4680  ;;  %v5359_v1 = vmul.f32 %v7712_v13, %v13331_v15  ;;  %v13805_v2 = vpop.f32.mrf.mxu1  ;;  %v6662_v15 = vadd.f32 %v13678_v52, %v13669_v61  ;;  %v15886_v61 = vld [vmem:[#allocation118_spill] sm:$0xff] }
 0xba6   : > { %5488 = vmatmul.mubr.bf16.gmra.mxu1 %v5385_v27  ;;  %v15883_v27 = vld [vmem:[#allocation134_spill] sm:$0xff] }
 0xba7   : > { %5644 = vrot.lane.b32.xlu0 %v6543_v6, %s8016_s10  ;;  %5495 = vmatprep.mubr.bf16.mxu1 %v5388_v23  ;;  %v6656_v43 = vadd.f32 %v15883_v27, %v15882_v49  ;;  %v6679_v6 = vpop.f32.mrf.mxu0  ;;  %v5387_v39 = vpack.c.bf16 %v5361_v57, %v5359_v1  ;;  %v15884_v23 = vld [vmem:[#allocation139_spill] sm:$0xff]  ;;  %v13817_v13 = vpop.f32.mrf.mxu1  ;;  %v5365_v57 = vmul.f32 %v7714_v3, %v13438_v4  ;;  %v15888_v27 = vld [vmem:[#allocation124_spill] sm:$0xff] }
 0xba8   : > { %v6555_v24 = vadd.f32 %v15885_v63, %v15884_v23  ;;  %v6674_v3 = vadd.f32 %v13751_v30, %v13739_v50  ;;  %v6680_v49 = vadd.f32 %v6679_v6, %v6678_v40  ;;  %v15889_v30 = vld [vmem:[#allocation127_spill] sm:$0xff]  ;;  %v15890_v63 = vld [vmem:[#allocation40_spill] sm:$0xff] }
 0xba9   : > { %5758 = vrot.lane.b32.xlu1 %v6650_v59, %s8012_s8  ;;  %v13797_v12 = vpop.xlane.xlu1 %5318  ;;  %v13815_v18 = vpop.f32.mrf.mxu0  ;;  %v5389_v1 = vpack.c.bf16 %v5365_v57, %v5363_v8  ;;  %v15892_v6 = vld [vmem:[#allocation151_spill] sm:$0xff] }
 0xbaa   : > { %v13830_v44 = vpop.f32.mrf.mxu1 }
 0xbab   : > { %5648 = vrot.lane.b32.xlu0 %v6549_v0, %s8016_s10  ;;  %v6668_v0 = vadd.f32 %v13715_v19, %v13705_v38  ;;  %v13828_v52 = vpop.f32.mrf.mxu0 }
 0xbac   : > { %v6736_v19 = vpop.f32.mrf.mxu1 }
 0xbad   : > { %5762 = vrot.lane.b32.xlu1 %v6656_v43, %s8012_s8  ;;  %v13810_v59 = vpop.xlane.xlu1 %4686  ;;  %v6684_v38 = vpop.f32.mrf.mxu0 }
 0xbae   : > { %5496 = vmatmul.mubr.bf16.gmra.mxu1 %v5387_v39  ;;  %v6737_v55 = vpop.f32.mrf.mxu1 }
 0xbaf   : > { %5652 = vrot.lane.b32.xlu0 %v6555_v24, %s8016_s10  ;;  %5503 = vmatprep.mubr.bf16.mxu1 %v5390_v53  ;;  %v6685_v43 = vpop.f32.mrf.mxu0  ;;  %v15891_v24 = vld [vmem:[#allocation46_spill] sm:$0xff] }
 0xbb0   : > { %v6686_v50 = vadd.f32 %v6685_v43, %v6684_v38  ;;  %v13849_v23 = vpop.f32.mrf.mxu1  ;;  %v6601_v53 = vadd.f32 %v15891_v24, %v15890_v63  ;;  %v15897_v38 = vld [vmem:[#allocation155_spill] sm:$0xff]  ;;  %v15898_v43 = vld [vmem:[#allocation146_spill] sm:$0xff] }
 0xbb1   : > { %5766 = vrot.lane.b32.xlu1 %v6662_v15, %s8012_s8  ;;  %v13821_v16 = vpop.xlane.xlu1 %5324  ;;  %v15893_v15 = vld [vmem:[#allocation152_spill] sm:$0xff] }
 0xbb2   : > { %v6708_v57 = vadd.f32 %v15893_v15, %v15892_v6  ;;  %v13859_v8 = vpop.f32.mrf.mxu1  ;;  %v15901_v6 = vld [vmem:[#allocation160_spill] sm:$0xff] }
 0xbb3   : > { %5688 = vrot.lane.b32.xlu0 %v15886_v61, %s8014_s30  ;;  %v15895_v61 = vld [vmem:[#allocation5_spill] sm:$0xff] }
 0xbb5   : > { %5770 = vrot.lane.b32.xlu1 %v6668_v0, %s8012_s8  ;;  %v13833_v4 = vpop.xlane.xlu1 %4692  ;;  %v15894_v0 = vld [vmem:[#allocation145_spill] sm:$0xff] }
 0xbb6   : > { %5504 = vmatmul.mubr.bf16.gmra.mxu1 %v5389_v1  ;;  %v6607_v1 = vadd.f32 %v15895_v61, %v15894_v0  ;;  %v15902_v0 = vld [vmem:[#allocation8_spill] sm:$0xff]  ;;  %v15903_v61 = vld [vmem:[#allocation11_spill] sm:$0xff] }
 0xbb7   : > { %5692 = vrot.lane.b32.xlu0 %v15887_v36, %s8014_s30  ;;  %v15896_v36 = vld [vmem:[#allocation154_spill] sm:$0xff] }
 0xbb9   : > { %5774 = vrot.lane.b32.xlu1 %v6674_v3, %s8012_s8  ;;  %v13840_v33 = vpop.xlane.xlu1 %5330 }
 0xbbb   : > { %5696 = vrot.lane.b32.xlu0 %v15888_v27, %s8014_s30  ;;  %v6742_v27 = vpop.f32.mrf.mxu1 }
 0xbbd   : > { %5778 = vrot.lane.b32.xlu1 %v6680_v49, %s8012_s8  ;;  %v13845_v39 = vpop.permute.xlu1 %5560  ;;  %v6714_v49 = vadd.f32 %v15897_v38, %v15896_v36  ;;  %v6726_v38 = vadd.f32 %v13753_v37, %v13741_v9  ;;  %v7718_v37 = vpop.eup %7717 }
 0xbbf   : > { %5700 = vrot.lane.b32.xlu0 %v15889_v30, %s8014_s30 }
 0xbc1   : > { %5782 = vrot.lane.b32.xlu1 %v6686_v50, %s8012_s8  ;;  %v13854_v40 = vpop.permute.xlu1 %5564  ;;  %v15899_v50 = vld [vmem:[#allocation147_spill] sm:$0xff] }
 0xbc2   : > { %v6613_v30 = vadd.f32 %v15899_v50, %v15898_v43 }
 0xbc3   : > { %5704 = vrot.lane.b32.xlu0 %v6601_v53, %s8014_s30  ;;  %v15900_v53 = vld [vmem:[#allocation159_spill] sm:$0xff] }
 0xbc4   : > { %v6720_v15 = vadd.f32 %v15901_v6, %v15900_v53 }
 0xbc5   : > { %5818 = vrot.lane.b32.xlu1 %v6708_v57, %s8010_s13  ;;  %v13864_v3 = vpop.permute.xlu1 %5566  ;;  %v6743_v57 = vpop.f32.mrf.mxu1 }
 0xbc7   : > { %5708 = vrot.lane.b32.xlu0 %v6607_v1, %s8014_s30  ;;  %v6619_v1 = vadd.f32 %v15903_v61, %v15902_v0  ;;  %v15905_v0 = vld [vmem:[#allocation114_spill] sm:$0xff] }
 0xbc9   : > { %5822 = vrot.lane.b32.xlu1 %v6714_v49, %s8010_s13  ;;  %v13873_v63 = vpop.permute.xlu1 %5570  ;;  %v13886_v49 = vpop.f32.mrf.mxu1 }
 0xbca   : > { %v4675_v24 = vpop.xlane.xlu0 %4674 }
 0xbcb   : > { %7719 = vrcp.f32 %v4675_v24  ;;  %5712 = vrot.lane.b32.xlu0 %v6613_v30, %s8014_s30  ;;  %v6732_v30 = vadd.f32 %v13805_v2, %v13791_v62  ;;  %v15904_v24 = vld [vmem:[#allocation58_spill] sm:$0xff]  ;;  %v13895_v53 = vpop.f32.mrf.mxu1 }
 0xbcd   : > { %5826 = vrot.lane.b32.xlu1 %v6720_v15, %s8010_s13  ;;  %v13881_v36 = vpop.permute.xlu1 %5574  ;;  %v6738_v15 = vadd.f32 %v6737_v55, %v6736_v19  ;;  %v6748_v2 = vpop.f32.mrf.mxu1  ;;  %v4731_v19 = vmul.f32 %v7718_v37, %v13460_v17 }
 0xbce   : > { %v5313_v28 = vpop.xlane.xlu0 %5312 }
 0xbcf   : > { %5716 = vrot.lane.b32.xlu0 %v6619_v1, %s8014_s30  ;;  %7721 = vrcp.f32 %v5313_v28  ;;  %v4732_v1 = vmul.f32 %v7718_v37, %v13464_v7 }
 0xbd1   : > { %5830 = vrot.lane.b32.xlu1 %v6726_v38, %s8010_s13  ;;  %v13889_v43 = vpop.permute.xlu1 %5578  ;;  %v6744_v38 = vadd.f32 %v6743_v57, %v6742_v27  ;;  %v15909_v57 = vld [vmem:[#allocation135_spill] sm:$0xff] }
 0xbd2   : > { %v5316_v50 = vpop.xlane.xlu0 %5315 }
 0xbd3   : > { %7723 = vrcp.f32 %v5316_v50  ;;  %5752 = vrot.lane.b32.xlu0 %v15904_v24, %s8012_s8  ;;  %v15906_v50 = vld [vmem:[#allocation108_spill] sm:$0xff]  ;;  %v15907_v24 = vld [vmem:[#allocation71_spill] sm:$0xff] }
 0xbd4   : > { %7725 = vrcp.f32 %v13786_v32 }
 0xbd5   : > { %5834 = vrot.lane.b32.xlu1 %v6732_v30, %s8010_s13  ;;  %v13899_v9 = vpop.permute.xlu1 %5582 }
 0xbd6   : > { %v4684_v6 = vpop.xlane.xlu0 %4683 }
 0xbd7   : > { %7727 = vrcp.f32 %v4684_v6  ;;  %5756 = vrot.lane.b32.xlu0 %v15905_v0, %s8012_s8  ;;  %v15908_v6 = vld [vmem:[#allocation65_spill] sm:$0xff]  ;;  %v6749_v0 = vpop.f32.mrf.mxu1 }
 0xbd8   : > { %v7720_v62 = vpop.eup %7719  ;;  %7729 = vrcp.f32 %v13797_v12  ;;  %v6750_v27 = vadd.f32 %v6749_v0, %v6748_v2 }
 0xbd9   : > { %5838 = vrot.lane.b32.xlu1 %v6738_v15, %s8010_s13  ;;  %v13905_v61 = vpop.permute.xlu1 %5586  ;;  %v4730_v32 = vmul.f32 %v7720_v62, %v13542_v29  ;;  %v4729_v28 = vmul.f32 %v7720_v62, %v13538_v20  ;;  %v6430_v15 = vadd.f32 %v15908_v6, %v15907_v24 }
 0xbda   : > { %v5322_v55 = vpop.xlane.xlu0 %5321 }
 0xbdb   : > { %7731 = vrcp.f32 %v5322_v55  ;;  %5760 = vrot.lane.b32.xlu0 %v15906_v50, %s8012_s8  ;;  %v4754_v30 = vpack.c.bf16 %v4732_v1, %v4730_v32  ;;  %v4753_v12 = vpack.c.bf16 %v4731_v19, %v4729_v28  ;;  %v15910_v55 = vld [vmem:[#allocation56_spill] sm:$0xff] }
 0xbdc   : > { %7733 = vrcp.f32 %v13810_v59  ;;  %v7722_v17 = vpop.eup %7721  ;;  %v6665_v59 = vadd.f32 %v13696_v34, %v13687_v31 }
 0xbdd   : > { %5842 = vrot.lane.b32.xlu1 %v6744_v38, %s8010_s13  ;;  %v5591_v20 = vpop.permute.xlu1 %5590  ;;  %4873 = vmatprep.mubr.bf16.mxu0 %v4754_v30  ;;  %v5368_v1 = vmul.f32 %v7722_v17, %v13554_v54  ;;  %v5367_v2 = vmul.f32 %v7722_v17, %v13548_v51  ;;  %v15911_v38 = vld [vmem:[#allocation55_spill] sm:$0xff]  ;;  %v6671_v54 = vadd.f32 %v13732_v58, %v13723_v60 }
 0xbde   : > { %v13918_v7 = vsel %vm5992_vm15, %v6430_v15, %v5591_v20  ;;  %4874 = vmatmul.mubr.bf16.gmra.mxu0 %v4753_v12  ;;  %v4690_v29 = vpop.xlane.xlu0 %4689  ;;  %v6394_v50 = vadd.f32 %v15911_v38, %v15910_v55  ;;  %v15912_v58 = vld [vmem:[#allocation59_spill] sm:$0xff] }
 0xbdf   : > { %7735 = vrcp.f32 %v4690_v29  ;;  %5764 = vrot.lane.b32.xlu0 %v15909_v57, %s8012_s8 }
 0xbe0   : > { %v7724_v37 = vpop.eup %7723  ;;  %7737 = vrcp.f32 %v13821_v16 }
 0xbe1   : > { %v7726_v62 = vpop.eup %7725  ;;  %5846 = vrot.lane.b32.xlu1 %v6750_v27, %s8010_s13  ;;  %v13926_v32 = vpop.permute.xlu1 %5626  ;;  %v5370_v28 = vmul.f32 %v7724_v37, %v13567_v42  ;;  %v5369_v19 = vmul.f32 %v7724_v37, %v13561_v46  ;;  %v5996_v46 = vsel %vm5992_vm15, %v6394_v50, %v13864_v3 }
 0xbe2   : > { %v5328_v30 = vpop.xlane.xlu0 %5327  ;;  %v4734_v42 = vmul.f32 %v7726_v62, %v13474_v45  ;;  %v4733_v6 = vmul.f32 %v7726_v62, %v13468_v5 }
 0xbe3   : > { %7739 = vrcp.f32 %v5328_v30  ;;  %5768 = vrot.lane.b32.xlu0 %v6665_v59, %s8012_s8  ;;  %v5392_v31 = vpack.c.bf16 %v5370_v28, %v5368_v1  ;;  %v5391_v34 = vpack.c.bf16 %v5369_v19, %v5367_v2  ;;  %v15916_v2 = vld [vmem:[#allocation48_spill] sm:$0xff] }
 0xbe4   : > { %v7728_v16 = vpop.eup %7727  ;;  %7741 = vrcp.f32 %v13833_v4  ;;  %v15913_v4 = vld [vmem:[#allocation44_spill] sm:$0xff] }
 0xbe5   : > { %v7730_v51 = vpop.eup %7729  ;;  %v5631_v12 = vpop.permute.xlu1 %5630  ;;  %5511 = vmatprep.mubr.bf16.mxu1 %v5392_v31  ;;  %v4736_v24 = vmul.f32 %v7728_v16, %v13580_v14  ;;  %v4735_v15 = vmul.f32 %v7728_v16, %v13574_v41  ;;  %v6400_v45 = vadd.f32 %v15913_v4, %v15912_v58  ;;  %v6677_v14 = vadd.f32 %v13779_v26, %v13763_v11  ;;  %v15914_v26 = vld [vmem:[#allocation41_spill] sm:$0xff]  ;;  %v15918_v31 = vld [vmem:[#allocation12_spill] sm:$0xff]  ;;  %v15919_v16 = vld [vmem:[#allocation23_spill] sm:$0xff] }
 0xbe6   : > { %v13945_v0 = vsel %vm6009_vm4, %v5996_v46, %v5631_v12  ;;  %5512 = vmatmul.mubr.bf16.gmra.mxu1 %v5391_v34  ;;  %v4696_v60 = vpop.xlane.xlu0 %4695  ;;  %v5372_v5 = vmul.f32 %v7730_v51, %v13480_v25  ;;  %v5371_v37 = vmul.f32 %v7730_v51, %v13476_v21  ;;  %v6683_v21 = vadd.f32 %v13828_v52, %v13815_v18  ;;  %v15920_v46 = vld [vmem:[#allocation16_spill] sm:$0xff]  ;;  %v15922_v58 = vld [vmem:[#allocation21_spill] sm:$0xff] }
 0xbe7   : > { %7743 = vrcp.f32 %v4696_v60  ;;  %5772 = vrot.lane.b32.xlu0 %v6671_v54, %s8012_s8  ;;  %v4756_v3 = vpack.c.bf16 %v4736_v24, %v4734_v42  ;;  %v4755_v20 = vpack.c.bf16 %v4735_v15, %v4733_v6  ;;  %v5998_v29 = vsel %vm5992_vm15, %v6400_v45, %v13873_v63  ;;  %v15921_v6 = vld [vmem:[#allocation49_spill] sm:$0xff]  ;;  %v15923_v45 = vld [vmem:[#allocation15_spill] sm:$0xff] }
 0xbe8   : > { %v7732_v17 = vpop.eup %7731  ;;  %7745 = vrcp.f32 %v13840_v33  ;;  %v15915_v33 = vld [vmem:[#allocation67_spill] sm:$0xff]  ;;  %v6002_v15 = vsel %vm5992_vm15, %v15921_v6, %v13889_v43 }
 0xbe9   : > { %v7734_v41 = vpop.eup %7733  ;;  %v5635_v27 = vpop.permute.xlu1 %5634  ;;  %4881 = vmatprep.mubr.bf16.mxu0 %v4756_v3  ;;  %v5374_v57 = vmul.f32 %v7732_v17, %v13589_v48  ;;  %v5373_v59 = vmul.f32 %v7732_v17, %v13583_v56  ;;  %v6406_v25 = vadd.f32 %v15915_v33, %v15914_v26  ;;  %v15917_v48 = vld [vmem:[#allocation52_spill] sm:$0xff] }
 0xbea   : > { %v13960_v62 = vsel %vm6009_vm4, %v5998_v29, %v5635_v27  ;;  %4882 = vmatmul.mubr.bf16.gmra.mxu0 %v4755_v20  ;;  %v5334_v11 = vpop.xlane.xlu0 %5333  ;;  %v6388_v19 = vadd.f32 %v15917_v48, %v15916_v2  ;;  %v4738_v56 = vmul.f32 %v7734_v41, %v13488_v35  ;;  %v4737_v34 = vmul.f32 %v7734_v41, %v15918_v31  ;;  %v15924_v20 = vld [vmem:[#allocation24_spill] sm:$0xff]  ;;  %v15926_v27 = vld [vmem:[#allocation14_spill] sm:$0xff] }
 0xbeb   : > { %7747 = vrcp.f32 %v5334_v11  ;;  %5776 = vrot.lane.b32.xlu0 %v6677_v14, %s8012_s8  ;;  %v5394_v63 = vpack.c.bf16 %v5374_v57, %v5372_v5  ;;  %v5393_v1 = vpack.c.bf16 %v5373_v59, %v5371_v37  ;;  %v6000_v38 = vsel %vm5992_vm15, %v6406_v25, %v13881_v36  ;;  %v15927_v59 = vld [vmem:[#allocation53_spill] sm:$0xff]  ;;  %v15928_v33 = vld [vmem:[#allocation20_spill] sm:$0xff] }
 0xbec   : > { %v7736_v28 = vpop.eup %7735  ;;  %v6004_v11 = vsel %vm5992_vm15, %v15927_v59, %v13899_v9  ;;  %v15941_v59 = vld [vmem:[#allocation37_spill] sm:$0xff] }
 0xbed   : > { %v7738_v55 = vpop.eup %7737  ;;  %v5639_v50 = vpop.permute.xlu1 %5638  ;;  %5519 = vmatprep.mubr.bf16.mxu1 %v5394_v63  ;;  %v4740_v30 = vmul.f32 %v7736_v28, %v13598_v47  ;;  %v4739_v54 = vmul.f32 %v7736_v28, %v15919_v16  ;;  %v15929_v63 = vld [vmem:[#allocation13_spill] sm:$0xff]  ;;  %v15930_v28 = vld [vmem:[#allocation19_spill] sm:$0xff]  ;;  %v15934_v16 = vld [vmem:[#allocation140_spill] sm:$0xff] }
 0xbee   : > { %v13976_v42 = vsel %vm6009_vm4, %v6000_v38, %v5639_v50  ;;  %5520 = vmatmul.mubr.bf16.gmra.mxu1 %v5393_v1  ;;  %v5563_v51 = vpop.permute.xlu0 %5562  ;;  %v5376_v12 = vmul.f32 %v7738_v55, %v15920_v46  ;;  %v5375_v3 = vmul.f32 %v7738_v55, %v15923_v45  ;;  %v15932_v50 = vld [vmem:[#allocation18_spill] sm:$0xff] }
 0xbef   : > { %v5994_v18 = vsel %vm5992_vm15, %v6388_v19, %v5563_v51  ;;  %5780 = vrot.lane.b32.xlu0 %v6683_v21, %s8012_s8  ;;  %v4758_v35 = vpack.c.bf16 %v4740_v30, %v4738_v56  ;;  %v4757_v52 = vpack.c.bf16 %v4739_v54, %v4737_v34  ;;  %v15931_v21 = vld [vmem:[#allocation153_spill] sm:$0xff]  ;;  %v15933_v30 = vld [vmem:[#allocation64_spill] sm:$0xff]  ;;  %s6366_s8 = sshll.u32 %s8067_s19, 11 }
 0xbf0   : > { %v7740_v36 = vpop.eup %7739  ;;  %v6011_v47 = vsel %vm6009_vm4, %v5994_v18, %v13926_v32  ;;  %v15925_v32 = vld [vmem:[#allocation7_spill] sm:$0xff]  ;;  %v6006_v31 = vsel %vm5992_vm15, %v15933_v30, %v13905_v61  ;;  %v15935_v51 = vld [vmem:[#allocation17_spill] sm:$0xff]  ;;  %s14371_s12 = scalar_lea.hbm %s14422_s4, %s6366_s8 }
 0xbf1   : > { %v7742_v24 = vpop.eup %7741  ;;  %v5643_v60 = vpop.permute.xlu1 %5642  ;;  %4889 = vmatprep.mubr.bf16.mxu0 %v4758_v35  ;;  %v5378_v4 = vmul.f32 %v7740_v36, %v15922_v58  ;;  %v5377_v17 = vmul.f32 %v7740_v36, %v15924_v20  ;;  %v15936_v35 = vld [vmem:[#allocation26_spill] sm:$0xff]  ;;  %v15938_v58 = vld [vmem:[#allocation161_spill] sm:$0xff] }
 0xbf2   : > { %v13990_v14 = vsel %vm6009_vm4, %v6002_v15, %v5643_v60  ;;  %4890 = vmatmul.mubr.bf16.gmra.mxu0 %v4757_v52  ;;  %v13992_v5 = vpop.permute.xlu0 %5568  ;;  %v4742_v57 = vmul.f32 %v7742_v24, %v15926_v27  ;;  %v4741_v1 = vmul.f32 %v7742_v24, %v15929_v63  ;;  %v15943_v63 = vld [vmem:[#allocation39_spill] sm:$0xff] }
 0xbf3   : > { %5816 = vrot.lane.b32.xlu0 %v15925_v32, %s8010_s13  ;;  %v5396_v41 = vpack.c.bf16 %v5378_v4, %v5376_v12  ;;  %v5395_v29 = vpack.c.bf16 %v5377_v17, %v5375_v3  ;;  %v15937_v12 = vld [vmem:[#allocation158_spill] sm:$0xff]  ;;  %v6729_v4 = vadd.f32 %v13781_v22, %v13765_v10  ;;  %v6735_v17 = vadd.f32 %v13830_v44, %v13817_v13 }
 0xbf4   : > { %v7744_v43 = vpop.eup %7743  ;;  %v6741_v10 = vadd.f32 %v13859_v8, %v13849_v23  ;;  %v5995_v23 = vsel %vm5992_vm15, %v15941_v59, %v13854_v40 }
 0xbf5   : > { %v7746_v37 = vpop.eup %7745  ;;  %v5647_v26 = vpop.permute.xlu1 %5646  ;;  %5527 = vmatprep.mubr.bf16.mxu1 %v5396_v41  ;;  %v4744_v25 = vmul.f32 %v7744_v43, %v15928_v33  ;;  %v4743_v2 = vmul.f32 %v7744_v43, %v15930_v28 }
 0xbf6   : > { %v6021_v48 = vsel %vm6009_vm4, %v6004_v11, %v5647_v26  ;;  %5528 = vmatmul.mubr.bf16.gmra.mxu1 %v5395_v29  ;;  %v5573_v19 = vpop.permute.xlu0 %5572  ;;  %v5380_v9 = vmul.f32 %v7746_v37, %v15932_v50  ;;  %v5379_v18 = vmul.f32 %v7746_v37, %v15935_v51  ;;  %v15939_v29 = vld [vmem:[#allocation50_spill] sm:$0xff] }
 0xbf7   : > { %5820 = vrot.lane.b32.xlu0 %v15931_v21, %s8010_s13  ;;  %v4760_v56 = vpack.c.bf16 %v4744_v25, %v4742_v57  ;;  %v4759_v55 = vpack.c.bf16 %v4743_v2, %v4741_v1  ;;  %v6747_v57 = vadd.f32 %v13895_v53, %v13886_v49  ;;  %v15942_v26 = vld [vmem:[#allocation38_spill] sm:$0xff] }
 0xbf8   : > { %v7748_v38 = vpop.eup %7747  ;;  %v5997_v33 = vsel %vm5992_vm15, %v15942_v26, %v13992_v5 }
 0xbf9   : > { %v5651_v34 = vpop.permute.xlu1 %5650  ;;  %4897 = vmatprep.mubr.bf16.mxu0 %v4760_v56  ;;  %v5382_v54 = vmul.f32 %v7748_v38, %v15934_v16  ;;  %v5381_v52 = vmul.f32 %v7748_v38, %v15936_v35  ;;  %v15944_v56 = vld [vmem:[#allocation45_spill] sm:$0xff]  ;;  %v15946_v16 = vld [vmem:[#allocation60_spill] sm:$0xff] }
 0xbfa   : > { %v6023_v36 = vsel %vm6009_vm4, %v6006_v31, %v5651_v34  ;;  %4898 = vmatmul.mubr.bf16.gmra.mxu0 %v4759_v55  ;;  %v5577_v46 = vpop.permute.xlu0 %5576 }
 0xbfb   : > { %5824 = vrot.lane.b32.xlu0 %v15937_v12, %s8010_s13  ;;  %v5398_v24 = vpack.c.bf16 %v5382_v54, %v5380_v9  ;;  %v5397_v6 = vpack.c.bf16 %v5381_v52, %v5379_v18  ;;  %v6001_v55 = vsel %vm5992_vm15, %v15944_v56, %v5577_v46  ;;  %v15945_v9 = vld [vmem:[#allocation68_spill] sm:$0xff] }
 0xbfd   : > { %v5655_v15 = vpop.permute.xlu1 %5654  ;;  %5535 = vmatprep.mubr.bf16.mxu1 %v5398_v24 }
 0xbfe   : > { %v6025_v61 = vsel %vm6009_vm4, %v13918_v7, %v5655_v15  ;;  %5536 = vmatmul.mubr.bf16.gmra.mxu1 %v5397_v6  ;;  %v5581_v60 = vpop.permute.xlu0 %5580 }
 0xbff   : > { %5828 = vrot.lane.b32.xlu0 %v15938_v58, %s8010_s13  ;;  %v6003_v30 = vsel %vm5992_vm15, %v15945_v9, %v5581_v60 }
 0xc01   : > { %v5691_v45 = vpop.permute.xlu1 %5690 }
 0xc02   : > { %v6028_v3 = vsel %vm6026_vm2, %v6011_v47, %v5691_v45  ;;  %v5585_v20 = vpop.permute.xlu0 %5584  ;;  %v15940_v47 = vld [vmem:[#allocation51_spill] sm:$0xff] }
 0xc03   : > { %5832 = vrot.lane.b32.xlu0 %v6729_v4, %s8010_s13  ;;  %v5993_v27 = vsel %vm5992_vm15, %v15940_v47, %v13845_v39  ;;  %v6005_v54 = vsel %vm5992_vm15, %v15946_v16, %v5585_v20 }
 0xc05   : > { %v5695_v32 = vpop.permute.xlu1 %5694 }
 0xc06   : > { %v6030_v7 = vsel %vm6026_vm2, %v13945_v0, %v5695_v32  ;;  %v5589_v41 = vpop.permute.xlu0 %5588 }
 0xc07   : > { %v6007_v43 = vsel %vm5992_vm15, %v15939_v29, %v5589_v41  ;;  %5836 = vrot.lane.b32.xlu0 %v6735_v17, %s8010_s13 }
 0xc09   : > { %v5699_v22 = vpop.permute.xlu1 %5698 }
 0xc0a   : > { %v6032_v13 = vsel %vm6026_vm2, %v13960_v62, %v5699_v22  ;;  %v5625_v44 = vpop.permute.xlu0 %5624 }
 0xc0b   : > { %v6010_v0 = vsel %vm6009_vm4, %v5993_v27, %v5625_v44  ;;  %5840 = vrot.lane.b32.xlu0 %v6741_v10, %s8010_s13 }
 0xc0d   : > { %v5703_v37 = vpop.permute.xlu1 %5702 }
 0xc0e   : > { %v6034_v8 = vsel %vm6026_vm2, %v13976_v42, %v5703_v37  ;;  %v5629_v39 = vpop.permute.xlu0 %5628  ;;  %v5999_v42 = vsel %vm5992_vm15, %v15943_v63, %v5573_v19 }
 0xc0f   : > { %v6012_v11 = vsel %vm6009_vm4, %v5995_v23, %v5629_v39  ;;  %5844 = vrot.lane.b32.xlu0 %v6747_v57, %s8010_s13 }
 0xc11   : > { %v5707_v62 = vpop.permute.xlu1 %5706 }
 0xc12   : > { %v6036_v49 = vsel %vm6026_vm2, %v13990_v14, %v5707_v62  ;;  %v5633_v53 = vpop.permute.xlu0 %5632 }
 0xc13   : > { %v6014_v25 = vsel %vm6009_vm4, %v5997_v33, %v5633_v53 }
 0xc15   : > { %v5711_v40 = vpop.permute.xlu1 %5710 }
 0xc16   : > { %v6038_v1 = vsel %vm6026_vm2, %v6021_v48, %v5711_v40  ;;  %v5637_v28 = vpop.permute.xlu0 %5636 }
 0xc17   : > { %v6016_v2 = vsel %vm6009_vm4, %v5999_v42, %v5637_v28 }
 0xc19   : > { %v5715_v21 = vpop.permute.xlu1 %5714 }
 0xc1a   : > { %v6040_v5 = vsel %vm6026_vm2, %v6023_v36, %v5715_v21  ;;  %v5641_v38 = vpop.permute.xlu0 %5640 }
 0xc1b   : > { %v6018_v14 = vsel %vm6009_vm4, %v6001_v55, %v5641_v38 }
 0xc1d   : > { %v5719_v50 = vpop.permute.xlu1 %5718 }
 0xc1e   : > { %v6042_v19 = vsel %vm6026_vm2, %v6025_v61, %v5719_v50  ;;  %v5645_v31 = vpop.permute.xlu0 %5644 }
 0xc1f   : > { %v6020_v48 = vsel %vm6009_vm4, %v6003_v30, %v5645_v31 }
 0xc21   : > { %v5755_v34 = vpop.permute.xlu1 %5754 }
 0xc22   : > { %v14070_v51 = vsel %vm6043_vm7, %v6028_v3, %v5755_v34  ;;  %v5649_v18 = vpop.permute.xlu0 %5648 }
 0xc23   : > { %v6022_v35 = vsel %vm6009_vm4, %v6005_v54, %v5649_v18 }
 0xc25   : > { %v5759_v52 = vpop.permute.xlu1 %5758 }
 0xc26   : > { %v14074_v36 = vsel %vm6043_vm7, %v6030_v7, %v5759_v52  ;;  %v5653_v46 = vpop.permute.xlu0 %5652 }
 0xc27   : > { %v6024_v12 = vsel %vm6009_vm4, %v6007_v43, %v5653_v46 }
 0xc29   : > { %v5763_v24 = vpop.permute.xlu1 %5762 }
 0xc2a   : > { %v14078_v6 = vsel %vm6043_vm7, %v6032_v13, %v5763_v24  ;;  %v5689_v15 = vpop.permute.xlu0 %5688 }
 0xc2b   : > { %v6027_v61 = vsel %vm6026_vm2, %v6010_v0, %v5689_v15 }
 0xc2d   : > { %v5767_v60 = vpop.permute.xlu1 %5766 }
 0xc2e   : > { %v14082_v58 = vsel %vm6043_vm7, %v6034_v8, %v5767_v60  ;;  %v5693_v4 = vpop.permute.xlu0 %5692 }
 0xc2f   : > { %v6029_v45 = vsel %vm6026_vm2, %v6012_v11, %v5693_v4 }
 0xc30   : > { %v6767_v3 = vpop.f32.mrf.mxu0 }
 0xc31   : > { %v5771_v20 = vpop.permute.xlu1 %5770 }
 0xc32   : > { %v14086_v17 = vsel %vm6043_vm7, %v6036_v49, %v5771_v20  ;;  %v6768_v32 = vpop.f32.mrf.mxu0  ;;  %v5697_v7 = vpop.permute.xlu0 %5696 }
 0xc33   : > { %v6769_v41 = vadd.f32 %v6768_v32, %v6767_v3  ;;  %v6031_v29 = vsel %vm6026_vm2, %v6014_v25, %v5697_v7 }
 0xc34   : > { %v6770_v43 = vpop.f32.mrf.mxu0 }
 0xc35   : > { %v5775_v10 = vpop.permute.xlu1 %5774  ;;  %5880 = vrot.lane.b32.xlu0 %v6769_v41, %s8008_s6 }
 0xc36   : > { %v14091_v22 = vsel %vm6043_vm7, %v6038_v1, %v5775_v10  ;;  %v6771_v47 = vpop.f32.mrf.mxu0  ;;  %v5701_v27 = vpop.permute.xlu0 %5700 }
 0xc37   : > { %v6772_v13 = vadd.f32 %v6771_v47, %v6770_v43  ;;  %v6033_v44 = vsel %vm6026_vm2, %v6016_v2, %v5701_v27 }
 0xc38   : > { %v6773_v0 = vpop.f32.mrf.mxu0 }
 0xc39   : > { %v5779_v57 = vpop.permute.xlu1 %5778  ;;  %5882 = vrot.lane.b32.xlu1 %v6772_v13, %s8008_s6 }
 0xc3a   : > { %v14096_v37 = vsel %vm6043_vm7, %v6040_v5, %v5779_v57  ;;  %v6774_v59 = vpop.f32.mrf.mxu0  ;;  %v5705_v23 = vpop.permute.xlu0 %5704 }
 0xc3b   : > { %v6775_v8 = vadd.f32 %v6774_v59, %v6773_v0  ;;  %v6035_v39 = vsel %vm6026_vm2, %v6018_v14, %v5705_v23 }
 0xc3c   : > { %v6776_v11 = vpop.f32.mrf.mxu0 }
 0xc3d   : > { %v5783_v62 = vpop.permute.xlu1 %5782  ;;  %5884 = vrot.lane.b32.xlu0 %v6775_v8, %s8008_s6 }
 0xc3e   : > { %v14101_v26 = vsel %vm6043_vm7, %v6042_v19, %v5783_v62  ;;  %v6777_v33 = vpop.f32.mrf.mxu0  ;;  %v5709_v49 = vpop.permute.xlu0 %5708 }
 0xc3f   : > { %v6778_v53 = vadd.f32 %v6777_v33, %v6776_v11  ;;  %v6037_v25 = vsel %vm6026_vm2, %v6020_v48, %v5709_v49 }
 0xc40   : > { %v6779_v40 = vpop.f32.mrf.mxu0 }
 0xc41   : > { %5886 = vrot.lane.b32.xlu1 %v6778_v53, %s8008_s6 }
 0xc42   : > { %v6780_v63 = vpop.f32.mrf.mxu0  ;;  %v5713_v42 = vpop.permute.xlu0 %5712 }
 0xc43   : > { %v6781_v1 = vadd.f32 %v6780_v63, %v6779_v40  ;;  %v6039_v28 = vsel %vm6026_vm2, %v6022_v35, %v5713_v42 }
 0xc44   : > { %v6782_v2 = vpop.f32.mrf.mxu0 }
 0xc45   : > { %5888 = vrot.lane.b32.xlu0 %v6781_v1, %s8008_s6 }
 0xc46   : > { %v6783_v21 = vpop.f32.mrf.mxu0  ;;  %v5717_v56 = vpop.permute.xlu0 %5716 }
 0xc47   : > { %v6784_v55 = vadd.f32 %v6783_v21, %v6782_v2  ;;  %v6041_v5 = vsel %vm6026_vm2, %v6024_v12, %v5717_v56 }
 0xc48   : > { %v6785_v38 = vpop.f32.mrf.mxu0 }
 0xc49   : > { %5890 = vrot.lane.b32.xlu1 %v6784_v55, %s8008_s6 }
 0xc4a   : > { %v6786_v14 = vpop.f32.mrf.mxu0  ;;  %v5753_v50 = vpop.permute.xlu0 %5752 }
 0xc4b   : > { %v6787_v9 = vadd.f32 %v6786_v14, %v6785_v38  ;;  %v14110_v30 = vsel %vm6043_vm7, %v6027_v61, %v5753_v50 }
 0xc4c   : > { %v6788_v19 = vpop.f32.mrf.mxu0 }
 0xc4d   : > { %5892 = vrot.lane.b32.xlu0 %v6787_v9, %s8008_s6 }
 0xc4e   : > { %v6789_v31 = vpop.f32.mrf.mxu0  ;;  %v5757_v48 = vpop.permute.xlu0 %5756 }
 0xc4f   : > { %v6790_v34 = vadd.f32 %v6789_v31, %v6788_v19  ;;  %v14114_v16 = vsel %vm6043_vm7, %v6029_v45, %v5757_v48 }
 0xc51   : > { %5894 = vrot.lane.b32.xlu1 %v6790_v34, %s8008_s6 }
 0xc52   : > { %v5761_v54 = vpop.permute.xlu0 %5760 }
 0xc53   : > { %v14118_v18 = vsel %vm6043_vm7, %v6031_v29, %v5761_v54 }
 0xc56   : > { %v5765_v35 = vpop.permute.xlu0 %5764 }
 0xc57   : > { %v14121_v52 = vsel %vm6043_vm7, %v6033_v44, %v5765_v35 }
 0xc5a   : > { %v5769_v46 = vpop.permute.xlu0 %5768 }
 0xc5b   : > { %v14124_v12 = vsel %vm6043_vm7, %v6035_v39, %v5769_v46 }
 0xc5e   : > { %v5773_v24 = vpop.permute.xlu0 %5772  ;;  %v6831_v3 = vpop.f32.mrf.mxu1 }
 0xc5f   : > { %v14127_v15 = vsel %vm6043_vm7, %v6037_v25, %v5773_v24 }
 0xc60   : > { %v6832_v20 = vpop.f32.mrf.mxu1 }
 0xc62   : > { %v5777_v61 = vpop.permute.xlu0 %5776  ;;  %v6834_v32 = vpop.f32.mrf.mxu1 }
 0xc63   : > { %v14130_v60 = vsel %vm6043_vm7, %v6039_v28, %v5777_v61 }
 0xc64   : > { %v6835_v7 = vpop.f32.mrf.mxu1 }
 0xc66   : > { %v5781_v4 = vpop.permute.xlu0 %5780  ;;  %v6837_v41 = vpop.f32.mrf.mxu1 }
 0xc67   : > { %v14133_v45 = vsel %vm6043_vm7, %v6041_v5, %v5781_v4  ;;  %v6833_v4 = vadd.f32 %v6832_v20, %v6831_v3 }
 0xc68   : > { %v6838_v29 = vpop.f32.mrf.mxu1 }
 0xc6a   : > { %v6840_v43 = vpop.f32.mrf.mxu1 }
 0xc6c   : > { %v6841_v10 = vpop.f32.mrf.mxu1 }
 0xc6e   : > { %v6843_v47 = vpop.f32.mrf.mxu1 }
 0xc70   : > { %v6844_v27 = vpop.f32.mrf.mxu1 }
 0xc72   : > { %v6846_v13 = vpop.f32.mrf.mxu1 }
 0xc74   : > { %v6847_v44 = vpop.f32.mrf.mxu1 }
 0xc75   : > { %v6848_v3 = vadd.f32 %v6847_v44, %v6846_v13 }
 0xc76   : > { %v6849_v0 = vpop.f32.mrf.mxu1 }
 0xc78   : > { %v6850_v57 = vpop.f32.mrf.mxu1 }
 0xc79   : > { %v6851_v20 = vadd.f32 %v6850_v57, %v6849_v0 }
 0xc7a   : > { %v6852_v23 = vpop.f32.mrf.mxu1 }
 0xc7c   : > { %v6853_v62 = vpop.f32.mrf.mxu1 }
 0xc9e   : > { %v6791_v59 = vpop.f32.mrf.mxu0 }
 0xca0   : > { %v6792_v8 = vpop.f32.mrf.mxu0 }
 0xca1   : > { %v6793_v39 = vadd.f32 %v6792_v8, %v6791_v59 }
 0xca2   : > { %v6794_v11 = vpop.f32.mrf.mxu0 }
 0xca3   : > { %5896 = vrot.lane.b32.xlu0 %v6793_v39, %s8008_s6  ;;  %v6836_v39 = vadd.f32 %v6835_v7, %v6834_v32  ;;  %v6854_v32 = vadd.f32 %v6853_v62, %v6852_v23  ;;  %v5817_v62 = vpop.permute.xlu0 %5816 }
 0xca4   : > { %v6795_v33 = vpop.f32.mrf.mxu0 }
 0xca5   : > { %v6796_v49 = vadd.f32 %v6795_v33, %v6794_v11  ;;  %v6839_v11 = vadd.f32 %v6838_v29, %v6837_v41 }
 0xca6   : > { %v6855_v53 = vpop.f32.mrf.mxu1 }
 0xca7   : > { %5898 = vrot.lane.b32.xlu1 %v6796_v49, %s8008_s6  ;;  %v6842_v49 = vadd.f32 %v6841_v10, %v6840_v43 }
 0xca8   : > { %v6856_v25 = vpop.f32.mrf.mxu1 }
 0xca9   : > { %v6857_v7 = vadd.f32 %v6856_v25, %v6855_v53  ;;  %v5819_v53 = vpop.permute.xlu1 %5818  ;;  %v5821_v25 = vpop.permute.xlu0 %5820 }
 0xcaa   : > { %v6797_v40 = vpop.f32.mrf.mxu0  ;;  %v6858_v63 = vpop.f32.mrf.mxu1 }
 0xcac   : > { %v6798_v42 = vpop.f32.mrf.mxu0  ;;  %v6859_v28 = vpop.f32.mrf.mxu1 }
 0xcad   : > { %v6799_v1 = vadd.f32 %v6798_v42, %v6797_v40  ;;  %v6845_v40 = vadd.f32 %v6844_v27, %v6843_v47  ;;  %v6860_v29 = vadd.f32 %v6859_v28, %v6858_v63  ;;  %v5823_v63 = vpop.permute.xlu1 %5822  ;;  %v5825_v28 = vpop.permute.xlu0 %5824 }
 0xcae   : > { %v6800_v2 = vpop.f32.mrf.mxu0  ;;  %v6861_v55 = vpop.f32.mrf.mxu1 }
 0xcaf   : > { %5900 = vrot.lane.b32.xlu0 %v6799_v1, %s8008_s6 }
 0xcb0   : > { %v6801_v21 = vpop.f32.mrf.mxu0  ;;  %v6862_v50 = vpop.f32.mrf.mxu1 }
 0xcb1   : > { %v6802_v56 = vadd.f32 %v6801_v21, %v6800_v2  ;;  %v6863_v43 = vadd.f32 %v6862_v50, %v6861_v55  ;;  %v5827_v2 = vpop.permute.xlu1 %5826  ;;  %v5829_v21 = vpop.permute.xlu0 %5828 }
 0xcb2   : > { %v6803_v5 = vpop.f32.mrf.mxu0  ;;  %v6864_v48 = vpop.f32.mrf.mxu1 }
 0xcb3   : > { %5902 = vrot.lane.b32.xlu1 %v6802_v56, %s8008_s6 }
 0xcb4   : > { %v6804_v38 = vpop.f32.mrf.mxu0  ;;  %v6865_v46 = vpop.f32.mrf.mxu1 }
 0xcb5   : > { %v6805_v14 = vadd.f32 %v6804_v38, %v6803_v5  ;;  %v6866_v47 = vadd.f32 %v6865_v46, %v6864_v48  ;;  %v14159_v56 = vpop.permute.xlu1 %5830  ;;  %v14161_v55 = vpop.permute.xlu0 %5832 }
 0xcb6   : > { %v6806_v9 = vpop.f32.mrf.mxu0  ;;  %v6867_v8 = vpop.f32.mrf.mxu1 }
 0xcb7   : > { %5904 = vrot.lane.b32.xlu0 %v6805_v14, %s8008_s6 }
 0xcb8   : > { %v6807_v19 = vpop.f32.mrf.mxu0  ;;  %v6868_v33 = vpop.f32.mrf.mxu1 }
 0xcb9   : > { %v6808_v31 = vadd.f32 %v6807_v19, %v6806_v9  ;;  %v6869_v27 = vadd.f32 %v6868_v33, %v6867_v8  ;;  %v14163_v5 = vpop.permute.xlu1 %5834  ;;  %v14165_v38 = vpop.permute.xlu0 %5836 }
 0xcba   : > { %v6809_v34 = vpop.f32.mrf.mxu0  ;;  %v6870_v42 = vpop.f32.mrf.mxu1 }
 0xcbb   : > { %5906 = vrot.lane.b32.xlu1 %v6808_v31, %s8008_s6 }
 0xcbc   : > { %v6810_v54 = vpop.f32.mrf.mxu0  ;;  %v6871_v1 = vpop.f32.mrf.mxu1 }
 0xcbd   : > { %v6811_v35 = vadd.f32 %v6810_v54, %v6809_v34  ;;  %v6872_v44 = vadd.f32 %v6871_v1, %v6870_v42  ;;  %v14167_v14 = vpop.permute.xlu1 %5838  ;;  %v14169_v50 = vpop.permute.xlu0 %5840  ;;  %v6061_v42 = vsel %vm6060_vm6, %v14110_v30, %v5817_v62 }
 0xcbe   : > { %v6812_v24 = vpop.f32.mrf.mxu0  ;;  %v6873_v41 = vpop.f32.mrf.mxu1 }
 0xcbf   : > { %5908 = vrot.lane.b32.xlu0 %v6811_v35, %s8008_s6 }
 0xcc0   : > { %v6813_v61 = vpop.f32.mrf.mxu0  ;;  %v6874_v10 = vpop.f32.mrf.mxu1 }
 0xcc1   : > { %v6814_v59 = vadd.f32 %v6813_v61, %v6812_v24  ;;  %v6875_v0 = vadd.f32 %v6874_v10, %v6873_v41  ;;  %v14171_v9 = vpop.permute.xlu1 %5842  ;;  %v14173_v19 = vpop.permute.xlu0 %5844  ;;  %v6062_v41 = vsel %vm6060_vm6, %v14070_v51, %v5819_v53  ;;  %v6064_v51 = vsel %vm6060_vm6, %v14074_v36, %v5823_v63 }
 0xcc2   : > { %v6876_v13 = vpop.f32.mrf.mxu1  ;;  %v6067_v63 = vsel %vm6060_vm6, %v14121_v52, %v5829_v21  ;;  %v6069_v21 = vsel %vm6060_vm6, %v14124_v12, %v14161_v55  ;;  %v6070_v12 = vsel %vm6060_vm6, %v14086_v17, %v14163_v5 }
 0xcc3   : > { %5910 = vrot.lane.b32.xlu1 %v6814_v59, %s8008_s6  ;;  %5944 = vrot.lane.b32.xlu0 %v6833_v4, %s8005_s28 }
 0xcc4   : > { %v6877_v57 = vpop.f32.mrf.mxu1 }
 0xcc5   : > { %v6878_v23 = vadd.f32 %v6877_v57, %v6876_v13  ;;  %v14175_v31 = vpop.permute.xlu1 %5846  ;;  %v5881_v48 = vpop.permute.xlu0 %5880 }
 0xcc7   : > { %5946 = vrot.lane.b32.xlu1 %v6836_v39, %s8005_s28  ;;  %5948 = vrot.lane.b32.xlu0 %v6839_v11, %s8005_s28 }
 0xcc9   : > { %v5883_v34 = vpop.permute.xlu1 %5882  ;;  %v5885_v54 = vpop.permute.xlu0 %5884 }
 0xccb   : > { %5950 = vrot.lane.b32.xlu1 %v6842_v49, %s8005_s28  ;;  %5952 = vrot.lane.b32.xlu0 %v6845_v40, %s8005_s28 }
 0xccd   : > { %v5887_v35 = vpop.permute.xlu1 %5886  ;;  %v5889_v46 = vpop.permute.xlu0 %5888 }
 0xccf   : > { %5954 = vrot.lane.b32.xlu1 %v6848_v3, %s8005_s28  ;;  %5956 = vrot.lane.b32.xlu0 %v6851_v20, %s8005_s28  ;;  %v6078_v3 = vsel %vm6077_vm11, %v6061_v42, %v5881_v48 }
 0xcd1   : > { %v5891_v24 = vpop.permute.xlu1 %5890  ;;  %v5893_v61 = vpop.permute.xlu0 %5892 }
 0xcd3   : > { %5958 = vrot.lane.b32.xlu1 %v6854_v32, %s8005_s28  ;;  %5960 = vrot.lane.b32.xlu0 %v6857_v7, %s8005_s28 }
 0xcd5   : > { %v5895_v4 = vpop.permute.xlu1 %5894 }
 0xcd7   : > { %5962 = vrot.lane.b32.xlu1 %v6860_v29, %s8005_s28  ;;  %5964 = vrot.lane.b32.xlu0 %v6863_v43, %s8005_s28  ;;  %v6063_v29 = vsel %vm6060_vm6, %v14114_v16, %v5821_v25  ;;  %v6079_v43 = vsel %vm6077_vm11, %v6062_v41, %v5883_v34  ;;  %v6065_v16 = vsel %vm6060_vm6, %v14118_v18, %v5825_v28 }
 0xcd8   : > { %v6080_v30 = vsel %vm6077_vm11, %v6063_v29, %v5885_v54  ;;  %v6082_v62 = vsel %vm6077_vm11, %v6065_v16, %v5889_v46  ;;  %v6066_v18 = vsel %vm6060_vm6, %v14078_v6, %v5827_v2  ;;  %v6084_v46 = vsel %vm6077_vm11, %v6067_v63, %v5893_v61 }
 0xcd9   : > { %v6068_v2 = vsel %vm6060_vm6, %v14082_v58, %v14159_v56  ;;  %v6072_v56 = vsel %vm6060_vm6, %v14091_v22, %v14167_v14 }
 0xcda   : > { %v6085_v61 = vsel %vm6077_vm11, %v6068_v2, %v5895_v4 }
 0xcdb   : > { %5966 = vrot.lane.b32.xlu1 %v6866_v47, %s8005_s28  ;;  %5968 = vrot.lane.b32.xlu0 %v6869_v27, %s8005_s28 }
 0xcdf   : > { %5970 = vrot.lane.b32.xlu1 %v6872_v44, %s8005_s28  ;;  %5972 = vrot.lane.b32.xlu0 %v6875_v0, %s8005_s28 }
 0xce3   : > { %5974 = vrot.lane.b32.xlu1 %v6878_v23, %s8005_s28  ;;  %v6081_v23 = vsel %vm6077_vm11, %v6064_v51, %v5887_v35  ;;  %v6083_v35 = vsel %vm6077_vm11, %v6066_v18, %v5891_v24  ;;  %s207_s28 = sand.u32 1, %s7993_s16   ;;  %v6071_v51 = vsel %vm6060_vm6, %v14127_v15, %v14165_v38  ;;  %v6073_v38 = vsel %vm6060_vm6, %v14130_v60, %v14169_v50 }
 0xce4   : > { %s6315_s6 = sshll.u32 %s207_s28, 7  ;;  %s14378_s19 = scalar_lea.sflag [#allocation3], %s207_s28 }
 0xce5   : > { %s14292_s13 = scalar_lea.vmem [#allocation2], %s6315_s6 }
 0xce6   : > { %s6237_s30 = sshll.u32 %s14292_s13, 4  ;;  %s14373_s30 = int_to_ptr.vmem [resolvable:$true] %s6237_s30 }
 0xce7   : > { %s7941_s14 = scalar_lea.vmem %s14373_s30, 2048  ;;  %p7948_p1 = scmp.lt.s32.totalorder %s14373_s30, %s7946_s22 }
 0xce8   : > { %p7942_p12 = scmp.ne.s32.totalorder %s14373_s30, %s7941_s14  ;;  %p7949_p2 = scmp.lt.s32.totalorder %s7947_s5, %s7941_s14 }
 0xcea   : > { %p7943_p13 = pnand %p7942_p12, %p8084_p5  ;;  %p7950_p3 = por %p7949_p2, %p7948_p1 }
 0xcec   : > { %p7944_p0 = pneg %p7943_p13 }
 0xcee   : > { %p7951_p4 = pnand %p7950_p3, %p7944_p0 }
 0xd15   : > { %v5897_v59 = vpop.permute.xlu0 %5896 }
 0xd19   : > { %v14177_v8 = vpop.permute.xlu1 %5898 }
 0xd1a   : > { %v6087_v17 = vsel %vm6077_vm11, %v6070_v12, %v14177_v8 }
 0xd21   : > { %v14179_v39 = vpop.permute.xlu0 %5900 }
 0xd22   : > { %v6088_v22 = vsel %vm6077_vm11, %v6071_v51, %v14179_v39 }
 0xd25   : > { %v14181_v11 = vpop.permute.xlu1 %5902 }
 0xd29   : > { %v14183_v33 = vpop.permute.xlu0 %5904 }
 0xd2d   : > { %v14185_v49 = vpop.permute.xlu1 %5906 }
 0xd31   : > { %v14187_v40 = vpop.permute.xlu0 %5908 }
 0xd35   : > { %v14192_v20 = vpop.permute.xlu1 %5910  ;;  %v5945_v1 = vpop.permute.xlu0 %5944 }
 0xd36   : > { %v14195_v32 = vsel %vm6094_vm5, %v6078_v3, %v5945_v1 }
 0xd37   : > { %v6127_v7 = vmin.f32 %v14195_v32, 0.0  ;;  %vm6111_vm13 = vcmp.gt.f32.partialorder %v14195_v32, 0.0 }
 0xd39   : > { %v6143_v10 = vmul.f32 1.442695, %v6127_v7  ;;  %v5947_v47 = vpop.permute.xlu1 %5946  ;;  %v5949_v27 = vpop.permute.xlu0 %5948 }
 0xd3a   : > { %v14205_v13 = vsel %vm6094_vm5, %v6079_v43, %v5947_v47  ;;  %v14208_v44 = vsel %vm6094_vm5, %v6080_v30, %v5949_v27  ;;  %v6086_v43 = vsel %vm6077_vm11, %v6069_v21, %v5897_v59  ;;  %v6074_v59 = vsel %vm6060_vm6, %v14096_v37, %v14171_v9 }
 0xd3b   : > { %7749 = vpow2.f32 %v6143_v10  ;;  %v6128_v0 = vmin.f32 %v14205_v13, 0.0  ;;  %v6129_v57 = vmin.f32 %v14208_v44, 0.0  ;;  %vm6112_vm3 = vcmp.gt.f32.partialorder %v14205_v13, 0.0 }
 0xd3c   : > { %vm6113_vm1 = vcmp.gt.f32.partialorder %v14208_v44, 0.0 }
 0xd3d   : > { %v6145_v53 = vmul.f32 1.442695, %v6128_v0  ;;  %v5951_v25 = vpop.permute.xlu1 %5950  ;;  %v5953_v48 = vpop.permute.xlu0 %5952  ;;  %v6147_v34 = vmul.f32 1.442695, %v6129_v57 }
 0xd3e   : > { %v14219_v54 = vsel %vm6094_vm5, %v6081_v23, %v5951_v25  ;;  %v14222_v42 = vsel %vm6094_vm5, %v6082_v62, %v5953_v48  ;;  %v6089_v25 = vsel %vm6077_vm11, %v6072_v56, %v14181_v11 }
 0xd3f   : > { %7751 = vpow2.f32 %v6145_v53  ;;  %v6130_v36 = vmin.f32 %v14219_v54, 0.0  ;;  %v6131_v28 = vmin.f32 %v14222_v42, 0.0  ;;  %v6075_v53 = vsel %vm6060_vm6, %v14133_v45, %v14173_v19 }
 0xd40   : > { %7753 = vpow2.f32 %v6147_v34  ;;  %vm6114_vm10 = vcmp.gt.f32.partialorder %v14219_v54, 0.0  ;;  %vm6115_vm12 = vcmp.gt.f32.partialorder %v14222_v42, 0.0 }
 0xd41   : > { %v6149_v3 = vmul.f32 1.442695, %v6130_v36  ;;  %v5955_v1 = vpop.permute.xlu1 %5954  ;;  %v5957_v7 = vpop.permute.xlu0 %5956  ;;  %v6151_v41 = vmul.f32 1.442695, %v6131_v28 }
 0xd42   : > { %v14233_v29 = vsel %vm6094_vm5, %v6083_v35, %v5955_v1  ;;  %v14236_v6 = vsel %vm6094_vm5, %v6084_v46, %v5957_v7  ;;  %v6091_v46 = vsel %vm6077_vm11, %v6074_v59, %v14185_v49 }
 0xd43   : > { %7755 = vpow2.f32 %v6149_v3  ;;  %v6132_v52 = vmin.f32 %v14233_v29, 0.0  ;;  %v6133_v24 = vmin.f32 %v14236_v6, 0.0  ;;  %vm6116_vm0 = vcmp.gt.f32.partialorder %v14233_v29, 0.0 }
 0xd44   : > { %7757 = vpow2.f32 %v6151_v41  ;;  %v6092_v41 = vsel %vm6077_vm11, %v6075_v53, %v14187_v40  ;;  %vm6117_vm8 = vcmp.gt.f32.partialorder %v14236_v6, 0.0 }
 0xd45   : > { %v6153_v30 = vmul.f32 1.442695, %v6132_v52  ;;  %v5959_v10 = vpop.permute.xlu1 %5958  ;;  %v5961_v47 = vpop.permute.xlu0 %5960  ;;  %v6155_v27 = vmul.f32 1.442695, %v6133_v24 }
 0xd46   : > { %v14252_v0 = vsel %vm6094_vm5, %v6085_v61, %v5959_v10  ;;  %v14255_v58 = vsel %vm6094_vm5, %v6086_v43, %v5961_v47  ;;  %v6076_v10 = vsel %vm6060_vm6, %v14101_v26, %v14175_v31 }
 0xd47   : > { %7759 = vpow2.f32 %v6153_v30  ;;  %v6134_v55 = vmin.f32 %v14252_v0, 0.0  ;;  %v6135_v16 = vmin.f32 %v14255_v58, 0.0  ;;  %vm6118_vm9 = vcmp.gt.f32.partialorder %v14252_v0, 0.0 }
 0xd48   : > { %v7750_v4 = vpop.eup %7749  ;;  %7761 = vpow2.f32 %v6155_v27  ;;  %vm6119_vm14 = vcmp.gt.f32.partialorder %v14255_v58, 0.0 }
 0xd49   : > { %v6344_v5 = vadd.f32 -1.0, %v7750_v4  ;;  %v6157_v14 = vmul.f32 1.442695, %v6134_v55  ;;  %v5963_v57 = vpop.permute.xlu1 %5962  ;;  %v5965_v23 = vpop.permute.xlu0 %5964  ;;  %v6159_v37 = vmul.f32 1.442695, %v6135_v16 }
 0xd4a   : > { %v14277_v9 = vsel %vm6094_vm5, %v6087_v17, %v5963_v57  ;;  %v14280_v15 = vsel %vm6094_vm5, %v6088_v22, %v5965_v23 }
 0xd4b   : > { %v6191_v8 = vsel %vm6111_vm13, %v14195_v32, %v6344_v5  ;;  %7763 = vpow2.f32 %v6157_v14  ;;  %v6136_v39 = vmin.f32 %v14277_v9, 0.0  ;;  %v6137_v60 = vmin.f32 %v14280_v15, 0.0 }
 0xd4c   : > { %v7752_v62 = vpop.eup %7751  ;;  %6207 = vst [vmem:[%s14292_s13] sm:$0xff] %v6191_v8  ;;  %7765 = vpow2.f32 %v6159_v37  ;;  %v6090_v32 = vsel %vm6077_vm11, %v6073_v38, %v14183_v33  ;;  %vm6120_vm15 = vcmp.gt.f32.partialorder %v14277_v9, 0.0  ;;  %vm6121_vm4 = vcmp.gt.f32.partialorder %v14280_v15, 0.0 }
 0xd4d   : > { %v7754_v50 = vpop.eup %7753  ;;  %v6345_v48 = vadd.f32 -1.0, %v7752_v62  ;;  %v6161_v34 = vmul.f32 1.442695, %v6136_v39  ;;  %v5967_v45 = vpop.permute.xlu1 %5966  ;;  %v6163_v11 = vmul.f32 1.442695, %v6137_v60 }
 0xd4e   : > { %v5969_v19 = vpop.permute.xlu0 %5968  ;;  %v6346_v36 = vadd.f32 -1.0, %v7754_v50  ;;  %v14300_v18 = vsel %vm6094_vm5, %v6089_v25, %v5967_v45 }
 0xd4f   : > { %v14303_v63 = vsel %vm6094_vm5, %v6090_v32, %v5969_v19  ;;  %v6192_v28 = vsel %vm6112_vm3, %v14205_v13, %v6345_v48  ;;  %7767 = vpow2.f32 %v6161_v34  ;;  %v6138_v33 = vmin.f32 %v14300_v18, 0.0 }
 0xd50   : > { %v7756_v35 = vpop.eup %7755  ;;  %6208 = vst [vmem:[%s14292_s13 + $0x8] sm:$0xff] %v6192_v28  ;;  %v6193_v3 = vsel %vm6113_vm1, %v14208_v44, %v6346_v36  ;;  %7769 = vpow2.f32 %v6163_v11  ;;  %v6139_v1 = vmin.f32 %v14303_v63, 0.0  ;;  %vm6122_vm2 = vcmp.gt.f32.partialorder %v14300_v18, 0.0 }
 0xd51   : > { %v7758_v7 = vpop.eup %7757  ;;  %6209 = vst [vmem:[%s14292_s13 + $0x10] sm:$0xff] %v6193_v3  ;;  %v6347_v13 = vadd.f32 -1.0, %v7756_v35  ;;  %v6165_v52 = vmul.f32 1.442695, %v6138_v33  ;;  %v5971_v2 = vpop.permute.xlu1 %5970  ;;  %vm6123_vm7 = vcmp.gt.f32.partialorder %v14303_v63, 0.0 }
 0xd52   : > { %v5973_v21 = vpop.permute.xlu0 %5972  ;;  %v6348_v24 = vadd.f32 -1.0, %v7758_v7  ;;  %v6167_v49 = vmul.f32 1.442695, %v6139_v1  ;;  %v14318_v44 = vsel %vm6094_vm5, %v6091_v46, %v5971_v2 }
 0xd53   : > { %v14321_v61 = vsel %vm6094_vm5, %v6092_v41, %v5973_v21  ;;  %v6194_v43 = vsel %vm6114_vm10, %v14219_v54, %v6347_v13  ;;  %7771 = vpow2.f32 %v6165_v52  ;;  %v6140_v40 = vmin.f32 %v14318_v44, 0.0 }
 0xd54   : > { %v7760_v30 = vpop.eup %7759  ;;  %6210 = vst [vmem:[%s14292_s13 + $0x18] sm:$0xff] %v6194_v43  ;;  %v6195_v47 = vsel %vm6115_vm12, %v14222_v42, %v6348_v24  ;;  %7773 = vpow2.f32 %v6167_v49  ;;  %v6141_v27 = vmin.f32 %v14321_v61, 0.0  ;;  %v6093_v54 = vsel %vm6077_vm11, %v6076_v10, %v14192_v20 }
 0xd55   : > { %v7762_v12 = vpop.eup %7761  ;;  %6211 = vst [vmem:[%s14292_s13 + $0x20] sm:$0xff] %v6195_v47  ;;  %v6349_v56 = vadd.f32 -1.0, %v7760_v30  ;;  %v6169_v55 = vmul.f32 1.442695, %v6140_v40  ;;  %v5975_v4 = vpop.permute.xlu1 %5974  ;;  %vm6124_vm11 = vcmp.gt.f32.partialorder %v14318_v44, 0.0  ;;  %vm6125_vm6 = vcmp.gt.f32.partialorder %v14321_v61, 0.0 }
 0xd56   : > { %v6350_v59 = vadd.f32 -1.0, %v7762_v12  ;;  %v6171_v26 = vmul.f32 1.442695, %v6141_v27  ;;  %v6110_v31 = vsel %vm6094_vm5, %v6093_v54, %v5975_v4 }
 0xd57   : > { %v6196_v42 = vsel %vm6116_vm0, %v14233_v29, %v6349_v56  ;;  %7775 = vpow2.f32 %v6169_v55  ;;  %v6142_v51 = vmin.f32 %v6110_v31, 0.0  ;;  %vm6126_vm5 = vcmp.gt.f32.partialorder %v6110_v31, 0.0 }
 0xd58   : > { %v7764_v16 = vpop.eup %7763  ;;  %6212 = vst [vmem:[%s14292_s13 + $0x28] sm:$0xff] %v6196_v42  ;;  %v6197_v20 = vsel %vm6117_vm8, %v14236_v6, %v6350_v59  ;;  %7777 = vpow2.f32 %v6171_v26 }
 0xd59   : > { %v7766_v17 = vpop.eup %7765  ;;  %6213 = vst [vmem:[%s14292_s13 + $0x30] sm:$0xff] %v6197_v20  ;;  %v6351_v22 = vadd.f32 -1.0, %v7764_v16  ;;  %v6173_v5 = vmul.f32 1.442695, %v6142_v51 }
 0xd5a   : > { %v6352_v14 = vadd.f32 -1.0, %v7766_v17 }
 0xd5b   : > { %v6198_v29 = vsel %vm6118_vm9, %v14252_v0, %v6351_v22  ;;  %7779 = vpow2.f32 %v6173_v5 }
 0xd5c   : > { %v7768_v57 = vpop.eup %7767  ;;  %6214 = vst [vmem:[%s14292_s13 + $0x38] sm:$0xff] %v6198_v29  ;;  %v6199_v23 = vsel %vm6119_vm14, %v14255_v58, %v6352_v14 }
 0xd5d   : > { %v7770_v6 = vpop.eup %7769  ;;  %6215 = vst [vmem:[%s14292_s13 + $0x40] sm:$0xff] %v6199_v23  ;;  %v6353_v37 = vadd.f32 -1.0, %v7768_v57 }
 0xd5e   : > { %v6354_v38 = vadd.f32 -1.0, %v7770_v6 }
 0xd5f   : > { %v6200_v8 = vsel %vm6120_vm15, %v14277_v9, %v6353_v37 }
 0xd60   : > { %v7772_v0 = vpop.eup %7771  ;;  %6216 = vst [vmem:[%s14292_s13 + $0x48] sm:$0xff] %v6200_v8  ;;  %v6201_v39 = vsel %vm6121_vm4, %v14280_v15, %v6354_v38 }
 0xd61   : > { %v7774_v62 = vpop.eup %7773  ;;  %6217 = vst [vmem:[%s14292_s13 + $0x50] sm:$0xff] %v6201_v39  ;;  %v6355_v58 = vadd.f32 -1.0, %v7772_v0 }
 0xd62   : > { %v6356_v53 = vadd.f32 -1.0, %v7774_v62 }
 0xd63   : > { %v6202_v25 = vsel %vm6122_vm2, %v14300_v18, %v6355_v58 }
 0xd64   : > { %v7776_v9 = vpop.eup %7775  ;;  %6218 = vst [vmem:[%s14292_s13 + $0x58] sm:$0xff] %v6202_v25  ;;  %v6203_v60 = vsel %vm6123_vm7, %v14303_v63, %v6356_v53 }
 0xd65   : > { %v7778_v50 = vpop.eup %7777  ;;  %6219 = vst [vmem:[%s14292_s13 + $0x60] sm:$0xff] %v6203_v60  ;;  %v6357_v15 = vadd.f32 -1.0, %v7776_v9 }
 0xd66   : > { %v6358_v32 = vadd.f32 -1.0, %v7778_v50 }
 0xd67   : > { %v6204_v48 = vsel %vm6124_vm11, %v14318_v44, %v6357_v15 }
 0xd68   : > { %v7780_v34 = vpop.eup %7779  ;;  %6220 = vst [vmem:[%s14292_s13 + $0x68] sm:$0xff] %v6204_v48  ;;  %v6205_v45 = vsel %vm6125_vm6, %v14321_v61, %v6358_v32 }
 0xd69   : > { %6221 = vst [vmem:[%s14292_s13 + $0x70] sm:$0xff] %v6205_v45  ;;  %v6359_v19 = vadd.f32 -1.0, %v7780_v34 }
 0xd6b   : > { %v6206_v36 = vsel %vm6126_vm5, %v6110_v31, %v6359_v19 }
 0xd6c   : > { %6222 = vst [vmem:[%s14292_s13 + $0x78] sm:$0xff] %v6206_v36 }
 0xd6d   : > { %7954 = shalt.err (!%p7951_p4)
}
 0xd6e   : > { %s7955_s23 = scalar_lea.hbm %s14371_s12, 2048  ;;  %s7959_s7 = scalar_lea.hbm %s14422_s4, 4096 }
 0xd6f   : > { %p7956_p7 = scmp.ne.s32.totalorder %s14371_s12, %s7955_s23  ;;  %p7960_p10 = scmp.lt.s32.totalorder %s14371_s12, %s14422_s4 }
 0xd70   : > { %p7961_p11 = scmp.lt.s32.totalorder %s7959_s7, %s7955_s23 }
 0xd71   : > { %p7957_p8 = pnand %p7956_p7, %p8084_p5 }
 0xd72   : > { %p7962_p12 = por %p7961_p11, %p7960_p10 }
 0xd73   : > { %p7958_p9 = pneg %p7957_p8 }
 0xd75   : > { %p7963_p13 = pnand %p7962_p12, %p7958_p9 }
 0xd77   : > { %7966 = shalt.err (!%p7963_p13)
}
 0xd78   : > { %s8019_s6 = smov 128   ;;  %s8020_s13 = smov 8  }
 0xd79   : > { %6879 = dma.vmem_to_hbm [thread:$0]  (%p8084_p5), %s14373_s30, 2048, %s14371_s12, %s14378_s19, %s8019_s6, %s8019_s6, %s8020_s13  }
 0xd7a PF: > { %p6885_p0 = scmp.ge.s32.totalorder %s8001_s18, 2  ;;  %s6252_s8 = sand.u32 1, %s7989_s15  }
 0xd7b   : > { %s6253_s10 = scalar_lea.sflag [#allocation3], %s6252_s8 }
 0xd7c   : > { %p6882_p1 = pnand %p6885_p0, %p8088_p6 }
 0xd7e   : > { %p6883_p2 = pneg %p6882_p1 }
 0xd80   : > { %7984 = dma.done.wait (%p6883_p2), %s6253_s10, 2048  }
 0xd81   : > { %7986 = vsyncadd (%p6883_p2), %s6253_s10, 4294965248  ;;  %p14_p3 = scmp.ge.s32.totalorder %s8071_s21, 4   ;;  %s15947_s15 = smov %s7993_s16 }
 0xd82   : > { %s15948_s16 = smov %s7997_s17  ;;  %s15949_s17 = smov %s8082_s24 }
 0xd83   : > { %s15950_s18 = smov %s8071_s21  ;;  %16 = sbr.rel (!%p14_p3) target bundleno = 3 (0x3), region = 81 }
 0xd88   :  { %6258 = vsyncpa [#allocation3], 1 }
 0xd89   :  { %6260 = vsyncpa [#allocation3 + $0x1], 1 }

</bundles_post_ra>
